<compile_context>
chip_gen: v6e
topology: v6e:2x2x1
jax: 0.10.0
libtpu: 0.0.40
codegen_flags: <defaults>
</compile_context>

<pallas_src>
import math

import jax
import jax.numpy as jnp
from jax import lax
from jax.experimental import pallas as pl
from jax.experimental.pallas import tpu as pltpu


def ffn_kernel(x_ref, w1_ref, b1_ref, w2_ref, b2_ref, o_ref, acc_ref):
    """One (TM, d_model) x-tile against one TK-wide chunk of d_ff.

    acc += relu(x @ W1_chunk^T + b1_chunk) @ W2_chunk^T
    On the last chunk: out = acc + b2.
    """
    k = pl.program_id(1)

    @pl.when(k == 0)
    def _init():
        acc_ref[...] = jnp.zeros_like(acc_ref)

    # linear_1 chunk: (TM, d_model) . (TK, d_model)^T -> (TM, TK), f32 MXU accumulation.
    h = lax.dot_general(
        x_ref[...], w1_ref[...],
        dimension_numbers=(((1,), (1,)), ((), ())),
        preferred_element_type=jnp.float32)
    h = jnp.maximum(h + b1_ref[...].astype(jnp.float32), 0.0)   # bias + ReLU

    # TODO(synk): training-mode dropout would use pltpu.prng_seed +
    #             pltpu.stateful_bernoulli with a 1/(1-p) rescale; eval mode == identity.

    # linear_2 partial: (TM, TK) . (d_model, TK)^T -> (TM, d_model), accumulate in f32.
    acc_ref[...] += lax.dot_general(
        h.astype(w2_ref.dtype), w2_ref[...],
        dimension_numbers=(((1,), (1,)), ((), ())),
        preferred_element_type=jnp.float32)

    @pl.when(k == pl.num_programs(1) - 1)
    def _finalize():
        o_ref[...] = (acc_ref[...] + b2_ref[...].astype(jnp.float32)).astype(o_ref.dtype)


def _round_up(x, m):
    return ((x + m - 1) // m) * m


def _vmem_need(tm, tk, d_model, x_item, w_item, b_item):
    """Rough double-buffered VMEM footprint estimate (bytes)."""
    return (2 * tm * d_model * x_item          # x tile
            + 2 * tk * d_model * w_item        # W1 chunk
            + 2 * d_model * tk * w_item        # W2 chunk
            + 2 * (tk + d_model) * b_item
            + 2 * tm * d_model * x_item        # out tile
            + tm * d_model * 4                 # f32 accumulator scratch
            + tm * tk * 4)                     # in-kernel f32 intermediate h


def _pick_tiles(M, d_model, d_ff, x_item, w_item, b_item, budget=40 * 1024 * 1024):
    # d_ff chunk: largest 128-multiple from the list that divides d_ff,
    # else one full-extent chunk (full blocks always lower).
    tk = d_ff
    for cand in (1024, 512, 256, 128):
        if d_ff % cand == 0:
            tk = cand
            break
    # M tile: biggest power-of-two row tile that fits the VMEM budget; small-M fallback.
    tm = _round_up(max(M, 1), 8)
    if M >= 64:
        tm = 64
        for cand in (512, 256, 128, 64):
            if cand <= _round_up(M, 8) or cand <= 512:
                if _vmem_need(cand, tk, d_model, x_item, w_item, b_item) <= budget:
                    tm = cand
                    break
        tm = min(tm, _round_up(M, 8)) if _round_up(M, 8) < tm else tm
        tm = max(tm, 8)
    return tm, tk


@jax.jit
def feed_forward(x, w1, b1, w2, b2):
    """
    x  : (batch, seq, d_model)
    w1 : (d_ff, d_model)   b1 : (d_ff,)      (PyTorch nn.Linear layout — used as-is)
    w2 : (d_model, d_ff)   b2 : (d_model,)
    returns (batch, seq, d_model)
    """
    batch, seq, d_model = x.shape
    d_ff = w1.shape[0]
    M = batch * seq

    x_item = x.dtype.itemsize
    w_item = w1.dtype.itemsize
    b_item = b1.dtype.itemsize

    tm, tk = _pick_tiles(M, d_model, d_ff, x_item, w_item, b_item)
    m_pad = _round_up(M, tm)
    m_tiles = m_pad // tm
    k_tiles = d_ff // tk

    x2d = x.reshape(M, d_model)
    if m_pad != M:
        x2d = jnp.pad(x2d, ((0, m_pad - M), (0, 0)))

    b1_2d = b1.reshape(1, d_ff)
    b2_2d = b2.reshape(1, d_model)

    # Advisory cost estimate for the XLA scheduler.
    flops = 4 * m_pad * d_ff * d_model              # two matmuls, 2 flops / MAC
    bytes_accessed = (2 * m_pad * d_model * x_item  # x in + out
                      + 2 * d_ff * d_model * w_item  # W1 + W2
                      + (d_ff + d_model) * b_item)
    cost = pl.CostEstimate(flops=flops, transcendentals=0,
                           bytes_accessed=bytes_accessed)

    vmem_need = _vmem_need(tm, tk, d_model, x_item, w_item, b_item)
    vmem_limit = int(min(max(int(1.5 * vmem_need), 32 * 1024 * 1024),
                         48 * 1024 * 1024))

    out2d = pl.pallas_call(
        ffn_kernel,
        out_shape=jax.ShapeDtypeStruct((m_pad, d_model), x.dtype),
        grid_spec=pltpu.PrefetchScalarGridSpec(
            num_scalar_prefetch=0,
            grid=(m_tiles, k_tiles),                                   # reduction axis last
            in_specs=[
                pl.BlockSpec((tm, d_model), lambda i, k: (i, 0)),      # x tile (resident over k)
                pl.BlockSpec((tk, d_model), lambda i, k: (k, 0)),      # W1 chunk (PyTorch layout)
                pl.BlockSpec((1, tk), lambda i, k: (0, k)),            # b1 chunk
                pl.BlockSpec((d_model, tk), lambda i, k: (0, k)),      # W2 chunk (PyTorch layout)
                pl.BlockSpec((1, d_model), lambda i, k: (0, 0)),       # b2
            ],
            out_specs=pl.BlockSpec((tm, d_model), lambda i, k: (i, 0)),
            scratch_shapes=[pltpu.VMEM((tm, d_model), jnp.float32)],
        ),
        compiler_params=pltpu.CompilerParams(
            dimension_semantics=("parallel", "arbitrary"),
            vmem_limit_bytes=vmem_limit),
        cost_estimate=cost,
    )(x2d, w1, b1_2d, w2, b2_2d)

    if m_pad != M:
        out2d = out2d[:M]
    return out2d.reshape(batch, seq, d_model)


def init_params(key, d_model, d_ff, dtype=jnp.float32):
    """Deterministic PyTorch-style (kaiming-uniform-ish) Linear init, PyTorch layout."""
    k1, k2, k3, k4 = jax.random.split(key, 4)
    bound1 = 1.0 / math.sqrt(d_model)
    bound2 = 1.0 / math.sqrt(d_ff)
    w1 = jax.random.uniform(k1, (d_ff, d_model), dtype, -bound1, bound1)
    b1 = jax.random.uniform(k2, (d_ff,), dtype, -bound1, bound1)
    w2 = jax.random.uniform(k3, (d_model, d_ff), dtype, -bound2, bound2)
    b2 = jax.random.uniform(k4, (d_model,), dtype, -bound2, bound2)
    return w1, b1, w2, b2


if __name__ == "__main__":
    # Small shapes that still exercise the tiling:
    #   M = batch*seq = 400 -> padded to 512 (M tiles of 512 or fewer),
    #   d_ff = 2048 (module default) -> reduction chunks of 1024.
    batch, seq, d_model, d_ff = 2, 200, 128, 2048

    key = jax.random.PRNGKey(0)
    kx, kp = jax.random.split(key)
    x = jax.random.normal(kx, (batch, seq, d_model), jnp.float32)
    w1, b1, w2, b2 = init_params(kp, d_model, d_ff)

    out = feed_forward(x, w1, b1, w2, b2)
    out = jax.block_until_ready(out)

    # pure-JAX reference (eval-mode dropout == identity)
    ref = jnp.maximum(x @ w1.T + b1, 0.0) @ w2.T + b2
    assert out.shape == (batch, seq, d_model)
    max_err = jnp.max(jnp.abs(out - ref))
    assert jnp.allclose(out, ref, atol=1e-3, rtol=1e-3), f"max err {max_err}"

    print("KERNEL_OK")
</pallas_src>

<mosaic_0001>
module attributes {stable_mosaic.version = 11 : i64} {
  func.func @ffn_kernel(%arg0: i32, %arg1: i32, %arg2: memref<400x128xf32, #tpu.memory_space<vmem>>, %arg3: memref<1024x128xf32, #tpu.memory_space<vmem>>, %arg4: memref<1x1024xf32, #tpu.memory_space<vmem>>, %arg5: memref<128x1024xf32, #tpu.memory_space<vmem>>, %arg6: memref<1x128xf32, #tpu.memory_space<vmem>>, %arg7: memref<400x128xf32, #tpu.memory_space<vmem>>, %arg8: memref<400x128xf32, #tpu.memory_space<vmem>>) attributes {dimension_semantics = [#tpu.dimension_semantics<parallel>, #tpu.dimension_semantics<arbitrary>], iteration_bounds = array<i64: 1, 2>, scalar_prefetch = 0 : i64, scratch_operands = 1 : i64, tpu.core_type = #tpu.core_type<tc>, window_params = [{transform_indices = @transform_0, window_bounds = array<i64: 400, 128>}, {transform_indices = @transform_1, window_bounds = array<i64: 1024, 128>}, {transform_indices = @transform_2, window_bounds = array<i64: 1, 1024>}, {transform_indices = @transform_3, window_bounds = array<i64: 128, 1024>}, {pipeline_mode = #tpu.pipeline_mode<synchronous>, transform_indices = @transform_4, window_bounds = array<i64: 1, 128>}, {transform_indices = @transform_5, window_bounds = array<i64: 400, 128>}]} {
    %c0_i32 = arith.constant 0 : i32
    %0 = arith.cmpi eq, %arg1, %c0_i32 : i32
    %1 = arith.extui %0 : i1 to i32
    %c0_i32_0 = arith.constant 0 : i32
    %2 = arith.cmpi ne, %1, %c0_i32_0 : i32
    scf.if %2 {
      %cst_15 = arith.constant 0.000000e+00 : f32
      %19 = vector.broadcast %cst_15 : f32 to vector<400x128xf32>
      %c0_16 = arith.constant 0 : index
      %c0_17 = arith.constant 0 : index
      %20 = vector.load %arg8[%c0_16, %c0_17] : memref<400x128xf32, #tpu.memory_space<vmem>>, vector<400x128xf32>
      tpu.vector_store %arg8[%c0_16, %c0_17], %19 {strides = array<i32>} : memref<400x128xf32, #tpu.memory_space<vmem>>, vector<400x128xf32>,
    } else {
    }
    %c0 = arith.constant 0 : index
    %c0_1 = arith.constant 0 : index
    %3 = vector.load %arg2[%c0, %c0_1] : memref<400x128xf32, #tpu.memory_space<vmem>>, vector<400x128xf32>
    %c0_2 = arith.constant 0 : index
    %c0_3 = arith.constant 0 : index
    %4 = vector.load %arg3[%c0_2, %c0_3] : memref<1024x128xf32, #tpu.memory_space<vmem>>, vector<1024x128xf32>
    %cst = arith.constant dense<0.000000e+00> : vector<400x1024xf32>
    %5 = tpu.matmul %3, %4, %cst {dimension_numbers = #tpu.dot_dimension_numbers<[1], [1], [0], [0], [0, 0, 1, 0], [], []>} : vector<400x128xf32>, vector<1024x128xf32>, vector<400x1024xf32> -> vector<400x1024xf32>
    %c0_4 = arith.constant 0 : index
    %c0_5 = arith.constant 0 : index
    %6 = vector.load %arg4[%c0_4, %c0_5] : memref<1x1024xf32, #tpu.memory_space<vmem>>, vector<1x1024xf32>
    %7 = vector.broadcast %6 : vector<1x1024xf32> to vector<400x1024xf32>
    %8 = arith.addf %5, %7 : vector<400x1024xf32>
    %cst_6 = arith.constant 0.000000e+00 : f32
    %9 = vector.broadcast %cst_6 : f32 to vector<400x1024xf32>
    %10 = arith.maximumf %8, %9 : vector<400x1024xf32>
    %c0_7 = arith.constant 0 : index
    %c0_8 = arith.constant 0 : index
    %11 = vector.load %arg8[%c0_7, %c0_8] : memref<400x128xf32, #tpu.memory_space<vmem>>, vector<400x128xf32>
    %c0_9 = arith.constant 0 : index
    %c0_10 = arith.constant 0 : index
    %12 = vector.load %arg5[%c0_9, %c0_10] : memref<128x1024xf32, #tpu.memory_space<vmem>>, vector<128x1024xf32>
    %cst_11 = arith.constant dense<0.000000e+00> : vector<400x128xf32>
    %13 = tpu.matmul %10, %12, %cst_11 {dimension_numbers = #tpu.dot_dimension_numbers<[1], [1], [0], [0], [0, 0, 1, 0], [], []>} : vector<400x1024xf32>, vector<128x1024xf32>, vector<400x128xf32> -> vector<400x128xf32>
    %14 = arith.addf %11, %13 : vector<400x128xf32>
    %c0_12 = arith.constant 0 : index
    %c0_13 = arith.constant 0 : index
    %15 = vector.load %arg8[%c0_12, %c0_13] : memref<400x128xf32, #tpu.memory_space<vmem>>, vector<400x128xf32>
    tpu.vector_store %arg8[%c0_12, %c0_13], %14 {strides = array<i32>} : memref<400x128xf32, #tpu.memory_space<vmem>>, vector<400x128xf32>,
    %c1_i32 = arith.constant 1 : i32
    %16 = arith.cmpi eq, %arg1, %c1_i32 : i32
    %17 = arith.extui %16 : i1 to i32
    %c0_i32_14 = arith.constant 0 : i32
    %18 = arith.cmpi ne, %17, %c0_i32_14 : i32
    scf.if %18 {
      %c0_15 = arith.constant 0 : index
      %c0_16 = arith.constant 0 : index
      %19 = vector.load %arg8[%c0_15, %c0_16] : memref<400x128xf32, #tpu.memory_space<vmem>>, vector<400x128xf32>
      %c0_17 = arith.constant 0 : index
      %c0_18 = arith.constant 0 : index
      %20 = vector.load %arg6[%c0_17, %c0_18] : memref<1x128xf32, #tpu.memory_space<vmem>>, vector<1x128xf32>
      %21 = vector.broadcast %20 : vector<1x128xf32> to vector<400x128xf32>
      %22 = arith.addf %19, %21 : vector<400x128xf32>
      %c0_19 = arith.constant 0 : index
      %c0_20 = arith.constant 0 : index
      %23 = vector.load %arg7[%c0_19, %c0_20] : memref<400x128xf32, #tpu.memory_space<vmem>>, vector<400x128xf32>
      tpu.vector_store %arg7[%c0_19, %c0_20], %22 {strides = array<i32>} : memref<400x128xf32, #tpu.memory_space<vmem>>, vector<400x128xf32>,
    } else {
    }
    return
  }
  func.func @transform_0(%arg0: i32, %arg1: i32) -> (i32, i32) {
    %c0_i32 = arith.constant 0 : i32
    %c0_i32_0 = arith.constant 0 : i32
    return %arg0, %c0_i32 : i32, i32
  }
  func.func @transform_1(%arg0: i32, %arg1: i32) -> (i32, i32) {
    %c0_i32 = arith.constant 0 : i32
    %c0_i32_0 = arith.constant 0 : i32
    return %arg1, %c0_i32 : i32, i32
  }
  func.func @transform_2(%arg0: i32, %arg1: i32) -> (i32, i32) {
    %c0_i32 = arith.constant 0 : i32
    %c0_i32_0 = arith.constant 0 : i32
    return %c0_i32, %arg1 : i32, i32
  }
  func.func @transform_3(%arg0: i32, %arg1: i32) -> (i32, i32) {
    %c0_i32 = arith.constant 0 : i32
    %c0_i32_0 = arith.constant 0 : i32
    return %c0_i32, %arg1 : i32, i32
  }
  func.func @transform_4(%arg0: i32, %arg1: i32) -> (i32, i32) {
    %c0_i32 = arith.constant 0 : i32
    %c0_i32_0 = arith.constant 0 : i32
    %c0_i32_1 = arith.constant 0 : i32
    return %c0_i32, %c0_i32_0 : i32, i32
  }
  func.func @transform_5(%arg0: i32, %arg1: i32) -> (i32, i32) {
    %c0_i32 = arith.constant 0 : i32
    %c0_i32_0 = arith.constant 0 : i32
    return %arg0, %c0_i32 : i32, i32
  }
}

</mosaic_0001>

<bundles_post_ra>
// kernel: feed_forward.1
= control target key start
LH: loop header
LB: loop body
LE: loop exit
PB: predicated region body
PF: predicated region fallthrough
CT: control target
= control target key end

     0   :  { %s7910_s0 = inlined_call_operand.hbm [shape: f32[400,128], index: 0, kind: input, shape index: {}]   ;;  %s7911_s1 = inlined_call_operand.hbm [shape: f32[2048,128], index: 1, kind: input, shape index: {}]   ;;  %s7912_s2 = inlined_call_operand.hbm [shape: f32[1,2048], index: 2, kind: input, shape index: {}]   ;;  %s7913_s3 = inlined_call_operand.hbm [shape: f32[128,2048], index: 3, kind: input, shape index: {}]   ;;  %s7914_s4 = inlined_call_operand.vmem [shape: f32[1,128], index: 4, kind: input, shape index: {}]   ;;  %s7915_s5 = inlined_call_operand.hbm [shape: f32[400,128], index: 5, kind: output, shape index: {}]  }
   0x1   :  { %7921 = sst [smem:[#allocation180_spill]] %s7911_s1 }
   0x2   :  { %7922 = sst [smem:[#allocation181_spill]] %s7912_s2 }
   0x3   :  { %10 = vsyncpa [#allocation4], 0 }
   0x4   :  { %11 = vsyncpa [#allocation7], 0 }
   0x5   :  { %13 = vsyncpa [#allocation7 + $0x1], 0 }
   0x6   :  { %14 = vsyncpa [#allocation10], 0 }
   0x7   :  { %16 = vsyncpa [#allocation10 + $0x1], 0 }
   0x8   :  { %17 = vsyncpa [#allocation5], 0  ;;  %s5213_s18 = smov 0   ;;  %s5215_s19 = smov 0  }
   0x9   :  { %s5217_s20 = smov 0   ;;  %s5219_s21 = smov 0  }
   0xa   :  { %s5221_s22 = smov 0   ;;  %s5223_s23 = smov 0  }
   0xb LB: > { %s32_s24 = sadd.s32 1, %s5164_s22  ;;  %s68_s25 = sadd.s32 1, %s5156_s20  ;;  %s5168_s23 = sphi %s5223_s23, %s23_s23   ;;  %s5164_s22 = sphi %s5221_s22, %s8584_s22   ;;  %s5160_s21 = sphi %s5219_s21, %s8583_s21   ;;  %s5156_s20 = sphi %s5217_s20, %s8582_s20   ;;  %s5152_s19 = sphi %s5215_s19, %s8581_s19   ;;  %s5148_s18 = sphi %s5213_s18, %s8580_s18  }
   0xc   : > { %p33_p0 = scmp.ge.s32.totalorder %s32_s24, 2  ;;  %p75_p1 = scmp.ne.s32.totalorder %s5156_s20, %s5152_s19 }
   0xd   : > { %p76_p2 = scmp.eq.s32.totalorder %s5168_s23, 0  ;;  %p4899_p5 = scmp.lt.s32.totalorder %s5168_s23, 2 }
   0xe   : > { %s8586_s24 = smov (%p33_p0, %s32_s24), 0  ;;  %s223_s28 = sand.u32 1, %s5168_s23  }
   0xf   : > { %p5250_p3 = por %p76_p2, %p75_p1  ;;  %s65_s27 = ssub.s32 %s5164_s22, %s8586_s24 }
  0x10   : > { %p66_p4 = scmp.eq.s32.totalorder %s65_s27, 0  ;;  %s5259_s29 = sand.u32 1, %s5156_s20  }
  0x11   : > { %s4318_s6 = sshll.u32 %s5259_s29, 10  ;;  %s4339_s7 = sshll.u32 %s5164_s22, 14 }
  0x12   : > { %s5262_s30 = scalar_select %p66_p4, %s5156_s20, %s68_s25  }
  0x13   : > { %s7924_s1 = sld [smem:[#allocation180_spill]]  ;;  %s227_s11 = scalar_lea.vmem [#allocation6], %s4318_s6 }
  0x14   : > { %s234_s12 = sshll.u32 %s227_s11, 4  ;;  %p5271_p6 = pnand %p4899_p5, %p5250_p3  ;;  %s235_s12 = int_to_ptr.vmem [resolvable:$true] %s234_s12 }
  0x15   : > { %s267_s14 = scalar_lea.vmem [#allocation9], %s4318_s6  ;;  %s5275_s16 = scalar_lea.sflag [#allocation7], %s223_s28 }
  0x16   : > { %s274_s15 = sshll.u32 %s267_s14, 4  ;;  %p4974_p7 = pneg %p5271_p6  ;;  %s5288_s15 = int_to_ptr.vmem [resolvable:$true] %s274_s15 }
  0x17   : > { %s4985_s17 = scalar_lea.vmem %s235_s12, 16384  ;;  %s5170_s25 = smov [#allocation6]  }
  0x18   : > { %p4986_p8 = scmp.ne.s32.totalorder %s235_s12, %s4985_s17  ;;  %s4990_s26 = sshll.u32 %s5170_s25, 4  ;;  %s4991_s26 = int_to_ptr.vmem [resolvable:$false] %s4990_s26 }
  0x19   : > { %s233_s10 = scalar_lea.hbm %s7924_s1, %s4339_s7  ;;  %s4992_s27 = scalar_lea.vmem %s4991_s26, 32768 }
  0x1a   : > { %p4988_p9 = pnand %p4986_p8, %p4974_p7  ;;  %p4993_p11 = scmp.lt.s32.totalorder %s235_s12, %s4991_s26 }
  0x1b   : > { %p4994_p12 = scmp.lt.s32.totalorder %s4992_s27, %s4985_s17 }
  0x1c   : > { %p4989_p10 = pneg %p4988_p9 }
  0x1d   : > { %p4995_p13 = por %p4994_p12, %p4993_p11 }
  0x1f   : > { %p4996_p0 = pnand %p4995_p13, %p4989_p10 }
  0x21   : > { %4999 = shalt.err (!%p4996_p0)
}
  0x22   : > { %s7916_s6 = smov 128   ;;  %s7917_s28 = smov 8  }
  0x23   : > { %4891 = dma.hbm_to_vmem [thread:$0]  (!%p5271_p6), %s233_s10, 16384, %s235_s12, %s5275_s16, %s7916_s6, %s7916_s6, %s7917_s28  }
  0x24   : > { %s5291_s7 = sadd.s32 4294967295, %s5168_s23   ;;  %p81_p1 = scmp.ne.s32.totalorder %s5152_s19, %s5148_s18 }
  0x25   : > { %p7918_p2 = scmp.eq.s32.totalorder %s5291_s7, 0  ;;  %p4315_p3 = scmp.ge.s32.totalorder %s5168_s23, 1 }
  0x26   : > { %p191_p4 = scmp.lt.s32.totalorder %s5168_s23, 3  ;;  %s5173_s10 = smov [#allocation3]  }
  0x27   : > { %p5300_p5 = por %p7918_p2, %p81_p1  ;;  %s206_s11 = sshll.u32 %s5173_s10, 4  ;;  %s207_s11 = int_to_ptr.vmem [resolvable:$true] %s206_s11 }
  0x28   : > { %p5304_p8 = pnand %p4315_p3, %p191_p4  ;;  %s4321_s12 = sshll.u32 %s5259_s29, 3 }
  0x29   : > { %s4340_s18 = sshll.u32 %s5164_s22, 7  ;;  %s248_s14 = scalar_lea.vmem [#allocation8], %s4321_s12 }
  0x2a   : > { %p4884_p9 = pneg %p5304_p8  ;;  %s256_s17 = sshll.u32 %s248_s14, 4  ;;  %s257_s17 = int_to_ptr.vmem [resolvable:$true] %s256_s17 }
  0x2b   : > { %s7929_s2 = sld [smem:[#allocation181_spill]]  ;;  %s4341_s28 = sshll.u32 %s5164_s22, 10 }
  0x2c   : > { %p5314_p10 = pnand %p4884_p9, %p7918_p2  ;;  %s5011_s10 = scalar_lea.vmem %s207_s11, 6400 }
  0x2d   : > { %p5012_p12 = scmp.ne.s32.totalorder %s207_s11, %s5011_s10  ;;  %p5019_p1 = scmp.lt.s32.totalorder %s207_s11, %s207_s11 }
  0x2e   : > { %p5002_p11 = pneg %p5314_p10  ;;  %p5020_p3 = scmp.lt.s32.totalorder %s5011_s10, %s5011_s10 }
  0x30   : > { %p5014_p13 = pnand %p5012_p12, %p5002_p11  ;;  %p5021_p4 = por %p5020_p3, %p5019_p1 }
  0x31   : > { %s254_s6 = scalar_lea.hbm %s7929_s2, %s4340_s18 }
  0x32   : > { %p5015_p0 = pneg %p5014_p13 }
  0x34   : > { %p5022_p9 = pnand %p5021_p4, %p5015_p0 }
  0x36   : > { %5025 = shalt.err (!%p5022_p9)
}
  0x37   : > { %s7930_s12 = smov 8   ;;  %s7931_s14 = smov 128  }
  0x38   : > { %4887 = dma.hbm_to_vmem [thread:$0]  (!%p5314_p10), %s7910_s0, 6400, %s207_s11, [#allocation4], %s7931_s14, %s7931_s14, %s7930_s12  }
  0x39   : > { %s5039_s27 = scalar_lea.vmem %s257_s17, 128  ;;  %s5174_s10 = smov [#allocation8]  }
  0x3a   : > { %p5040_p2 = scmp.ne.s32.totalorder %s257_s17, %s5039_s27  ;;  %s5044_s1 = sshll.u32 %s5174_s10, 4  ;;  %s5045_s1 = int_to_ptr.vmem [resolvable:$false] %s5044_s1 }
  0x3b   : > { %s5046_s2 = scalar_lea.vmem %s5045_s1, 256  ;;  %p5047_p13 = scmp.lt.s32.totalorder %s257_s17, %s5045_s1 }
  0x3c   : > { %p5042_p11 = pnand %p5040_p2, %p4974_p7  ;;  %p5048_p0 = scmp.lt.s32.totalorder %s5046_s2, %s5039_s27 }
  0x3e   : > { %p5043_p12 = pneg %p5042_p11  ;;  %p5049_p1 = por %p5048_p0, %p5047_p13 }
  0x40   : > { %p5050_p3 = pnand %p5049_p1, %p5043_p12 }
  0x42   : > { %5053 = shalt.err (!%p5050_p3)
}
  0x43   : > { %4894 = dma.hbm_to_vmem [thread:$0]  (!%p5271_p6), %s254_s6, 128, %s257_s17, %s5275_s16  }
  0x44   : > { %s273_s12 = scalar_lea.hbm %s7913_s3, %s4341_s28  ;;  %s264_s14 = scalar_lea.sflag [#allocation10], %s5259_s29 }
  0x45   : > { %s5067_s26 = scalar_lea.vmem %s5288_s15, 16384  ;;  %s5175_s1 = smov [#allocation9]  }
  0x46   : > { %p5068_p2 = scmp.ne.s32.totalorder %s5288_s15, %s5067_s26  ;;  %s5072_s2 = sshll.u32 %s5175_s1, 4  ;;  %s5073_s2 = int_to_ptr.vmem [resolvable:$false] %s5072_s2 }
  0x47   : > { %s5074_s18 = scalar_lea.vmem %s5073_s2, 32768  ;;  %p5075_p9 = scmp.lt.s32.totalorder %s5288_s15, %s5073_s2 }
  0x48   : > { %p5070_p10 = pnand %p5068_p2, %p4974_p7  ;;  %p5076_p11 = scmp.lt.s32.totalorder %s5074_s18, %s5067_s26 }
  0x4a   : > { %p5071_p4 = pneg %p5070_p10  ;;  %p5077_p12 = por %p5076_p11, %p5075_p9 }
  0x4c   : > { %p5078_p13 = pnand %p5077_p12, %p5071_p4 }
  0x4e   : > { %5081 = shalt.err (!%p5078_p13)
}
  0x4f   : > { %s5176_s16 = smov 2048   ;;  %s5177_s6 = smov 1024  }
  0x50   : > { %s5178_s29 = smov 64   ;;  %286 = sbr.rel (%p5304_p8) target bundleno = 1234 (0x4d2), region = 40 }
  0x51   : > { %4897 = dma.hbm_to_vmem [thread:$0]  (!%p5271_p6), %s273_s12, 16384, %s5288_s15, %s264_s14, %s5176_s16, %s5177_s6, %s5178_s29  }
  0x55   : > { %p7932_p7 = scmp.eq.s32.totalorder %s5291_s7, 0 }
  0x57   : > { %5131 = dma.done.wait (%p7932_p7), [#allocation4], 6400   ;;  %p7933_p0 = pmov %p7932_p7 }
  0x58   : > { %s292_s28 = sand.u32 1, %s5291_s7   ;;  %s294_s17 = sand.u32 1, %s5152_s19  }
  0x59   : > { %5133 = vsyncadd (%p7933_p0), [#allocation4], 4294960896  ;;  %s4329_s27 = sshll.u32 %s294_s17, 10  ;;  %s293_s10 = scalar_lea.sflag [#allocation7], %s292_s28 }
  0x5a   : > { %s5359_s11 = scalar_lea.vmem [#allocation6], %s4329_s27 }
  0x5b   : > { %5135 = dma.done.wait (%p5300_p5), %s293_s10, 16512  }
  0x5c   : > { %5137 = vsyncadd (%p5300_p5), %s293_s10, 4294950784  ;;  %s4330_s13 = sshll.u32 %s294_s17, 3  ;;  %s311_s9 = scalar_lea.sflag [#allocation10], %s294_s17 }
  0x5d   : > { %s5365_s15 = scalar_lea.vmem [#allocation8], %s4330_s13  ;;  %s5367_s25 = scalar_lea.vmem [#allocation9], %s4329_s27 }
  0x5e   : > { %5139 = dma.done.wait (%p5300_p5), %s311_s9, 16384  }
  0x5f   : > { %5141 = vsyncadd (%p5300_p5), %s311_s9, 4294950912  ;;  %p4332_p6 = scmp.ne.s32.totalorder %s5160_s21, 0 }
  0x61   : > { %354 = sbr.rel (%p4332_p6) target bundleno = 128 (0x80), region = 60 }
  0x66   : > { %v5179_v0 = vmov 0.0  }
  0x67   : > { %355 = vst [vmem:[#allocation2 + $0xb0] sm:$0xff] %v5179_v0  ;;  %356 = vst [vmem:[#allocation2 + $0xd0] sm:$0xff] %v5179_v0 }
  0x68   : > { %357 = vst [vmem:[#allocation2 + $0x10] sm:$0xff] %v5179_v0  ;;  %358 = vst [vmem:[#allocation2 + $0x48] sm:$0xff] %v5179_v0 }
  0x69   : > { %359 = vst [vmem:[#allocation2 + $0x160] sm:$0xff] %v5179_v0  ;;  %360 = vst [vmem:[#allocation2 + $0x128] sm:$0xff] %v5179_v0 }
  0x6a   : > { %361 = vst [vmem:[#allocation2 + $0x40] sm:$0xff] %v5179_v0  ;;  %362 = vst [vmem:[#allocation2 + $0x178] sm:$0xff] %v5179_v0 }
  0x6b   : > { %363 = vst [vmem:[#allocation2 + $0x108] sm:$0xff] %v5179_v0  ;;  %364 = vst [vmem:[#allocation2 + $0x110] sm:$0xff] %v5179_v0 }
  0x6c   : > { %365 = vst [vmem:[#allocation2 + $0x90] sm:$0xff] %v5179_v0  ;;  %366 = vst [vmem:[#allocation2 + $0x118] sm:$0xff] %v5179_v0 }
  0x6d   : > { %367 = vst [vmem:[#allocation2 + $0x148] sm:$0xff] %v5179_v0  ;;  %368 = vst [vmem:[#allocation2 + $0x100] sm:$0xff] %v5179_v0 }
  0x6e   : > { %369 = vst [vmem:[#allocation2 + $0x58] sm:$0xff] %v5179_v0  ;;  %370 = vst [vmem:[#allocation2 + $0xd8] sm:$0xff] %v5179_v0 }
  0x6f   : > { %371 = vst [vmem:[#allocation2 + $0x180] sm:$0xff] %v5179_v0  ;;  %372 = vst [vmem:[#allocation2 + $0x130] sm:$0xff] %v5179_v0 }
  0x70   : > { %373 = vst [vmem:[#allocation2 + $0x138] sm:$0xff] %v5179_v0  ;;  %374 = vst [vmem:[#allocation2 + $0x120] sm:$0xff] %v5179_v0 }
  0x71   : > { %375 = vst [vmem:[#allocation2 + $0xe0] sm:$0xff] %v5179_v0  ;;  %376 = vst [vmem:[#allocation2 + $0xa8] sm:$0xff] %v5179_v0 }
  0x72   : > { %377 = vst [vmem:[#allocation2 + $0xb8] sm:$0xff] %v5179_v0  ;;  %378 = vst [vmem:[#allocation2 + $0x168] sm:$0xff] %v5179_v0 }
  0x73   : > { %379 = vst [vmem:[#allocation2 + $0xe8] sm:$0xff] %v5179_v0  ;;  %380 = vst [vmem:[#allocation2 + $0xf8] sm:$0xff] %v5179_v0 }
  0x74   : > { %381 = vst [vmem:[#allocation2 + $0x20] sm:$0xff] %v5179_v0  ;;  %382 = vst [vmem:[#allocation2 + $0x88] sm:$0xff] %v5179_v0 }
  0x75   : > { %383 = vst [vmem:[#allocation2 + $0xa0] sm:$0xff] %v5179_v0  ;;  %384 = vst [vmem:[#allocation2 + $0x170] sm:$0xff] %v5179_v0 }
  0x76   : > { %385 = vst [vmem:[#allocation2 + $0xf0] sm:$0xff] %v5179_v0  ;;  %386 = vst [vmem:[#allocation2 + $0x140] sm:$0xff] %v5179_v0 }
  0x77   : > { %387 = vst [vmem:[#allocation2 + $0x50] sm:$0xff] %v5179_v0  ;;  %388 = vst [vmem:[#allocation2] sm:$0xff] %v5179_v0 }
  0x78   : > { %389 = vst [vmem:[#allocation2 + $0x8] sm:$0xff] %v5179_v0  ;;  %390 = vst [vmem:[#allocation2 + $0xc0] sm:$0xff] %v5179_v0 }
  0x79   : > { %391 = vst [vmem:[#allocation2 + $0x98] sm:$0xff] %v5179_v0  ;;  %392 = vst [vmem:[#allocation2 + $0x30] sm:$0xff] %v5179_v0 }
  0x7a   : > { %393 = vst [vmem:[#allocation2 + $0x188] sm:$0xff] %v5179_v0  ;;  %394 = vst [vmem:[#allocation2 + $0x18] sm:$0xff] %v5179_v0 }
  0x7b   : > { %395 = vst [vmem:[#allocation2 + $0x28] sm:$0xff] %v5179_v0  ;;  %396 = vst [vmem:[#allocation2 + $0x158] sm:$0xff] %v5179_v0 }
  0x7c   : > { %397 = vst [vmem:[#allocation2 + $0x38] sm:$0xff] %v5179_v0  ;;  %398 = vst [vmem:[#allocation2 + $0x70] sm:$0xff] %v5179_v0 }
  0x7d   : > { %399 = vst [vmem:[#allocation2 + $0x68] sm:$0xff] %v5179_v0  ;;  %400 = vst [vmem:[#allocation2 + $0x80] sm:$0xff] %v5179_v0 }
  0x7e   : > { %401 = vst [vmem:[#allocation2 + $0xc8] sm:$0xff] %v5179_v0  ;;  %402 = vst [vmem:[#allocation2 + $0x60] sm:$0xff] %v5179_v0 }
  0x7f   : > { %403 = vst [vmem:[#allocation2 + $0x78] sm:$0xff] %v5179_v0  ;;  %404 = vst [vmem:[#allocation2 + $0x150] sm:$0xff] %v5179_v0 }
  0x80 PF: > { %v486_v1 = vld [vmem:[%s5359_s11 + $0xf8] sm:$0xff]  ;;  %v485_v5 = vld [vmem:[%s5359_s11 + $0xf0] sm:$0xff]  ;;  %v484_v9 = vld [vmem:[%s5359_s11 + $0xe8] sm:$0xff]  ;;  %p4333_p5 = scmp.ne.s32.totalorder %s5160_s21, 1 }
  0x81   : > { %v518_v2 = vld [vmem:[%s5359_s11 + $0x1f8] sm:$0xff]  ;;  %4342 = vmatprep.subr.mxu0 %v486_v1  ;;  %v517_v6 = vld [vmem:[%s5359_s11 + $0x1f0] sm:$0xff]  ;;  %v516_v10 = vld [vmem:[%s5359_s11 + $0x1e8] sm:$0xff] }
  0x82   : > { %v470_v3 = vld [vmem:[%s5359_s11 + $0x78] sm:$0xff]  ;;  %4474 = vmatprep.subr.mxu1 %v518_v2  ;;  %v469_v7 = vld [vmem:[%s5359_s11 + $0x70] sm:$0xff]  ;;  %v468_v11 = vld [vmem:[%s5359_s11 + $0x68] sm:$0xff] }
  0x83   : > { %v502_v4 = vld [vmem:[%s5359_s11 + $0x178] sm:$0xff]  ;;  %4343 = vmatpush3.xpose.msra.mxu0 %v470_v3  ;;  %v501_v8 = vld [vmem:[%s5359_s11 + $0x170] sm:$0xff]  ;;  %v500_v12 = vld [vmem:[%s5359_s11 + $0x168] sm:$0xff] }
  0x84   : > { %4475 = vmatpush3.xpose.msra.mxu1 %v502_v4  ;;  %4344 = vmatprep.subr.mxu0 %v485_v5  ;;  %v483_v13 = vld [vmem:[%s5359_s11 + $0xe0] sm:$0xff]  ;;  %v482_v17 = vld [vmem:[%s5359_s11 + $0xd8] sm:$0xff]  ;;  %v481_v21 = vld [vmem:[%s5359_s11 + $0xd0] sm:$0xff] }
  0x85   : > { %4476 = vmatprep.subr.mxu1 %v517_v6  ;;  %v515_v14 = vld [vmem:[%s5359_s11 + $0x1e0] sm:$0xff]  ;;  %v514_v18 = vld [vmem:[%s5359_s11 + $0x1d8] sm:$0xff]  ;;  %v513_v22 = vld [vmem:[%s5359_s11 + $0x1d0] sm:$0xff] }
  0x86   : > { %v467_v15 = vld [vmem:[%s5359_s11 + $0x60] sm:$0xff]  ;;  %v466_v19 = vld [vmem:[%s5359_s11 + $0x58] sm:$0xff]  ;;  %v465_v23 = vld [vmem:[%s5359_s11 + $0x50] sm:$0xff] }
  0x87   : > { %4345 = vmatpush3.xpose.msra.mxu0 %v469_v7  ;;  %v499_v16 = vld [vmem:[%s5359_s11 + $0x160] sm:$0xff]  ;;  %v498_v20 = vld [vmem:[%s5359_s11 + $0x158] sm:$0xff]  ;;  %v497_v24 = vld [vmem:[%s5359_s11 + $0x150] sm:$0xff] }
  0x88   : > { %4477 = vmatpush3.xpose.msra.mxu1 %v501_v8  ;;  %4346 = vmatprep.subr.mxu0 %v484_v9  ;;  %v480_v25 = vld [vmem:[%s5359_s11 + $0xc8] sm:$0xff]  ;;  %v5400_v27 = vld [vmem:[#allocation3] sm:$0xff]  ;;  %v479_v30 = vld [vmem:[%s5359_s11 + $0xc0] sm:$0xff] }
  0x89   : > { %4478 = vmatprep.subr.mxu1 %v516_v10  ;;  %v512_v26 = vld [vmem:[%s5359_s11 + $0x1c8] sm:$0xff]  ;;  %v511_v31 = vld [vmem:[%s5359_s11 + $0x1c0] sm:$0xff]  ;;  %4374 = vmatprep.mubr.f32.mxu0 %v5400_v27  ;;  %v478_v34 = vld [vmem:[%s5359_s11 + $0xb8] sm:$0xff] }
  0x8a   : > { %v464_v28 = vld [vmem:[%s5359_s11 + $0x48] sm:$0xff]  ;;  %4506 = vmatprep.mubr.f32.mxu1 %v5400_v27  ;;  %v463_v32 = vld [vmem:[%s5359_s11 + $0x40] sm:$0xff]  ;;  %v510_v35 = vld [vmem:[%s5359_s11 + $0x1b8] sm:$0xff] }
  0x8b   : > { %4347 = vmatpush3.xpose.msra.mxu0 %v468_v11  ;;  %v496_v29 = vld [vmem:[%s5359_s11 + $0x148] sm:$0xff]  ;;  %v495_v33 = vld [vmem:[%s5359_s11 + $0x140] sm:$0xff]  ;;  %v462_v36 = vld [vmem:[%s5359_s11 + $0x38] sm:$0xff] }
  0x8c   : > { %4479 = vmatpush3.xpose.msra.mxu1 %v500_v12  ;;  %4348 = vmatprep.subr.mxu0 %v483_v13  ;;  %v494_v37 = vld [vmem:[%s5359_s11 + $0x138] sm:$0xff]  ;;  %v477_v38 = vld [vmem:[%s5359_s11 + $0xb0] sm:$0xff]  ;;  %v476_v42 = vld [vmem:[%s5359_s11 + $0xa8] sm:$0xff] }
  0x8d   : > { %4480 = vmatprep.subr.mxu1 %v515_v14  ;;  %v509_v39 = vld [vmem:[%s5359_s11 + $0x1b0] sm:$0xff]  ;;  %v508_v43 = vld [vmem:[%s5359_s11 + $0x1a8] sm:$0xff]  ;;  %v475_v46 = vld [vmem:[%s5359_s11 + $0xa0] sm:$0xff] }
  0x8e   : > { %v461_v40 = vld [vmem:[%s5359_s11 + $0x30] sm:$0xff]  ;;  %v460_v44 = vld [vmem:[%s5359_s11 + $0x28] sm:$0xff]  ;;  %v507_v47 = vld [vmem:[%s5359_s11 + $0x1a0] sm:$0xff] }
  0x8f   : > { %4349 = vmatpush3.xpose.msra.mxu0 %v467_v15  ;;  %v493_v41 = vld [vmem:[%s5359_s11 + $0x130] sm:$0xff]  ;;  %v492_v45 = vld [vmem:[%s5359_s11 + $0x128] sm:$0xff]  ;;  %v459_v48 = vld [vmem:[%s5359_s11 + $0x20] sm:$0xff] }
  0x90   : > { %4481 = vmatpush3.xpose.msra.mxu1 %v499_v16  ;;  %4350 = vmatprep.subr.mxu0 %v482_v17  ;;  %v491_v49 = vld [vmem:[%s5359_s11 + $0x120] sm:$0xff]  ;;  %v474_v50 = vld [vmem:[%s5359_s11 + $0x98] sm:$0xff]  ;;  %v473_v54 = vld [vmem:[%s5359_s11 + $0x90] sm:$0xff] }
  0x91   : > { %4482 = vmatprep.subr.mxu1 %v514_v18  ;;  %v506_v51 = vld [vmem:[%s5359_s11 + $0x198] sm:$0xff]  ;;  %v505_v55 = vld [vmem:[%s5359_s11 + $0x190] sm:$0xff]  ;;  %v472_v58 = vld [vmem:[%s5359_s11 + $0x88] sm:$0xff] }
  0x92   : > { %v458_v52 = vld [vmem:[%s5359_s11 + $0x18] sm:$0xff]  ;;  %v457_v56 = vld [vmem:[%s5359_s11 + $0x10] sm:$0xff]  ;;  %v504_v59 = vld [vmem:[%s5359_s11 + $0x188] sm:$0xff] }
  0x93   : > { %4351 = vmatpush3.xpose.msra.mxu0 %v466_v19  ;;  %v490_v53 = vld [vmem:[%s5359_s11 + $0x118] sm:$0xff]  ;;  %v489_v57 = vld [vmem:[%s5359_s11 + $0x110] sm:$0xff]  ;;  %v456_v60 = vld [vmem:[%s5359_s11 + $0x8] sm:$0xff] }
  0x94   : > { %4483 = vmatpush3.xpose.msra.mxu1 %v498_v20  ;;  %4352 = vmatprep.subr.mxu0 %v481_v21  ;;  %v488_v61 = vld [vmem:[%s5359_s11 + $0x108] sm:$0xff]  ;;  %v471_v62 = vld [vmem:[%s5359_s11 + $0x80] sm:$0xff]  ;;  %v550_v2 = vld [vmem:[%s5359_s11 + $0x2f8] sm:$0xff] }
  0x95   : > { %4484 = vmatprep.subr.mxu1 %v513_v22  ;;  %v503_v63 = vld [vmem:[%s5359_s11 + $0x180] sm:$0xff]  ;;  %v582_v3 = vld [vmem:[%s5359_s11 + $0x3f8] sm:$0xff]  ;;  %v549_v7 = vld [vmem:[%s5359_s11 + $0x2f0] sm:$0xff] }
  0x96   : > { %v455_v0 = vld [vmem:[%s5359_s11] sm:$0xff]  ;;  %v534_v4 = vld [vmem:[%s5359_s11 + $0x278] sm:$0xff]  ;;  %v581_v8 = vld [vmem:[%s5359_s11 + $0x3f0] sm:$0xff] }
  0x97   : > { %4353 = vmatpush3.xpose.msra.mxu0 %v465_v23  ;;  %v487_v1 = vld [vmem:[%s5359_s11 + $0x100] sm:$0xff]  ;;  %v5445_v5 = vld [vmem:[#allocation3 + $0x8] sm:$0xff]  ;;  %v533_v10 = vld [vmem:[%s5359_s11 + $0x270] sm:$0xff] }
  0x98   : > { %4485 = vmatpush3.xpose.msra.mxu1 %v497_v24  ;;  %4354 = vmatprep.subr.mxu0 %v480_v25  ;;  %v566_v6 = vld [vmem:[%s5359_s11 + $0x378] sm:$0xff]  ;;  %v5454_v9 = vld [vmem:[#allocation3 + $0x10] sm:$0xff]  ;;  %v565_v11 = vld [vmem:[%s5359_s11 + $0x370] sm:$0xff] }
  0x99   : > { %4486 = vmatprep.subr.mxu1 %v512_v26  ;;  %v548_v12 = vld [vmem:[%s5359_s11 + $0x2e8] sm:$0xff]  ;;  %v547_v17 = vld [vmem:[%s5359_s11 + $0x2e0] sm:$0xff]  ;;  %v5474_v19 = vld [vmem:[#allocation3 + $0x20] sm:$0xff] }
  0x9a   : > { %v580_v13 = vld [vmem:[%s5359_s11 + $0x3e8] sm:$0xff]  ;;  %v579_v18 = vld [vmem:[%s5359_s11 + $0x3e0] sm:$0xff]  ;;  %v546_v22 = vld [vmem:[%s5359_s11 + $0x2d8] sm:$0xff] }
  0x9b   : > { %4355 = vmatpush3.xpose.msra.mxu0 %v464_v28  ;;  %v5464_v14 = vld [vmem:[#allocation3 + $0x18] sm:$0xff]  ;;  %v531_v20 = vld [vmem:[%s5359_s11 + $0x260] sm:$0xff]  ;;  %v578_v23 = vld [vmem:[%s5359_s11 + $0x3d8] sm:$0xff] }
  0x9c   : > { %4487 = vmatpush3.xpose.msra.mxu1 %v496_v29  ;;  %4356 = vmatprep.subr.mxu0 %v479_v30  ;;  %v532_v15 = vld [vmem:[%s5359_s11 + $0x268] sm:$0xff]  ;;  %v563_v21 = vld [vmem:[%s5359_s11 + $0x360] sm:$0xff]  ;;  %v5484_v24 = vld [vmem:[#allocation3 + $0x28] sm:$0xff] }
  0x9d   : > { %4488 = vmatprep.subr.mxu1 %v511_v31  ;;  %v564_v16 = vld [vmem:[%s5359_s11 + $0x368] sm:$0xff]  ;;  %v530_v25 = vld [vmem:[%s5359_s11 + $0x258] sm:$0xff]  ;;  %v545_v28 = vld [vmem:[%s5359_s11 + $0x2d0] sm:$0xff] }
  0x9e   : > { %v562_v26 = vld [vmem:[%s5359_s11 + $0x358] sm:$0xff]  ;;  %v577_v29 = vld [vmem:[%s5359_s11 + $0x3d0] sm:$0xff]  ;;  %v5494_v30 = vld [vmem:[#allocation3 + $0x30] sm:$0xff] }
  0x9f   : > { %4357 = vmatpush3.xpose.msra.mxu0 %v463_v32  ;;  %v529_v31 = vld [vmem:[%s5359_s11 + $0x250] sm:$0xff] }
  0xa0   : > { %4489 = vmatpush3.xpose.msra.mxu1 %v495_v33  ;;  %4358 = vmatprep.subr.mxu0 %v478_v34  ;;  %v561_v32 = vld [vmem:[%s5359_s11 + $0x350] sm:$0xff]  ;;  %v544_v33 = vld [vmem:[%s5359_s11 + $0x2c8] sm:$0xff] }
  0xa1   : > { %4490 = vmatprep.subr.mxu1 %v510_v35  ;;  %v576_v34 = vld [vmem:[%s5359_s11 + $0x3c8] sm:$0xff] }
  0xa2   : > { %v5504_v35 = vld [vmem:[#allocation3 + $0x38] sm:$0xff] }
  0xa3   : > { %4359 = vmatpush3.xpose.msra.mxu0 %v462_v36  ;;  %v528_v36 = vld [vmem:[%s5359_s11 + $0x248] sm:$0xff] }
  0xa4   : > { %4491 = vmatpush3.xpose.msra.mxu1 %v494_v37  ;;  %4360 = vmatprep.subr.mxu0 %v477_v38  ;;  %v560_v37 = vld [vmem:[%s5359_s11 + $0x348] sm:$0xff]  ;;  %v543_v38 = vld [vmem:[%s5359_s11 + $0x2c0] sm:$0xff] }
  0xa5   : > { %4492 = vmatprep.subr.mxu1 %v509_v39  ;;  %v575_v39 = vld [vmem:[%s5359_s11 + $0x3c0] sm:$0xff] }
  0xa7   : > { %4361 = vmatpush3.xpose.msra.mxu0 %v461_v40  ;;  %v5514_v40 = vld [vmem:[#allocation3 + $0x40] sm:$0xff] }
  0xa8   : > { %4493 = vmatpush3.xpose.msra.mxu1 %v493_v41  ;;  %4362 = vmatprep.subr.mxu0 %v476_v42  ;;  %v527_v41 = vld [vmem:[%s5359_s11 + $0x240] sm:$0xff] }
  0xa9   : > { %4494 = vmatprep.subr.mxu1 %v508_v43  ;;  %v559_v42 = vld [vmem:[%s5359_s11 + $0x340] sm:$0xff]  ;;  %v542_v43 = vld [vmem:[%s5359_s11 + $0x2b8] sm:$0xff] }
  0xab   : > { %4363 = vmatpush3.xpose.msra.mxu0 %v460_v44  ;;  %v574_v44 = vld [vmem:[%s5359_s11 + $0x3b8] sm:$0xff] }
  0xac   : > { %4495 = vmatpush3.xpose.msra.mxu1 %v492_v45  ;;  %4364 = vmatprep.subr.mxu0 %v475_v46  ;;  %v5524_v45 = vld [vmem:[#allocation3 + $0x48] sm:$0xff] }
  0xad   : > { %4496 = vmatprep.subr.mxu1 %v507_v47  ;;  %v526_v46 = vld [vmem:[%s5359_s11 + $0x238] sm:$0xff] }
  0xae   : > { %v558_v47 = vld [vmem:[%s5359_s11 + $0x338] sm:$0xff] }
  0xaf   : > { %4365 = vmatpush3.xpose.msra.mxu0 %v459_v48  ;;  %v541_v48 = vld [vmem:[%s5359_s11 + $0x2b0] sm:$0xff] }
  0xb0   : > { %4497 = vmatpush3.xpose.msra.mxu1 %v491_v49  ;;  %4366 = vmatprep.subr.mxu0 %v474_v50  ;;  %v573_v49 = vld [vmem:[%s5359_s11 + $0x3b0] sm:$0xff]  ;;  %v5534_v50 = vld [vmem:[#allocation3 + $0x50] sm:$0xff] }
  0xb1   : > { %4498 = vmatprep.subr.mxu1 %v506_v51  ;;  %v525_v51 = vld [vmem:[%s5359_s11 + $0x230] sm:$0xff] }
  0xb3   : > { %4367 = vmatpush3.xpose.msra.mxu0 %v458_v52  ;;  %v557_v52 = vld [vmem:[%s5359_s11 + $0x330] sm:$0xff] }
  0xb4   : > { %4499 = vmatpush3.xpose.msra.mxu1 %v490_v53  ;;  %4368 = vmatprep.subr.mxu0 %v473_v54  ;;  %v540_v53 = vld [vmem:[%s5359_s11 + $0x2a8] sm:$0xff] }
  0xb5   : > { %4500 = vmatprep.subr.mxu1 %v505_v55  ;;  %v572_v54 = vld [vmem:[%s5359_s11 + $0x3a8] sm:$0xff] }
  0xb6   : > { %v5544_v55 = vld [vmem:[#allocation3 + $0x58] sm:$0xff] }
  0xb7   : > { %4369 = vmatpush3.xpose.msra.mxu0 %v457_v56  ;;  %v524_v56 = vld [vmem:[%s5359_s11 + $0x228] sm:$0xff] }
  0xb8   : > { %4501 = vmatpush3.xpose.msra.mxu1 %v489_v57  ;;  %4370 = vmatprep.subr.mxu0 %v472_v58  ;;  %v556_v57 = vld [vmem:[%s5359_s11 + $0x328] sm:$0xff]  ;;  %v539_v58 = vld [vmem:[%s5359_s11 + $0x2a0] sm:$0xff] }
  0xb9   : > { %4502 = vmatprep.subr.mxu1 %v504_v59  ;;  %v571_v59 = vld [vmem:[%s5359_s11 + $0x3a0] sm:$0xff] }
  0xbb   : > { %4371 = vmatpush3.xpose.msra.mxu0 %v456_v60  ;;  %v5554_v60 = vld [vmem:[#allocation3 + $0x60] sm:$0xff] }
  0xbc   : > { %4503 = vmatpush3.xpose.msra.mxu1 %v488_v61  ;;  %4372 = vmatprep.subr.mxu0 %v471_v62  ;;  %v523_v61 = vld [vmem:[%s5359_s11 + $0x220] sm:$0xff] }
  0xbd   : > { %4504 = vmatprep.subr.mxu1 %v503_v63  ;;  %v555_v62 = vld [vmem:[%s5359_s11 + $0x320] sm:$0xff]  ;;  %v538_v63 = vld [vmem:[%s5359_s11 + $0x298] sm:$0xff] }
  0xbf   : > { %4373 = vmatpush3.xpose.msra.mxu0 %v455_v0  ;;  %v570_v0 = vld [vmem:[%s5359_s11 + $0x398] sm:$0xff] }
  0xc0   : > { %4505 = vmatpush3.xpose.msra.mxu1 %v487_v1  ;;  %4606 = vmatprep.subr.mxu0 %v550_v2  ;;  %v5564_v1 = vld [vmem:[#allocation3 + $0x68] sm:$0xff] }
  0xc1   : > { %4738 = vmatprep.subr.mxu1 %v582_v3  ;;  %v522_v2 = vld [vmem:[%s5359_s11 + $0x218] sm:$0xff] }
  0xc2   : > { %4375 = vmatmul.mubr.f32.vlgmr.msra.gmra.mxu0 %v5400_v27  ;;  %v554_v3 = vld [vmem:[%s5359_s11 + $0x318] sm:$0xff] }
  0xc3   : > { %4507 = vmatmul.mubr.f32.vlgmr.msra.gmra.mxu1 %v5400_v27  ;;  %4607 = vmatpush3.xpose.msra.mxu0 %v534_v4  ;;  %v537_v4 = vld [vmem:[%s5359_s11 + $0x290] sm:$0xff] }
  0xc4   : > { %4376 = vmatprep.mubr.f32.mxu0 %v5445_v5  ;;  %4508 = vmatprep.mubr.f32.mxu1 %v5445_v5 }
  0xc5   : > { %4739 = vmatpush3.xpose.msra.mxu1 %v566_v6  ;;  %4608 = vmatprep.subr.mxu0 %v549_v7  ;;  %v569_v6 = vld [vmem:[%s5359_s11 + $0x390] sm:$0xff]  ;;  %v5574_v7 = vld [vmem:[#allocation3 + $0x70] sm:$0xff] }
  0xc6   : > { %4740 = vmatprep.subr.mxu1 %v581_v8  ;;  %4377 = vmatmul.mubr.f32.gmra.mxu0 %v5445_v5  ;;  %v521_v8 = vld [vmem:[%s5359_s11 + $0x210] sm:$0xff] }
  0xc7   : > { %4509 = vmatmul.mubr.f32.gmra.mxu1 %v5445_v5  ;;  %4378 = vmatprep.mubr.f32.mxu0 %v5454_v9 }
  0xc8   : > { %4510 = vmatprep.mubr.f32.mxu1 %v5454_v9  ;;  %4609 = vmatpush3.xpose.msra.mxu0 %v533_v10  ;;  %v553_v10 = vld [vmem:[%s5359_s11 + $0x310] sm:$0xff] }
  0xc9   : > { %4741 = vmatpush3.xpose.msra.mxu1 %v565_v11  ;;  %4610 = vmatprep.subr.mxu0 %v548_v12  ;;  %v536_v11 = vld [vmem:[%s5359_s11 + $0x288] sm:$0xff] }
  0xca   : > { %4742 = vmatprep.subr.mxu1 %v580_v13  ;;  %4379 = vmatmul.mubr.f32.gmra.mxu0 %v5454_v9  ;;  %v568_v12 = vld [vmem:[%s5359_s11 + $0x388] sm:$0xff] }
  0xcb   : > { %4511 = vmatmul.mubr.f32.gmra.mxu1 %v5454_v9  ;;  %4380 = vmatprep.mubr.f32.mxu0 %v5464_v14  ;;  %v5584_v13 = vld [vmem:[#allocation3 + $0x78] sm:$0xff] }
  0xcc   : > { %4512 = vmatprep.mubr.f32.mxu1 %v5464_v14  ;;  %4611 = vmatpush3.xpose.msra.mxu0 %v532_v15  ;;  %v520_v15 = vld [vmem:[%s5359_s11 + $0x208] sm:$0xff] }
  0xcd   : > { %4743 = vmatpush3.xpose.msra.mxu1 %v564_v16  ;;  %4612 = vmatprep.subr.mxu0 %v547_v17  ;;  %v552_v16 = vld [vmem:[%s5359_s11 + $0x308] sm:$0xff]  ;;  %v5592_v17 = vld [vmem:[#allocation3 + $0x80] sm:$0xff] }
  0xce   : > { %4744 = vmatprep.subr.mxu1 %v579_v18  ;;  %4381 = vmatmul.mubr.f32.gmra.mxu0 %v5464_v14  ;;  %v535_v18 = vld [vmem:[%s5359_s11 + $0x280] sm:$0xff] }
  0xcf   : > { %4513 = vmatmul.mubr.f32.gmra.mxu1 %v5464_v14  ;;  %4382 = vmatprep.mubr.f32.mxu0 %v5474_v19 }
  0xd0   : > { %4514 = vmatprep.mubr.f32.mxu1 %v5474_v19  ;;  %4613 = vmatpush3.xpose.msra.mxu0 %v531_v20  ;;  %v519_v20 = vld [vmem:[%s5359_s11 + $0x200] sm:$0xff] }
  0xd1   : > { %4745 = vmatpush3.xpose.msra.mxu1 %v563_v21  ;;  %4614 = vmatprep.subr.mxu0 %v546_v22  ;;  %v567_v21 = vld [vmem:[%s5359_s11 + $0x380] sm:$0xff] }
  0xd2   : > { %4746 = vmatprep.subr.mxu1 %v578_v23  ;;  %4383 = vmatmul.mubr.f32.gmra.mxu0 %v5474_v19  ;;  %v551_v22 = vld [vmem:[%s5359_s11 + $0x300] sm:$0xff]  ;;  %v5602_v23 = vld [vmem:[#allocation3 + $0x88] sm:$0xff] }
  0xd3   : > { %4515 = vmatmul.mubr.f32.gmra.mxu1 %v5474_v19  ;;  %4384 = vmatprep.mubr.f32.mxu0 %v5484_v24 }
  0xd4   : > { %4516 = vmatprep.mubr.f32.mxu1 %v5484_v24  ;;  %4615 = vmatpush3.xpose.msra.mxu0 %v530_v25  ;;  %v5608_v25 = vld [vmem:[#allocation3 + $0x90] sm:$0xff] }
  0xd5   : > { %4747 = vmatpush3.xpose.msra.mxu1 %v562_v26  ;;  %4616 = vmatprep.subr.mxu0 %v545_v28  ;;  %v5614_v26 = vld [vmem:[#allocation3 + $0x98] sm:$0xff]  ;;  %v5620_v28 = vld [vmem:[#allocation3 + $0xa0] sm:$0xff] }
  0xd6   : > { %4748 = vmatprep.subr.mxu1 %v577_v29  ;;  %4385 = vmatmul.mubr.f32.gmra.mxu0 %v5484_v24  ;;  %v2656_v29 = vld [vmem:[%s5367_s25 + $0x3c8] sm:$0xff] }
  0xd7   : > { %4517 = vmatmul.mubr.f32.gmra.mxu1 %v5484_v24  ;;  %4386 = vmatprep.mubr.f32.mxu0 %v5494_v30 }
  0xd8   : > { %4518 = vmatprep.mubr.f32.mxu1 %v5494_v30  ;;  %4617 = vmatpush3.xpose.msra.mxu0 %v529_v31  ;;  %v2658_v31 = vld [vmem:[%s5367_s25 + $0x3d8] sm:$0xff] }
  0xd9   : > { %4749 = vmatpush3.xpose.msra.mxu1 %v561_v32  ;;  %4618 = vmatprep.subr.mxu0 %v544_v33  ;;  %v5628_v32 = vld [vmem:[#allocation3 + $0xa8] sm:$0xff]  ;;  %v5634_v33 = vld [vmem:[#allocation3 + $0xb0] sm:$0xff] }
  0xda   : > { %4750 = vmatprep.subr.mxu1 %v576_v34  ;;  %4387 = vmatmul.mubr.f32.gmra.mxu0 %v5494_v30  ;;  %v5640_v34 = vld [vmem:[#allocation3 + $0xb8] sm:$0xff] }
  0xdb   : > { %4519 = vmatmul.mubr.f32.gmra.mxu1 %v5494_v30  ;;  %4388 = vmatprep.mubr.f32.mxu0 %v5504_v35 }
  0xdc   : > { %4520 = vmatprep.mubr.f32.mxu1 %v5504_v35  ;;  %4619 = vmatpush3.xpose.msra.mxu0 %v528_v36  ;;  %v5646_v36 = vld [vmem:[#allocation3 + $0xc0] sm:$0xff] }
  0xdd   : > { %4751 = vmatpush3.xpose.msra.mxu1 %v560_v37  ;;  %4620 = vmatprep.subr.mxu0 %v543_v38  ;;  %v5652_v37 = vld [vmem:[#allocation3 + $0xc8] sm:$0xff]  ;;  %v5658_v38 = vld [vmem:[#allocation3 + $0xd0] sm:$0xff] }
  0xde   : > { %4752 = vmatprep.subr.mxu1 %v575_v39  ;;  %4389 = vmatmul.mubr.f32.gmra.mxu0 %v5504_v35  ;;  %v5664_v39 = vld [vmem:[#allocation3 + $0xd8] sm:$0xff] }
  0xdf   : > { %4521 = vmatmul.mubr.f32.gmra.mxu1 %v5504_v35  ;;  %4390 = vmatprep.mubr.f32.mxu0 %v5514_v40 }
  0xe0   : > { %4522 = vmatprep.mubr.f32.mxu1 %v5514_v40  ;;  %4621 = vmatpush3.xpose.msra.mxu0 %v527_v41  ;;  %v5670_v41 = vld [vmem:[#allocation3 + $0xe0] sm:$0xff] }
  0xe1   : > { %4753 = vmatpush3.xpose.msra.mxu1 %v559_v42  ;;  %4622 = vmatprep.subr.mxu0 %v542_v43  ;;  %v5676_v42 = vld [vmem:[#allocation3 + $0xe8] sm:$0xff]  ;;  %v5682_v43 = vld [vmem:[#allocation3 + $0xf0] sm:$0xff] }
  0xe2   : > { %4754 = vmatprep.subr.mxu1 %v574_v44  ;;  %4391 = vmatmul.mubr.f32.gmra.mxu0 %v5514_v40  ;;  %v5688_v44 = vld [vmem:[#allocation3 + $0xf8] sm:$0xff] }
  0xe3   : > { %4523 = vmatmul.mubr.f32.gmra.mxu1 %v5514_v40  ;;  %4392 = vmatprep.mubr.f32.mxu0 %v5524_v45 }
  0xe4   : > { %4524 = vmatprep.mubr.f32.mxu1 %v5524_v45  ;;  %4623 = vmatpush3.xpose.msra.mxu0 %v526_v46  ;;  %v5694_v46 = vld [vmem:[#allocation3 + $0x100] sm:$0xff] }
  0xe5   : > { %4755 = vmatpush3.xpose.msra.mxu1 %v558_v47  ;;  %4624 = vmatprep.subr.mxu0 %v541_v48  ;;  %v5700_v47 = vld [vmem:[#allocation3 + $0x108] sm:$0xff]  ;;  %v5706_v48 = vld [vmem:[#allocation3 + $0x110] sm:$0xff] }
  0xe6   : > { %4756 = vmatprep.subr.mxu1 %v573_v49  ;;  %4393 = vmatmul.mubr.f32.gmra.mxu0 %v5524_v45  ;;  %v5712_v49 = vld [vmem:[#allocation3 + $0x118] sm:$0xff] }
  0xe7   : > { %4525 = vmatmul.mubr.f32.gmra.mxu1 %v5524_v45  ;;  %4394 = vmatprep.mubr.f32.mxu0 %v5534_v50 }
  0xe8   : > { %4526 = vmatprep.mubr.f32.mxu1 %v5534_v50  ;;  %4625 = vmatpush3.xpose.msra.mxu0 %v525_v51  ;;  %v5718_v51 = vld [vmem:[#allocation3 + $0x120] sm:$0xff] }
  0xe9   : > { %4757 = vmatpush3.xpose.msra.mxu1 %v557_v52  ;;  %4626 = vmatprep.subr.mxu0 %v540_v53  ;;  %v5724_v52 = vld [vmem:[#allocation3 + $0x128] sm:$0xff]  ;;  %v5730_v53 = vld [vmem:[#allocation3 + $0x130] sm:$0xff] }
  0xea   : > { %4758 = vmatprep.subr.mxu1 %v572_v54  ;;  %4395 = vmatmul.mubr.f32.gmra.mxu0 %v5534_v50  ;;  %v5736_v54 = vld [vmem:[#allocation3 + $0x138] sm:$0xff] }
  0xeb   : > { %4527 = vmatmul.mubr.f32.gmra.mxu1 %v5534_v50  ;;  %4396 = vmatprep.mubr.f32.mxu0 %v5544_v55 }
  0xec   : > { %4528 = vmatprep.mubr.f32.mxu1 %v5544_v55  ;;  %4627 = vmatpush3.xpose.msra.mxu0 %v524_v56  ;;  %v5742_v56 = vld [vmem:[#allocation3 + $0x140] sm:$0xff] }
  0xed   : > { %4759 = vmatpush3.xpose.msra.mxu1 %v556_v57  ;;  %4628 = vmatprep.subr.mxu0 %v539_v58  ;;  %v5748_v57 = vld [vmem:[#allocation3 + $0x148] sm:$0xff]  ;;  %v447_v58 = vld [vmem:[#allocation3 + $0x150] sm:$0xff] }
  0xee   : > { %4760 = vmatprep.subr.mxu1 %v571_v59  ;;  %4397 = vmatmul.mubr.f32.gmra.mxu0 %v5544_v55  ;;  %v448_v59 = vld [vmem:[#allocation3 + $0x158] sm:$0xff] }
  0xef   : > { %4529 = vmatmul.mubr.f32.gmra.mxu1 %v5544_v55  ;;  %4398 = vmatprep.mubr.f32.mxu0 %v5554_v60 }
  0xf0   : > { %4530 = vmatprep.mubr.f32.mxu1 %v5554_v60  ;;  %4629 = vmatpush3.xpose.msra.mxu0 %v523_v61  ;;  %v449_v61 = vld [vmem:[#allocation3 + $0x160] sm:$0xff] }
  0xf1   : > { %4761 = vmatpush3.xpose.msra.mxu1 %v555_v62  ;;  %4630 = vmatprep.subr.mxu0 %v538_v63  ;;  %v450_v62 = vld [vmem:[#allocation3 + $0x168] sm:$0xff]  ;;  %v451_v63 = vld [vmem:[#allocation3 + $0x170] sm:$0xff] }
  0xf2   : > { %4762 = vmatprep.subr.mxu1 %v570_v0  ;;  %4399 = vmatmul.mubr.f32.gmra.mxu0 %v5554_v60  ;;  %v452_v0 = vld [vmem:[#allocation3 + $0x178] sm:$0xff] }
  0xf3   : > { %4531 = vmatmul.mubr.f32.gmra.mxu1 %v5554_v60  ;;  %4400 = vmatprep.mubr.f32.mxu0 %v5564_v1 }
  0xf4   : > { %4532 = vmatprep.mubr.f32.mxu1 %v5564_v1  ;;  %4631 = vmatpush3.xpose.msra.mxu0 %v522_v2  ;;  %v453_v2 = vld [vmem:[#allocation3 + $0x180] sm:$0xff] }
  0xf5   : > { %4763 = vmatpush3.xpose.msra.mxu1 %v554_v3  ;;  %4632 = vmatprep.subr.mxu0 %v537_v4  ;;  %v454_v3 = vld [vmem:[#allocation3 + $0x188] sm:$0xff] }
  0xf6   : > { %4764 = vmatprep.subr.mxu1 %v569_v6  ;;  %4401 = vmatmul.mubr.f32.gmra.mxu0 %v5564_v1 }
  0xf7   : > { %4533 = vmatmul.mubr.f32.gmra.mxu1 %v5564_v1  ;;  %4402 = vmatprep.mubr.f32.mxu0 %v5574_v7 }
  0xf8   : > { %4534 = vmatprep.mubr.f32.mxu1 %v5574_v7  ;;  %4633 = vmatpush3.xpose.msra.mxu0 %v521_v8 }
  0xf9   : > { %4765 = vmatpush3.xpose.msra.mxu1 %v553_v10  ;;  %4634 = vmatprep.subr.mxu0 %v536_v11 }
  0xfa   : > { %4766 = vmatprep.subr.mxu1 %v568_v12  ;;  %4403 = vmatmul.mubr.f32.gmra.mxu0 %v5574_v7 }
  0xfb   : > { %4535 = vmatmul.mubr.f32.gmra.mxu1 %v5574_v7  ;;  %4404 = vmatprep.mubr.f32.mxu0 %v5584_v13 }
  0xfc   : > { %4536 = vmatprep.mubr.f32.mxu1 %v5584_v13  ;;  %4635 = vmatpush3.xpose.msra.mxu0 %v520_v15 }
  0xfd   : > { %4767 = vmatpush3.xpose.msra.mxu1 %v552_v16  ;;  %4636 = vmatprep.subr.mxu0 %v535_v18  ;;  %v2655_v18 = vld [vmem:[%s5367_s25 + $0x3c0] sm:$0xff] }
  0xfe   : > { %4405 = vmatmul.mubr.f32.gmra.mxu0 %v5584_v13  ;;  %4768 = vmatprep.subr.mxu1 %v567_v21 }
  0xff   : > { %4537 = vmatmul.mubr.f32.gmra.mxu1 %v5584_v13  ;;  %4406 = vmatprep.mubr.f32.mxu0 %v5592_v17 }
 0x100   : > { %4538 = vmatprep.mubr.f32.mxu1 %v5592_v17  ;;  %4637 = vmatpush3.xpose.msra.mxu0 %v519_v20  ;;  %v2657_v20 = vld [vmem:[%s5367_s25 + $0x3d0] sm:$0xff] }
 0x101   : > { %4769 = vmatpush3.xpose.msra.mxu1 %v551_v22  ;;  %2663 = vmatprep.subr.mxu0 %v2656_v29  ;;  %v2648_v29 = vld [vmem:[%s5367_s25 + $0x388] sm:$0xff] }
 0x102   : > { %4407 = vmatmul.mubr.f32.gmra.mxu0 %v5592_v17  ;;  %2978 = vmatprep.subr.mxu1 %v2658_v31  ;;  %v2650_v31 = vld [vmem:[%s5367_s25 + $0x398] sm:$0xff] }
 0x103   : > { %4539 = vmatmul.mubr.f32.gmra.mxu1 %v5592_v17  ;;  %4408 = vmatprep.mubr.f32.mxu0 %v5602_v23 }
 0x104   : > { %4540 = vmatprep.mubr.f32.mxu1 %v5602_v23 }
 0x106   : > { %4409 = vmatmul.mubr.f32.gmra.mxu0 %v5602_v23 }
 0x107   : > { %4541 = vmatmul.mubr.f32.gmra.mxu1 %v5602_v23  ;;  %4410 = vmatprep.mubr.f32.mxu0 %v5608_v25 }
 0x108   : > { %4542 = vmatprep.mubr.f32.mxu1 %v5608_v25 }
 0x10a   : > { %4411 = vmatmul.mubr.f32.gmra.mxu0 %v5608_v25 }
 0x10b   : > { %4543 = vmatmul.mubr.f32.gmra.mxu1 %v5608_v25  ;;  %4412 = vmatprep.mubr.f32.mxu0 %v5614_v26 }
 0x10c   : > { %4544 = vmatprep.mubr.f32.mxu1 %v5614_v26 }
 0x10e   : > { %4413 = vmatmul.mubr.f32.gmra.mxu0 %v5614_v26 }
 0x10f   : > { %4545 = vmatmul.mubr.f32.gmra.mxu1 %v5614_v26  ;;  %4414 = vmatprep.mubr.f32.mxu0 %v5620_v28 }
 0x110   : > { %4546 = vmatprep.mubr.f32.mxu1 %v5620_v28 }
 0x112   : > { %4415 = vmatmul.mubr.f32.gmra.mxu0 %v5620_v28 }
 0x113   : > { %4547 = vmatmul.mubr.f32.gmra.mxu1 %v5620_v28  ;;  %4416 = vmatprep.mubr.f32.mxu0 %v5628_v32 }
 0x114   : > { %4548 = vmatprep.mubr.f32.mxu1 %v5628_v32 }
 0x116   : > { %4417 = vmatmul.mubr.f32.gmra.mxu0 %v5628_v32 }
 0x117   : > { %4549 = vmatmul.mubr.f32.gmra.mxu1 %v5628_v32  ;;  %4418 = vmatprep.mubr.f32.mxu0 %v5634_v33 }
 0x118   : > { %4550 = vmatprep.mubr.f32.mxu1 %v5634_v33 }
 0x11a   : > { %4419 = vmatmul.mubr.f32.gmra.mxu0 %v5634_v33 }
 0x11b   : > { %4551 = vmatmul.mubr.f32.gmra.mxu1 %v5634_v33  ;;  %4420 = vmatprep.mubr.f32.mxu0 %v5640_v34 }
 0x11c   : > { %4552 = vmatprep.mubr.f32.mxu1 %v5640_v34 }
 0x11e   : > { %4421 = vmatmul.mubr.f32.gmra.mxu0 %v5640_v34 }
 0x11f   : > { %4553 = vmatmul.mubr.f32.gmra.mxu1 %v5640_v34  ;;  %4422 = vmatprep.mubr.f32.mxu0 %v5646_v36 }
 0x120   : > { %4554 = vmatprep.mubr.f32.mxu1 %v5646_v36 }
 0x122   : > { %4423 = vmatmul.mubr.f32.gmra.mxu0 %v5646_v36 }
 0x123   : > { %4555 = vmatmul.mubr.f32.gmra.mxu1 %v5646_v36  ;;  %4424 = vmatprep.mubr.f32.mxu0 %v5652_v37 }
 0x124   : > { %4556 = vmatprep.mubr.f32.mxu1 %v5652_v37 }
 0x126   : > { %4425 = vmatmul.mubr.f32.gmra.mxu0 %v5652_v37 }
 0x127   : > { %4557 = vmatmul.mubr.f32.gmra.mxu1 %v5652_v37  ;;  %4426 = vmatprep.mubr.f32.mxu0 %v5658_v38 }
 0x128   : > { %4558 = vmatprep.mubr.f32.mxu1 %v5658_v38 }
 0x12a   : > { %4427 = vmatmul.mubr.f32.gmra.mxu0 %v5658_v38 }
 0x12b   : > { %4559 = vmatmul.mubr.f32.gmra.mxu1 %v5658_v38  ;;  %4428 = vmatprep.mubr.f32.mxu0 %v5664_v39 }
 0x12c   : > { %4560 = vmatprep.mubr.f32.mxu1 %v5664_v39 }
 0x12e   : > { %4429 = vmatmul.mubr.f32.gmra.mxu0 %v5664_v39 }
 0x12f   : > { %4561 = vmatmul.mubr.f32.gmra.mxu1 %v5664_v39  ;;  %4430 = vmatprep.mubr.f32.mxu0 %v5670_v41 }
 0x130   : > { %4562 = vmatprep.mubr.f32.mxu1 %v5670_v41 }
 0x132   : > { %4431 = vmatmul.mubr.f32.gmra.mxu0 %v5670_v41 }
 0x133   : > { %4563 = vmatmul.mubr.f32.gmra.mxu1 %v5670_v41  ;;  %4432 = vmatprep.mubr.f32.mxu0 %v5676_v42 }
 0x134   : > { %4564 = vmatprep.mubr.f32.mxu1 %v5676_v42 }
 0x136   : > { %4433 = vmatmul.mubr.f32.gmra.mxu0 %v5676_v42 }
 0x137   : > { %4565 = vmatmul.mubr.f32.gmra.mxu1 %v5676_v42  ;;  %4434 = vmatprep.mubr.f32.mxu0 %v5682_v43 }
 0x138   : > { %4566 = vmatprep.mubr.f32.mxu1 %v5682_v43 }
 0x13a   : > { %4435 = vmatmul.mubr.f32.gmra.mxu0 %v5682_v43 }
 0x13b   : > { %4567 = vmatmul.mubr.f32.gmra.mxu1 %v5682_v43  ;;  %4436 = vmatprep.mubr.f32.mxu0 %v5688_v44 }
 0x13c   : > { %4568 = vmatprep.mubr.f32.mxu1 %v5688_v44 }
 0x13e   : > { %4437 = vmatmul.mubr.f32.gmra.mxu0 %v5688_v44 }
 0x13f   : > { %4569 = vmatmul.mubr.f32.gmra.mxu1 %v5688_v44  ;;  %4438 = vmatprep.mubr.f32.mxu0 %v5694_v46 }
 0x140   : > { %4570 = vmatprep.mubr.f32.mxu1 %v5694_v46 }
 0x142   : > { %4439 = vmatmul.mubr.f32.gmra.mxu0 %v5694_v46 }
 0x143   : > { %4571 = vmatmul.mubr.f32.gmra.mxu1 %v5694_v46  ;;  %4440 = vmatprep.mubr.f32.mxu0 %v5700_v47 }
 0x144   : > { %4572 = vmatprep.mubr.f32.mxu1 %v5700_v47 }
 0x146   : > { %4441 = vmatmul.mubr.f32.gmra.mxu0 %v5700_v47 }
 0x147   : > { %4573 = vmatmul.mubr.f32.gmra.mxu1 %v5700_v47  ;;  %4442 = vmatprep.mubr.f32.mxu0 %v5706_v48 }
 0x148   : > { %4574 = vmatprep.mubr.f32.mxu1 %v5706_v48 }
 0x14a   : > { %4443 = vmatmul.mubr.f32.gmra.mxu0 %v5706_v48 }
 0x14b   : > { %4575 = vmatmul.mubr.f32.gmra.mxu1 %v5706_v48  ;;  %4444 = vmatprep.mubr.f32.mxu0 %v5712_v49 }
 0x14c   : > { %4576 = vmatprep.mubr.f32.mxu1 %v5712_v49 }
 0x14e   : > { %4445 = vmatmul.mubr.f32.gmra.mxu0 %v5712_v49 }
 0x14f   : > { %4577 = vmatmul.mubr.f32.gmra.mxu1 %v5712_v49  ;;  %4446 = vmatprep.mubr.f32.mxu0 %v5718_v51 }
 0x150   : > { %4578 = vmatprep.mubr.f32.mxu1 %v5718_v51 }
 0x152   : > { %4447 = vmatmul.mubr.f32.gmra.mxu0 %v5718_v51 }
 0x153   : > { %4579 = vmatmul.mubr.f32.gmra.mxu1 %v5718_v51  ;;  %4448 = vmatprep.mubr.f32.mxu0 %v5724_v52 }
 0x154   : > { %4580 = vmatprep.mubr.f32.mxu1 %v5724_v52 }
 0x156   : > { %4449 = vmatmul.mubr.f32.gmra.mxu0 %v5724_v52 }
 0x157   : > { %4581 = vmatmul.mubr.f32.gmra.mxu1 %v5724_v52  ;;  %4450 = vmatprep.mubr.f32.mxu0 %v5730_v53 }
 0x158   : > { %4582 = vmatprep.mubr.f32.mxu1 %v5730_v53 }
 0x15a   : > { %4451 = vmatmul.mubr.f32.gmra.mxu0 %v5730_v53 }
 0x15b   : > { %4583 = vmatmul.mubr.f32.gmra.mxu1 %v5730_v53  ;;  %4452 = vmatprep.mubr.f32.mxu0 %v5736_v54 }
 0x15c   : > { %4584 = vmatprep.mubr.f32.mxu1 %v5736_v54 }
 0x15e   : > { %4453 = vmatmul.mubr.f32.gmra.mxu0 %v5736_v54 }
 0x15f   : > { %4585 = vmatmul.mubr.f32.gmra.mxu1 %v5736_v54  ;;  %4454 = vmatprep.mubr.f32.mxu0 %v5742_v56 }
 0x160   : > { %4586 = vmatprep.mubr.f32.mxu1 %v5742_v56 }
 0x162   : > { %4455 = vmatmul.mubr.f32.gmra.mxu0 %v5742_v56 }
 0x163   : > { %4587 = vmatmul.mubr.f32.gmra.mxu1 %v5742_v56  ;;  %4456 = vmatprep.mubr.f32.mxu0 %v5748_v57 }
 0x164   : > { %4588 = vmatprep.mubr.f32.mxu1 %v5748_v57 }
 0x166   : > { %4457 = vmatmul.mubr.f32.gmra.mxu0 %v5748_v57 }
 0x167   : > { %4589 = vmatmul.mubr.f32.gmra.mxu1 %v5748_v57  ;;  %4458 = vmatprep.mubr.f32.mxu0 %v447_v58 }
 0x168   : > { %4590 = vmatprep.mubr.f32.mxu1 %v447_v58 }
 0x16a   : > { %4459 = vmatmul.mubr.f32.gmra.mxu0 %v447_v58 }
 0x16b   : > { %4591 = vmatmul.mubr.f32.gmra.mxu1 %v447_v58  ;;  %4460 = vmatprep.mubr.f32.mxu0 %v448_v59 }
 0x16c   : > { %4592 = vmatprep.mubr.f32.mxu1 %v448_v59 }
 0x16e   : > { %4461 = vmatmul.mubr.f32.gmra.mxu0 %v448_v59 }
 0x16f   : > { %4593 = vmatmul.mubr.f32.gmra.mxu1 %v448_v59  ;;  %4462 = vmatprep.mubr.f32.mxu0 %v449_v61 }
 0x170   : > { %4594 = vmatprep.mubr.f32.mxu1 %v449_v61 }
 0x172   : > { %4463 = vmatmul.mubr.f32.gmra.mxu0 %v449_v61 }
 0x173   : > { %4595 = vmatmul.mubr.f32.gmra.mxu1 %v449_v61  ;;  %4464 = vmatprep.mubr.f32.mxu0 %v450_v62  ;;  %v2647_v61 = vld [vmem:[%s5367_s25 + $0x380] sm:$0xff] }
 0x174   : > { %4596 = vmatprep.mubr.f32.mxu1 %v450_v62 }
 0x176   : > { %4465 = vmatmul.mubr.f32.gmra.mxu0 %v450_v62 }
 0x177   : > { %4597 = vmatmul.mubr.f32.gmra.mxu1 %v450_v62  ;;  %4466 = vmatprep.mubr.f32.mxu0 %v451_v63  ;;  %v2649_v62 = vld [vmem:[%s5367_s25 + $0x390] sm:$0xff] }
 0x178   : > { %4598 = vmatprep.mubr.f32.mxu1 %v451_v63 }
 0x17a   : > { %4467 = vmatmul.mubr.f32.gmra.mxu0 %v451_v63 }
 0x17b   : > { %4599 = vmatmul.mubr.f32.gmra.mxu1 %v451_v63  ;;  %4468 = vmatprep.mubr.f32.mxu0 %v452_v0 }
 0x17c   : > { %4600 = vmatprep.mubr.f32.mxu1 %v452_v0 }
 0x17e   : > { %4469 = vmatmul.mubr.f32.gmra.mxu0 %v452_v0 }
 0x17f   : > { %4601 = vmatmul.mubr.f32.gmra.mxu1 %v452_v0  ;;  %4470 = vmatprep.mubr.f32.mxu0 %v453_v2  ;;  %v2640_v0 = vld [vmem:[%s5367_s25 + $0x348] sm:$0xff] }
 0x180   : > { %4602 = vmatprep.mubr.f32.mxu1 %v453_v2 }
 0x182   : > { %v5756_v4 = vpop.f32.mrf.mxu0  ;;  %4471 = vmatmul.mubr.f32.gmra.mxu0 %v453_v2 }
 0x183   : > { %v5758_v6 = vpop.f32.mrf.mxu1  ;;  %4603 = vmatmul.mubr.f32.gmra.mxu1 %v453_v2  ;;  %4472 = vmatprep.mubr.f32.mxu0 %v454_v3  ;;  %v2642_v2 = vld [vmem:[%s5367_s25 + $0x358] sm:$0xff] }
 0x184   : > { %4604 = vmatprep.mubr.f32.mxu1 %v454_v3  ;;  %v5760_v8 = vpop.f32.mrf.mxu0 }
 0x185   : > { %v5762_v10 = vpop.f32.mrf.mxu1 }
 0x186   : > { %v5764_v11 = vpop.f32.mrf.mxu0  ;;  %4473 = vmatmul.mubr.f32.gmra.mxu0 %v454_v3 }
 0x187   : > { %v5766_v12 = vpop.f32.mrf.mxu1  ;;  %4605 = vmatmul.mubr.f32.gmra.mxu1 %v454_v3  ;;  %4638 = vmatprep.mubr.f32.mxu0 %v5400_v27 }
 0x188   : > { %4770 = vmatprep.mubr.f32.mxu1 %v5400_v27  ;;  %v5770_v15 = vpop.f32.mrf.mxu0 }
 0x189   : > { %v5772_v16 = vpop.f32.mrf.mxu1 }
 0x18a   : > { %v5776_v21 = vpop.f32.mrf.mxu0  ;;  %4639 = vmatmul.mubr.f32.vlgmr.msra.gmra.mxu0 %v5400_v27 }
 0x18b   : > { %v5778_v22 = vpop.f32.mrf.mxu1  ;;  %4771 = vmatmul.mubr.f32.vlgmr.msra.gmra.mxu1 %v5400_v27  ;;  %2664 = vmatpush1.xpose.msra.mxu0 %v2655_v18 }
 0x18c   : > { %4640 = vmatprep.mubr.f32.mxu0 %v5445_v5  ;;  %v5785_v58 = vpop.f32.mrf.mxu0  ;;  %4772 = vmatprep.mubr.f32.mxu1 %v5445_v5 }
 0x18d   : > { %v5787_v59 = vpop.f32.mrf.mxu1  ;;  %2979 = vmatpush1.xpose.msra.mxu1 %v2657_v20  ;;  %2665 = vmatprep.subr.mxu0 %v2648_v29  ;;  %v2639_v20 = vld [vmem:[%s5367_s25 + $0x340] sm:$0xff]  ;;  %v2641_v29 = vld [vmem:[%s5367_s25 + $0x350] sm:$0xff] }
 0x18e   : > { %2980 = vmatprep.subr.mxu1 %v2650_v31  ;;  %v5792_v27 = vpop.f32.mrf.mxu0  ;;  %4641 = vmatmul.mubr.f32.gmra.mxu0 %v5445_v5 }
 0x18f   : > { %7934 = vst [vmem:[#allocation16_spill] sm:$0xff] %v5792_v27  ;;  %v5794_v63 = vpop.f32.mrf.mxu1  ;;  %4773 = vmatmul.mubr.f32.gmra.mxu1 %v5445_v5  ;;  %4642 = vmatprep.mubr.f32.mxu0 %v5454_v9  ;;  %v2634_v27 = vld [vmem:[%s5367_s25 + $0x318] sm:$0xff] }
 0x190   : > { %7935 = vst [vmem:[#allocation17_spill] sm:$0xff] %v5794_v63  ;;  %4774 = vmatprep.mubr.f32.mxu1 %v5454_v9  ;;  %v5802_v3 = vpop.f32.mrf.mxu0  ;;  %2666 = vmatpush1.xpose.msra.mxu0 %v2647_v61  ;;  %v2632_v63 = vld [vmem:[%s5367_s25 + $0x308] sm:$0xff] }
 0x191   : > { %v5804_v18 = vpop.f32.mrf.mxu1  ;;  %2981 = vmatpush1.xpose.msra.mxu1 %v2649_v62  ;;  %2667 = vmatprep.subr.mxu0 %v2640_v0  ;;  %v2631_v0 = vld [vmem:[%s5367_s25 + $0x300] sm:$0xff] }
 0x192   : > { %2982 = vmatprep.subr.mxu1 %v2642_v2  ;;  %v5808_v5 = vpop.f32.mrf.mxu0  ;;  %4643 = vmatmul.mubr.f32.gmra.mxu0 %v5454_v9  ;;  %v2633_v2 = vld [vmem:[%s5367_s25 + $0x310] sm:$0xff] }
 0x193   : > { %7936 = vst [vmem:[#allocation18_spill] sm:$0xff] %v5808_v5  ;;  %v5810_v31 = vpop.f32.mrf.mxu1  ;;  %4775 = vmatmul.mubr.f32.gmra.mxu1 %v5454_v9  ;;  %4644 = vmatprep.mubr.f32.mxu0 %v5464_v14  ;;  %v2624_v5 = vld [vmem:[%s5367_s25 + $0x2c8] sm:$0xff] }
 0x194   : > { %7937 = vst [vmem:[#allocation19_spill] sm:$0xff] %v5810_v31  ;;  %4776 = vmatprep.mubr.f32.mxu1 %v5464_v14  ;;  %v5818_v61 = vpop.f32.mrf.mxu0  ;;  %2668 = vmatpush1.xpose.msra.mxu0 %v2639_v20  ;;  %v2623_v20 = vld [vmem:[%s5367_s25 + $0x2c0] sm:$0xff] }
 0x195   : > { %7938 = vst [vmem:[#allocation20_spill] sm:$0xff] %v5818_v61  ;;  %v5820_v62 = vpop.f32.mrf.mxu1  ;;  %2983 = vmatpush1.xpose.msra.mxu1 %v2641_v29  ;;  %2669 = vmatprep.subr.mxu0 %v2632_v63  ;;  %v2626_v61 = vld [vmem:[%s5367_s25 + $0x2d8] sm:$0xff]  ;;  %v2625_v29 = vld [vmem:[%s5367_s25 + $0x2d0] sm:$0xff] }
 0x196   : > { %2984 = vmatprep.subr.mxu1 %v2634_v27  ;;  %v5824_v9 = vpop.f32.mrf.mxu0  ;;  %4645 = vmatmul.mubr.f32.gmra.mxu0 %v5464_v14 }
 0x197   : > { %7939 = vst [vmem:[#allocation21_spill] sm:$0xff] %v5824_v9  ;;  %v5826_v31 = vpop.f32.mrf.mxu1  ;;  %4777 = vmatmul.mubr.f32.gmra.mxu1 %v5464_v14  ;;  %4646 = vmatprep.mubr.f32.mxu0 %v5474_v19  ;;  %v2616_v9 = vld [vmem:[%s5367_s25 + $0x288] sm:$0xff] }
 0x198   : > { %7940 = vst [vmem:[#allocation22_spill] sm:$0xff] %v5826_v31  ;;  %4778 = vmatprep.mubr.f32.mxu1 %v5474_v19  ;;  %v5834_v63 = vpop.f32.mrf.mxu0  ;;  %2670 = vmatpush1.xpose.msra.mxu0 %v2631_v0  ;;  %v2615_v0 = vld [vmem:[%s5367_s25 + $0x280] sm:$0xff] }
 0x199   : > { %7941 = vst [vmem:[#allocation23_spill] sm:$0xff] %v5834_v63  ;;  %v5836_v27 = vpop.f32.mrf.mxu1  ;;  %2985 = vmatpush1.xpose.msra.mxu1 %v2633_v2  ;;  %2671 = vmatprep.subr.mxu0 %v2624_v5  ;;  %v2618_v63 = vld [vmem:[%s5367_s25 + $0x298] sm:$0xff]  ;;  %v2617_v2 = vld [vmem:[%s5367_s25 + $0x290] sm:$0xff] }
 0x19a   : > { %2986 = vmatprep.subr.mxu1 %v2626_v61  ;;  %v5840_v14 = vpop.f32.mrf.mxu0  ;;  %4647 = vmatmul.mubr.f32.gmra.mxu0 %v5474_v19 }
 0x19b   : > { %7942 = vst [vmem:[#allocation24_spill] sm:$0xff] %v5840_v14  ;;  %v5842_v31 = vpop.f32.mrf.mxu1  ;;  %4779 = vmatmul.mubr.f32.gmra.mxu1 %v5474_v19  ;;  %4648 = vmatprep.mubr.f32.mxu0 %v5484_v24  ;;  %v2608_v14 = vld [vmem:[%s5367_s25 + $0x248] sm:$0xff] }
 0x19c   : > { %7943 = vst [vmem:[#allocation25_spill] sm:$0xff] %v5842_v31  ;;  %4780 = vmatprep.mubr.f32.mxu1 %v5484_v24  ;;  %v5850_v5 = vpop.f32.mrf.mxu0  ;;  %2672 = vmatpush1.xpose.msra.mxu0 %v2623_v20  ;;  %v2607_v20 = vld [vmem:[%s5367_s25 + $0x240] sm:$0xff] }
 0x19d   : > { %7944 = vst [vmem:[#allocation26_spill] sm:$0xff] %v5850_v5  ;;  %v5852_v61 = vpop.f32.mrf.mxu1  ;;  %2987 = vmatpush1.xpose.msra.mxu1 %v2625_v29  ;;  %2673 = vmatprep.subr.mxu0 %v2616_v9  ;;  %v2610_v5 = vld [vmem:[%s5367_s25 + $0x258] sm:$0xff]  ;;  %v2609_v29 = vld [vmem:[%s5367_s25 + $0x250] sm:$0xff] }
 0x19e   : > { %2988 = vmatprep.subr.mxu1 %v2618_v63  ;;  %v5856_v19 = vpop.f32.mrf.mxu0  ;;  %4649 = vmatmul.mubr.f32.gmra.mxu0 %v5484_v24 }
 0x19f   : > { %7945 = vst [vmem:[#allocation27_spill] sm:$0xff] %v5856_v19  ;;  %v5858_v31 = vpop.f32.mrf.mxu1  ;;  %4781 = vmatmul.mubr.f32.gmra.mxu1 %v5484_v24  ;;  %4650 = vmatprep.mubr.f32.mxu0 %v5494_v30  ;;  %v2600_v19 = vld [vmem:[%s5367_s25 + $0x208] sm:$0xff] }
 0x1a0   : > { %7946 = vst [vmem:[#allocation28_spill] sm:$0xff] %v5858_v31  ;;  %4782 = vmatprep.mubr.f32.mxu1 %v5494_v30  ;;  %v5866_v9 = vpop.f32.mrf.mxu0  ;;  %2674 = vmatpush1.xpose.msra.mxu0 %v2615_v0  ;;  %v2599_v0 = vld [vmem:[%s5367_s25 + $0x200] sm:$0xff] }
 0x1a1   : > { %7947 = vst [vmem:[#allocation29_spill] sm:$0xff] %v5866_v9  ;;  %v5868_v63 = vpop.f32.mrf.mxu1  ;;  %2989 = vmatpush1.xpose.msra.mxu1 %v2617_v2  ;;  %2675 = vmatprep.subr.mxu0 %v2608_v14  ;;  %v2602_v9 = vld [vmem:[%s5367_s25 + $0x218] sm:$0xff]  ;;  %v2601_v2 = vld [vmem:[%s5367_s25 + $0x210] sm:$0xff] }
 0x1a2   : > { %2990 = vmatprep.subr.mxu1 %v2610_v5  ;;  %v5872_v24 = vpop.f32.mrf.mxu0  ;;  %4651 = vmatmul.mubr.f32.gmra.mxu0 %v5494_v30 }
 0x1a3   : > { %7948 = vst [vmem:[#allocation30_spill] sm:$0xff] %v5872_v24  ;;  %v5874_v31 = vpop.f32.mrf.mxu1  ;;  %4783 = vmatmul.mubr.f32.gmra.mxu1 %v5494_v30  ;;  %4652 = vmatprep.mubr.f32.mxu0 %v5504_v35  ;;  %v2592_v24 = vld [vmem:[%s5367_s25 + $0x1c8] sm:$0xff] }
 0x1a4   : > { %7949 = vst [vmem:[#allocation31_spill] sm:$0xff] %v5874_v31  ;;  %4784 = vmatprep.mubr.f32.mxu1 %v5504_v35  ;;  %v5882_v14 = vpop.f32.mrf.mxu0  ;;  %2676 = vmatpush1.xpose.msra.mxu0 %v2607_v20  ;;  %v2591_v20 = vld [vmem:[%s5367_s25 + $0x1c0] sm:$0xff] }
 0x1a5   : > { %7950 = vst [vmem:[#allocation32_spill] sm:$0xff] %v5882_v14  ;;  %v5884_v5 = vpop.f32.mrf.mxu1  ;;  %2991 = vmatpush1.xpose.msra.mxu1 %v2609_v29  ;;  %2677 = vmatprep.subr.mxu0 %v2600_v19  ;;  %v2594_v14 = vld [vmem:[%s5367_s25 + $0x1d8] sm:$0xff]  ;;  %v2593_v29 = vld [vmem:[%s5367_s25 + $0x1d0] sm:$0xff] }
 0x1a6   : > { %2992 = vmatprep.subr.mxu1 %v2602_v9  ;;  %v5888_v30 = vpop.f32.mrf.mxu0  ;;  %4653 = vmatmul.mubr.f32.gmra.mxu0 %v5504_v35 }
 0x1a7   : > { %7951 = vst [vmem:[#allocation33_spill] sm:$0xff] %v5888_v30  ;;  %v5890_v31 = vpop.f32.mrf.mxu1  ;;  %4785 = vmatmul.mubr.f32.gmra.mxu1 %v5504_v35  ;;  %4654 = vmatprep.mubr.f32.mxu0 %v5514_v40  ;;  %v2584_v30 = vld [vmem:[%s5367_s25 + $0x188] sm:$0xff] }
 0x1a8   : > { %7952 = vst [vmem:[#allocation34_spill] sm:$0xff] %v5890_v31  ;;  %4786 = vmatprep.mubr.f32.mxu1 %v5514_v40  ;;  %v5898_v19 = vpop.f32.mrf.mxu0  ;;  %2678 = vmatpush1.xpose.msra.mxu0 %v2599_v0  ;;  %v2583_v0 = vld [vmem:[%s5367_s25 + $0x180] sm:$0xff] }
 0x1a9   : > { %7953 = vst [vmem:[#allocation35_spill] sm:$0xff] %v5898_v19  ;;  %v5900_v9 = vpop.f32.mrf.mxu1  ;;  %2993 = vmatpush1.xpose.msra.mxu1 %v2601_v2  ;;  %2679 = vmatprep.subr.mxu0 %v2592_v24  ;;  %v2586_v19 = vld [vmem:[%s5367_s25 + $0x198] sm:$0xff]  ;;  %v2585_v2 = vld [vmem:[%s5367_s25 + $0x190] sm:$0xff] }
 0x1aa   : > { %2994 = vmatprep.subr.mxu1 %v2594_v14  ;;  %v5904_v35 = vpop.f32.mrf.mxu0  ;;  %4655 = vmatmul.mubr.f32.gmra.mxu0 %v5514_v40 }
 0x1ab   : > { %7954 = vst [vmem:[#allocation36_spill] sm:$0xff] %v5904_v35  ;;  %v5906_v31 = vpop.f32.mrf.mxu1  ;;  %4787 = vmatmul.mubr.f32.gmra.mxu1 %v5514_v40  ;;  %4656 = vmatprep.mubr.f32.mxu0 %v5524_v45  ;;  %v2576_v35 = vld [vmem:[%s5367_s25 + $0x148] sm:$0xff] }
 0x1ac   : > { %7955 = vst [vmem:[#allocation37_spill] sm:$0xff] %v5906_v31  ;;  %4788 = vmatprep.mubr.f32.mxu1 %v5524_v45  ;;  %v5914_v24 = vpop.f32.mrf.mxu0  ;;  %2680 = vmatpush1.xpose.msra.mxu0 %v2591_v20  ;;  %v2575_v20 = vld [vmem:[%s5367_s25 + $0x140] sm:$0xff] }
 0x1ad   : > { %7956 = vst [vmem:[#allocation38_spill] sm:$0xff] %v5914_v24  ;;  %v5916_v14 = vpop.f32.mrf.mxu1  ;;  %2995 = vmatpush1.xpose.msra.mxu1 %v2593_v29  ;;  %2681 = vmatprep.subr.mxu0 %v2584_v30  ;;  %v2578_v24 = vld [vmem:[%s5367_s25 + $0x158] sm:$0xff]  ;;  %v2577_v29 = vld [vmem:[%s5367_s25 + $0x150] sm:$0xff] }
 0x1ae   : > { %2996 = vmatprep.subr.mxu1 %v2586_v19  ;;  %v5920_v40 = vpop.f32.mrf.mxu0  ;;  %4657 = vmatmul.mubr.f32.gmra.mxu0 %v5524_v45 }
 0x1af   : > { %7957 = vst [vmem:[#allocation39_spill] sm:$0xff] %v5920_v40  ;;  %v5922_v31 = vpop.f32.mrf.mxu1  ;;  %4789 = vmatmul.mubr.f32.gmra.mxu1 %v5524_v45  ;;  %4658 = vmatprep.mubr.f32.mxu0 %v5534_v50  ;;  %v2568_v40 = vld [vmem:[%s5367_s25 + $0x108] sm:$0xff] }
 0x1b0   : > { %7958 = vst [vmem:[#allocation40_spill] sm:$0xff] %v5922_v31  ;;  %4790 = vmatprep.mubr.f32.mxu1 %v5534_v50  ;;  %v5930_v30 = vpop.f32.mrf.mxu0  ;;  %2682 = vmatpush1.xpose.msra.mxu0 %v2583_v0  ;;  %v2567_v0 = vld [vmem:[%s5367_s25 + $0x100] sm:$0xff] }
 0x1b1   : > { %7959 = vst [vmem:[#allocation41_spill] sm:$0xff] %v5930_v30  ;;  %v5932_v19 = vpop.f32.mrf.mxu1  ;;  %2997 = vmatpush1.xpose.msra.mxu1 %v2585_v2  ;;  %2683 = vmatprep.subr.mxu0 %v2576_v35  ;;  %v2570_v30 = vld [vmem:[%s5367_s25 + $0x118] sm:$0xff]  ;;  %v2569_v2 = vld [vmem:[%s5367_s25 + $0x110] sm:$0xff] }
 0x1b2   : > { %2998 = vmatprep.subr.mxu1 %v2578_v24  ;;  %v5936_v45 = vpop.f32.mrf.mxu0  ;;  %4659 = vmatmul.mubr.f32.gmra.mxu0 %v5534_v50 }
 0x1b3   : > { %7960 = vst [vmem:[#allocation42_spill] sm:$0xff] %v5936_v45  ;;  %v5938_v31 = vpop.f32.mrf.mxu1  ;;  %4791 = vmatmul.mubr.f32.gmra.mxu1 %v5534_v50  ;;  %4660 = vmatprep.mubr.f32.mxu0 %v5544_v55  ;;  %v2560_v45 = vld [vmem:[%s5367_s25 + $0xc8] sm:$0xff] }
 0x1b4   : > { %7961 = vst [vmem:[#allocation43_spill] sm:$0xff] %v5938_v31  ;;  %4792 = vmatprep.mubr.f32.mxu1 %v5544_v55  ;;  %v5946_v35 = vpop.f32.mrf.mxu0  ;;  %2684 = vmatpush1.xpose.msra.mxu0 %v2575_v20  ;;  %v2559_v20 = vld [vmem:[%s5367_s25 + $0xc0] sm:$0xff] }
 0x1b5   : > { %7962 = vst [vmem:[#allocation44_spill] sm:$0xff] %v5946_v35  ;;  %v5948_v24 = vpop.f32.mrf.mxu1  ;;  %2999 = vmatpush1.xpose.msra.mxu1 %v2577_v29  ;;  %2685 = vmatprep.subr.mxu0 %v2568_v40  ;;  %v2562_v35 = vld [vmem:[%s5367_s25 + $0xd8] sm:$0xff]  ;;  %v2561_v29 = vld [vmem:[%s5367_s25 + $0xd0] sm:$0xff] }
 0x1b6   : > { %3000 = vmatprep.subr.mxu1 %v2570_v30  ;;  %v5952_v50 = vpop.f32.mrf.mxu0  ;;  %4661 = vmatmul.mubr.f32.gmra.mxu0 %v5544_v55 }
 0x1b7   : > { %7963 = vst [vmem:[#allocation45_spill] sm:$0xff] %v5952_v50  ;;  %v5954_v31 = vpop.f32.mrf.mxu1  ;;  %4793 = vmatmul.mubr.f32.gmra.mxu1 %v5544_v55  ;;  %4662 = vmatprep.mubr.f32.mxu0 %v5554_v60  ;;  %v2552_v50 = vld [vmem:[%s5367_s25 + $0x88] sm:$0xff] }
 0x1b8   : > { %7964 = vst [vmem:[#allocation46_spill] sm:$0xff] %v5954_v31  ;;  %4794 = vmatprep.mubr.f32.mxu1 %v5554_v60  ;;  %v5962_v40 = vpop.f32.mrf.mxu0  ;;  %2686 = vmatpush1.xpose.msra.mxu0 %v2567_v0  ;;  %v2551_v0 = vld [vmem:[%s5367_s25 + $0x80] sm:$0xff] }
 0x1b9   : > { %7965 = vst [vmem:[#allocation47_spill] sm:$0xff] %v5962_v40  ;;  %v5964_v30 = vpop.f32.mrf.mxu1  ;;  %3001 = vmatpush1.xpose.msra.mxu1 %v2569_v2  ;;  %2687 = vmatprep.subr.mxu0 %v2560_v45  ;;  %v2554_v40 = vld [vmem:[%s5367_s25 + $0x98] sm:$0xff]  ;;  %v2553_v2 = vld [vmem:[%s5367_s25 + $0x90] sm:$0xff] }
 0x1ba   : > { %3002 = vmatprep.subr.mxu1 %v2562_v35  ;;  %v5968_v55 = vpop.f32.mrf.mxu0  ;;  %4663 = vmatmul.mubr.f32.gmra.mxu0 %v5554_v60 }
 0x1bb   : > { %7966 = vst [vmem:[#allocation48_spill] sm:$0xff] %v5968_v55  ;;  %v5970_v31 = vpop.f32.mrf.mxu1  ;;  %4795 = vmatmul.mubr.f32.gmra.mxu1 %v5554_v60  ;;  %4664 = vmatprep.mubr.f32.mxu0 %v5564_v1  ;;  %v2544_v55 = vld [vmem:[%s5367_s25 + $0x48] sm:$0xff] }
 0x1bc   : > { %7967 = vst [vmem:[#allocation49_spill] sm:$0xff] %v5970_v31  ;;  %4796 = vmatprep.mubr.f32.mxu1 %v5564_v1  ;;  %v5978_v45 = vpop.f32.mrf.mxu0  ;;  %2688 = vmatpush1.xpose.msra.mxu0 %v2559_v20 }
 0x1bd   : > { %7968 = vst [vmem:[#allocation50_spill] sm:$0xff] %v5978_v45  ;;  %v5980_v35 = vpop.f32.mrf.mxu1  ;;  %3003 = vmatpush1.xpose.msra.mxu1 %v2561_v29  ;;  %2689 = vmatprep.subr.mxu0 %v2552_v50  ;;  %v2546_v45 = vld [vmem:[%s5367_s25 + $0x58] sm:$0xff]  ;;  %v2545_v29 = vld [vmem:[%s5367_s25 + $0x50] sm:$0xff] }
 0x1be   : > { %3004 = vmatprep.subr.mxu1 %v2554_v40  ;;  %v5984_v60 = vpop.f32.mrf.mxu0  ;;  %4665 = vmatmul.mubr.f32.gmra.mxu0 %v5564_v1  ;;  %v2543_v40 = vld [vmem:[%s5367_s25 + $0x40] sm:$0xff] }
 0x1bf   : > { %7969 = vst [vmem:[#allocation51_spill] sm:$0xff] %v5984_v60  ;;  %v5986_v31 = vpop.f32.mrf.mxu1  ;;  %4797 = vmatmul.mubr.f32.gmra.mxu1 %v5564_v1  ;;  %4666 = vmatprep.mubr.f32.mxu0 %v5574_v7 }
 0x1c0   : > { %7970 = vst [vmem:[#allocation52_spill] sm:$0xff] %v5986_v31  ;;  %4798 = vmatprep.mubr.f32.mxu1 %v5574_v7  ;;  %v5994_v50 = vpop.f32.mrf.mxu0  ;;  %2690 = vmatpush1.xpose.msra.mxu0 %v2551_v0 }
 0x1c1   : > { %v5996_v20 = vpop.f32.mrf.mxu1  ;;  %3005 = vmatpush1.xpose.msra.mxu1 %v2553_v2  ;;  %2691 = vmatprep.subr.mxu0 %v2544_v55 }
 0x1c2   : > { %3006 = vmatprep.subr.mxu1 %v2546_v45  ;;  %v6000_v31 = vpop.f32.mrf.mxu0  ;;  %4667 = vmatmul.mubr.f32.gmra.mxu0 %v5574_v7 }
 0x1c3   : > { %7971 = vst [vmem:[#allocation53_spill] sm:$0xff] %v6000_v31  ;;  %v6002_v60 = vpop.f32.mrf.mxu1  ;;  %4799 = vmatmul.mubr.f32.gmra.mxu1 %v5574_v7  ;;  %4668 = vmatprep.mubr.f32.mxu0 %v5584_v13 }
 0x1c4   : > { %7972 = vst [vmem:[#allocation54_spill] sm:$0xff] %v6002_v60  ;;  %4800 = vmatprep.mubr.f32.mxu1 %v5584_v13  ;;  %v6008_v1 = vpop.f32.mrf.mxu0  ;;  %2692 = vmatpush1.xpose.msra.mxu0 %v2543_v40  ;;  %v2536_v40 = vld [vmem:[%s5367_s25 + $0x8] sm:$0xff]  ;;  %v2537_v60 = vld [vmem:[%s5367_s25 + $0x10] sm:$0xff] }
 0x1c5   : > { %v6010_v0 = vpop.f32.mrf.mxu1  ;;  %3007 = vmatpush1.xpose.msra.mxu1 %v2545_v29  ;;  %2693 = vmatprep.subr.mxu0 %v2536_v40 }
 0x1c6   : > { %v6012_v55 = vpop.f32.mrf.mxu0  ;;  %4669 = vmatmul.mubr.f32.gmra.mxu0 %v5584_v13 }
 0x1c7   : > { %7973 = vst [vmem:[#allocation55_spill] sm:$0xff] %v6012_v55  ;;  %v6014_v45 = vpop.f32.mrf.mxu1  ;;  %4801 = vmatmul.mubr.f32.gmra.mxu1 %v5584_v13  ;;  %4670 = vmatprep.mubr.f32.mxu0 %v5592_v17  ;;  %v2538_v13 = vld [vmem:[%s5367_s25 + $0x18] sm:$0xff] }
 0x1c8   : > { %7974 = vst [vmem:[#allocation56_spill] sm:$0xff] %v6014_v45  ;;  %4802 = vmatprep.mubr.f32.mxu1 %v5592_v17  ;;  %v6020_v7 = vpop.f32.mrf.mxu0  ;;  %v2535_v45 = vld [vmem:[%s5367_s25] sm:$0xff]  ;;  %3008 = vmatprep.subr.mxu1 %v2538_v13  ;;  %v2660_v13 = vld [vmem:[%s5367_s25 + $0x3e8] sm:$0xff] }
 0x1c9   : > { %7975 = vst [vmem:[#allocation57_spill] sm:$0xff] %v6020_v7  ;;  %v6022_v2 = vpop.f32.mrf.mxu1  ;;  %2694 = vmatpush1.xpose.msra.mxu0 %v2535_v45  ;;  %3009 = vmatpush1.xpose.msra.mxu1 %v2537_v60 }
 0x1ca   : > { %v6025_v29 = vpop.f32.mrf.mxu0  ;;  %4671 = vmatmul.mubr.f32.gmra.mxu0 %v5592_v17  ;;  %3293 = vmatprep.subr.mxu0 %v2660_v13 }
 0x1cb   : > { %7976 = vst [vmem:[#allocation58_spill] sm:$0xff] %v6025_v29  ;;  %v6027_v55 = vpop.f32.mrf.mxu1  ;;  %4803 = vmatmul.mubr.f32.gmra.mxu1 %v5592_v17  ;;  %4672 = vmatprep.mubr.f32.mxu0 %v5602_v23 }
 0x1cc   : > { %7977 = vst [vmem:[#allocation59_spill] sm:$0xff] %v6027_v55  ;;  %4804 = vmatprep.mubr.f32.mxu1 %v5602_v23  ;;  %v6036_v31 = vpop.f32.mrf.mxu0 }
 0x1cd   : > { %v6038_v7 = vpop.f32.mrf.mxu1 }
 0x1ce   : > { %7978 = vst [vmem:[#allocation60_spill] sm:$0xff] %v6038_v7  ;;  %v6040_v55 = vpop.f32.mrf.mxu0  ;;  %4673 = vmatmul.mubr.f32.gmra.mxu0 %v5602_v23 }
 0x1cf   : > { %7979 = vst [vmem:[#allocation61_spill] sm:$0xff] %v6040_v55  ;;  %v6042_v29 = vpop.f32.mrf.mxu1  ;;  %4805 = vmatmul.mubr.f32.gmra.mxu1 %v5602_v23  ;;  %4674 = vmatprep.mubr.f32.mxu0 %v5608_v25 }
 0x1d0   : > { %7980 = vst [vmem:[#allocation62_spill] sm:$0xff] %v6042_v29  ;;  %4806 = vmatprep.mubr.f32.mxu1 %v5608_v25  ;;  %v6048_v17 = vpop.f32.mrf.mxu0 }
 0x1d1   : > { %v6050_v7 = vpop.f32.mrf.mxu1 }
 0x1d2   : > { %v6052_v45 = vpop.f32.mrf.mxu0  ;;  %4675 = vmatmul.mubr.f32.gmra.mxu0 %v5608_v25 }
 0x1d3   : > { %7981 = vst [vmem:[#allocation63_spill] sm:$0xff] %v6052_v45  ;;  %v6054_v60 = vpop.f32.mrf.mxu1  ;;  %4807 = vmatmul.mubr.f32.gmra.mxu1 %v5608_v25  ;;  %4676 = vmatprep.mubr.f32.mxu0 %v5614_v26  ;;  %v2662_v25 = vld [vmem:[%s5367_s25 + $0x3f8] sm:$0xff] }
 0x1d4   : > { %7982 = vst [vmem:[#allocation64_spill] sm:$0xff] %v6054_v60  ;;  %4808 = vmatprep.mubr.f32.mxu1 %v5614_v26  ;;  %v6060_v23 = vpop.f32.mrf.mxu0  ;;  %3608 = vmatprep.subr.mxu1 %v2662_v25 }
 0x1d5   : > { %v6062_v40 = vpop.f32.mrf.mxu1 }
 0x1d6   : > { %7983 = vst [vmem:[#allocation65_spill] sm:$0xff] %v6062_v40  ;;  %v6065_v29 = vpop.f32.mrf.mxu0  ;;  %4677 = vmatmul.mubr.f32.gmra.mxu0 %v5614_v26 }
 0x1d7   : > { %7984 = vst [vmem:[#allocation66_spill] sm:$0xff] %v6065_v29  ;;  %v6067_v55 = vpop.f32.mrf.mxu1  ;;  %4809 = vmatmul.mubr.f32.gmra.mxu1 %v5614_v26  ;;  %4678 = vmatprep.mubr.f32.mxu0 %v5620_v28 }
 0x1d8   : > { %7985 = vst [vmem:[#allocation67_spill] sm:$0xff] %v6067_v55  ;;  %4810 = vmatprep.mubr.f32.mxu1 %v5620_v28  ;;  %v6074_v60 = vpop.f32.mrf.mxu0 }
 0x1d9   : > { %7986 = vst [vmem:[#allocation68_spill] sm:$0xff] %v6074_v60  ;;  %v6076_v45 = vpop.f32.mrf.mxu1 }
 0x1da   : > { %v6078_v40 = vpop.f32.mrf.mxu0  ;;  %4679 = vmatmul.mubr.f32.gmra.mxu0 %v5620_v28 }
 0x1db   : > { %7987 = vst [vmem:[#allocation69_spill] sm:$0xff] %v6078_v40  ;;  %v6080_v29 = vpop.f32.mrf.mxu1  ;;  %4811 = vmatmul.mubr.f32.gmra.mxu1 %v5620_v28  ;;  %4680 = vmatprep.mubr.f32.mxu0 %v5628_v32 }
 0x1dc   : > { %7988 = vst [vmem:[#allocation70_spill] sm:$0xff] %v6080_v29  ;;  %4812 = vmatprep.mubr.f32.mxu1 %v5628_v32  ;;  %v6086_v26 = vpop.f32.mrf.mxu0 }
 0x1dd   : > { %v6088_v55 = vpop.f32.mrf.mxu1 }
 0x1de   : > { %v6090_v60 = vpop.f32.mrf.mxu0  ;;  %4681 = vmatmul.mubr.f32.gmra.mxu0 %v5628_v32 }
 0x1df   : > { %7989 = vst [vmem:[#allocation71_spill] sm:$0xff] %v6090_v60  ;;  %v6092_v13 = vpop.f32.mrf.mxu1  ;;  %4813 = vmatmul.mubr.f32.gmra.mxu1 %v5628_v32  ;;  %4682 = vmatprep.mubr.f32.mxu0 %v5634_v33 }
 0x1e0   : > { %7990 = vst [vmem:[#allocation72_spill] sm:$0xff] %v6092_v13  ;;  %4814 = vmatprep.mubr.f32.mxu1 %v5634_v33  ;;  %v6098_v28 = vpop.f32.mrf.mxu0 }
 0x1e1   : > { %7991 = vst [vmem:[#allocation73_spill] sm:$0xff] %v6098_v28  ;;  %v6100_v25 = vpop.f32.mrf.mxu1 }
 0x1e2   : > { %v6102_v29 = vpop.f32.mrf.mxu0  ;;  %4683 = vmatmul.mubr.f32.gmra.mxu0 %v5634_v33 }
 0x1e3   : > { %7992 = vst [vmem:[#allocation74_spill] sm:$0xff] %v6102_v29  ;;  %v6104_v40 = vpop.f32.mrf.mxu1  ;;  %4815 = vmatmul.mubr.f32.gmra.mxu1 %v5634_v33  ;;  %4684 = vmatprep.mubr.f32.mxu0 %v5640_v34 }
 0x1e4   : > { %7993 = vst [vmem:[#allocation75_spill] sm:$0xff] %v6104_v40  ;;  %4816 = vmatprep.mubr.f32.mxu1 %v5640_v34  ;;  %v6110_v32 = vpop.f32.mrf.mxu0 }
 0x1e5   : > { %7994 = vst [vmem:[#allocation76_spill] sm:$0xff] %v6110_v32  ;;  %v6112_v13 = vpop.f32.mrf.mxu1 }
 0x1e6   : > { %v6114_v60 = vpop.f32.mrf.mxu0  ;;  %4685 = vmatmul.mubr.f32.gmra.mxu0 %v5640_v34 }
 0x1e7   : > { %7995 = vst [vmem:[#allocation77_spill] sm:$0xff] %v6114_v60  ;;  %v6116_v28 = vpop.f32.mrf.mxu1  ;;  %4817 = vmatmul.mubr.f32.gmra.mxu1 %v5640_v34  ;;  %4686 = vmatprep.mubr.f32.mxu0 %v5646_v36 }
 0x1e8   : > { %7996 = vst [vmem:[#allocation78_spill] sm:$0xff] %v6116_v28  ;;  %4818 = vmatprep.mubr.f32.mxu1 %v5646_v36  ;;  %v6122_v33 = vpop.f32.mrf.mxu0 }
 0x1e9   : > { %7997 = vst [vmem:[#allocation79_spill] sm:$0xff] %v6122_v33  ;;  %v6124_v40 = vpop.f32.mrf.mxu1 }
 0x1ea   : > { %v6126_v29 = vpop.f32.mrf.mxu0  ;;  %4687 = vmatmul.mubr.f32.gmra.mxu0 %v5646_v36 }
 0x1eb   : > { %7998 = vst [vmem:[#allocation80_spill] sm:$0xff] %v6126_v29  ;;  %v6128_v32 = vpop.f32.mrf.mxu1  ;;  %4819 = vmatmul.mubr.f32.gmra.mxu1 %v5646_v36  ;;  %4688 = vmatprep.mubr.f32.mxu0 %v5652_v37 }
 0x1ec   : > { %7999 = vst [vmem:[#allocation81_spill] sm:$0xff] %v6128_v32  ;;  %4820 = vmatprep.mubr.f32.mxu1 %v5652_v37  ;;  %v6134_v34 = vpop.f32.mrf.mxu0 }
 0x1ed   : > { %8000 = vst [vmem:[#allocation82_spill] sm:$0xff] %v6134_v34  ;;  %v6136_v28 = vpop.f32.mrf.mxu1 }
 0x1ee   : > { %v6138_v60 = vpop.f32.mrf.mxu0  ;;  %4689 = vmatmul.mubr.f32.gmra.mxu0 %v5652_v37 }
 0x1ef   : > { %8001 = vst [vmem:[#allocation83_spill] sm:$0xff] %v6138_v60  ;;  %v6140_v33 = vpop.f32.mrf.mxu1  ;;  %4821 = vmatmul.mubr.f32.gmra.mxu1 %v5652_v37  ;;  %4690 = vmatprep.mubr.f32.mxu0 %v5658_v38 }
 0x1f0   : > { %8002 = vst [vmem:[#allocation84_spill] sm:$0xff] %v6140_v33  ;;  %4822 = vmatprep.mubr.f32.mxu1 %v5658_v38  ;;  %v6146_v36 = vpop.f32.mrf.mxu0 }
 0x1f1   : > { %8003 = vst [vmem:[#allocation85_spill] sm:$0xff] %v6146_v36  ;;  %v6148_v32 = vpop.f32.mrf.mxu1 }
 0x1f2   : > { %v6150_v29 = vpop.f32.mrf.mxu0  ;;  %4691 = vmatmul.mubr.f32.gmra.mxu0 %v5658_v38 }
 0x1f3   : > { %8004 = vst [vmem:[#allocation86_spill] sm:$0xff] %v6150_v29  ;;  %v6152_v34 = vpop.f32.mrf.mxu1  ;;  %4823 = vmatmul.mubr.f32.gmra.mxu1 %v5658_v38  ;;  %4692 = vmatprep.mubr.f32.mxu0 %v5664_v39 }
 0x1f4   : > { %8005 = vst [vmem:[#allocation87_spill] sm:$0xff] %v6152_v34  ;;  %4824 = vmatprep.mubr.f32.mxu1 %v5664_v39  ;;  %v6158_v37 = vpop.f32.mrf.mxu0 }
 0x1f5   : > { %8006 = vst [vmem:[#allocation88_spill] sm:$0xff] %v6158_v37  ;;  %v6160_v33 = vpop.f32.mrf.mxu1 }
 0x1f6   : > { %v6162_v60 = vpop.f32.mrf.mxu0  ;;  %4693 = vmatmul.mubr.f32.gmra.mxu0 %v5664_v39 }
 0x1f7   : > { %8007 = vst [vmem:[#allocation89_spill] sm:$0xff] %v6162_v60  ;;  %v6164_v36 = vpop.f32.mrf.mxu1  ;;  %4825 = vmatmul.mubr.f32.gmra.mxu1 %v5664_v39  ;;  %4694 = vmatprep.mubr.f32.mxu0 %v5670_v41 }
 0x1f8   : > { %8008 = vst [vmem:[#allocation90_spill] sm:$0xff] %v6164_v36  ;;  %4826 = vmatprep.mubr.f32.mxu1 %v5670_v41  ;;  %v6170_v38 = vpop.f32.mrf.mxu0 }
 0x1f9   : > { %8009 = vst [vmem:[#allocation91_spill] sm:$0xff] %v6170_v38  ;;  %v6172_v34 = vpop.f32.mrf.mxu1 }
 0x1fa   : > { %v6174_v29 = vpop.f32.mrf.mxu0  ;;  %4695 = vmatmul.mubr.f32.gmra.mxu0 %v5670_v41 }
 0x1fb   : > { %8010 = vst [vmem:[#allocation92_spill] sm:$0xff] %v6174_v29  ;;  %v6176_v37 = vpop.f32.mrf.mxu1  ;;  %4827 = vmatmul.mubr.f32.gmra.mxu1 %v5670_v41  ;;  %4696 = vmatprep.mubr.f32.mxu0 %v5676_v42 }
 0x1fc   : > { %8011 = vst [vmem:[#allocation93_spill] sm:$0xff] %v6176_v37  ;;  %4828 = vmatprep.mubr.f32.mxu1 %v5676_v42  ;;  %v6182_v39 = vpop.f32.mrf.mxu0 }
 0x1fd   : > { %8012 = vst [vmem:[#allocation94_spill] sm:$0xff] %v6182_v39  ;;  %v6184_v36 = vpop.f32.mrf.mxu1 }
 0x1fe   : > { %v6186_v60 = vpop.f32.mrf.mxu0  ;;  %4697 = vmatmul.mubr.f32.gmra.mxu0 %v5676_v42 }
 0x1ff   : > { %8013 = vst [vmem:[#allocation95_spill] sm:$0xff] %v6186_v60  ;;  %v6188_v38 = vpop.f32.mrf.mxu1  ;;  %4829 = vmatmul.mubr.f32.gmra.mxu1 %v5676_v42  ;;  %4698 = vmatprep.mubr.f32.mxu0 %v5682_v43 }
 0x200   : > { %8014 = vst [vmem:[#allocation96_spill] sm:$0xff] %v6188_v38  ;;  %4830 = vmatprep.mubr.f32.mxu1 %v5682_v43  ;;  %v6194_v41 = vpop.f32.mrf.mxu0 }
 0x201   : > { %8015 = vst [vmem:[#allocation97_spill] sm:$0xff] %v6194_v41  ;;  %v6196_v37 = vpop.f32.mrf.mxu1 }
 0x202   : > { %v6198_v29 = vpop.f32.mrf.mxu0  ;;  %4699 = vmatmul.mubr.f32.gmra.mxu0 %v5682_v43 }
 0x203   : > { %8016 = vst [vmem:[#allocation98_spill] sm:$0xff] %v6198_v29  ;;  %v6200_v39 = vpop.f32.mrf.mxu1  ;;  %4831 = vmatmul.mubr.f32.gmra.mxu1 %v5682_v43  ;;  %4700 = vmatprep.mubr.f32.mxu0 %v5688_v44 }
 0x204   : > { %8017 = vst [vmem:[#allocation99_spill] sm:$0xff] %v6200_v39  ;;  %4832 = vmatprep.mubr.f32.mxu1 %v5688_v44  ;;  %v6206_v42 = vpop.f32.mrf.mxu0 }
 0x205   : > { %8018 = vst [vmem:[#allocation100_spill] sm:$0xff] %v6206_v42  ;;  %v6208_v38 = vpop.f32.mrf.mxu1 }
 0x206   : > { %v6210_v60 = vpop.f32.mrf.mxu0  ;;  %4701 = vmatmul.mubr.f32.gmra.mxu0 %v5688_v44 }
 0x207   : > { %8019 = vst [vmem:[#allocation101_spill] sm:$0xff] %v6210_v60  ;;  %v6212_v41 = vpop.f32.mrf.mxu1  ;;  %4833 = vmatmul.mubr.f32.gmra.mxu1 %v5688_v44  ;;  %4702 = vmatprep.mubr.f32.mxu0 %v5694_v46 }
 0x208   : > { %8020 = vst [vmem:[#allocation102_spill] sm:$0xff] %v6212_v41  ;;  %4834 = vmatprep.mubr.f32.mxu1 %v5694_v46  ;;  %v6218_v43 = vpop.f32.mrf.mxu0 }
 0x209   : > { %8021 = vst [vmem:[#allocation103_spill] sm:$0xff] %v6218_v43  ;;  %v6220_v39 = vpop.f32.mrf.mxu1 }
 0x20a   : > { %v6222_v29 = vpop.f32.mrf.mxu0  ;;  %4703 = vmatmul.mubr.f32.gmra.mxu0 %v5694_v46 }
 0x20b   : > { %8022 = vst [vmem:[#allocation104_spill] sm:$0xff] %v6222_v29  ;;  %v6224_v42 = vpop.f32.mrf.mxu1  ;;  %4835 = vmatmul.mubr.f32.gmra.mxu1 %v5694_v46  ;;  %4704 = vmatprep.mubr.f32.mxu0 %v5700_v47 }
 0x20c   : > { %8023 = vst [vmem:[#allocation105_spill] sm:$0xff] %v6224_v42  ;;  %4836 = vmatprep.mubr.f32.mxu1 %v5700_v47  ;;  %v6230_v44 = vpop.f32.mrf.mxu0 }
 0x20d   : > { %8024 = vst [vmem:[#allocation106_spill] sm:$0xff] %v6230_v44  ;;  %v6232_v41 = vpop.f32.mrf.mxu1 }
 0x20e   : > { %v6234_v60 = vpop.f32.mrf.mxu0  ;;  %4705 = vmatmul.mubr.f32.gmra.mxu0 %v5700_v47 }
 0x20f   : > { %8025 = vst [vmem:[#allocation107_spill] sm:$0xff] %v6234_v60  ;;  %v6236_v43 = vpop.f32.mrf.mxu1  ;;  %4837 = vmatmul.mubr.f32.gmra.mxu1 %v5700_v47  ;;  %4706 = vmatprep.mubr.f32.mxu0 %v5706_v48 }
 0x210   : > { %8026 = vst [vmem:[#allocation108_spill] sm:$0xff] %v6236_v43  ;;  %4838 = vmatprep.mubr.f32.mxu1 %v5706_v48  ;;  %v6242_v46 = vpop.f32.mrf.mxu0 }
 0x211   : > { %8027 = vst [vmem:[#allocation109_spill] sm:$0xff] %v6242_v46  ;;  %v6244_v42 = vpop.f32.mrf.mxu1 }
 0x212   : > { %8028 = vst [vmem:[#allocation110_spill] sm:$0xff] %v6244_v42  ;;  %v6246_v29 = vpop.f32.mrf.mxu0  ;;  %4707 = vmatmul.mubr.f32.gmra.mxu0 %v5706_v48 }
 0x213   : > { %8029 = vst [vmem:[#allocation111_spill] sm:$0xff] %v6246_v29  ;;  %v6248_v44 = vpop.f32.mrf.mxu1  ;;  %4839 = vmatmul.mubr.f32.gmra.mxu1 %v5706_v48  ;;  %4708 = vmatprep.mubr.f32.mxu0 %v5712_v49 }
 0x214   : > { %8030 = vst [vmem:[#allocation112_spill] sm:$0xff] %v6248_v44  ;;  %4840 = vmatprep.mubr.f32.mxu1 %v5712_v49  ;;  %v6254_v47 = vpop.f32.mrf.mxu0 }
 0x215   : > { %8031 = vst [vmem:[#allocation113_spill] sm:$0xff] %v6254_v47  ;;  %v6256_v43 = vpop.f32.mrf.mxu1 }
 0x216   : > { %8032 = vst [vmem:[#allocation114_spill] sm:$0xff] %v6256_v43  ;;  %v6258_v60 = vpop.f32.mrf.mxu0  ;;  %4709 = vmatmul.mubr.f32.gmra.mxu0 %v5712_v49 }
 0x217   : > { %8033 = vst [vmem:[#allocation115_spill] sm:$0xff] %v6258_v60  ;;  %v6260_v46 = vpop.f32.mrf.mxu1  ;;  %4841 = vmatmul.mubr.f32.gmra.mxu1 %v5712_v49  ;;  %4710 = vmatprep.mubr.f32.mxu0 %v5718_v51 }
 0x218   : > { %8034 = vst [vmem:[#allocation116_spill] sm:$0xff] %v6260_v46  ;;  %4842 = vmatprep.mubr.f32.mxu1 %v5718_v51  ;;  %v6266_v48 = vpop.f32.mrf.mxu0 }
 0x219   : > { %8035 = vst [vmem:[#allocation117_spill] sm:$0xff] %v6266_v48  ;;  %v6268_v44 = vpop.f32.mrf.mxu1 }
 0x21a   : > { %8036 = vst [vmem:[#allocation118_spill] sm:$0xff] %v6268_v44  ;;  %v6270_v29 = vpop.f32.mrf.mxu0  ;;  %4711 = vmatmul.mubr.f32.gmra.mxu0 %v5718_v51 }
 0x21b   : > { %8037 = vst [vmem:[#allocation119_spill] sm:$0xff] %v6270_v29  ;;  %v6272_v47 = vpop.f32.mrf.mxu1  ;;  %4843 = vmatmul.mubr.f32.gmra.mxu1 %v5718_v51  ;;  %4712 = vmatprep.mubr.f32.mxu0 %v5724_v52 }
 0x21c   : > { %8038 = vst [vmem:[#allocation120_spill] sm:$0xff] %v6272_v47  ;;  %4844 = vmatprep.mubr.f32.mxu1 %v5724_v52  ;;  %v6278_v49 = vpop.f32.mrf.mxu0 }
 0x21d   : > { %8039 = vst [vmem:[#allocation121_spill] sm:$0xff] %v6278_v49  ;;  %v6280_v46 = vpop.f32.mrf.mxu1 }
 0x21e   : > { %8040 = vst [vmem:[#allocation122_spill] sm:$0xff] %v6280_v46  ;;  %v6282_v60 = vpop.f32.mrf.mxu0  ;;  %4713 = vmatmul.mubr.f32.gmra.mxu0 %v5724_v52 }
 0x21f   : > { %8041 = vst [vmem:[#allocation123_spill] sm:$0xff] %v6282_v60  ;;  %v6284_v48 = vpop.f32.mrf.mxu1  ;;  %4845 = vmatmul.mubr.f32.gmra.mxu1 %v5724_v52  ;;  %4714 = vmatprep.mubr.f32.mxu0 %v5730_v53 }
 0x220   : > { %8042 = vst [vmem:[#allocation124_spill] sm:$0xff] %v6284_v48  ;;  %4846 = vmatprep.mubr.f32.mxu1 %v5730_v53  ;;  %v6290_v51 = vpop.f32.mrf.mxu0 }
 0x221   : > { %8043 = vst [vmem:[#allocation125_spill] sm:$0xff] %v6290_v51  ;;  %v6292_v47 = vpop.f32.mrf.mxu1 }
 0x222   : > { %8044 = vst [vmem:[#allocation126_spill] sm:$0xff] %v6292_v47  ;;  %v6294_v29 = vpop.f32.mrf.mxu0  ;;  %4715 = vmatmul.mubr.f32.gmra.mxu0 %v5730_v53 }
 0x223   : > { %8045 = vst [vmem:[#allocation127_spill] sm:$0xff] %v6294_v29  ;;  %v6296_v49 = vpop.f32.mrf.mxu1  ;;  %4847 = vmatmul.mubr.f32.gmra.mxu1 %v5730_v53  ;;  %4716 = vmatprep.mubr.f32.mxu0 %v5736_v54 }
 0x224   : > { %8046 = vst [vmem:[#allocation128_spill] sm:$0xff] %v6296_v49  ;;  %4848 = vmatprep.mubr.f32.mxu1 %v5736_v54  ;;  %v6302_v52 = vpop.f32.mrf.mxu0 }
 0x225   : > { %8047 = vst [vmem:[#allocation129_spill] sm:$0xff] %v6302_v52  ;;  %v6304_v48 = vpop.f32.mrf.mxu1 }
 0x226   : > { %8048 = vst [vmem:[#allocation130_spill] sm:$0xff] %v6304_v48  ;;  %v6306_v60 = vpop.f32.mrf.mxu0  ;;  %4717 = vmatmul.mubr.f32.gmra.mxu0 %v5736_v54  ;;  %v4961_v48 = vld [vmem:[#allocation3 + $0x140] sm:$0xff] }
 0x227   : > { %8049 = vst [vmem:[#allocation131_spill] sm:$0xff] %v6306_v60  ;;  %v6308_v51 = vpop.f32.mrf.mxu1  ;;  %4849 = vmatmul.mubr.f32.gmra.mxu1 %v5736_v54  ;;  %4718 = vmatprep.mubr.f32.mxu0 %v5742_v56 }
 0x228   : > { %8050 = vst [vmem:[#allocation132_spill] sm:$0xff] %v6308_v51  ;;  %4850 = vmatprep.mubr.f32.mxu1 %v5742_v56  ;;  %v6314_v53 = vpop.f32.mrf.mxu0 }
 0x229   : > { %8051 = vst [vmem:[#allocation133_spill] sm:$0xff] %v6314_v53  ;;  %v6316_v49 = vpop.f32.mrf.mxu1 }
 0x22a   : > { %8052 = vst [vmem:[#allocation134_spill] sm:$0xff] %v6316_v49  ;;  %v6318_v29 = vpop.f32.mrf.mxu0  ;;  %4719 = vmatmul.mubr.f32.gmra.mxu0 %v4961_v48  ;;  %v4962_v49 = vld [vmem:[#allocation3 + $0x148] sm:$0xff] }
 0x22b   : > { %8053 = vst [vmem:[#allocation135_spill] sm:$0xff] %v6318_v29  ;;  %v6320_v52 = vpop.f32.mrf.mxu1  ;;  %4851 = vmatmul.mubr.f32.gmra.mxu1 %v4961_v48  ;;  %4720 = vmatprep.mubr.f32.mxu0 %v5748_v57  ;;  %v4963_v29 = vld [vmem:[#allocation3 + $0x150] sm:$0xff] }
 0x22c   : > { %8054 = vst [vmem:[#allocation136_spill] sm:$0xff] %v6320_v52  ;;  %4852 = vmatprep.mubr.f32.mxu1 %v5748_v57  ;;  %v6324_v54 = vpop.f32.mrf.mxu0 }
 0x22d   : > { %8055 = vst [vmem:[#allocation137_spill] sm:$0xff] %v6324_v54  ;;  %v6326_v51 = vpop.f32.mrf.mxu1 }
 0x22e   : > { %8056 = vst [vmem:[#allocation138_spill] sm:$0xff] %v6326_v51  ;;  %v6328_v56 = vpop.f32.mrf.mxu0  ;;  %4721 = vmatmul.mubr.f32.gmra.mxu0 %v4962_v49  ;;  %v4964_v51 = vld [vmem:[#allocation3 + $0x158] sm:$0xff] }
 0x22f   : > { %8057 = vst [vmem:[#allocation139_spill] sm:$0xff] %v6328_v56  ;;  %v6330_v60 = vpop.f32.mrf.mxu1  ;;  %4853 = vmatmul.mubr.f32.gmra.mxu1 %v4962_v49  ;;  %4722 = vmatprep.mubr.f32.mxu0 %v4963_v29 }
 0x230   : > { %8058 = vst [vmem:[#allocation140_spill] sm:$0xff] %v6330_v60  ;;  %4854 = vmatprep.mubr.f32.mxu1 %v4963_v29  ;;  %v6332_v52 = vpop.f32.mrf.mxu0 }
 0x231   : > { %8059 = vst [vmem:[#allocation141_spill] sm:$0xff] %v6332_v52  ;;  %v6334_v48 = vpop.f32.mrf.mxu1 }
 0x232   : > { %8060 = vst [vmem:[#allocation142_spill] sm:$0xff] %v6334_v48  ;;  %v6336_v53 = vpop.f32.mrf.mxu0  ;;  %4723 = vmatmul.mubr.f32.gmra.mxu0 %v4963_v29  ;;  %v4965_v48 = vld [vmem:[#allocation3 + $0x160] sm:$0xff] }
 0x233   : > { %8061 = vst [vmem:[#allocation143_spill] sm:$0xff] %v6336_v53  ;;  %v6338_v57 = vpop.f32.mrf.mxu1  ;;  %4855 = vmatmul.mubr.f32.gmra.mxu1 %v4963_v29  ;;  %4724 = vmatprep.mubr.f32.mxu0 %v4964_v51 }
 0x234   : > { %8062 = vst [vmem:[#allocation144_spill] sm:$0xff] %v6338_v57  ;;  %4856 = vmatprep.mubr.f32.mxu1 %v4964_v51  ;;  %v6340_v60 = vpop.f32.mrf.mxu0 }
 0x235   : > { %8063 = vst [vmem:[#allocation145_spill] sm:$0xff] %v6340_v60  ;;  %v6342_v56 = vpop.f32.mrf.mxu1  ;;  %v4966_v60 = vld [vmem:[#allocation3 + $0x168] sm:$0xff] }
 0x236   : > { %8064 = vst [vmem:[#allocation146_spill] sm:$0xff] %v6342_v56  ;;  %v6344_v49 = vpop.f32.mrf.mxu0  ;;  %4725 = vmatmul.mubr.f32.gmra.mxu0 %v4964_v51  ;;  %v585_v56 = vlaneseq }
 0x237   : > { %8065 = vst [vmem:[#allocation147_spill] sm:$0xff] %v6344_v49  ;;  %v6346_v54 = vpop.f32.mrf.mxu1  ;;  %4857 = vmatmul.mubr.f32.gmra.mxu1 %v4964_v51  ;;  %4726 = vmatprep.mubr.f32.mxu0 %v4965_v48 }
 0x238   : > { %8066 = vst [vmem:[#allocation148_spill] sm:$0xff] %v6346_v54  ;;  %4858 = vmatprep.mubr.f32.mxu1 %v4965_v48  ;;  %v6348_v53 = vpop.f32.mrf.mxu0 }
 0x239   : > { %8067 = vst [vmem:[#allocation149_spill] sm:$0xff] %v6348_v53  ;;  %v6350_v57 = vpop.f32.mrf.mxu1 }
 0x23a   : > { %8068 = vst [vmem:[#allocation150_spill] sm:$0xff] %v6350_v57  ;;  %v6352_v29 = vpop.f32.mrf.mxu0  ;;  %4727 = vmatmul.mubr.f32.gmra.mxu0 %v4965_v48 }
 0x23b   : > { %8069 = vst [vmem:[#allocation151_spill] sm:$0xff] %v6352_v29  ;;  %v6354_v52 = vpop.f32.mrf.mxu1  ;;  %4859 = vmatmul.mubr.f32.gmra.mxu1 %v4965_v48  ;;  %4728 = vmatprep.mubr.f32.mxu0 %v4966_v60  ;;  %v6364_v29 = vshrl.u32 %v585_v56, 7  ;;  %v583_v56 = vld [vmem:[%s5365_s15] sm:$0xff] }
 0x23c   : > { %8070 = vst [vmem:[#allocation152_spill] sm:$0xff] %v6354_v52  ;;  %4860 = vmatprep.mubr.f32.mxu1 %v4966_v60  ;;  %v6356_v54 = vpop.f32.mrf.mxu0  ;;  %v4967_v52 = vld [vmem:[#allocation3 + $0x170] sm:$0xff] }
 0x23d   : > { %8071 = vst [vmem:[#allocation153_spill] sm:$0xff] %v6356_v54  ;;  %v6358_v51 = vpop.f32.mrf.mxu1  ;;  %8075 = vst [vmem:[#allocation157_spill] sm:$0xff] %v6364_v29  ;;  %v591_v54 = vsub.s32 1, %v6364_v29 }
 0x23e   : > { %8072 = vst [vmem:[#allocation154_spill] sm:$0xff] %v6358_v51  ;;  %v6360_v49 = vpop.f32.mrf.mxu0  ;;  %4729 = vmatmul.mubr.f32.gmra.mxu0 %v4966_v60  ;;  %v599_v51 = vsub.s32 3, %v6364_v29 }
 0x23f   : > { %8073 = vst [vmem:[#allocation155_spill] sm:$0xff] %v6360_v49  ;;  %v6362_v47 = vpop.f32.mrf.mxu1  ;;  %4861 = vmatmul.mubr.f32.gmra.mxu1 %v4966_v60  ;;  %4730 = vmatprep.mubr.f32.mxu0 %v4967_v52  ;;  %v4968_v60 = vld [vmem:[#allocation3 + $0x178] sm:$0xff]  ;;  %v6383_v44 = vrot.slane %v583_v56, %v591_v54 }
 0x240   : > { %8074 = vst [vmem:[#allocation156_spill] sm:$0xff] %v6362_v47  ;;  %4862 = vmatprep.mubr.f32.mxu1 %v4967_v52  ;;  %v6366_v48 = vpop.f32.mrf.mxu0  ;;  %v587_v47 = vsub.s32 0, %v6364_v29  ;;  %v6385_v43 = vrot.slane %v583_v56, %v599_v51 }
 0x241   : > { %8076 = vst [vmem:[#allocation158_spill] sm:$0xff] %v6366_v48  ;;  %v6368_v57 = vpop.f32.mrf.mxu1  ;;  %v595_v48 = vsub.s32 2, %v6364_v29  ;;  %v694_v54 = vadd.f32 %v5760_v8, %v6383_v44 }
 0x242   : > { %8077 = vst [vmem:[#allocation159_spill] sm:$0xff] %v6368_v57  ;;  %v6372_v53 = vpop.f32.mrf.mxu0  ;;  %4731 = vmatmul.mubr.f32.gmra.mxu0 %v4967_v52  ;;  %v6391_v42 = vrot.slane %v583_v56, %v587_v47  ;;  %v1059_v51 = vadd.f32 %v5762_v10, %v6385_v43  ;;  %v4970_v47 = vld [vmem:[#allocation3 + $0x188] sm:$0xff] }
 0x243   : > { %8078 = vst [vmem:[#allocation160_spill] sm:$0xff] %v6372_v53  ;;  %v6374_v49 = vpop.f32.mrf.mxu1  ;;  %4863 = vmatmul.mubr.f32.gmra.mxu1 %v4967_v52  ;;  %4732 = vmatprep.mubr.f32.mxu0 %v4968_v60  ;;  %v4969_v52 = vld [vmem:[#allocation3 + $0x180] sm:$0xff]  ;;  %v6393_v29 = vrot.slane %v583_v56, %v595_v48  ;;  %v2086_v10 = vmax.f32 %v694_v54, 0.0 }
 0x244   : > { %8079 = vst [vmem:[#allocation161_spill] sm:$0xff] %v6374_v49  ;;  %4864 = vmatprep.mubr.f32.mxu1 %v4968_v60  ;;  %v6379_v46 = vpop.f32.mrf.mxu0  ;;  %v692_v48 = vadd.f32 %v5756_v4, %v6391_v42 }
 0x245   : > { %8080 = vst [vmem:[#allocation162_spill] sm:$0xff] %v6379_v46  ;;  %v6381_v57 = vpop.f32.mrf.mxu1  ;;  %v1057_v56 = vadd.f32 %v5758_v6, %v6393_v29 }
 0x246   : > { %8081 = vst [vmem:[#allocation163_spill] sm:$0xff] %v6381_v57  ;;  %v6387_v53 = vpop.f32.mrf.mxu0  ;;  %4733 = vmatmul.mubr.f32.gmra.mxu0 %v4968_v60  ;;  %v2085_v6 = vmax.f32 %v692_v48, 0.0  ;;  %v2659_v48 = vld [vmem:[%s5367_s25 + $0x3e0] sm:$0xff] }
 0x247   : > { %8082 = vst [vmem:[#allocation164_spill] sm:$0xff] %v6387_v53  ;;  %v6389_v49 = vpop.f32.mrf.mxu1  ;;  %4865 = vmatmul.mubr.f32.gmra.mxu1 %v4968_v60  ;;  %4734 = vmatprep.mubr.f32.mxu0 %v4969_v52  ;;  %v2087_v54 = vmax.f32 %v1057_v56, 0.0  ;;  %v2661_v56 = vld [vmem:[%s5367_s25 + $0x3f0] sm:$0xff] }
 0x248   : > { %8083 = vst [vmem:[#allocation165_spill] sm:$0xff] %v6389_v49  ;;  %4866 = vmatprep.mubr.f32.mxu1 %v4969_v52  ;;  %v6395_v46 = vpop.f32.mrf.mxu0 }
 0x249   : > { %v6397_v57 = vpop.f32.mrf.mxu1 }
 0x24a   : > { %8084 = vst [vmem:[#allocation166_spill] sm:$0xff] %v6397_v57  ;;  %v6403_v49 = vpop.f32.mrf.mxu0  ;;  %4735 = vmatmul.mubr.f32.gmra.mxu0 %v4969_v52  ;;  %v2088_v57 = vmax.f32 %v1059_v51, 0.0 }
 0x24b   : > { %8085 = vst [vmem:[#allocation167_spill] sm:$0xff] %v6403_v49  ;;  %v6405_v60 = vpop.f32.mrf.mxu1  ;;  %4867 = vmatmul.mubr.f32.gmra.mxu1 %v4969_v52  ;;  %4736 = vmatprep.mubr.f32.mxu0 %v4970_v47  ;;  %v700_v49 = vadd.f32 %v5770_v15, %v6383_v44  ;;  %v1065_v52 = vadd.f32 %v5772_v16, %v6385_v43 }
 0x24c   : > { %8086 = vst [vmem:[#allocation168_spill] sm:$0xff] %v6405_v60  ;;  %4868 = vmatprep.mubr.f32.mxu1 %v4970_v47  ;;  %v6411_v53 = vpop.f32.mrf.mxu0  ;;  %v698_v15 = vadd.f32 %v5764_v11, %v6391_v42  ;;  %v1063_v16 = vadd.f32 %v5766_v12, %v6393_v29  ;;  %v2652_v12 = vld [vmem:[%s5367_s25 + $0x3a8] sm:$0xff] }
 0x24d   : > { %8087 = vst [vmem:[#allocation169_spill] sm:$0xff] %v6411_v53  ;;  %v6413_v8 = vpop.f32.mrf.mxu1  ;;  %v2096_v53 = vmax.f32 %v1065_v52, 0.0 }
 0x24e   : > { %8088 = vst [vmem:[#allocation170_spill] sm:$0xff] %v6413_v8  ;;  %v6419_v60 = vpop.f32.mrf.mxu0  ;;  %4737 = vmatmul.mubr.f32.gmra.mxu0 %v4970_v47  ;;  %v2094_v8 = vmax.f32 %v700_v49, 0.0  ;;  %v2093_v49 = vmax.f32 %v698_v15, 0.0  ;;  %v2095_v52 = vmax.f32 %v1063_v16, 0.0  ;;  %v1077_v15 = vadd.f32 %v5804_v18, %v6385_v43  ;;  %v8096_v18 = vld [vmem:[#allocation16_spill] sm:$0xff] }
 0x24f   : > { %8089 = vst [vmem:[#allocation171_spill] sm:$0xff] %v6419_v60  ;;  %v6421_v4 = vpop.f32.mrf.mxu1  ;;  %4869 = vmatmul.mubr.f32.gmra.mxu1 %v4970_v47  ;;  %2727 = vmatprep.mubr.f32.mxu0 %v2086_v10  ;;  %v706_v47 = vadd.f32 %v5785_v58, %v6383_v44  ;;  %v704_v58 = vadd.f32 %v5776_v21, %v6391_v42  ;;  %v2651_v21 = vld [vmem:[%s5367_s25 + $0x3a0] sm:$0xff] }
 0x250   : > { %8090 = vst [vmem:[#allocation172_spill] sm:$0xff] %v6421_v4  ;;  %3042 = vmatprep.mubr.f32.mxu1 %v2088_v57  ;;  %v6427_v51 = vpop.f32.mrf.mxu0  ;;  %v1071_v57 = vadd.f32 %v5787_v59, %v6385_v43  ;;  %v2654_v4 = vld [vmem:[%s5367_s25 + $0x3b8] sm:$0xff]  ;;  %v1069_v59 = vadd.f32 %v5778_v22, %v6393_v29  ;;  %v2653_v22 = vld [vmem:[%s5367_s25 + $0x3b0] sm:$0xff] }
 0x251   : > { %v6429_v60 = vpop.f32.mrf.mxu1 }
 0x252   : > { %v6437_v10 = vpop.f32.mrf.mxu0  ;;  %2728 = vmatmul.mubr.f32.vlgmr.msra.gmra.mxu0 %v2085_v6 }
 0x253   : > { %8091 = vst [vmem:[#allocation173_spill] sm:$0xff] %v6437_v10  ;;  %v6439_v11 = vpop.f32.mrf.mxu1  ;;  %3043 = vmatmul.mubr.f32.vlgmr.msra.gmra.mxu1 %v2087_v54  ;;  %2732 = vmatprep.mubr.f32.mxu0 %v2094_v8  ;;  %v2102_v54 = vmax.f32 %v706_v47, 0.0  ;;  %v2104_v8 = vmax.f32 %v1071_v57, 0.0  ;;  %v2103_v47 = vmax.f32 %v1069_v59, 0.0  ;;  %v710_v57 = vadd.f32 %v8096_v18, %v6391_v42  ;;  %v2645_v18 = vld [vmem:[%s5367_s25 + $0x370] sm:$0xff] }
 0x254   : > { %8092 = vst [vmem:[#allocation174_spill] sm:$0xff] %v6439_v11  ;;  %3047 = vmatprep.mubr.f32.mxu1 %v2096_v53  ;;  %3294 = vmatpush1.xpose.msra.mxu0 %v2659_v48  ;;  %v6447_v10 = vpop.f32.mrf.mxu0  ;;  %v712_v53 = vadd.f32 %v5802_v3, %v6383_v44  ;;  %v2644_v11 = vld [vmem:[%s5367_s25 + $0x368] sm:$0xff]  ;;  %v2101_v3 = vmax.f32 %v704_v58, 0.0  ;;  %v1083_v59 = vadd.f32 %v5820_v62, %v6385_v43  ;;  %v8102_v62 = vld [vmem:[#allocation18_spill] sm:$0xff] }
 0x255   : > { %v6449_v6 = vpop.f32.mrf.mxu1  ;;  %3609 = vmatpush1.xpose.msra.mxu1 %v2661_v56  ;;  %3295 = vmatprep.subr.mxu0 %v2652_v12  ;;  %v2646_v56 = vld [vmem:[%s5367_s25 + $0x378] sm:$0xff] }
 0x256   : > { %8093 = vst [vmem:[#allocation175_spill] sm:$0xff] %v6449_v6  ;;  %3610 = vmatprep.subr.mxu1 %v2654_v4  ;;  %v6457_v16 = vpop.f32.mrf.mxu0  ;;  %2733 = vmatmul.mubr.f32.gmra.mxu0 %v2093_v49  ;;  %v8097_v4 = vld [vmem:[#allocation17_spill] sm:$0xff]  ;;  %v2110_v49 = vmax.f32 %v712_v53, 0.0  ;;  %v2109_v53 = vmax.f32 %v710_v57, 0.0 }
 0x257   : > { %8094 = vst [vmem:[#allocation176_spill] sm:$0xff] %v6457_v16  ;;  %v6459_v48 = vpop.f32.mrf.mxu1  ;;  %3048 = vmatmul.mubr.f32.gmra.mxu1 %v2095_v52  ;;  %2737 = vmatprep.mubr.f32.mxu0 %v2102_v54  ;;  %v1075_v12 = vadd.f32 %v8097_v4, %v6393_v29  ;;  %v2112_v52 = vmax.f32 %v1077_v15, 0.0  ;;  %v8099_v54 = vld [vmem:[#allocation20_spill] sm:$0xff] }
 0x258   : > { %8095 = vst [vmem:[#allocation177_spill] sm:$0xff] %v6459_v48  ;;  %3052 = vmatprep.mubr.f32.mxu1 %v2104_v8  ;;  %v6467_v6 = vpop.f32.mrf.mxu0  ;;  %3296 = vmatpush1.xpose.msra.mxu0 %v2651_v21  ;;  %v718_v58 = vadd.f32 %v8099_v54, %v6383_v44  ;;  %v2643_v8 = vld [vmem:[%s5367_s25 + $0x360] sm:$0xff]  ;;  %v2636_v21 = vld [vmem:[%s5367_s25 + $0x328] sm:$0xff] }
 0x259   : > { %v6469_v48 = vpop.f32.mrf.mxu1  ;;  %3611 = vmatpush1.xpose.msra.mxu1 %v2653_v22  ;;  %3297 = vmatprep.subr.mxu0 %v2644_v11  ;;  %v2638_v22 = vld [vmem:[%s5367_s25 + $0x338] sm:$0xff]  ;;  %v2111_v15 = vmax.f32 %v1075_v12, 0.0  ;;  %v716_v11 = vadd.f32 %v8102_v62, %v6391_v42  ;;  %v1089_v12 = vadd.f32 %v5836_v27, %v6385_v43  ;;  %v2637_v62 = vld [vmem:[%s5367_s25 + $0x330] sm:$0xff] }
 0x25a   : > { %8098 = vst [vmem:[#allocation16_spill] sm:$0xff] %v6469_v48  ;;  %3612 = vmatprep.subr.mxu1 %v2646_v56  ;;  %v6477_v4 = vpop.f32.mrf.mxu0  ;;  %2738 = vmatmul.mubr.f32.gmra.mxu0 %v2101_v3  ;;  %v8103_v56 = vld [vmem:[#allocation19_spill] sm:$0xff]  ;;  %v2118_v3 = vmax.f32 %v718_v58, 0.0  ;;  %v8108_v27 = vld [vmem:[#allocation21_spill] sm:$0xff] }
 0x25b   : > { %8100 = vst [vmem:[#allocation17_spill] sm:$0xff] %v6477_v4  ;;  %v6479_v16 = vpop.f32.mrf.mxu1  ;;  %3053 = vmatmul.mubr.f32.gmra.mxu1 %v2103_v47  ;;  %2742 = vmatprep.mubr.f32.mxu0 %v2110_v49  ;;  %v1081_v54 = vadd.f32 %v8103_v56, %v6393_v29  ;;  %v2120_v47 = vmax.f32 %v1083_v59, 0.0  ;;  %v8105_v49 = vld [vmem:[#allocation23_spill] sm:$0xff]  ;;  %v2117_v58 = vmax.f32 %v716_v11, 0.0 }
 0x25c   : > { %8101 = vst [vmem:[#allocation20_spill] sm:$0xff] %v6479_v16  ;;  %3057 = vmatprep.mubr.f32.mxu1 %v2112_v52  ;;  %v6487_v48 = vpop.f32.mrf.mxu0  ;;  %3298 = vmatpush1.xpose.msra.mxu0 %v2643_v8  ;;  %v724_v57 = vadd.f32 %v8105_v49, %v6383_v44  ;;  %v2635_v52 = vld [vmem:[%s5367_s25 + $0x320] sm:$0xff]  ;;  %v2628_v8 = vld [vmem:[%s5367_s25 + $0x2e8] sm:$0xff] }
 0x25d   : > { %v6489_v16 = vpop.f32.mrf.mxu1  ;;  %3613 = vmatpush1.xpose.msra.mxu1 %v2645_v18  ;;  %3299 = vmatprep.subr.mxu0 %v2636_v21  ;;  %v2630_v18 = vld [vmem:[%s5367_s25 + $0x2f8] sm:$0xff]  ;;  %v2119_v59 = vmax.f32 %v1081_v54, 0.0  ;;  %v722_v21 = vadd.f32 %v8108_v27, %v6391_v42  ;;  %v1095_v54 = vadd.f32 %v5852_v61, %v6385_v43  ;;  %v2629_v27 = vld [vmem:[%s5367_s25 + $0x2f0] sm:$0xff] }
 0x25e   : > { %8104 = vst [vmem:[#allocation18_spill] sm:$0xff] %v6489_v16  ;;  %3614 = vmatprep.subr.mxu1 %v2638_v22  ;;  %v6497_v56 = vpop.f32.mrf.mxu0  ;;  %2743 = vmatmul.mubr.f32.gmra.mxu0 %v2109_v53  ;;  %v8109_v22 = vld [vmem:[#allocation22_spill] sm:$0xff]  ;;  %v2126_v53 = vmax.f32 %v724_v57, 0.0  ;;  %v8114_v61 = vld [vmem:[#allocation24_spill] sm:$0xff] }
 0x25f   : > { %8106 = vst [vmem:[#allocation19_spill] sm:$0xff] %v6497_v56  ;;  %v6499_v4 = vpop.f32.mrf.mxu1  ;;  %3058 = vmatmul.mubr.f32.gmra.mxu1 %v2111_v15  ;;  %2747 = vmatprep.mubr.f32.mxu0 %v2118_v3  ;;  %v1087_v49 = vadd.f32 %v8109_v22, %v6393_v29  ;;  %v2128_v15 = vmax.f32 %v1089_v12, 0.0  ;;  %v8111_v3 = vld [vmem:[#allocation26_spill] sm:$0xff]  ;;  %v2125_v57 = vmax.f32 %v722_v21, 0.0 }
 0x260   : > { %8107 = vst [vmem:[#allocation23_spill] sm:$0xff] %v6499_v4  ;;  %3062 = vmatprep.mubr.f32.mxu1 %v2120_v47  ;;  %v6507_v16 = vpop.f32.mrf.mxu0  ;;  %3300 = vmatpush1.xpose.msra.mxu0 %v2635_v52  ;;  %v730_v11 = vadd.f32 %v8111_v3, %v6383_v44  ;;  %v2627_v47 = vld [vmem:[%s5367_s25 + $0x2e0] sm:$0xff]  ;;  %v2620_v52 = vld [vmem:[%s5367_s25 + $0x2a8] sm:$0xff] }
 0x261   : > { %v6509_v4 = vpop.f32.mrf.mxu1  ;;  %3615 = vmatpush1.xpose.msra.mxu1 %v2637_v62  ;;  %3301 = vmatprep.subr.mxu0 %v2628_v8  ;;  %v2622_v62 = vld [vmem:[%s5367_s25 + $0x2b8] sm:$0xff]  ;;  %v2127_v12 = vmax.f32 %v1087_v49, 0.0  ;;  %v728_v8 = vadd.f32 %v8114_v61, %v6391_v42  ;;  %v1101_v49 = vadd.f32 %v5868_v63, %v6385_v43  ;;  %v2621_v61 = vld [vmem:[%s5367_s25 + $0x2b0] sm:$0xff]  ;;  %v8120_v63 = vld [vmem:[#allocation27_spill] sm:$0xff] }
 0x262   : > { %8110 = vst [vmem:[#allocation21_spill] sm:$0xff] %v6509_v4  ;;  %3616 = vmatprep.subr.mxu1 %v2630_v18  ;;  %v6517_v22 = vpop.f32.mrf.mxu0  ;;  %2748 = vmatmul.mubr.f32.gmra.mxu0 %v2117_v58  ;;  %v8115_v18 = vld [vmem:[#allocation25_spill] sm:$0xff]  ;;  %v2134_v58 = vmax.f32 %v730_v11, 0.0 }
 0x263   : > { %8112 = vst [vmem:[#allocation22_spill] sm:$0xff] %v6517_v22  ;;  %v6519_v56 = vpop.f32.mrf.mxu1  ;;  %3063 = vmatmul.mubr.f32.gmra.mxu1 %v2119_v59  ;;  %2752 = vmatprep.mubr.f32.mxu0 %v2126_v53  ;;  %v1093_v3 = vadd.f32 %v8115_v18, %v6393_v29  ;;  %v2136_v59 = vmax.f32 %v1095_v54, 0.0  ;;  %v8117_v53 = vld [vmem:[#allocation29_spill] sm:$0xff]  ;;  %v2133_v11 = vmax.f32 %v728_v8, 0.0 }
 0x264   : > { %8113 = vst [vmem:[#allocation26_spill] sm:$0xff] %v6519_v56  ;;  %3067 = vmatprep.mubr.f32.mxu1 %v2128_v15  ;;  %v6527_v4 = vpop.f32.mrf.mxu0  ;;  %3302 = vmatpush1.xpose.msra.mxu0 %v2627_v47  ;;  %v736_v21 = vadd.f32 %v8117_v53, %v6383_v44  ;;  %v2619_v15 = vld [vmem:[%s5367_s25 + $0x2a0] sm:$0xff]  ;;  %v2612_v47 = vld [vmem:[%s5367_s25 + $0x268] sm:$0xff] }
 0x265   : > { %v6529_v56 = vpop.f32.mrf.mxu1  ;;  %3617 = vmatpush1.xpose.msra.mxu1 %v2629_v27  ;;  %3303 = vmatprep.subr.mxu0 %v2620_v52  ;;  %v2614_v27 = vld [vmem:[%s5367_s25 + $0x278] sm:$0xff]  ;;  %v2135_v54 = vmax.f32 %v1093_v3, 0.0  ;;  %v734_v52 = vadd.f32 %v8120_v63, %v6391_v42  ;;  %v1107_v3 = vadd.f32 %v5884_v5, %v6385_v43  ;;  %v2613_v63 = vld [vmem:[%s5367_s25 + $0x270] sm:$0xff]  ;;  %v8126_v5 = vld [vmem:[#allocation30_spill] sm:$0xff] }
 0x266   : > { %8116 = vst [vmem:[#allocation24_spill] sm:$0xff] %v6529_v56  ;;  %3618 = vmatprep.subr.mxu1 %v2622_v62  ;;  %v6537_v18 = vpop.f32.mrf.mxu0  ;;  %2753 = vmatmul.mubr.f32.gmra.mxu0 %v2125_v57  ;;  %v8121_v62 = vld [vmem:[#allocation28_spill] sm:$0xff]  ;;  %v2142_v57 = vmax.f32 %v736_v21, 0.0 }
 0x267   : > { %8118 = vst [vmem:[#allocation25_spill] sm:$0xff] %v6537_v18  ;;  %v6539_v22 = vpop.f32.mrf.mxu1  ;;  %3068 = vmatmul.mubr.f32.gmra.mxu1 %v2127_v12  ;;  %2757 = vmatprep.mubr.f32.mxu0 %v2134_v58  ;;  %v1099_v53 = vadd.f32 %v8121_v62, %v6393_v29  ;;  %v2144_v12 = vmax.f32 %v1101_v49, 0.0  ;;  %v8123_v58 = vld [vmem:[#allocation32_spill] sm:$0xff]  ;;  %v2141_v21 = vmax.f32 %v734_v52, 0.0 }
 0x268   : > { %8119 = vst [vmem:[#allocation29_spill] sm:$0xff] %v6539_v22  ;;  %3072 = vmatprep.mubr.f32.mxu1 %v2136_v59  ;;  %v6547_v56 = vpop.f32.mrf.mxu0  ;;  %3304 = vmatpush1.xpose.msra.mxu0 %v2619_v15  ;;  %v742_v8 = vadd.f32 %v8123_v58, %v6383_v44  ;;  %v2611_v59 = vld [vmem:[%s5367_s25 + $0x260] sm:$0xff]  ;;  %v2604_v15 = vld [vmem:[%s5367_s25 + $0x228] sm:$0xff] }
 0x269   : > { %v6549_v22 = vpop.f32.mrf.mxu1  ;;  %3619 = vmatpush1.xpose.msra.mxu1 %v2621_v61  ;;  %3305 = vmatprep.subr.mxu0 %v2612_v47  ;;  %v2606_v61 = vld [vmem:[%s5367_s25 + $0x238] sm:$0xff]  ;;  %v2143_v49 = vmax.f32 %v1099_v53, 0.0  ;;  %v740_v47 = vadd.f32 %v8126_v5, %v6391_v42  ;;  %v1113_v53 = vadd.f32 %v5900_v9, %v6385_v43  ;;  %v2605_v5 = vld [vmem:[%s5367_s25 + $0x230] sm:$0xff] }
 0x26a   : > { %8122 = vst [vmem:[#allocation27_spill] sm:$0xff] %v6549_v22  ;;  %3620 = vmatprep.subr.mxu1 %v2614_v27  ;;  %v6557_v62 = vpop.f32.mrf.mxu0  ;;  %2758 = vmatmul.mubr.f32.gmra.mxu0 %v2133_v11  ;;  %v8127_v27 = vld [vmem:[#allocation31_spill] sm:$0xff]  ;;  %v2150_v11 = vmax.f32 %v742_v8, 0.0  ;;  %v8132_v9 = vld [vmem:[#allocation33_spill] sm:$0xff] }
 0x26b   : > { %8124 = vst [vmem:[#allocation28_spill] sm:$0xff] %v6557_v62  ;;  %v6559_v18 = vpop.f32.mrf.mxu1  ;;  %3073 = vmatmul.mubr.f32.gmra.mxu1 %v2135_v54  ;;  %2762 = vmatprep.mubr.f32.mxu0 %v2142_v57  ;;  %v1105_v58 = vadd.f32 %v8127_v27, %v6393_v29  ;;  %v2152_v54 = vmax.f32 %v1107_v3, 0.0  ;;  %v8129_v57 = vld [vmem:[#allocation35_spill] sm:$0xff]  ;;  %v2149_v8 = vmax.f32 %v740_v47, 0.0 }
 0x26c   : > { %8125 = vst [vmem:[#allocation32_spill] sm:$0xff] %v6559_v18  ;;  %3077 = vmatprep.mubr.f32.mxu1 %v2144_v12  ;;  %v6567_v22 = vpop.f32.mrf.mxu0  ;;  %3306 = vmatpush1.xpose.msra.mxu0 %v2611_v59  ;;  %v748_v52 = vadd.f32 %v8129_v57, %v6383_v44  ;;  %v2603_v12 = vld [vmem:[%s5367_s25 + $0x220] sm:$0xff]  ;;  %v2596_v59 = vld [vmem:[%s5367_s25 + $0x1e8] sm:$0xff] }
 0x26d   : > { %v6569_v18 = vpop.f32.mrf.mxu1  ;;  %3621 = vmatpush1.xpose.msra.mxu1 %v2613_v63  ;;  %3307 = vmatprep.subr.mxu0 %v2604_v15  ;;  %v2598_v63 = vld [vmem:[%s5367_s25 + $0x1f8] sm:$0xff]  ;;  %v2151_v3 = vmax.f32 %v1105_v58, 0.0  ;;  %v746_v15 = vadd.f32 %v8132_v9, %v6391_v42  ;;  %v1119_v58 = vadd.f32 %v5916_v14, %v6385_v43  ;;  %v2597_v9 = vld [vmem:[%s5367_s25 + $0x1f0] sm:$0xff] }
 0x26e   : > { %8128 = vst [vmem:[#allocation30_spill] sm:$0xff] %v6569_v18  ;;  %3622 = vmatprep.subr.mxu1 %v2606_v61  ;;  %v6577_v27 = vpop.f32.mrf.mxu0  ;;  %2763 = vmatmul.mubr.f32.gmra.mxu0 %v2141_v21  ;;  %v8133_v61 = vld [vmem:[#allocation34_spill] sm:$0xff]  ;;  %v2158_v21 = vmax.f32 %v748_v52, 0.0  ;;  %v8138_v14 = vld [vmem:[#allocation36_spill] sm:$0xff] }
 0x26f   : > { %8130 = vst [vmem:[#allocation31_spill] sm:$0xff] %v6577_v27  ;;  %v6579_v62 = vpop.f32.mrf.mxu1  ;;  %3078 = vmatmul.mubr.f32.gmra.mxu1 %v2143_v49  ;;  %2767 = vmatprep.mubr.f32.mxu0 %v2150_v11  ;;  %v1111_v57 = vadd.f32 %v8133_v61, %v6393_v29  ;;  %v2160_v49 = vmax.f32 %v1113_v53, 0.0  ;;  %v8135_v11 = vld [vmem:[#allocation38_spill] sm:$0xff]  ;;  %v2157_v52 = vmax.f32 %v746_v15, 0.0 }
 0x270   : > { %8131 = vst [vmem:[#allocation35_spill] sm:$0xff] %v6579_v62  ;;  %3082 = vmatprep.mubr.f32.mxu1 %v2152_v54  ;;  %v6587_v18 = vpop.f32.mrf.mxu0  ;;  %3308 = vmatpush1.xpose.msra.mxu0 %v2603_v12  ;;  %v754_v47 = vadd.f32 %v8135_v11, %v6383_v44  ;;  %v2595_v54 = vld [vmem:[%s5367_s25 + $0x1e0] sm:$0xff]  ;;  %v2588_v12 = vld [vmem:[%s5367_s25 + $0x1a8] sm:$0xff] }
 0x271   : > { %v6589_v62 = vpop.f32.mrf.mxu1  ;;  %3623 = vmatpush1.xpose.msra.mxu1 %v2605_v5  ;;  %3309 = vmatprep.subr.mxu0 %v2596_v59  ;;  %v2590_v5 = vld [vmem:[%s5367_s25 + $0x1b8] sm:$0xff]  ;;  %v2159_v53 = vmax.f32 %v1111_v57, 0.0  ;;  %v752_v59 = vadd.f32 %v8138_v14, %v6391_v42  ;;  %v1125_v57 = vadd.f32 %v5932_v19, %v6385_v43  ;;  %v2589_v14 = vld [vmem:[%s5367_s25 + $0x1b0] sm:$0xff]  ;;  %v8144_v19 = vld [vmem:[#allocation39_spill] sm:$0xff] }
 0x272   : > { %8134 = vst [vmem:[#allocation33_spill] sm:$0xff] %v6589_v62  ;;  %3624 = vmatprep.subr.mxu1 %v2598_v63  ;;  %v6597_v61 = vpop.f32.mrf.mxu0  ;;  %2768 = vmatmul.mubr.f32.gmra.mxu0 %v2149_v8  ;;  %v8139_v63 = vld [vmem:[#allocation37_spill] sm:$0xff]  ;;  %v2166_v8 = vmax.f32 %v754_v47, 0.0 }
 0x273   : > { %8136 = vst [vmem:[#allocation34_spill] sm:$0xff] %v6597_v61  ;;  %v6599_v27 = vpop.f32.mrf.mxu1  ;;  %3083 = vmatmul.mubr.f32.gmra.mxu1 %v2151_v3  ;;  %2772 = vmatprep.mubr.f32.mxu0 %v2158_v21  ;;  %v1117_v11 = vadd.f32 %v8139_v63, %v6393_v29  ;;  %v2168_v3 = vmax.f32 %v1119_v58, 0.0  ;;  %v8141_v21 = vld [vmem:[#allocation41_spill] sm:$0xff]  ;;  %v2165_v47 = vmax.f32 %v752_v59, 0.0 }
 0x274   : > { %8137 = vst [vmem:[#allocation38_spill] sm:$0xff] %v6599_v27  ;;  %3087 = vmatprep.mubr.f32.mxu1 %v2160_v49  ;;  %v6607_v62 = vpop.f32.mrf.mxu0  ;;  %3310 = vmatpush1.xpose.msra.mxu0 %v2595_v54  ;;  %v760_v15 = vadd.f32 %v8141_v21, %v6383_v44  ;;  %v2587_v49 = vld [vmem:[%s5367_s25 + $0x1a0] sm:$0xff]  ;;  %v2580_v54 = vld [vmem:[%s5367_s25 + $0x168] sm:$0xff] }
 0x275   : > { %v6609_v27 = vpop.f32.mrf.mxu1  ;;  %3625 = vmatpush1.xpose.msra.mxu1 %v2597_v9  ;;  %3311 = vmatprep.subr.mxu0 %v2588_v12  ;;  %v2582_v9 = vld [vmem:[%s5367_s25 + $0x178] sm:$0xff]  ;;  %v2167_v58 = vmax.f32 %v1117_v11, 0.0  ;;  %v758_v12 = vadd.f32 %v8144_v19, %v6391_v42  ;;  %v1131_v11 = vadd.f32 %v5948_v24, %v6385_v43  ;;  %v2581_v19 = vld [vmem:[%s5367_s25 + $0x170] sm:$0xff]  ;;  %v8150_v24 = vld [vmem:[#allocation42_spill] sm:$0xff] }
 0x276   : > { %8140 = vst [vmem:[#allocation36_spill] sm:$0xff] %v6609_v27  ;;  %3626 = vmatprep.subr.mxu1 %v2590_v5  ;;  %v6617_v63 = vpop.f32.mrf.mxu0  ;;  %2773 = vmatmul.mubr.f32.gmra.mxu0 %v2157_v52  ;;  %v8145_v5 = vld [vmem:[#allocation40_spill] sm:$0xff]  ;;  %v2174_v52 = vmax.f32 %v760_v15, 0.0 }
 0x277   : > { %8142 = vst [vmem:[#allocation37_spill] sm:$0xff] %v6617_v63  ;;  %v6619_v61 = vpop.f32.mrf.mxu1  ;;  %3088 = vmatmul.mubr.f32.gmra.mxu1 %v2159_v53  ;;  %2777 = vmatprep.mubr.f32.mxu0 %v2166_v8  ;;  %v1123_v21 = vadd.f32 %v8145_v5, %v6393_v29  ;;  %v2176_v53 = vmax.f32 %v1125_v57, 0.0  ;;  %v8147_v8 = vld [vmem:[#allocation44_spill] sm:$0xff]  ;;  %v2173_v15 = vmax.f32 %v758_v12, 0.0 }
 0x278   : > { %8143 = vst [vmem:[#allocation41_spill] sm:$0xff] %v6619_v61  ;;  %3092 = vmatprep.mubr.f32.mxu1 %v2168_v3  ;;  %v6627_v27 = vpop.f32.mrf.mxu0  ;;  %3312 = vmatpush1.xpose.msra.mxu0 %v2587_v49  ;;  %v766_v59 = vadd.f32 %v8147_v8, %v6383_v44  ;;  %v2579_v3 = vld [vmem:[%s5367_s25 + $0x160] sm:$0xff]  ;;  %v2572_v49 = vld [vmem:[%s5367_s25 + $0x128] sm:$0xff] }
 0x279   : > { %v6629_v61 = vpop.f32.mrf.mxu1  ;;  %3627 = vmatpush1.xpose.msra.mxu1 %v2589_v14  ;;  %3313 = vmatprep.subr.mxu0 %v2580_v54  ;;  %v2574_v14 = vld [vmem:[%s5367_s25 + $0x138] sm:$0xff]  ;;  %v2175_v57 = vmax.f32 %v1123_v21, 0.0  ;;  %v764_v54 = vadd.f32 %v8150_v24, %v6391_v42  ;;  %v1137_v21 = vadd.f32 %v5964_v30, %v6385_v43  ;;  %v2573_v24 = vld [vmem:[%s5367_s25 + $0x130] sm:$0xff] }
 0x27a   : > { %8146 = vst [vmem:[#allocation39_spill] sm:$0xff] %v6629_v61  ;;  %3628 = vmatprep.subr.mxu1 %v2582_v9  ;;  %v6637_v5 = vpop.f32.mrf.mxu0  ;;  %2778 = vmatmul.mubr.f32.gmra.mxu0 %v2165_v47  ;;  %v8151_v9 = vld [vmem:[#allocation43_spill] sm:$0xff]  ;;  %v2182_v47 = vmax.f32 %v766_v59, 0.0  ;;  %v8156_v30 = vld [vmem:[#allocation45_spill] sm:$0xff] }
 0x27b   : > { %8148 = vst [vmem:[#allocation40_spill] sm:$0xff] %v6637_v5  ;;  %v6639_v63 = vpop.f32.mrf.mxu1  ;;  %3093 = vmatmul.mubr.f32.gmra.mxu1 %v2167_v58  ;;  %2782 = vmatprep.mubr.f32.mxu0 %v2174_v52  ;;  %v1129_v8 = vadd.f32 %v8151_v9, %v6393_v29  ;;  %v2184_v58 = vmax.f32 %v1131_v11, 0.0  ;;  %v8153_v52 = vld [vmem:[#allocation47_spill] sm:$0xff]  ;;  %v2181_v59 = vmax.f32 %v764_v54, 0.0 }
 0x27c   : > { %8149 = vst [vmem:[#allocation44_spill] sm:$0xff] %v6639_v63  ;;  %3097 = vmatprep.mubr.f32.mxu1 %v2176_v53  ;;  %v6647_v61 = vpop.f32.mrf.mxu0  ;;  %3314 = vmatpush1.xpose.msra.mxu0 %v2579_v3  ;;  %v772_v12 = vadd.f32 %v8153_v52, %v6383_v44  ;;  %v2571_v53 = vld [vmem:[%s5367_s25 + $0x120] sm:$0xff]  ;;  %v2564_v3 = vld [vmem:[%s5367_s25 + $0xe8] sm:$0xff] }
 0x27d   : > { %v6649_v63 = vpop.f32.mrf.mxu1  ;;  %3629 = vmatpush1.xpose.msra.mxu1 %v2581_v19  ;;  %3315 = vmatprep.subr.mxu0 %v2572_v49  ;;  %v2566_v19 = vld [vmem:[%s5367_s25 + $0xf8] sm:$0xff]  ;;  %v2183_v11 = vmax.f32 %v1129_v8, 0.0  ;;  %v770_v49 = vadd.f32 %v8156_v30, %v6391_v42  ;;  %v1143_v8 = vadd.f32 %v5980_v35, %v6385_v43  ;;  %v2565_v30 = vld [vmem:[%s5367_s25 + $0xf0] sm:$0xff] }
 0x27e   : > { %8152 = vst [vmem:[#allocation42_spill] sm:$0xff] %v6649_v63  ;;  %3630 = vmatprep.subr.mxu1 %v2574_v14  ;;  %v6657_v9 = vpop.f32.mrf.mxu0  ;;  %2783 = vmatmul.mubr.f32.gmra.mxu0 %v2173_v15  ;;  %v8157_v14 = vld [vmem:[#allocation46_spill] sm:$0xff]  ;;  %v2190_v15 = vmax.f32 %v772_v12, 0.0  ;;  %v8162_v35 = vld [vmem:[#allocation48_spill] sm:$0xff] }
 0x27f   : > { %8154 = vst [vmem:[#allocation43_spill] sm:$0xff] %v6657_v9  ;;  %v6659_v5 = vpop.f32.mrf.mxu1  ;;  %3098 = vmatmul.mubr.f32.gmra.mxu1 %v2175_v57  ;;  %2787 = vmatprep.mubr.f32.mxu0 %v2182_v47  ;;  %v1135_v52 = vadd.f32 %v8157_v14, %v6393_v29  ;;  %v2192_v57 = vmax.f32 %v1137_v21, 0.0  ;;  %v8159_v47 = vld [vmem:[#allocation50_spill] sm:$0xff]  ;;  %v2189_v12 = vmax.f32 %v770_v49, 0.0  ;;  %v784_v49 = vadd.f32 %v5994_v50, %v6383_v44 }
 0x280   : > { %8155 = vst [vmem:[#allocation47_spill] sm:$0xff] %v6659_v5  ;;  %3102 = vmatprep.mubr.f32.mxu1 %v2184_v58  ;;  %v6667_v63 = vpop.f32.mrf.mxu0  ;;  %3316 = vmatpush1.xpose.msra.mxu0 %v2571_v53  ;;  %v778_v54 = vadd.f32 %v8159_v47, %v6383_v44  ;;  %v2563_v58 = vld [vmem:[%s5367_s25 + $0xe0] sm:$0xff]  ;;  %v2556_v53 = vld [vmem:[%s5367_s25 + $0xa8] sm:$0xff] }
 0x281   : > { %v6669_v5 = vpop.f32.mrf.mxu1  ;;  %3631 = vmatpush1.xpose.msra.mxu1 %v2573_v24  ;;  %3317 = vmatprep.subr.mxu0 %v2564_v3  ;;  %v2558_v24 = vld [vmem:[%s5367_s25 + $0xb8] sm:$0xff]  ;;  %v2191_v21 = vmax.f32 %v1135_v52, 0.0  ;;  %v776_v3 = vadd.f32 %v8162_v35, %v6391_v42  ;;  %v1149_v52 = vadd.f32 %v5996_v20, %v6385_v43  ;;  %v8165_v20 = vld [vmem:[#allocation51_spill] sm:$0xff] }
 0x282   : > { %8158 = vst [vmem:[#allocation45_spill] sm:$0xff] %v6669_v5  ;;  %3632 = vmatprep.subr.mxu1 %v2566_v19  ;;  %v6677_v14 = vpop.f32.mrf.mxu0  ;;  %2788 = vmatmul.mubr.f32.gmra.mxu0 %v2181_v59  ;;  %v8163_v19 = vld [vmem:[#allocation49_spill] sm:$0xff]  ;;  %v2198_v59 = vmax.f32 %v778_v54, 0.0 }
 0x283   : > { %8160 = vst [vmem:[#allocation46_spill] sm:$0xff] %v6677_v14  ;;  %v6679_v9 = vpop.f32.mrf.mxu1  ;;  %3103 = vmatmul.mubr.f32.gmra.mxu1 %v2183_v11  ;;  %2792 = vmatprep.mubr.f32.mxu0 %v2190_v15  ;;  %v1141_v47 = vadd.f32 %v8163_v19, %v6393_v29  ;;  %v2200_v11 = vmax.f32 %v1143_v8, 0.0  ;;  %v2555_v15 = vld [vmem:[%s5367_s25 + $0xa0] sm:$0xff]  ;;  %v2197_v50 = vmax.f32 %v776_v3, 0.0  ;;  %v782_v8 = vadd.f32 %v8165_v20, %v6391_v42 }
 0x284   : > { %8161 = vst [vmem:[#allocation50_spill] sm:$0xff] %v6679_v9  ;;  %3107 = vmatprep.mubr.f32.mxu1 %v2192_v57  ;;  %v6687_v5 = vpop.f32.mrf.mxu0  ;;  %3318 = vmatpush1.xpose.msra.mxu0 %v2563_v58  ;;  %v2557_v57 = vld [vmem:[%s5367_s25 + $0xb0] sm:$0xff]  ;;  %v2548_v58 = vld [vmem:[%s5367_s25 + $0x68] sm:$0xff]  ;;  %v1155_v3 = vadd.f32 %v6010_v0, %v6385_v43 }
 0x285   : > { %v6689_v9 = vpop.f32.mrf.mxu1  ;;  %3633 = vmatpush1.xpose.msra.mxu1 %v2565_v30  ;;  %3319 = vmatprep.subr.mxu0 %v2556_v53  ;;  %v2550_v30 = vld [vmem:[%s5367_s25 + $0x78] sm:$0xff]  ;;  %v2199_v54 = vmax.f32 %v1141_v47, 0.0  ;;  %v8166_v53 = vld [vmem:[#allocation52_spill] sm:$0xff]  ;;  %v2547_v47 = vld [vmem:[%s5367_s25 + $0x60] sm:$0xff] }
 0x286   : > { %3634 = vmatprep.subr.mxu1 %v2558_v24  ;;  %v6697_v35 = vpop.f32.mrf.mxu0  ;;  %2793 = vmatmul.mubr.f32.gmra.mxu0 %v2189_v12  ;;  %v1147_v24 = vadd.f32 %v8166_v53, %v6393_v29  ;;  %v2206_v12 = vmax.f32 %v784_v49, 0.0  ;;  %v2205_v49 = vmax.f32 %v782_v8, 0.0  ;;  %v1161_v8 = vadd.f32 %v6022_v2, %v6385_v43 }
 0x287   : > { %8164 = vst [vmem:[#allocation48_spill] sm:$0xff] %v6697_v35  ;;  %v6699_v19 = vpop.f32.mrf.mxu1  ;;  %3108 = vmatmul.mubr.f32.gmra.mxu1 %v2191_v21  ;;  %2797 = vmatprep.mubr.f32.mxu0 %v2198_v59  ;;  %v2208_v21 = vmax.f32 %v1149_v52, 0.0  ;;  %v790_v59 = vadd.f32 %v6008_v1, %v6383_v44 }
 0x288   : > { %3112 = vmatprep.mubr.f32.mxu1 %v2200_v11  ;;  %v6707_v14 = vpop.f32.mrf.mxu0  ;;  %3320 = vmatpush1.xpose.msra.mxu0 %v2555_v15  ;;  %v2549_v11 = vld [vmem:[%s5367_s25 + $0x70] sm:$0xff]  ;;  %v2207_v52 = vmax.f32 %v1147_v24, 0.0  ;;  %v8169_v15 = vld [vmem:[#allocation53_spill] sm:$0xff] }
 0x289   : > { %v6709_v35 = vpop.f32.mrf.mxu1  ;;  %3635 = vmatpush1.xpose.msra.mxu1 %v2557_v57  ;;  %3321 = vmatprep.subr.mxu0 %v2548_v58  ;;  %v788_v1 = vadd.f32 %v8169_v15, %v6391_v42  ;;  %v8170_v57 = vld [vmem:[#allocation54_spill] sm:$0xff] }
 0x28a   : > { %3636 = vmatprep.subr.mxu1 %v2550_v30  ;;  %v6717_v20 = vpop.f32.mrf.mxu0  ;;  %2798 = vmatmul.mubr.f32.gmra.mxu0 %v2197_v50  ;;  %v1153_v0 = vadd.f32 %v8170_v57, %v6393_v29  ;;  %v8172_v50 = vld [vmem:[#allocation57_spill] sm:$0xff] }
 0x28b   : > { %8167 = vst [vmem:[#allocation49_spill] sm:$0xff] %v6717_v20  ;;  %v6719_v53 = vpop.f32.mrf.mxu1  ;;  %3113 = vmatmul.mubr.f32.gmra.mxu1 %v2199_v54  ;;  %2802 = vmatprep.mubr.f32.mxu0 %v2206_v12  ;;  %v2214_v20 = vmax.f32 %v790_v59, 0.0  ;;  %v796_v54 = vadd.f32 %v8172_v50, %v6383_v44  ;;  %v8175_v59 = vld [vmem:[#allocation55_spill] sm:$0xff] }
 0x28c   : > { %8168 = vst [vmem:[#allocation51_spill] sm:$0xff] %v6719_v53  ;;  %3117 = vmatprep.mubr.f32.mxu1 %v2208_v21  ;;  %v6725_v58 = vpop.f32.mrf.mxu0  ;;  %3322 = vmatpush1.xpose.msra.mxu0 %v2547_v47  ;;  %v2216_v53 = vmax.f32 %v1155_v3, 0.0  ;;  %v2213_v21 = vmax.f32 %v788_v1, 0.0  ;;  %v2215_v47 = vmax.f32 %v1153_v0, 0.0  ;;  %v794_v3 = vadd.f32 %v8175_v59, %v6391_v42  ;;  %v2540_v1 = vld [vmem:[%s5367_s25 + $0x28] sm:$0xff] }
 0x28d   : > { %v6727_v30 = vpop.f32.mrf.mxu1  ;;  %3637 = vmatpush1.xpose.msra.mxu1 %v2549_v11  ;;  %v8176_v11 = vld [vmem:[#allocation56_spill] sm:$0xff]  ;;  %v2222_v50 = vmax.f32 %v796_v54, 0.0  ;;  %3323 = vmatprep.subr.mxu0 %v2540_v1 }
 0x28e   : > { %8171 = vst [vmem:[#allocation52_spill] sm:$0xff] %v6727_v30  ;;  %v6733_v24 = vpop.f32.mrf.mxu0  ;;  %2803 = vmatmul.mubr.f32.gmra.mxu0 %v2205_v49  ;;  %v1159_v15 = vadd.f32 %v8176_v11, %v6393_v29  ;;  %v2224_v49 = vmax.f32 %v1161_v8, 0.0  ;;  %v2539_v11 = vld [vmem:[%s5367_s25 + $0x20] sm:$0xff]  ;;  %v2221_v54 = vmax.f32 %v794_v3, 0.0  ;;  %v1173_v3 = vadd.f32 %v6050_v7, %v6385_v43 }
 0x28f   : > { %8173 = vst [vmem:[#allocation53_spill] sm:$0xff] %v6733_v24  ;;  %v6735_v12 = vpop.f32.mrf.mxu1  ;;  %3118 = vmatmul.mubr.f32.gmra.mxu1 %v2207_v52  ;;  %2807 = vmatprep.mubr.f32.mxu0 %v2214_v20  ;;  %v802_v20 = vadd.f32 %v6036_v31, %v6383_v44  ;;  %v2541_v24 = vld [vmem:[%s5367_s25 + $0x30] sm:$0xff] }
 0x290   : > { %8174 = vst [vmem:[#allocation54_spill] sm:$0xff] %v6735_v12  ;;  %3122 = vmatprep.mubr.f32.mxu1 %v2216_v53  ;;  %v6741_v2 = vpop.f32.mrf.mxu0  ;;  %v8179_v53 = vld [vmem:[#allocation60_spill] sm:$0xff]  ;;  %v2542_v12 = vld [vmem:[%s5367_s25 + $0x38] sm:$0xff]  ;;  %v2223_v8 = vmax.f32 %v1159_v15, 0.0  ;;  %3324 = vmatpush1.xpose.msra.mxu0 %v2539_v11  ;;  %v2240_v11 = vmax.f32 %v1173_v3, 0.0 }
 0x291   : > { %8177 = vst [vmem:[#allocation57_spill] sm:$0xff] %v6741_v2  ;;  %v6743_v57 = vpop.f32.mrf.mxu1  ;;  %v1167_v52 = vadd.f32 %v8179_v53, %v6385_v43  ;;  %v8182_v2 = vld [vmem:[#allocation59_spill] sm:$0xff]  ;;  %3638 = vmatprep.subr.mxu1 %v2542_v12  ;;  %v8191_v3 = vld [vmem:[#allocation64_spill] sm:$0xff] }
 0x292   : > { %8178 = vst [vmem:[#allocation55_spill] sm:$0xff] %v6743_v57  ;;  %v6750_v0 = vpop.f32.mrf.mxu0  ;;  %2808 = vmatmul.mubr.f32.gmra.mxu0 %v2213_v21  ;;  %v8181_v57 = vld [vmem:[#allocation58_spill] sm:$0xff]  ;;  %v1165_v53 = vadd.f32 %v8182_v2, %v6393_v29  ;;  %v2230_v21 = vmax.f32 %v802_v20, 0.0  ;;  %3639 = vmatpush1.xpose.msra.mxu1 %v2541_v24 }
 0x293   : > { %8180 = vst [vmem:[#allocation56_spill] sm:$0xff] %v6750_v0  ;;  %v6752_v59 = vpop.f32.mrf.mxu1  ;;  %3123 = vmatmul.mubr.f32.gmra.mxu1 %v2215_v47  ;;  %2812 = vmatprep.mubr.f32.mxu0 %v2222_v50  ;;  %v800_v31 = vadd.f32 %v8181_v57, %v6391_v42  ;;  %v2232_v47 = vmax.f32 %v1167_v52, 0.0  ;;  %v808_v50 = vadd.f32 %v6048_v17, %v6383_v44  ;;  %v8186_v17 = vld [vmem:[#allocation62_spill] sm:$0xff] }
 0x294   : > { %3127 = vmatprep.mubr.f32.mxu1 %v2224_v49  ;;  %v6761_v30 = vpop.f32.mrf.mxu0  ;;  %v2231_v12 = vmax.f32 %v1165_v53, 0.0  ;;  %v8185_v49 = vld [vmem:[#allocation61_spill] sm:$0xff]  ;;  %v1171_v52 = vadd.f32 %v8186_v17, %v6393_v29  ;;  %v8190_v17 = vld [vmem:[#allocation63_spill] sm:$0xff] }
 0x295   : > { %v6763_v0 = vpop.f32.mrf.mxu1  ;;  %v2229_v2 = vmax.f32 %v800_v31, 0.0  ;;  %v806_v20 = vadd.f32 %v8185_v49, %v6391_v42  ;;  %v2238_v24 = vmax.f32 %v808_v50, 0.0  ;;  %v812_v50 = vadd.f32 %v8190_v17, %v6391_v42  ;;  %v8196_v17 = vld [vmem:[#allocation66_spill] sm:$0xff] }
 0x296   : > { %v6769_v15 = vpop.f32.mrf.mxu0  ;;  %2813 = vmatmul.mubr.f32.gmra.mxu0 %v2221_v54  ;;  %v814_v54 = vadd.f32 %v6060_v23, %v6383_v44  ;;  %v2239_v49 = vmax.f32 %v1171_v52, 0.0 }
 0x297   : > { %8183 = vst [vmem:[#allocation60_spill] sm:$0xff] %v6769_v15  ;;  %v6771_v57 = vpop.f32.mrf.mxu1  ;;  %3128 = vmatmul.mubr.f32.gmra.mxu1 %v2223_v8  ;;  %2817 = vmatprep.mubr.f32.mxu0 %v2230_v21  ;;  %v8187_v8 = vld [vmem:[#allocation65_spill] sm:$0xff] }
 0x298   : > { %8184 = vst [vmem:[#allocation58_spill] sm:$0xff] %v6771_v57  ;;  %3132 = vmatprep.mubr.f32.mxu1 %v2232_v47  ;;  %v6777_v1 = vpop.f32.mrf.mxu0  ;;  %v1179_v21 = vadd.f32 %v8187_v8, %v6385_v43  ;;  %v2237_v47 = vmax.f32 %v806_v20, 0.0  ;;  %v1177_v57 = vadd.f32 %v8191_v3, %v6393_v29  ;;  %v2246_v8 = vmax.f32 %v814_v54, 0.0 }
 0x299   : > { %v6779_v7 = vpop.f32.mrf.mxu1  ;;  %v818_v54 = vadd.f32 %v8196_v17, %v6391_v42  ;;  %v8200_v17 = vld [vmem:[#allocation69_spill] sm:$0xff] }
 0x29a   : > { %v6785_v31 = vpop.f32.mrf.mxu0  ;;  %2818 = vmatmul.mubr.f32.gmra.mxu0 %v2229_v2 }
 0x29b   : > { %8188 = vst [vmem:[#allocation59_spill] sm:$0xff] %v6785_v31  ;;  %v6787_v53 = vpop.f32.mrf.mxu1  ;;  %3133 = vmatmul.mubr.f32.gmra.mxu1 %v2231_v12  ;;  %2822 = vmatprep.mubr.f32.mxu0 %v2238_v24  ;;  %v2248_v31 = vmax.f32 %v1179_v21, 0.0  ;;  %v1185_v12 = vadd.f32 %v6076_v45, %v6385_v43  ;;  %v2245_v24 = vmax.f32 %v812_v50, 0.0  ;;  %v8197_v21 = vld [vmem:[#allocation67_spill] sm:$0xff]  ;;  %v2253_v50 = vmax.f32 %v818_v54, 0.0 }
 0x29c   : > { %8189 = vst [vmem:[#allocation61_spill] sm:$0xff] %v6787_v53  ;;  %3137 = vmatprep.mubr.f32.mxu1 %v2240_v11  ;;  %v6793_v23 = vpop.f32.mrf.mxu0  ;;  %v8193_v53 = vld [vmem:[#allocation68_spill] sm:$0xff]  ;;  %v2247_v11 = vmax.f32 %v1177_v57, 0.0  ;;  %v1183_v3 = vadd.f32 %v8197_v21, %v6393_v29 }
 0x29d   : > { %v6795_v15 = vpop.f32.mrf.mxu1  ;;  %v820_v2 = vadd.f32 %v8193_v53, %v6383_v44 }
 0x29e   : > { %8192 = vst [vmem:[#allocation62_spill] sm:$0xff] %v6795_v15  ;;  %v6801_v20 = vpop.f32.mrf.mxu0  ;;  %2823 = vmatmul.mubr.f32.gmra.mxu0 %v2237_v47  ;;  %v826_v47 = vadd.f32 %v6086_v26, %v6383_v44 }
 0x29f   : > { %8194 = vst [vmem:[#allocation65_spill] sm:$0xff] %v6801_v20  ;;  %v6803_v52 = vpop.f32.mrf.mxu1  ;;  %3138 = vmatmul.mubr.f32.gmra.mxu1 %v2239_v49  ;;  %2827 = vmatprep.mubr.f32.mxu0 %v2246_v8  ;;  %v2254_v45 = vmax.f32 %v820_v2, 0.0  ;;  %v2256_v20 = vmax.f32 %v1185_v12, 0.0  ;;  %v2255_v8 = vmax.f32 %v1183_v3, 0.0  ;;  %v824_v2 = vadd.f32 %v8200_v17, %v6391_v42  ;;  %v8201_v12 = vld [vmem:[#allocation70_spill] sm:$0xff]  ;;  %v8206_v17 = vld [vmem:[#allocation71_spill] sm:$0xff] }
 0x2a0   : > { %8195 = vst [vmem:[#allocation63_spill] sm:$0xff] %v6803_v52  ;;  %3142 = vmatprep.mubr.f32.mxu1 %v2248_v31  ;;  %v6809_v53 = vpop.f32.mrf.mxu0  ;;  %v1191_v31 = vadd.f32 %v6088_v55, %v6385_v43  ;;  %v1189_v21 = vadd.f32 %v8201_v12, %v6393_v29  ;;  %v2262_v55 = vmax.f32 %v826_v47, 0.0  ;;  %v830_v47 = vadd.f32 %v8206_v17, %v6391_v42  ;;  %v8212_v17 = vld [vmem:[#allocation74_spill] sm:$0xff] }
 0x2a1   : > { %v6811_v15 = vpop.f32.mrf.mxu1  ;;  %v2261_v3 = vmax.f32 %v824_v2, 0.0 }
 0x2a2   : > { %v6817_v49 = vpop.f32.mrf.mxu0  ;;  %2828 = vmatmul.mubr.f32.gmra.mxu0 %v2245_v24 }
 0x2a3   : > { %8198 = vst [vmem:[#allocation64_spill] sm:$0xff] %v6817_v49  ;;  %v6819_v57 = vpop.f32.mrf.mxu1  ;;  %3143 = vmatmul.mubr.f32.gmra.mxu1 %v2247_v11  ;;  %2832 = vmatprep.mubr.f32.mxu0 %v2254_v45  ;;  %v2264_v49 = vmax.f32 %v1191_v31, 0.0  ;;  %v2263_v45 = vmax.f32 %v1189_v21, 0.0  ;;  %v8207_v31 = vld [vmem:[#allocation72_spill] sm:$0xff]  ;;  %v2269_v21 = vmax.f32 %v830_v47, 0.0 }
 0x2a4   : > { %8199 = vst [vmem:[#allocation68_spill] sm:$0xff] %v6819_v57  ;;  %3147 = vmatprep.mubr.f32.mxu1 %v2256_v20  ;;  %v6825_v26 = vpop.f32.mrf.mxu0  ;;  %v8203_v57 = vld [vmem:[#allocation73_spill] sm:$0xff]  ;;  %v1197_v20 = vadd.f32 %v6100_v25, %v6385_v43  ;;  %v1195_v12 = vadd.f32 %v8207_v31, %v6393_v29 }
 0x2a5   : > { %v6827_v52 = vpop.f32.mrf.mxu1  ;;  %v832_v24 = vadd.f32 %v8203_v57, %v6383_v44 }
 0x2a6   : > { %8202 = vst [vmem:[#allocation66_spill] sm:$0xff] %v6827_v52  ;;  %v6833_v11 = vpop.f32.mrf.mxu0  ;;  %2833 = vmatmul.mubr.f32.gmra.mxu0 %v2253_v50 }
 0x2a7   : > { %8204 = vst [vmem:[#allocation67_spill] sm:$0xff] %v6833_v11  ;;  %v6835_v54 = vpop.f32.mrf.mxu1  ;;  %3148 = vmatmul.mubr.f32.gmra.mxu1 %v2255_v8  ;;  %2837 = vmatprep.mubr.f32.mxu0 %v2262_v55  ;;  %v2270_v25 = vmax.f32 %v832_v24, 0.0  ;;  %v2272_v11 = vmax.f32 %v1197_v20, 0.0  ;;  %v2271_v55 = vmax.f32 %v1195_v12, 0.0  ;;  %v836_v24 = vadd.f32 %v8212_v17, %v6391_v42  ;;  %v8213_v20 = vld [vmem:[#allocation75_spill] sm:$0xff]  ;;  %v8218_v17 = vld [vmem:[#allocation77_spill] sm:$0xff] }
 0x2a8   : > { %8205 = vst [vmem:[#allocation69_spill] sm:$0xff] %v6835_v54  ;;  %3152 = vmatprep.mubr.f32.mxu1 %v2264_v49  ;;  %v6841_v57 = vpop.f32.mrf.mxu0  ;;  %v8209_v54 = vld [vmem:[#allocation76_spill] sm:$0xff]  ;;  %v1203_v49 = vadd.f32 %v6112_v13, %v6385_v43  ;;  %v1201_v31 = vadd.f32 %v8213_v20, %v6393_v29 }
 0x2a9   : > { %v6843_v52 = vpop.f32.mrf.mxu1  ;;  %v838_v50 = vadd.f32 %v8209_v54, %v6383_v44  ;;  %v2277_v12 = vmax.f32 %v836_v24, 0.0 }
 0x2aa   : > { %8208 = vst [vmem:[#allocation70_spill] sm:$0xff] %v6843_v52  ;;  %v6849_v8 = vpop.f32.mrf.mxu0  ;;  %2838 = vmatmul.mubr.f32.gmra.mxu0 %v2261_v3 }
 0x2ab   : > { %8210 = vst [vmem:[#allocation73_spill] sm:$0xff] %v6849_v8  ;;  %v6851_v2 = vpop.f32.mrf.mxu1  ;;  %3153 = vmatmul.mubr.f32.gmra.mxu1 %v2263_v45  ;;  %2842 = vmatprep.mubr.f32.mxu0 %v2270_v25  ;;  %v2278_v13 = vmax.f32 %v838_v50, 0.0  ;;  %v2280_v8 = vmax.f32 %v1203_v49, 0.0  ;;  %v2279_v25 = vmax.f32 %v1201_v31, 0.0  ;;  %v842_v50 = vadd.f32 %v8218_v17, %v6391_v42  ;;  %v8219_v49 = vld [vmem:[#allocation78_spill] sm:$0xff]  ;;  %v8224_v17 = vld [vmem:[#allocation80_spill] sm:$0xff] }
 0x2ac   : > { %8211 = vst [vmem:[#allocation71_spill] sm:$0xff] %v6851_v2  ;;  %3157 = vmatprep.mubr.f32.mxu1 %v2272_v11  ;;  %v6857_v54 = vpop.f32.mrf.mxu0  ;;  %v8215_v2 = vld [vmem:[#allocation79_spill] sm:$0xff]  ;;  %v1209_v11 = vadd.f32 %v6124_v40, %v6385_v43  ;;  %v1207_v20 = vadd.f32 %v8219_v49, %v6393_v29 }
 0x2ad   : > { %v6859_v52 = vpop.f32.mrf.mxu1  ;;  %v844_v3 = vadd.f32 %v8215_v2, %v6383_v44  ;;  %v2285_v31 = vmax.f32 %v842_v50, 0.0 }
 0x2ae   : > { %8214 = vst [vmem:[#allocation72_spill] sm:$0xff] %v6859_v52  ;;  %v6865_v45 = vpop.f32.mrf.mxu0  ;;  %2843 = vmatmul.mubr.f32.gmra.mxu0 %v2269_v21 }
 0x2af   : > { %8216 = vst [vmem:[#allocation76_spill] sm:$0xff] %v6865_v45  ;;  %v6867_v47 = vpop.f32.mrf.mxu1  ;;  %3158 = vmatmul.mubr.f32.gmra.mxu1 %v2271_v55  ;;  %2847 = vmatprep.mubr.f32.mxu0 %v2278_v13  ;;  %v2286_v40 = vmax.f32 %v844_v3, 0.0  ;;  %v2288_v45 = vmax.f32 %v1209_v11, 0.0  ;;  %v2287_v13 = vmax.f32 %v1207_v20, 0.0  ;;  %v848_v3 = vadd.f32 %v8224_v17, %v6391_v42  ;;  %v8225_v11 = vld [vmem:[#allocation81_spill] sm:$0xff]  ;;  %v8230_v17 = vld [vmem:[#allocation83_spill] sm:$0xff] }
 0x2b0   : > { %8217 = vst [vmem:[#allocation74_spill] sm:$0xff] %v6867_v47  ;;  %3162 = vmatprep.mubr.f32.mxu1 %v2280_v8  ;;  %v6873_v2 = vpop.f32.mrf.mxu0  ;;  %v8221_v47 = vld [vmem:[#allocation82_spill] sm:$0xff]  ;;  %v1215_v8 = vadd.f32 %v6136_v28, %v6385_v43  ;;  %v1213_v49 = vadd.f32 %v8225_v11, %v6393_v29 }
 0x2b1   : > { %v6875_v52 = vpop.f32.mrf.mxu1  ;;  %v850_v21 = vadd.f32 %v8221_v47, %v6383_v44  ;;  %v2293_v20 = vmax.f32 %v848_v3, 0.0 }
 0x2b2   : > { %8220 = vst [vmem:[#allocation75_spill] sm:$0xff] %v6875_v52  ;;  %v6881_v55 = vpop.f32.mrf.mxu0  ;;  %2848 = vmatmul.mubr.f32.gmra.mxu0 %v2277_v12 }
 0x2b3   : > { %8222 = vst [vmem:[#allocation79_spill] sm:$0xff] %v6881_v55  ;;  %v6883_v24 = vpop.f32.mrf.mxu1  ;;  %3163 = vmatmul.mubr.f32.gmra.mxu1 %v2279_v25  ;;  %2852 = vmatprep.mubr.f32.mxu0 %v2286_v40  ;;  %v2294_v28 = vmax.f32 %v850_v21, 0.0  ;;  %v2296_v55 = vmax.f32 %v1215_v8, 0.0  ;;  %v2295_v40 = vmax.f32 %v1213_v49, 0.0  ;;  %v854_v21 = vadd.f32 %v8230_v17, %v6391_v42  ;;  %v8231_v8 = vld [vmem:[#allocation84_spill] sm:$0xff]  ;;  %v8236_v17 = vld [vmem:[#allocation86_spill] sm:$0xff] }
 0x2b4   : > { %8223 = vst [vmem:[#allocation77_spill] sm:$0xff] %v6883_v24  ;;  %3167 = vmatprep.mubr.f32.mxu1 %v2288_v45  ;;  %v6889_v47 = vpop.f32.mrf.mxu0  ;;  %v8227_v24 = vld [vmem:[#allocation85_spill] sm:$0xff]  ;;  %v1221_v45 = vadd.f32 %v6148_v32, %v6385_v43  ;;  %v1219_v11 = vadd.f32 %v8231_v8, %v6393_v29 }
 0x2b5   : > { %v6891_v52 = vpop.f32.mrf.mxu1  ;;  %v856_v12 = vadd.f32 %v8227_v24, %v6383_v44  ;;  %v2301_v49 = vmax.f32 %v854_v21, 0.0 }
 0x2b6   : > { %8226 = vst [vmem:[#allocation78_spill] sm:$0xff] %v6891_v52  ;;  %v6897_v25 = vpop.f32.mrf.mxu0  ;;  %2853 = vmatmul.mubr.f32.gmra.mxu0 %v2285_v31 }
 0x2b7   : > { %8228 = vst [vmem:[#allocation82_spill] sm:$0xff] %v6897_v25  ;;  %v6899_v50 = vpop.f32.mrf.mxu1  ;;  %3168 = vmatmul.mubr.f32.gmra.mxu1 %v2287_v13  ;;  %2857 = vmatprep.mubr.f32.mxu0 %v2294_v28  ;;  %v2302_v32 = vmax.f32 %v856_v12, 0.0  ;;  %v2304_v25 = vmax.f32 %v1221_v45, 0.0  ;;  %v2303_v28 = vmax.f32 %v1219_v11, 0.0  ;;  %v860_v12 = vadd.f32 %v8236_v17, %v6391_v42  ;;  %v8237_v45 = vld [vmem:[#allocation87_spill] sm:$0xff]  ;;  %v8242_v17 = vld [vmem:[#allocation89_spill] sm:$0xff] }
 0x2b8   : > { %8229 = vst [vmem:[#allocation80_spill] sm:$0xff] %v6899_v50  ;;  %3172 = vmatprep.mubr.f32.mxu1 %v2296_v55  ;;  %v6905_v24 = vpop.f32.mrf.mxu0  ;;  %v8233_v50 = vld [vmem:[#allocation88_spill] sm:$0xff]  ;;  %v1227_v55 = vadd.f32 %v6160_v33, %v6385_v43  ;;  %v1225_v8 = vadd.f32 %v8237_v45, %v6393_v29 }
 0x2b9   : > { %v6907_v52 = vpop.f32.mrf.mxu1  ;;  %v862_v31 = vadd.f32 %v8233_v50, %v6383_v44  ;;  %v2309_v11 = vmax.f32 %v860_v12, 0.0 }
 0x2ba   : > { %8232 = vst [vmem:[#allocation81_spill] sm:$0xff] %v6907_v52  ;;  %v6913_v13 = vpop.f32.mrf.mxu0  ;;  %2858 = vmatmul.mubr.f32.gmra.mxu0 %v2293_v20 }
 0x2bb   : > { %8234 = vst [vmem:[#allocation85_spill] sm:$0xff] %v6913_v13  ;;  %v6915_v3 = vpop.f32.mrf.mxu1  ;;  %3173 = vmatmul.mubr.f32.gmra.mxu1 %v2295_v40  ;;  %2862 = vmatprep.mubr.f32.mxu0 %v2302_v32  ;;  %v2310_v33 = vmax.f32 %v862_v31, 0.0  ;;  %v2312_v13 = vmax.f32 %v1227_v55, 0.0  ;;  %v2311_v32 = vmax.f32 %v1225_v8, 0.0  ;;  %v866_v31 = vadd.f32 %v8242_v17, %v6391_v42  ;;  %v8243_v55 = vld [vmem:[#allocation90_spill] sm:$0xff]  ;;  %v8248_v17 = vld [vmem:[#allocation92_spill] sm:$0xff] }
 0x2bc   : > { %8235 = vst [vmem:[#allocation83_spill] sm:$0xff] %v6915_v3  ;;  %3177 = vmatprep.mubr.f32.mxu1 %v2304_v25  ;;  %v6921_v50 = vpop.f32.mrf.mxu0  ;;  %v8239_v3 = vld [vmem:[#allocation91_spill] sm:$0xff]  ;;  %v1233_v25 = vadd.f32 %v6172_v34, %v6385_v43  ;;  %v1231_v45 = vadd.f32 %v8243_v55, %v6393_v29 }
 0x2bd   : > { %v6923_v52 = vpop.f32.mrf.mxu1  ;;  %v868_v20 = vadd.f32 %v8239_v3, %v6383_v44  ;;  %v2317_v8 = vmax.f32 %v866_v31, 0.0 }
 0x2be   : > { %8238 = vst [vmem:[#allocation84_spill] sm:$0xff] %v6923_v52  ;;  %v6929_v40 = vpop.f32.mrf.mxu0  ;;  %2863 = vmatmul.mubr.f32.gmra.mxu0 %v2301_v49 }
 0x2bf   : > { %8240 = vst [vmem:[#allocation88_spill] sm:$0xff] %v6929_v40  ;;  %v6931_v21 = vpop.f32.mrf.mxu1  ;;  %3178 = vmatmul.mubr.f32.gmra.mxu1 %v2303_v28  ;;  %2867 = vmatprep.mubr.f32.mxu0 %v2310_v33  ;;  %v2318_v34 = vmax.f32 %v868_v20, 0.0  ;;  %v2320_v40 = vmax.f32 %v1233_v25, 0.0  ;;  %v2319_v33 = vmax.f32 %v1231_v45, 0.0  ;;  %v872_v20 = vadd.f32 %v8248_v17, %v6391_v42  ;;  %v8249_v25 = vld [vmem:[#allocation93_spill] sm:$0xff]  ;;  %v8255_v17 = vld [vmem:[#allocation95_spill] sm:$0xff] }
 0x2c0   : > { %8241 = vst [vmem:[#allocation86_spill] sm:$0xff] %v6931_v21  ;;  %3182 = vmatprep.mubr.f32.mxu1 %v2312_v13  ;;  %v6937_v3 = vpop.f32.mrf.mxu0  ;;  %v8245_v21 = vld [vmem:[#allocation94_spill] sm:$0xff]  ;;  %v1239_v13 = vadd.f32 %v6184_v36, %v6385_v43  ;;  %v1237_v55 = vadd.f32 %v8249_v25, %v6393_v29 }
 0x2c1   : > { %v6939_v52 = vpop.f32.mrf.mxu1  ;;  %v874_v49 = vadd.f32 %v8245_v21, %v6383_v44  ;;  %v2325_v45 = vmax.f32 %v872_v20, 0.0 }
 0x2c2   : > { %8244 = vst [vmem:[#allocation87_spill] sm:$0xff] %v6939_v52  ;;  %v6945_v28 = vpop.f32.mrf.mxu0  ;;  %2868 = vmatmul.mubr.f32.gmra.mxu0 %v2309_v11 }
 0x2c3   : > { %8246 = vst [vmem:[#allocation91_spill] sm:$0xff] %v6945_v28  ;;  %v6947_v12 = vpop.f32.mrf.mxu1  ;;  %3183 = vmatmul.mubr.f32.gmra.mxu1 %v2311_v32  ;;  %2872 = vmatprep.mubr.f32.mxu0 %v2318_v34  ;;  %v2326_v36 = vmax.f32 %v874_v49, 0.0  ;;  %v2328_v28 = vmax.f32 %v1239_v13, 0.0  ;;  %v2327_v34 = vmax.f32 %v1237_v55, 0.0  ;;  %v878_v49 = vadd.f32 %v8255_v17, %v6391_v42  ;;  %v8256_v13 = vld [vmem:[#allocation96_spill] sm:$0xff]  ;;  %v8262_v17 = vld [vmem:[#allocation98_spill] sm:$0xff] }
 0x2c4   : > { %8247 = vst [vmem:[#allocation89_spill] sm:$0xff] %v6947_v12  ;;  %3187 = vmatprep.mubr.f32.mxu1 %v2320_v40  ;;  %v6953_v21 = vpop.f32.mrf.mxu0  ;;  %v8252_v12 = vld [vmem:[#allocation97_spill] sm:$0xff]  ;;  %v1245_v40 = vadd.f32 %v6196_v37, %v6385_v43  ;;  %v1243_v25 = vadd.f32 %v8256_v13, %v6393_v29 }
 0x2c5   : > { %8250 = vst [vmem:[#allocation90_spill] sm:$0xff] %v6953_v21  ;;  %v6955_v52 = vpop.f32.mrf.mxu1  ;;  %v880_v11 = vadd.f32 %v8252_v12, %v6383_v44  ;;  %v2333_v55 = vmax.f32 %v878_v49, 0.0 }
 0x2c6   : > { %8251 = vst [vmem:[#allocation94_spill] sm:$0xff] %v6955_v52  ;;  %v6961_v32 = vpop.f32.mrf.mxu0  ;;  %2873 = vmatmul.mubr.f32.gmra.mxu0 %v2317_v8 }
 0x2c7   : > { %8253 = vst [vmem:[#allocation92_spill] sm:$0xff] %v6961_v32  ;;  %v6963_v31 = vpop.f32.mrf.mxu1  ;;  %3188 = vmatmul.mubr.f32.gmra.mxu1 %v2319_v33  ;;  %2877 = vmatprep.mubr.f32.mxu0 %v2326_v36  ;;  %v2334_v37 = vmax.f32 %v880_v11, 0.0  ;;  %v2336_v32 = vmax.f32 %v1245_v40, 0.0  ;;  %v2335_v36 = vmax.f32 %v1243_v25, 0.0  ;;  %v884_v11 = vadd.f32 %v8262_v17, %v6391_v42  ;;  %v8263_v40 = vld [vmem:[#allocation99_spill] sm:$0xff]  ;;  %v8269_v17 = vld [vmem:[#allocation101_spill] sm:$0xff] }
 0x2c8   : > { %8254 = vst [vmem:[#allocation93_spill] sm:$0xff] %v6963_v31  ;;  %3192 = vmatprep.mubr.f32.mxu1 %v2328_v28  ;;  %v6969_v12 = vpop.f32.mrf.mxu0  ;;  %v8259_v31 = vld [vmem:[#allocation100_spill] sm:$0xff]  ;;  %v1251_v28 = vadd.f32 %v6208_v38, %v6385_v43  ;;  %v1249_v13 = vadd.f32 %v8263_v40, %v6393_v29 }
 0x2c9   : > { %8257 = vst [vmem:[#allocation97_spill] sm:$0xff] %v6969_v12  ;;  %v6971_v52 = vpop.f32.mrf.mxu1  ;;  %v886_v8 = vadd.f32 %v8259_v31, %v6383_v44  ;;  %v2341_v25 = vmax.f32 %v884_v11, 0.0 }
 0x2ca   : > { %8258 = vst [vmem:[#allocation95_spill] sm:$0xff] %v6971_v52  ;;  %v6977_v33 = vpop.f32.mrf.mxu0  ;;  %2878 = vmatmul.mubr.f32.gmra.mxu0 %v2325_v45 }
 0x2cb   : > { %8260 = vst [vmem:[#allocation96_spill] sm:$0xff] %v6977_v33  ;;  %v6979_v20 = vpop.f32.mrf.mxu1  ;;  %3193 = vmatmul.mubr.f32.gmra.mxu1 %v2327_v34  ;;  %2882 = vmatprep.mubr.f32.mxu0 %v2334_v37  ;;  %v2342_v38 = vmax.f32 %v886_v8, 0.0  ;;  %v2344_v33 = vmax.f32 %v1251_v28, 0.0  ;;  %v2343_v37 = vmax.f32 %v1249_v13, 0.0  ;;  %v890_v8 = vadd.f32 %v8269_v17, %v6391_v42  ;;  %v8270_v28 = vld [vmem:[#allocation102_spill] sm:$0xff]  ;;  %v8276_v17 = vld [vmem:[#allocation104_spill] sm:$0xff] }
 0x2cc   : > { %8261 = vst [vmem:[#allocation100_spill] sm:$0xff] %v6979_v20  ;;  %3197 = vmatprep.mubr.f32.mxu1 %v2336_v32  ;;  %v6985_v31 = vpop.f32.mrf.mxu0  ;;  %v8266_v20 = vld [vmem:[#allocation103_spill] sm:$0xff]  ;;  %v1257_v32 = vadd.f32 %v6220_v39, %v6385_v43  ;;  %v1255_v40 = vadd.f32 %v8270_v28, %v6393_v29 }
 0x2cd   : > { %8264 = vst [vmem:[#allocation98_spill] sm:$0xff] %v6985_v31  ;;  %v6987_v52 = vpop.f32.mrf.mxu1  ;;  %v892_v45 = vadd.f32 %v8266_v20, %v6383_v44  ;;  %v2349_v13 = vmax.f32 %v890_v8, 0.0 }
 0x2ce   : > { %8265 = vst [vmem:[#allocation99_spill] sm:$0xff] %v6987_v52  ;;  %v6993_v34 = vpop.f32.mrf.mxu0  ;;  %2883 = vmatmul.mubr.f32.gmra.mxu0 %v2333_v55 }
 0x2cf   : > { %8267 = vst [vmem:[#allocation103_spill] sm:$0xff] %v6993_v34  ;;  %v6995_v49 = vpop.f32.mrf.mxu1  ;;  %3198 = vmatmul.mubr.f32.gmra.mxu1 %v2335_v36  ;;  %2887 = vmatprep.mubr.f32.mxu0 %v2342_v38  ;;  %v2350_v39 = vmax.f32 %v892_v45, 0.0  ;;  %v2352_v34 = vmax.f32 %v1257_v32, 0.0  ;;  %v2351_v38 = vmax.f32 %v1255_v40, 0.0  ;;  %v896_v45 = vadd.f32 %v8276_v17, %v6391_v42  ;;  %v8277_v32 = vld [vmem:[#allocation105_spill] sm:$0xff] }
 0x2d0   : > { %8268 = vst [vmem:[#allocation178_spill] sm:$0xff] %v6995_v49  ;;  %3202 = vmatprep.mubr.f32.mxu1 %v2344_v33  ;;  %v7001_v20 = vpop.f32.mrf.mxu0  ;;  %v8273_v49 = vld [vmem:[#allocation106_spill] sm:$0xff]  ;;  %v1263_v33 = vadd.f32 %v6232_v41, %v6385_v43  ;;  %v1261_v28 = vadd.f32 %v8277_v32, %v6393_v29  ;;  %v8284_v32 = vld [vmem:[#allocation107_spill] sm:$0xff] }
 0x2d1   : > { %8271 = vst [vmem:[#allocation101_spill] sm:$0xff] %v7001_v20  ;;  %v7003_v52 = vpop.f32.mrf.mxu1  ;;  %v898_v55 = vadd.f32 %v8273_v49, %v6383_v44  ;;  %v8385_v20 = vld [vmem:[#allocation162_spill] sm:$0xff] }
 0x2d2   : > { %8272 = vst [vmem:[#allocation102_spill] sm:$0xff] %v7003_v52  ;;  %v7009_v36 = vpop.f32.mrf.mxu0  ;;  %2888 = vmatmul.mubr.f32.gmra.mxu0 %v2341_v25  ;;  %v2359_v17 = vmax.f32 %v1261_v28, 0.0  ;;  %v982_v31 = vadd.f32 %v8385_v20, %v6383_v44 }
 0x2d3   : > { %8274 = vst [vmem:[#allocation106_spill] sm:$0xff] %v7009_v36  ;;  %v7011_v11 = vpop.f32.mrf.mxu1  ;;  %3203 = vmatmul.mubr.f32.gmra.mxu1 %v2343_v37  ;;  %2892 = vmatprep.mubr.f32.mxu0 %v2350_v39  ;;  %v2358_v41 = vmax.f32 %v898_v55, 0.0  ;;  %v2360_v36 = vmax.f32 %v1263_v33, 0.0  ;;  %v8281_v37 = vld [vmem:[#allocation110_spill] sm:$0xff]  ;;  %v2357_v39 = vmax.f32 %v896_v45, 0.0  ;;  %v902_v55 = vadd.f32 %v8284_v32, %v6391_v42  ;;  %v8285_v33 = vld [vmem:[#allocation108_spill] sm:$0xff] }
 0x2d4   : > { %8275 = vst [vmem:[#allocation179_spill] sm:$0xff] %v7011_v11  ;;  %3207 = vmatprep.mubr.f32.mxu1 %v2352_v34  ;;  %v7017_v49 = vpop.f32.mrf.mxu0  ;;  %v8280_v11 = vld [vmem:[#allocation109_spill] sm:$0xff]  ;;  %v1269_v34 = vadd.f32 %v8281_v37, %v6385_v43 }
 0x2d5   : > { %8278 = vst [vmem:[#allocation104_spill] sm:$0xff] %v7017_v49  ;;  %v7019_v52 = vpop.f32.mrf.mxu1  ;;  %v904_v25 = vadd.f32 %v8280_v11, %v6383_v44 }
 0x2d6   : > { %8279 = vst [vmem:[#allocation105_spill] sm:$0xff] %v7019_v52  ;;  %v7025_v8 = vpop.f32.mrf.mxu0  ;;  %2893 = vmatmul.mubr.f32.gmra.mxu0 %v2349_v13  ;;  %v1267_v52 = vadd.f32 %v8285_v33, %v6393_v29  ;;  %v8292_v33 = vld [vmem:[#allocation111_spill] sm:$0xff] }
 0x2d7   : > { %8282 = vst [vmem:[#allocation109_spill] sm:$0xff] %v7025_v8  ;;  %v7027_v40 = vpop.f32.mrf.mxu1  ;;  %3208 = vmatmul.mubr.f32.gmra.mxu1 %v2351_v38  ;;  %2897 = vmatprep.mubr.f32.mxu0 %v2358_v41  ;;  %v2366_v37 = vmax.f32 %v904_v25, 0.0  ;;  %v2368_v8 = vmax.f32 %v1269_v34, 0.0  ;;  %v8289_v38 = vld [vmem:[#allocation114_spill] sm:$0xff]  ;;  %v2365_v41 = vmax.f32 %v902_v55, 0.0  ;;  %v908_v25 = vadd.f32 %v8292_v33, %v6391_v42  ;;  %v8293_v34 = vld [vmem:[#allocation112_spill] sm:$0xff] }
 0x2d8   : > { %8283 = vst [vmem:[#allocation110_spill] sm:$0xff] %v7027_v40  ;;  %3212 = vmatprep.mubr.f32.mxu1 %v2360_v36  ;;  %v7033_v11 = vpop.f32.mrf.mxu0  ;;  %v8288_v40 = vld [vmem:[#allocation113_spill] sm:$0xff]  ;;  %v1275_v36 = vadd.f32 %v8289_v38, %v6385_v43  ;;  %v2367_v32 = vmax.f32 %v1267_v52, 0.0 }
 0x2d9   : > { %8286 = vst [vmem:[#allocation107_spill] sm:$0xff] %v7033_v11  ;;  %v7035_v49 = vpop.f32.mrf.mxu1  ;;  %v910_v13 = vadd.f32 %v8288_v40, %v6383_v44 }
 0x2da   : > { %8287 = vst [vmem:[#allocation108_spill] sm:$0xff] %v7035_v49  ;;  %v7041_v45 = vpop.f32.mrf.mxu0  ;;  %2898 = vmatmul.mubr.f32.gmra.mxu0 %v2357_v39  ;;  %v1273_v49 = vadd.f32 %v8293_v34, %v6393_v29  ;;  %v8300_v34 = vld [vmem:[#allocation115_spill] sm:$0xff] }
 0x2db   : > { %8290 = vst [vmem:[#allocation113_spill] sm:$0xff] %v7041_v45  ;;  %v7043_v28 = vpop.f32.mrf.mxu1  ;;  %3213 = vmatmul.mubr.f32.gmra.mxu1 %v2359_v17  ;;  %2902 = vmatprep.mubr.f32.mxu0 %v2366_v37  ;;  %v2374_v38 = vmax.f32 %v910_v13, 0.0  ;;  %v2376_v45 = vmax.f32 %v1275_v36, 0.0  ;;  %v8297_v17 = vld [vmem:[#allocation118_spill] sm:$0xff]  ;;  %v2373_v37 = vmax.f32 %v908_v25, 0.0  ;;  %v914_v13 = vadd.f32 %v8300_v34, %v6391_v42  ;;  %v8301_v36 = vld [vmem:[#allocation116_spill] sm:$0xff] }
 0x2dc   : > { %8291 = vst [vmem:[#allocation114_spill] sm:$0xff] %v7043_v28  ;;  %3217 = vmatprep.mubr.f32.mxu1 %v2368_v8  ;;  %v7049_v40 = vpop.f32.mrf.mxu0  ;;  %v8296_v28 = vld [vmem:[#allocation117_spill] sm:$0xff]  ;;  %v1281_v8 = vadd.f32 %v8297_v17, %v6385_v43  ;;  %v2375_v33 = vmax.f32 %v1273_v49, 0.0 }
 0x2dd   : > { %8294 = vst [vmem:[#allocation111_spill] sm:$0xff] %v7049_v40  ;;  %v7051_v11 = vpop.f32.mrf.mxu1  ;;  %v916_v39 = vadd.f32 %v8296_v28, %v6383_v44 }
 0x2de   : > { %8295 = vst [vmem:[#allocation112_spill] sm:$0xff] %v7051_v11  ;;  %v7057_v55 = vpop.f32.mrf.mxu0  ;;  %2903 = vmatmul.mubr.f32.gmra.mxu0 %v2365_v41  ;;  %v1279_v11 = vadd.f32 %v8301_v36, %v6393_v29  ;;  %v8308_v36 = vld [vmem:[#allocation119_spill] sm:$0xff] }
 0x2df   : > { %8298 = vst [vmem:[#allocation117_spill] sm:$0xff] %v7057_v55  ;;  %v7059_v52 = vpop.f32.mrf.mxu1  ;;  %3218 = vmatmul.mubr.f32.gmra.mxu1 %v2367_v32  ;;  %2907 = vmatprep.mubr.f32.mxu0 %v2374_v38  ;;  %v2382_v17 = vmax.f32 %v916_v39, 0.0  ;;  %v2384_v55 = vmax.f32 %v1281_v8, 0.0  ;;  %v8305_v32 = vld [vmem:[#allocation122_spill] sm:$0xff]  ;;  %v2381_v38 = vmax.f32 %v914_v13, 0.0  ;;  %v920_v39 = vadd.f32 %v8308_v36, %v6391_v42  ;;  %v8309_v8 = vld [vmem:[#allocation120_spill] sm:$0xff] }
 0x2e0   : > { %8299 = vst [vmem:[#allocation118_spill] sm:$0xff] %v7059_v52  ;;  %3222 = vmatprep.mubr.f32.mxu1 %v2376_v45  ;;  %v7065_v28 = vpop.f32.mrf.mxu0  ;;  %v8304_v52 = vld [vmem:[#allocation121_spill] sm:$0xff]  ;;  %v1287_v45 = vadd.f32 %v8305_v32, %v6385_v43  ;;  %v2383_v34 = vmax.f32 %v1279_v11, 0.0 }
 0x2e1   : > { %8302 = vst [vmem:[#allocation115_spill] sm:$0xff] %v7065_v28  ;;  %v7067_v40 = vpop.f32.mrf.mxu1  ;;  %v922_v41 = vadd.f32 %v8304_v52, %v6383_v44 }
 0x2e2   : > { %8303 = vst [vmem:[#allocation116_spill] sm:$0xff] %v7067_v40  ;;  %v7073_v25 = vpop.f32.mrf.mxu0  ;;  %2908 = vmatmul.mubr.f32.gmra.mxu0 %v2373_v37  ;;  %v1285_v40 = vadd.f32 %v8309_v8, %v6393_v29  ;;  %v8316_v8 = vld [vmem:[#allocation123_spill] sm:$0xff] }
 0x2e3   : > { %8306 = vst [vmem:[#allocation121_spill] sm:$0xff] %v7073_v25  ;;  %v7075_v49 = vpop.f32.mrf.mxu1  ;;  %3223 = vmatmul.mubr.f32.gmra.mxu1 %v2375_v33  ;;  %2912 = vmatprep.mubr.f32.mxu0 %v2382_v17  ;;  %v2390_v32 = vmax.f32 %v922_v41, 0.0  ;;  %v2392_v25 = vmax.f32 %v1287_v45, 0.0  ;;  %v8313_v33 = vld [vmem:[#allocation126_spill] sm:$0xff]  ;;  %v2389_v17 = vmax.f32 %v920_v39, 0.0  ;;  %v926_v41 = vadd.f32 %v8316_v8, %v6391_v42  ;;  %v8317_v45 = vld [vmem:[#allocation124_spill] sm:$0xff] }
 0x2e4   : > { %8307 = vst [vmem:[#allocation122_spill] sm:$0xff] %v7075_v49  ;;  %3227 = vmatprep.mubr.f32.mxu1 %v2384_v55  ;;  %v7081_v52 = vpop.f32.mrf.mxu0  ;;  %v8312_v49 = vld [vmem:[#allocation125_spill] sm:$0xff]  ;;  %v1293_v55 = vadd.f32 %v8313_v33, %v6385_v43  ;;  %v2391_v36 = vmax.f32 %v1285_v40, 0.0 }
 0x2e5   : > { %8310 = vst [vmem:[#allocation119_spill] sm:$0xff] %v7081_v52  ;;  %v7083_v28 = vpop.f32.mrf.mxu1  ;;  %v928_v37 = vadd.f32 %v8312_v49, %v6383_v44 }
 0x2e6   : > { %8311 = vst [vmem:[#allocation120_spill] sm:$0xff] %v7083_v28  ;;  %v7089_v13 = vpop.f32.mrf.mxu0  ;;  %2913 = vmatmul.mubr.f32.gmra.mxu0 %v2381_v38  ;;  %v1291_v28 = vadd.f32 %v8317_v45, %v6393_v29  ;;  %v8324_v45 = vld [vmem:[#allocation127_spill] sm:$0xff] }
 0x2e7   : > { %8314 = vst [vmem:[#allocation125_spill] sm:$0xff] %v7089_v13  ;;  %v7091_v11 = vpop.f32.mrf.mxu1  ;;  %3228 = vmatmul.mubr.f32.gmra.mxu1 %v2383_v34  ;;  %2917 = vmatprep.mubr.f32.mxu0 %v2390_v32  ;;  %v2398_v33 = vmax.f32 %v928_v37, 0.0  ;;  %v2400_v13 = vmax.f32 %v1293_v55, 0.0  ;;  %v8321_v34 = vld [vmem:[#allocation130_spill] sm:$0xff]  ;;  %v2397_v32 = vmax.f32 %v926_v41, 0.0  ;;  %v932_v37 = vadd.f32 %v8324_v45, %v6391_v42  ;;  %v8325_v55 = vld [vmem:[#allocation128_spill] sm:$0xff] }
 0x2e8   : > { %8315 = vst [vmem:[#allocation126_spill] sm:$0xff] %v7091_v11  ;;  %3232 = vmatprep.mubr.f32.mxu1 %v2392_v25  ;;  %v7097_v49 = vpop.f32.mrf.mxu0  ;;  %v8320_v11 = vld [vmem:[#allocation129_spill] sm:$0xff]  ;;  %v1299_v25 = vadd.f32 %v8321_v34, %v6385_v43  ;;  %v2399_v8 = vmax.f32 %v1291_v28, 0.0 }
 0x2e9   : > { %8318 = vst [vmem:[#allocation123_spill] sm:$0xff] %v7097_v49  ;;  %v7099_v52 = vpop.f32.mrf.mxu1  ;;  %v934_v38 = vadd.f32 %v8320_v11, %v6383_v44 }
 0x2ea   : > { %8319 = vst [vmem:[#allocation124_spill] sm:$0xff] %v7099_v52  ;;  %v7105_v39 = vpop.f32.mrf.mxu0  ;;  %2918 = vmatmul.mubr.f32.gmra.mxu0 %v2389_v17  ;;  %v1297_v52 = vadd.f32 %v8325_v55, %v6393_v29  ;;  %v8332_v55 = vld [vmem:[#allocation131_spill] sm:$0xff] }
 0x2eb   : > { %8322 = vst [vmem:[#allocation129_spill] sm:$0xff] %v7105_v39  ;;  %v7107_v40 = vpop.f32.mrf.mxu1  ;;  %3233 = vmatmul.mubr.f32.gmra.mxu1 %v2391_v36  ;;  %2922 = vmatprep.mubr.f32.mxu0 %v2398_v33  ;;  %v2406_v34 = vmax.f32 %v934_v38, 0.0  ;;  %v2408_v39 = vmax.f32 %v1299_v25, 0.0  ;;  %v8329_v36 = vld [vmem:[#allocation134_spill] sm:$0xff]  ;;  %v2405_v33 = vmax.f32 %v932_v37, 0.0  ;;  %v938_v38 = vadd.f32 %v8332_v55, %v6391_v42  ;;  %v8333_v25 = vld [vmem:[#allocation132_spill] sm:$0xff] }
 0x2ec   : > { %8323 = vst [vmem:[#allocation130_spill] sm:$0xff] %v7107_v40  ;;  %3237 = vmatprep.mubr.f32.mxu1 %v2400_v13  ;;  %v7113_v11 = vpop.f32.mrf.mxu0  ;;  %v8328_v40 = vld [vmem:[#allocation133_spill] sm:$0xff]  ;;  %v1305_v13 = vadd.f32 %v8329_v36, %v6385_v43  ;;  %v2407_v45 = vmax.f32 %v1297_v52, 0.0 }
 0x2ed   : > { %8326 = vst [vmem:[#allocation127_spill] sm:$0xff] %v7113_v11  ;;  %v7115_v49 = vpop.f32.mrf.mxu1  ;;  %v940_v17 = vadd.f32 %v8328_v40, %v6383_v44 }
 0x2ee   : > { %8327 = vst [vmem:[#allocation128_spill] sm:$0xff] %v7115_v49  ;;  %v7121_v41 = vpop.f32.mrf.mxu0  ;;  %2923 = vmatmul.mubr.f32.gmra.mxu0 %v2397_v32  ;;  %v1303_v49 = vadd.f32 %v8333_v25, %v6393_v29  ;;  %v8340_v25 = vld [vmem:[#allocation135_spill] sm:$0xff] }
 0x2ef   : > { %8330 = vst [vmem:[#allocation133_spill] sm:$0xff] %v7121_v41  ;;  %v7123_v28 = vpop.f32.mrf.mxu1  ;;  %3238 = vmatmul.mubr.f32.gmra.mxu1 %v2399_v8  ;;  %2927 = vmatprep.mubr.f32.mxu0 %v2406_v34  ;;  %v2414_v36 = vmax.f32 %v940_v17, 0.0  ;;  %v2416_v41 = vmax.f32 %v1305_v13, 0.0  ;;  %v8337_v8 = vld [vmem:[#allocation138_spill] sm:$0xff]  ;;  %v2413_v34 = vmax.f32 %v938_v38, 0.0  ;;  %v944_v17 = vadd.f32 %v8340_v25, %v6391_v42  ;;  %v8341_v13 = vld [vmem:[#allocation136_spill] sm:$0xff] }
 0x2f0   : > { %8331 = vst [vmem:[#allocation134_spill] sm:$0xff] %v7123_v28  ;;  %3242 = vmatprep.mubr.f32.mxu1 %v2408_v39  ;;  %v7129_v40 = vpop.f32.mrf.mxu0  ;;  %v8336_v28 = vld [vmem:[#allocation137_spill] sm:$0xff]  ;;  %v1311_v39 = vadd.f32 %v8337_v8, %v6385_v43  ;;  %v2415_v55 = vmax.f32 %v1303_v49, 0.0 }
 0x2f1   : > { %8334 = vst [vmem:[#allocation131_spill] sm:$0xff] %v7129_v40  ;;  %v7131_v11 = vpop.f32.mrf.mxu1  ;;  %v946_v32 = vadd.f32 %v8336_v28, %v6383_v44 }
 0x2f2   : > { %8335 = vst [vmem:[#allocation132_spill] sm:$0xff] %v7131_v11  ;;  %v7137_v37 = vpop.f32.mrf.mxu0  ;;  %2928 = vmatmul.mubr.f32.gmra.mxu0 %v2405_v33  ;;  %v1309_v11 = vadd.f32 %v8341_v13, %v6393_v29  ;;  %v8348_v13 = vld [vmem:[#allocation139_spill] sm:$0xff] }
 0x2f3   : > { %8338 = vst [vmem:[#allocation137_spill] sm:$0xff] %v7137_v37  ;;  %v7139_v52 = vpop.f32.mrf.mxu1  ;;  %3243 = vmatmul.mubr.f32.gmra.mxu1 %v2407_v45  ;;  %2932 = vmatprep.mubr.f32.mxu0 %v2414_v36  ;;  %v2422_v8 = vmax.f32 %v946_v32, 0.0  ;;  %v2424_v37 = vmax.f32 %v1311_v39, 0.0  ;;  %v8345_v45 = vld [vmem:[#allocation142_spill] sm:$0xff]  ;;  %v2421_v36 = vmax.f32 %v944_v17, 0.0  ;;  %v950_v32 = vadd.f32 %v8348_v13, %v6391_v42  ;;  %v8349_v39 = vld [vmem:[#allocation140_spill] sm:$0xff] }
 0x2f4   : > { %8339 = vst [vmem:[#allocation138_spill] sm:$0xff] %v7139_v52  ;;  %3247 = vmatprep.mubr.f32.mxu1 %v2416_v41  ;;  %v7145_v28 = vpop.f32.mrf.mxu0  ;;  %v8344_v52 = vld [vmem:[#allocation141_spill] sm:$0xff]  ;;  %v1317_v41 = vadd.f32 %v8345_v45, %v6385_v43  ;;  %v2423_v25 = vmax.f32 %v1309_v11, 0.0 }
 0x2f5   : > { %8342 = vst [vmem:[#allocation135_spill] sm:$0xff] %v7145_v28  ;;  %v7147_v40 = vpop.f32.mrf.mxu1  ;;  %v952_v33 = vadd.f32 %v8344_v52, %v6383_v44 }
 0x2f6   : > { %8343 = vst [vmem:[#allocation136_spill] sm:$0xff] %v7147_v40  ;;  %v7153_v38 = vpop.f32.mrf.mxu0  ;;  %2933 = vmatmul.mubr.f32.gmra.mxu0 %v2413_v34  ;;  %v1315_v40 = vadd.f32 %v8349_v39, %v6393_v29  ;;  %v8356_v39 = vld [vmem:[#allocation143_spill] sm:$0xff] }
 0x2f7   : > { %8346 = vst [vmem:[#allocation141_spill] sm:$0xff] %v7153_v38  ;;  %v7155_v49 = vpop.f32.mrf.mxu1  ;;  %3248 = vmatmul.mubr.f32.gmra.mxu1 %v2415_v55  ;;  %2937 = vmatprep.mubr.f32.mxu0 %v2422_v8  ;;  %v2430_v45 = vmax.f32 %v952_v33, 0.0  ;;  %v2432_v38 = vmax.f32 %v1317_v41, 0.0  ;;  %v8353_v55 = vld [vmem:[#allocation146_spill] sm:$0xff]  ;;  %v2429_v8 = vmax.f32 %v950_v32, 0.0  ;;  %v956_v33 = vadd.f32 %v8356_v39, %v6391_v42  ;;  %v8357_v41 = vld [vmem:[#allocation144_spill] sm:$0xff] }
 0x2f8   : > { %8347 = vst [vmem:[#allocation142_spill] sm:$0xff] %v7155_v49  ;;  %3252 = vmatprep.mubr.f32.mxu1 %v2424_v37  ;;  %v7161_v52 = vpop.f32.mrf.mxu0  ;;  %v8352_v49 = vld [vmem:[#allocation145_spill] sm:$0xff]  ;;  %v1323_v37 = vadd.f32 %v8353_v55, %v6385_v43  ;;  %v2431_v13 = vmax.f32 %v1315_v40, 0.0 }
 0x2f9   : > { %8350 = vst [vmem:[#allocation139_spill] sm:$0xff] %v7161_v52  ;;  %v7163_v28 = vpop.f32.mrf.mxu1  ;;  %v958_v34 = vadd.f32 %v8352_v49, %v6383_v44 }
 0x2fa   : > { %8351 = vst [vmem:[#allocation140_spill] sm:$0xff] %v7163_v28  ;;  %v7169_v17 = vpop.f32.mrf.mxu0  ;;  %2938 = vmatmul.mubr.f32.gmra.mxu0 %v2421_v36  ;;  %v1321_v28 = vadd.f32 %v8357_v41, %v6393_v29  ;;  %v8364_v41 = vld [vmem:[#allocation147_spill] sm:$0xff] }
 0x2fb   : > { %8354 = vst [vmem:[#allocation145_spill] sm:$0xff] %v7169_v17  ;;  %v7171_v11 = vpop.f32.mrf.mxu1  ;;  %3253 = vmatmul.mubr.f32.gmra.mxu1 %v2423_v25  ;;  %2942 = vmatprep.mubr.f32.mxu0 %v2430_v45  ;;  %v2438_v55 = vmax.f32 %v958_v34, 0.0  ;;  %v2440_v17 = vmax.f32 %v1323_v37, 0.0  ;;  %v8361_v25 = vld [vmem:[#allocation150_spill] sm:$0xff]  ;;  %v2437_v45 = vmax.f32 %v956_v33, 0.0  ;;  %v962_v34 = vadd.f32 %v8364_v41, %v6391_v42  ;;  %v8365_v37 = vld [vmem:[#allocation148_spill] sm:$0xff] }
 0x2fc   : > { %8355 = vst [vmem:[#allocation146_spill] sm:$0xff] %v7171_v11  ;;  %3257 = vmatprep.mubr.f32.mxu1 %v2432_v38  ;;  %v7177_v49 = vpop.f32.mrf.mxu0  ;;  %v8360_v11 = vld [vmem:[#allocation149_spill] sm:$0xff]  ;;  %v1329_v38 = vadd.f32 %v8361_v25, %v6385_v43  ;;  %v2439_v39 = vmax.f32 %v1321_v28, 0.0 }
 0x2fd   : > { %8358 = vst [vmem:[#allocation143_spill] sm:$0xff] %v7177_v49  ;;  %v7179_v52 = vpop.f32.mrf.mxu1  ;;  %v964_v36 = vadd.f32 %v8360_v11, %v6383_v44 }
 0x2fe   : > { %8359 = vst [vmem:[#allocation144_spill] sm:$0xff] %v7179_v52  ;;  %v7185_v32 = vpop.f32.mrf.mxu0  ;;  %2943 = vmatmul.mubr.f32.gmra.mxu0 %v2429_v8  ;;  %v1327_v52 = vadd.f32 %v8365_v37, %v6393_v29  ;;  %v8372_v37 = vld [vmem:[#allocation151_spill] sm:$0xff] }
 0x2ff   : > { %8362 = vst [vmem:[#allocation149_spill] sm:$0xff] %v7185_v32  ;;  %v7187_v40 = vpop.f32.mrf.mxu1  ;;  %3258 = vmatmul.mubr.f32.gmra.mxu1 %v2431_v13  ;;  %2947 = vmatprep.mubr.f32.mxu0 %v2438_v55  ;;  %v2446_v25 = vmax.f32 %v964_v36, 0.0  ;;  %v2448_v32 = vmax.f32 %v1329_v38, 0.0  ;;  %v8369_v13 = vld [vmem:[#allocation154_spill] sm:$0xff]  ;;  %v2445_v55 = vmax.f32 %v962_v34, 0.0  ;;  %v968_v36 = vadd.f32 %v8372_v37, %v6391_v42  ;;  %v8373_v38 = vld [vmem:[#allocation152_spill] sm:$0xff] }
 0x300   : > { %8363 = vst [vmem:[#allocation150_spill] sm:$0xff] %v7187_v40  ;;  %3262 = vmatprep.mubr.f32.mxu1 %v2440_v17  ;;  %v7193_v11 = vpop.f32.mrf.mxu0  ;;  %v8368_v40 = vld [vmem:[#allocation153_spill] sm:$0xff]  ;;  %v1335_v17 = vadd.f32 %v8369_v13, %v6385_v43  ;;  %v2447_v41 = vmax.f32 %v1327_v52, 0.0 }
 0x301   : > { %8366 = vst [vmem:[#allocation147_spill] sm:$0xff] %v7193_v11  ;;  %v7195_v49 = vpop.f32.mrf.mxu1  ;;  %v970_v8 = vadd.f32 %v8368_v40, %v6383_v44 }
 0x302   : > { %8367 = vst [vmem:[#allocation148_spill] sm:$0xff] %v7195_v49  ;;  %v7201_v33 = vpop.f32.mrf.mxu0  ;;  %2948 = vmatmul.mubr.f32.gmra.mxu0 %v2437_v45  ;;  %v1333_v49 = vadd.f32 %v8373_v38, %v6393_v29 }
 0x303   : > { %8370 = vst [vmem:[#allocation153_spill] sm:$0xff] %v7201_v33  ;;  %v7203_v28 = vpop.f32.mrf.mxu1  ;;  %3263 = vmatmul.mubr.f32.gmra.mxu1 %v2439_v39  ;;  %2952 = vmatprep.mubr.f32.mxu0 %v2446_v25  ;;  %v2454_v13 = vmax.f32 %v970_v8, 0.0  ;;  %v2456_v33 = vmax.f32 %v1335_v17, 0.0  ;;  %v8377_v39 = vld [vmem:[#allocation159_spill] sm:$0xff]  ;;  %v8380_v25 = vld [vmem:[#allocation157_spill] sm:$0xff]  ;;  %v2453_v8 = vmax.f32 %v968_v36, 0.0 }
 0x304   : > { %8371 = vst [vmem:[#allocation154_spill] sm:$0xff] %v7203_v28  ;;  %3267 = vmatprep.mubr.f32.mxu1 %v2448_v32  ;;  %v7209_v40 = vpop.f32.mrf.mxu0  ;;  %v8376_v28 = vld [vmem:[#allocation158_spill] sm:$0xff]  ;;  %v1341_v32 = vadd.f32 %v8377_v39, %v6385_v43  ;;  %v607_v37 = vsub.s32 5, %v8380_v25  ;;  %v615_v38 = vsub.s32 7, %v8380_v25  ;;  %v2455_v17 = vmax.f32 %v1333_v49, 0.0  ;;  %v8382_v39 = vld [vmem:[#allocation156_spill] sm:$0xff] }
 0x305   : > { %8374 = vst [vmem:[#allocation151_spill] sm:$0xff] %v7209_v40  ;;  %v7211_v11 = vpop.f32.mrf.mxu1  ;;  %v976_v45 = vadd.f32 %v8376_v28, %v6383_v44  ;;  %v8381_v28 = vld [vmem:[#allocation155_spill] sm:$0xff]  ;;  %v1339_v40 = vadd.f32 %v8382_v39, %v6393_v29  ;;  %v611_v39 = vsub.s32 6, %v8380_v25 }
 0x306   : > { %8375 = vst [vmem:[#allocation152_spill] sm:$0xff] %v7211_v11  ;;  %v7217_v34 = vpop.f32.mrf.mxu0  ;;  %2953 = vmatmul.mubr.f32.gmra.mxu0 %v2445_v55  ;;  %v974_v11 = vadd.f32 %v8381_v28, %v6391_v42  ;;  %v603_v28 = vsub.s32 4, %v8380_v25  ;;  %v2470_v25 = vmax.f32 %v982_v31, 0.0 }
 0x307   : > { %8378 = vst [vmem:[#allocation158_spill] sm:$0xff] %v7217_v34  ;;  %v7219_v52 = vpop.f32.mrf.mxu1  ;;  %3268 = vmatmul.mubr.f32.gmra.mxu1 %v2447_v41  ;;  %2957 = vmatprep.mubr.f32.mxu0 %v2454_v13  ;;  %v2462_v55 = vmax.f32 %v976_v45, 0.0  ;;  %v2464_v41 = vmax.f32 %v1341_v32, 0.0  ;;  %v2463_v32 = vmax.f32 %v1339_v40, 0.0 }
 0x308   : > { %8379 = vst [vmem:[#allocation159_spill] sm:$0xff] %v7219_v52  ;;  %3272 = vmatprep.mubr.f32.mxu1 %v2456_v33  ;;  %v7227_v34 = vpop.f32.mrf.mxu0  ;;  %v8386_v33 = vld [vmem:[#allocation163_spill] sm:$0xff]  ;;  %v2461_v20 = vmax.f32 %v974_v11, 0.0 }
 0x309   : > { %8383 = vst [vmem:[#allocation157_spill] sm:$0xff] %v7227_v34  ;;  %v7229_v52 = vpop.f32.mrf.mxu1  ;;  %v1347_v36 = vadd.f32 %v8386_v33, %v6385_v43  ;;  %v4971_v34 = vld [vmem:[%s5365_s15] sm:$0xff] }
 0x30a   : > { %8384 = vst [vmem:[#allocation155_spill] sm:$0xff] %v7229_v52  ;;  %v7235_v13 = vpop.f32.mrf.mxu0  ;;  %2958 = vmatmul.mubr.f32.gmra.mxu0 %v2453_v8  ;;  %v7242_v52 = vrot.slane %v4971_v34, %v607_v37  ;;  %v7244_v45 = vrot.slane %v4971_v34, %v615_v38  ;;  %v8389_v33 = vld [vmem:[#allocation160_spill] sm:$0xff]  ;;  %v988_v37 = vadd.f32 %v6395_v46, %v6383_v44  ;;  %v8391_v38 = vld [vmem:[#allocation166_spill] sm:$0xff]  ;;  %v8395_v46 = vld [vmem:[#allocation165_spill] sm:$0xff] }
 0x30b   : > { %8387 = vst [vmem:[#allocation156_spill] sm:$0xff] %v7235_v13  ;;  %v7237_v49 = vpop.f32.mrf.mxu1  ;;  %3273 = vmatmul.mubr.f32.gmra.mxu1 %v2455_v17  ;;  %2962 = vmatprep.mubr.f32.mxu0 %v2462_v55  ;;  %v980_v13 = vadd.f32 %v8389_v33, %v6391_v42  ;;  %v2472_v21 = vmax.f32 %v1347_v36, 0.0  ;;  %v1353_v55 = vadd.f32 %v8391_v38, %v6385_v43  ;;  %v8394_v33 = vld [vmem:[#allocation164_spill] sm:$0xff] }
 0x30c   : > { %8388 = vst [vmem:[#allocation162_spill] sm:$0xff] %v7237_v49  ;;  %3277 = vmatprep.mubr.f32.mxu1 %v2464_v41  ;;  %v8390_v49 = vld [vmem:[#allocation161_spill] sm:$0xff]  ;;  %v7250_v17 = vpop.f32.mrf.mxu0  ;;  %v7262_v41 = vrot.slane %v4971_v34, %v603_v28  ;;  %v986_v44 = vadd.f32 %v8394_v33, %v6391_v42  ;;  %v1351_v43 = vadd.f32 %v8395_v46, %v6393_v29  ;;  %v8399_v33 = vld [vmem:[#allocation167_spill] sm:$0xff] }
 0x30d   : > { %v1345_v8 = vadd.f32 %v8390_v49, %v6393_v29  ;;  %v7252_v12 = vpop.f32.mrf.mxu1  ;;  %v7264_v49 = vrot.slane %v4971_v34, %v611_v39  ;;  %v2469_v31 = vmax.f32 %v980_v13, 0.0  ;;  %v8397_v28 = vld [vmem:[#allocation169_spill] sm:$0xff]  ;;  %v8398_v39 = vld [vmem:[#allocation170_spill] sm:$0xff] }
 0x30e   : > { %v7258_v11 = vpop.f32.mrf.mxu0  ;;  %2963 = vmatmul.mubr.f32.gmra.mxu0 %v2461_v20  ;;  %v2478_v20 = vmax.f32 %v988_v37, 0.0  ;;  %v1424_v34 = vadd.f32 %v8397_v28, %v7242_v52  ;;  %v2477_v29 = vmax.f32 %v986_v44, 0.0  ;;  %v1422_v37 = vadd.f32 %v8399_v33, %v7262_v41 }
 0x30f   : > { %8392 = vst [vmem:[#allocation163_spill] sm:$0xff] %v7258_v11  ;;  %v7260_v40 = vpop.f32.mrf.mxu1  ;;  %3278 = vmatmul.mubr.f32.gmra.mxu1 %v2463_v32  ;;  %2967 = vmatprep.mubr.f32.mxu0 %v2470_v25  ;;  %v2471_v36 = vmax.f32 %v1345_v8, 0.0  ;;  %v2480_v32 = vmax.f32 %v1353_v55, 0.0  ;;  %v2479_v25 = vmax.f32 %v1351_v43, 0.0  ;;  %v8400_v55 = vld [vmem:[#allocation168_spill] sm:$0xff] }
 0x310   : > { %8393 = vst [vmem:[#allocation160_spill] sm:$0xff] %v7260_v40  ;;  %3282 = vmatprep.mubr.f32.mxu1 %v2472_v21  ;;  %v7270_v38 = vpop.f32.mrf.mxu0  ;;  %v1789_v21 = vadd.f32 %v8398_v39, %v7244_v45  ;;  %v1787_v46 = vadd.f32 %v8400_v55, %v7264_v49 }
 0x311   : > { %v7272_v11 = vpop.f32.mrf.mxu1 }
 0x312   : > { %8396 = vst [vmem:[#allocation161_spill] sm:$0xff] %v7272_v11  ;;  %v2729_v13 = vpop.f32.mrf.mxu0  ;;  %2968 = vmatmul.mubr.f32.gmra.mxu0 %v2469_v31  ;;  %v2090_v11 = vmax.f32 %v1424_v34, 0.0  ;;  %v2092_v39 = vmax.f32 %v1789_v21, 0.0  ;;  %v1430_v31 = vadd.f32 %v6427_v51, %v7242_v52  ;;  %v8402_v21 = vld [vmem:[#allocation172_spill] sm:$0xff] }
 0x313   : > { %v3044_v8 = vpop.f32.mrf.mxu1  ;;  %3283 = vmatmul.mubr.f32.gmra.mxu1 %v2471_v36  ;;  %2972 = vmatprep.mubr.f32.mxu0 %v2478_v20  ;;  %v1795_v36 = vadd.f32 %v6429_v60, %v7244_v45 }
 0x314   : > { %v7278_v42 = vadd.f32 %v3044_v8, %v2729_v13  ;;  %3287 = vmatprep.mubr.f32.mxu1 %v2480_v32  ;;  %v2731_v28 = vpop.f32.mrf.mxu0  ;;  %v2089_v32 = vmax.f32 %v1422_v37, 0.0  ;;  %v2091_v13 = vmax.f32 %v1787_v46, 0.0  ;;  %v1793_v8 = vadd.f32 %v8402_v21, %v7264_v49 }
 0x315   : > { %v3046_v40 = vpop.f32.mrf.mxu1  ;;  %v2098_v55 = vmax.f32 %v1430_v31, 0.0  ;;  %v2100_v60 = vmax.f32 %v1795_v36, 0.0  ;;  %v8405_v36 = vld [vmem:[#allocation174_spill] sm:$0xff] }
 0x316   : > { %v2734_v20 = vpop.f32.mrf.mxu0  ;;  %2973 = vmatmul.mubr.f32.gmra.mxu0 %v2477_v29  ;;  %v8401_v40 = vld [vmem:[#allocation171_spill] sm:$0xff]  ;;  %v1436_v29 = vadd.f32 %v6447_v10, %v7242_v52 }
 0x317   : > { %v3049_v44 = vpop.f32.mrf.mxu1  ;;  %3288 = vmatmul.mubr.f32.gmra.mxu1 %v2479_v25  ;;  %3357 = vmatprep.mubr.f32.mxu0 %v2090_v11  ;;  %v1428_v34 = vadd.f32 %v8401_v40, %v7262_v41  ;;  %v8403_v25 = vld [vmem:[#allocation175_spill] sm:$0xff]  ;;  %v1799_v40 = vadd.f32 %v8405_v36, %v7264_v49 }
 0x318   : > { %v7288_v43 = vadd.f32 %v3049_v44, %v2734_v20  ;;  %3672 = vmatprep.mubr.f32.mxu1 %v2092_v39  ;;  %v2736_v51 = vpop.f32.mrf.mxu0  ;;  %v1801_v28 = vadd.f32 %v8403_v25, %v7244_v45  ;;  %v2099_v20 = vmax.f32 %v1793_v8, 0.0  ;;  %v8404_v44 = vld [vmem:[#allocation173_spill] sm:$0xff] }
 0x319   : > { %v3051_v33 = vpop.f32.mrf.mxu1  ;;  %v2097_v46 = vmax.f32 %v1428_v34, 0.0  ;;  %v1434_v31 = vadd.f32 %v8404_v44, %v7262_v41  ;;  %v2106_v51 = vmax.f32 %v1436_v29, 0.0 }
 0x31a   : > { %v2739_v11 = vpop.f32.mrf.mxu0  ;;  %3358 = vmatmul.mubr.f32.vlgmr.msra.gmra.mxu0 %v2089_v32  ;;  %v2108_v33 = vmax.f32 %v1801_v28, 0.0  ;;  %v1442_v32 = vadd.f32 %v6467_v6, %v7242_v52  ;;  %v8408_v28 = vld [vmem:[#allocation177_spill] sm:$0xff] }
 0x31b   : > { %v3054_v39 = vpop.f32.mrf.mxu1  ;;  %3673 = vmatmul.mubr.f32.vlgmr.msra.gmra.mxu1 %v2091_v13  ;;  %3362 = vmatprep.mubr.f32.mxu0 %v2098_v55  ;;  %v8406_v13 = vld [vmem:[#allocation16_spill] sm:$0xff]  ;;  %v2105_v8 = vmax.f32 %v1434_v31, 0.0  ;;  %v1805_v44 = vadd.f32 %v8408_v28, %v7264_v49 }
 0x31c   : > { %v7298_v37 = vadd.f32 %v3054_v39, %v2739_v11  ;;  %3677 = vmatprep.mubr.f32.mxu1 %v2100_v60  ;;  %v2741_v10 = vpop.f32.mrf.mxu0  ;;  %v1807_v25 = vadd.f32 %v8406_v13, %v7244_v45  ;;  %v2107_v11 = vmax.f32 %v1799_v40, 0.0  ;;  %v8407_v39 = vld [vmem:[#allocation176_spill] sm:$0xff] }
 0x31d   : > { %v3056_v21 = vpop.f32.mrf.mxu1  ;;  %v1440_v29 = vadd.f32 %v8407_v39, %v7262_v41  ;;  %v2114_v10 = vmax.f32 %v1442_v32, 0.0 }
 0x31e   : > { %v2744_v55 = vpop.f32.mrf.mxu0  ;;  %3363 = vmatmul.mubr.f32.gmra.mxu0 %v2097_v46  ;;  %v2116_v21 = vmax.f32 %v1807_v25, 0.0  ;;  %v1448_v46 = vadd.f32 %v6487_v48, %v7242_v52  ;;  %v8411_v25 = vld [vmem:[#allocation20_spill] sm:$0xff] }
 0x31f   : > { %v3059_v60 = vpop.f32.mrf.mxu1  ;;  %3678 = vmatmul.mubr.f32.gmra.mxu1 %v2099_v20  ;;  %3367 = vmatprep.mubr.f32.mxu0 %v2106_v51  ;;  %v8409_v20 = vld [vmem:[#allocation18_spill] sm:$0xff]  ;;  %v2113_v40 = vmax.f32 %v1440_v29, 0.0  ;;  %v1811_v39 = vadd.f32 %v8411_v25, %v7264_v49 }
 0x320   : > { %v7308_v34 = vadd.f32 %v3059_v60, %v2744_v55  ;;  %3682 = vmatprep.mubr.f32.mxu1 %v2108_v33  ;;  %v2746_v6 = vpop.f32.mrf.mxu0  ;;  %v1813_v13 = vadd.f32 %v8409_v20, %v7244_v45  ;;  %v2115_v55 = vmax.f32 %v1805_v44, 0.0  ;;  %v8410_v60 = vld [vmem:[#allocation17_spill] sm:$0xff] }
 0x321   : > { %v3061_v36 = vpop.f32.mrf.mxu1  ;;  %v1446_v32 = vadd.f32 %v8410_v60, %v7262_v41  ;;  %v2122_v6 = vmax.f32 %v1448_v46, 0.0 }
 0x322   : > { %v2749_v51 = vpop.f32.mrf.mxu0  ;;  %3368 = vmatmul.mubr.f32.gmra.mxu0 %v2105_v8  ;;  %v2124_v36 = vmax.f32 %v1813_v13, 0.0  ;;  %v1454_v8 = vadd.f32 %v6507_v16, %v7242_v52  ;;  %v8414_v13 = vld [vmem:[#allocation23_spill] sm:$0xff] }
 0x323   : > { %v3064_v33 = vpop.f32.mrf.mxu1  ;;  %3683 = vmatmul.mubr.f32.gmra.mxu1 %v2107_v11  ;;  %3372 = vmatprep.mubr.f32.mxu0 %v2114_v10  ;;  %v8412_v11 = vld [vmem:[#allocation21_spill] sm:$0xff]  ;;  %v2121_v44 = vmax.f32 %v1446_v32, 0.0  ;;  %v1817_v60 = vadd.f32 %v8414_v13, %v7264_v49 }
 0x324   : > { %v7318_v31 = vadd.f32 %v3064_v33, %v2749_v51  ;;  %3687 = vmatprep.mubr.f32.mxu1 %v2116_v21  ;;  %v2751_v48 = vpop.f32.mrf.mxu0  ;;  %v1819_v20 = vadd.f32 %v8412_v11, %v7244_v45  ;;  %v2123_v51 = vmax.f32 %v1811_v39, 0.0  ;;  %v8413_v33 = vld [vmem:[#allocation19_spill] sm:$0xff] }
 0x325   : > { %v3066_v28 = vpop.f32.mrf.mxu1  ;;  %v1452_v46 = vadd.f32 %v8413_v33, %v7262_v41  ;;  %v2130_v48 = vmax.f32 %v1454_v8, 0.0 }
 0x326   : > { %v2754_v10 = vpop.f32.mrf.mxu0  ;;  %3373 = vmatmul.mubr.f32.gmra.mxu0 %v2113_v40  ;;  %v2132_v28 = vmax.f32 %v1819_v20, 0.0  ;;  %v1460_v40 = vadd.f32 %v6527_v4, %v7242_v52  ;;  %v8417_v20 = vld [vmem:[#allocation26_spill] sm:$0xff] }
 0x327   : > { %v3069_v21 = vpop.f32.mrf.mxu1  ;;  %3688 = vmatmul.mubr.f32.gmra.mxu1 %v2115_v55  ;;  %3377 = vmatprep.mubr.f32.mxu0 %v2122_v6  ;;  %v8415_v55 = vld [vmem:[#allocation24_spill] sm:$0xff]  ;;  %v2129_v39 = vmax.f32 %v1452_v46, 0.0  ;;  %v1823_v33 = vadd.f32 %v8417_v20, %v7264_v49 }
 0x328   : > { %v7328_v29 = vadd.f32 %v3069_v21, %v2754_v10  ;;  %3692 = vmatprep.mubr.f32.mxu1 %v2124_v36  ;;  %v2756_v16 = vpop.f32.mrf.mxu0  ;;  %v1825_v11 = vadd.f32 %v8415_v55, %v7244_v45  ;;  %v2131_v10 = vmax.f32 %v1817_v60, 0.0  ;;  %v8416_v21 = vld [vmem:[#allocation22_spill] sm:$0xff] }
 0x329   : > { %v3071_v25 = vpop.f32.mrf.mxu1  ;;  %v1458_v8 = vadd.f32 %v8416_v21, %v7262_v41  ;;  %v2138_v16 = vmax.f32 %v1460_v40, 0.0 }
 0x32a   : > { %v2759_v6 = vpop.f32.mrf.mxu0  ;;  %3378 = vmatmul.mubr.f32.gmra.mxu0 %v2121_v44  ;;  %v2140_v25 = vmax.f32 %v1825_v11, 0.0  ;;  %v1466_v44 = vadd.f32 %v6547_v56, %v7242_v52  ;;  %v8420_v11 = vld [vmem:[#allocation29_spill] sm:$0xff] }
 0x32b   : > { %v3074_v36 = vpop.f32.mrf.mxu1  ;;  %3693 = vmatmul.mubr.f32.gmra.mxu1 %v2123_v51  ;;  %3382 = vmatprep.mubr.f32.mxu0 %v2130_v48  ;;  %v8418_v51 = vld [vmem:[#allocation27_spill] sm:$0xff]  ;;  %v2137_v60 = vmax.f32 %v1458_v8, 0.0  ;;  %v1829_v21 = vadd.f32 %v8420_v11, %v7264_v49 }
 0x32c   : > { %v7338_v32 = vadd.f32 %v3074_v36, %v2759_v6  ;;  %3697 = vmatprep.mubr.f32.mxu1 %v2132_v28  ;;  %v2761_v4 = vpop.f32.mrf.mxu0  ;;  %v1831_v55 = vadd.f32 %v8418_v51, %v7244_v45  ;;  %v2139_v6 = vmax.f32 %v1823_v33, 0.0  ;;  %v8419_v36 = vld [vmem:[#allocation25_spill] sm:$0xff] }
 0x32d   : > { %v3076_v13 = vpop.f32.mrf.mxu1  ;;  %v1464_v40 = vadd.f32 %v8419_v36, %v7262_v41  ;;  %v2146_v4 = vmax.f32 %v1466_v44, 0.0 }
 0x32e   : > { %v2764_v48 = vpop.f32.mrf.mxu0  ;;  %3383 = vmatmul.mubr.f32.gmra.mxu0 %v2129_v39  ;;  %v2148_v13 = vmax.f32 %v1831_v55, 0.0  ;;  %v1472_v39 = vadd.f32 %v6567_v22, %v7242_v52  ;;  %v8423_v55 = vld [vmem:[#allocation32_spill] sm:$0xff] }
 0x32f   : > { %v3079_v28 = vpop.f32.mrf.mxu1  ;;  %3698 = vmatmul.mubr.f32.gmra.mxu1 %v2131_v10  ;;  %3387 = vmatprep.mubr.f32.mxu0 %v2138_v16  ;;  %v8421_v10 = vld [vmem:[#allocation30_spill] sm:$0xff]  ;;  %v2145_v33 = vmax.f32 %v1464_v40, 0.0  ;;  %v1835_v36 = vadd.f32 %v8423_v55, %v7264_v49 }
 0x330   : > { %v7348_v46 = vadd.f32 %v3079_v28, %v2764_v48  ;;  %3702 = vmatprep.mubr.f32.mxu1 %v2140_v25  ;;  %v2766_v56 = vpop.f32.mrf.mxu0  ;;  %v1837_v51 = vadd.f32 %v8421_v10, %v7244_v45  ;;  %v2147_v48 = vmax.f32 %v1829_v21, 0.0  ;;  %v8422_v28 = vld [vmem:[#allocation28_spill] sm:$0xff] }
 0x331   : > { %v3081_v20 = vpop.f32.mrf.mxu1  ;;  %v1470_v44 = vadd.f32 %v8422_v28, %v7262_v41  ;;  %v2154_v56 = vmax.f32 %v1472_v39, 0.0 }
 0x332   : > { %v2769_v16 = vpop.f32.mrf.mxu0  ;;  %3388 = vmatmul.mubr.f32.gmra.mxu0 %v2137_v60  ;;  %v2156_v20 = vmax.f32 %v1837_v51, 0.0  ;;  %v1478_v60 = vadd.f32 %v6587_v18, %v7242_v52  ;;  %v8426_v51 = vld [vmem:[#allocation35_spill] sm:$0xff] }
 0x333   : > { %v3084_v25 = vpop.f32.mrf.mxu1  ;;  %3703 = vmatmul.mubr.f32.gmra.mxu1 %v2139_v6  ;;  %3392 = vmatprep.mubr.f32.mxu0 %v2146_v4  ;;  %v8424_v6 = vld [vmem:[#allocation33_spill] sm:$0xff]  ;;  %v2153_v21 = vmax.f32 %v1470_v44, 0.0  ;;  %v1841_v28 = vadd.f32 %v8426_v51, %v7264_v49 }
 0x334   : > { %v7358_v8 = vadd.f32 %v3084_v25, %v2769_v16  ;;  %3707 = vmatprep.mubr.f32.mxu1 %v2148_v13  ;;  %v2771_v22 = vpop.f32.mrf.mxu0  ;;  %v1843_v10 = vadd.f32 %v8424_v6, %v7244_v45  ;;  %v2155_v16 = vmax.f32 %v1835_v36, 0.0  ;;  %v8425_v25 = vld [vmem:[#allocation31_spill] sm:$0xff] }
 0x335   : > { %v3086_v11 = vpop.f32.mrf.mxu1  ;;  %v1476_v39 = vadd.f32 %v8425_v25, %v7262_v41  ;;  %v2162_v22 = vmax.f32 %v1478_v60, 0.0 }
 0x336   : > { %v2774_v4 = vpop.f32.mrf.mxu0  ;;  %3393 = vmatmul.mubr.f32.gmra.mxu0 %v2145_v33  ;;  %v2164_v11 = vmax.f32 %v1843_v10, 0.0  ;;  %v1484_v33 = vadd.f32 %v6607_v62, %v7242_v52  ;;  %v8429_v10 = vld [vmem:[#allocation38_spill] sm:$0xff] }
 0x337   : > { %v3089_v13 = vpop.f32.mrf.mxu1  ;;  %3708 = vmatmul.mubr.f32.gmra.mxu1 %v2147_v48  ;;  %3397 = vmatprep.mubr.f32.mxu0 %v2154_v56  ;;  %v8427_v48 = vld [vmem:[#allocation36_spill] sm:$0xff]  ;;  %v2161_v36 = vmax.f32 %v1476_v39, 0.0  ;;  %v1847_v25 = vadd.f32 %v8429_v10, %v7264_v49 }
 0x338   : > { %v7368_v40 = vadd.f32 %v3089_v13, %v2774_v4  ;;  %3712 = vmatprep.mubr.f32.mxu1 %v2156_v20  ;;  %v2776_v18 = vpop.f32.mrf.mxu0  ;;  %v1849_v6 = vadd.f32 %v8427_v48, %v7244_v45  ;;  %v2163_v4 = vmax.f32 %v1841_v28, 0.0  ;;  %v8428_v13 = vld [vmem:[#allocation34_spill] sm:$0xff] }
 0x339   : > { %v3091_v55 = vpop.f32.mrf.mxu1  ;;  %v1482_v60 = vadd.f32 %v8428_v13, %v7262_v41  ;;  %v2170_v18 = vmax.f32 %v1484_v33, 0.0 }
 0x33a   : > { %v2779_v56 = vpop.f32.mrf.mxu0  ;;  %3398 = vmatmul.mubr.f32.gmra.mxu0 %v2153_v21  ;;  %v2172_v55 = vmax.f32 %v1849_v6, 0.0  ;;  %v1490_v21 = vadd.f32 %v6627_v27, %v7242_v52  ;;  %v8432_v6 = vld [vmem:[#allocation41_spill] sm:$0xff] }
 0x33b   : > { %v3094_v20 = vpop.f32.mrf.mxu1  ;;  %3713 = vmatmul.mubr.f32.gmra.mxu1 %v2155_v16  ;;  %3402 = vmatprep.mubr.f32.mxu0 %v2162_v22  ;;  %v8430_v16 = vld [vmem:[#allocation39_spill] sm:$0xff]  ;;  %v2169_v28 = vmax.f32 %v1482_v60, 0.0  ;;  %v1853_v13 = vadd.f32 %v8432_v6, %v7264_v49 }
 0x33c   : > { %v7378_v44 = vadd.f32 %v3094_v20, %v2779_v56  ;;  %3717 = vmatprep.mubr.f32.mxu1 %v2164_v11  ;;  %v2781_v62 = vpop.f32.mrf.mxu0  ;;  %v1855_v48 = vadd.f32 %v8430_v16, %v7244_v45  ;;  %v2171_v56 = vmax.f32 %v1847_v25, 0.0  ;;  %v8431_v20 = vld [vmem:[#allocation37_spill] sm:$0xff] }
 0x33d   : > { %v3096_v51 = vpop.f32.mrf.mxu1  ;;  %v1488_v33 = vadd.f32 %v8431_v20, %v7262_v41  ;;  %v2178_v62 = vmax.f32 %v1490_v21, 0.0 }
 0x33e   : > { %v2784_v22 = vpop.f32.mrf.mxu0  ;;  %3403 = vmatmul.mubr.f32.gmra.mxu0 %v2161_v36  ;;  %v2180_v51 = vmax.f32 %v1855_v48, 0.0  ;;  %v1496_v36 = vadd.f32 %v6647_v61, %v7242_v52  ;;  %v8435_v48 = vld [vmem:[#allocation44_spill] sm:$0xff] }
 0x33f   : > { %v3099_v11 = vpop.f32.mrf.mxu1  ;;  %3718 = vmatmul.mubr.f32.gmra.mxu1 %v2163_v4  ;;  %3407 = vmatprep.mubr.f32.mxu0 %v2170_v18  ;;  %v8433_v4 = vld [vmem:[#allocation42_spill] sm:$0xff]  ;;  %v2177_v25 = vmax.f32 %v1488_v33, 0.0  ;;  %v1859_v20 = vadd.f32 %v8435_v48, %v7264_v49 }
 0x340   : > { %v7388_v39 = vadd.f32 %v3099_v11, %v2784_v22  ;;  %3722 = vmatprep.mubr.f32.mxu1 %v2172_v55  ;;  %v2786_v27 = vpop.f32.mrf.mxu0  ;;  %v1861_v16 = vadd.f32 %v8433_v4, %v7244_v45  ;;  %v2179_v22 = vmax.f32 %v1853_v13, 0.0  ;;  %v8434_v11 = vld [vmem:[#allocation40_spill] sm:$0xff] }
 0x341   : > { %v3101_v10 = vpop.f32.mrf.mxu1  ;;  %v1494_v21 = vadd.f32 %v8434_v11, %v7262_v41  ;;  %v2186_v27 = vmax.f32 %v1496_v36, 0.0 }
 0x342   : > { %v2789_v18 = vpop.f32.mrf.mxu0  ;;  %3408 = vmatmul.mubr.f32.gmra.mxu0 %v2169_v28  ;;  %v2188_v10 = vmax.f32 %v1861_v16, 0.0  ;;  %v1502_v28 = vadd.f32 %v6667_v63, %v7242_v52  ;;  %v8438_v16 = vld [vmem:[#allocation47_spill] sm:$0xff] }
 0x343   : > { %v3104_v55 = vpop.f32.mrf.mxu1  ;;  %3723 = vmatmul.mubr.f32.gmra.mxu1 %v2171_v56  ;;  %3412 = vmatprep.mubr.f32.mxu0 %v2178_v62  ;;  %v8436_v56 = vld [vmem:[#allocation45_spill] sm:$0xff]  ;;  %v2185_v13 = vmax.f32 %v1494_v21, 0.0  ;;  %v1865_v11 = vadd.f32 %v8438_v16, %v7264_v49 }
 0x344   : > { %v7398_v60 = vadd.f32 %v3104_v55, %v2789_v18  ;;  %3727 = vmatprep.mubr.f32.mxu1 %v2180_v51  ;;  %v2791_v61 = vpop.f32.mrf.mxu0  ;;  %v1867_v4 = vadd.f32 %v8436_v56, %v7244_v45  ;;  %v2187_v18 = vmax.f32 %v1859_v20, 0.0  ;;  %v8437_v55 = vld [vmem:[#allocation43_spill] sm:$0xff] }
 0x345   : > { %v3106_v6 = vpop.f32.mrf.mxu1  ;;  %v1500_v36 = vadd.f32 %v8437_v55, %v7262_v41  ;;  %v2194_v61 = vmax.f32 %v1502_v28, 0.0  ;;  %v2195_v56 = vmax.f32 %v1865_v11, 0.0 }
 0x346   : > { %v2794_v62 = vpop.f32.mrf.mxu0  ;;  %3413 = vmatmul.mubr.f32.gmra.mxu0 %v2177_v25  ;;  %v2196_v6 = vmax.f32 %v1867_v4, 0.0  ;;  %v1508_v25 = vadd.f32 %v6687_v5, %v7242_v52  ;;  %v8440_v4 = vld [vmem:[#allocation50_spill] sm:$0xff] }
 0x347   : > { %v3109_v51 = vpop.f32.mrf.mxu1  ;;  %3728 = vmatmul.mubr.f32.gmra.mxu1 %v2179_v22  ;;  %3417 = vmatprep.mubr.f32.mxu0 %v2186_v27  ;;  %v1873_v22 = vadd.f32 %v6689_v9, %v7244_v45  ;;  %v2193_v20 = vmax.f32 %v1500_v36, 0.0 }
 0x348   : > { %v7408_v33 = vadd.f32 %v3109_v51, %v2794_v62  ;;  %3732 = vmatprep.mubr.f32.mxu1 %v2188_v10  ;;  %v2796_v63 = vpop.f32.mrf.mxu0  ;;  %v8439_v62 = vld [vmem:[#allocation46_spill] sm:$0xff]  ;;  %v1871_v51 = vadd.f32 %v8440_v4, %v7264_v49  ;;  %v2202_v16 = vmax.f32 %v1508_v25, 0.0 }
 0x349   : > { %v3111_v48 = vpop.f32.mrf.mxu1  ;;  %v1506_v28 = vadd.f32 %v8439_v62, %v7262_v41  ;;  %v2204_v9 = vmax.f32 %v1873_v22, 0.0  ;;  %v1877_v22 = vadd.f32 %v6699_v19, %v7264_v49 }
 0x34a   : > { %v2799_v27 = vpop.f32.mrf.mxu0  ;;  %3418 = vmatmul.mubr.f32.gmra.mxu0 %v2185_v13  ;;  %v1514_v13 = vadd.f32 %v6707_v14, %v7242_v52 }
 0x34b   : > { %v3114_v10 = vpop.f32.mrf.mxu1  ;;  %3733 = vmatmul.mubr.f32.gmra.mxu1 %v2187_v18  ;;  %3422 = vmatprep.mubr.f32.mxu0 %v2194_v61  ;;  %v1879_v18 = vadd.f32 %v6709_v35, %v7244_v45  ;;  %v2201_v11 = vmax.f32 %v1506_v28, 0.0  ;;  %v2203_v61 = vmax.f32 %v1871_v51, 0.0  ;;  %v2211_v19 = vmax.f32 %v1877_v22, 0.0 }
 0x34c   : > { %v7418_v21 = vadd.f32 %v3114_v10, %v2799_v27  ;;  %3737 = vmatprep.mubr.f32.mxu1 %v2196_v6  ;;  %v2801_v5 = vpop.f32.mrf.mxu0  ;;  %v8441_v6 = vld [vmem:[#allocation48_spill] sm:$0xff]  ;;  %v2210_v10 = vmax.f32 %v1514_v13, 0.0 }
 0x34d   : > { %v3116_v55 = vpop.f32.mrf.mxu1  ;;  %v1512_v25 = vadd.f32 %v8441_v6, %v7262_v41  ;;  %v2212_v35 = vmax.f32 %v1879_v18, 0.0  ;;  %v8445_v6 = vld [vmem:[#allocation57_spill] sm:$0xff] }
 0x34e   : > { %v2804_v63 = vpop.f32.mrf.mxu0  ;;  %3423 = vmatmul.mubr.f32.gmra.mxu0 %v2193_v20  ;;  %v1520_v20 = vadd.f32 %v6725_v58, %v7242_v52  ;;  %v8443_v55 = vld [vmem:[#allocation49_spill] sm:$0xff] }
 0x34f   : > { %v3119_v48 = vpop.f32.mrf.mxu1  ;;  %3738 = vmatmul.mubr.f32.gmra.mxu1 %v2195_v56  ;;  %3427 = vmatprep.mubr.f32.mxu0 %v2202_v16  ;;  %v8442_v56 = vld [vmem:[#allocation52_spill] sm:$0xff]  ;;  %v2209_v51 = vmax.f32 %v1512_v25, 0.0  ;;  %v1518_v16 = vadd.f32 %v8443_v55, %v7262_v41 }
 0x350   : > { %v7428_v36 = vadd.f32 %v3119_v48, %v2804_v63  ;;  %3742 = vmatprep.mubr.f32.mxu1 %v2204_v9  ;;  %v2806_v14 = vpop.f32.mrf.mxu0  ;;  %v1885_v62 = vadd.f32 %v8442_v56, %v7244_v45  ;;  %v8444_v9 = vld [vmem:[#allocation51_spill] sm:$0xff]  ;;  %v2218_v63 = vmax.f32 %v1520_v20, 0.0  ;;  %v8447_v56 = vld [vmem:[#allocation53_spill] sm:$0xff] }
 0x351   : > { %v3121_v27 = vpop.f32.mrf.mxu1  ;;  %v1883_v13 = vadd.f32 %v8444_v9, %v7264_v49  ;;  %v2217_v22 = vmax.f32 %v1518_v16, 0.0  ;;  %v1524_v20 = vadd.f32 %v8447_v56, %v7262_v41 }
 0x352   : > { %v2809_v4 = vpop.f32.mrf.mxu0  ;;  %3428 = vmatmul.mubr.f32.gmra.mxu0 %v2201_v11  ;;  %v2220_v48 = vmax.f32 %v1885_v62, 0.0  ;;  %v1526_v11 = vadd.f32 %v8445_v6, %v7242_v52  ;;  %v8448_v62 = vld [vmem:[#allocation54_spill] sm:$0xff]  ;;  %v8449_v6 = vld [vmem:[#allocation56_spill] sm:$0xff] }
 0x353   : > { %v3124_v5 = vpop.f32.mrf.mxu1  ;;  %3743 = vmatmul.mubr.f32.gmra.mxu1 %v2203_v61  ;;  %3432 = vmatprep.mubr.f32.mxu0 %v2210_v10  ;;  %v8446_v61 = vld [vmem:[#allocation55_spill] sm:$0xff] }
 0x354   : > { %v7438_v28 = vadd.f32 %v3124_v5, %v2809_v4  ;;  %3747 = vmatprep.mubr.f32.mxu1 %v2212_v35  ;;  %v2811_v58 = vpop.f32.mrf.mxu0  ;;  %v1891_v14 = vadd.f32 %v8446_v61, %v7244_v45  ;;  %v2219_v35 = vmax.f32 %v1883_v13, 0.0  ;;  %v1889_v4 = vadd.f32 %v8448_v62, %v7264_v49 }
 0x355   : > { %v3126_v18 = vpop.f32.mrf.mxu1  ;;  %v2226_v9 = vmax.f32 %v1526_v11, 0.0  ;;  %v2225_v13 = vmax.f32 %v1524_v20, 0.0  ;;  %v1530_v11 = vadd.f32 %v8449_v6, %v7262_v41  ;;  %v1895_v61 = vadd.f32 %v6752_v59, %v7264_v49 }
 0x356   : > { %v2814_v27 = vpop.f32.mrf.mxu0  ;;  %3433 = vmatmul.mubr.f32.gmra.mxu0 %v2209_v51  ;;  %v2228_v58 = vmax.f32 %v1891_v14, 0.0  ;;  %v1532_v51 = vadd.f32 %v6761_v30, %v7242_v52 }
 0x357   : > { %v3129_v10 = vpop.f32.mrf.mxu1  ;;  %3748 = vmatmul.mubr.f32.gmra.mxu1 %v2211_v19  ;;  %3437 = vmatprep.mubr.f32.mxu0 %v2218_v63  ;;  %v1897_v19 = vadd.f32 %v6763_v0, %v7244_v45  ;;  %v2233_v62 = vmax.f32 %v1530_v11, 0.0  ;;  %v2235_v59 = vmax.f32 %v1895_v61, 0.0 }
 0x358   : > { %v7448_v25 = vadd.f32 %v3129_v10, %v2814_v27  ;;  %3752 = vmatprep.mubr.f32.mxu1 %v2220_v48  ;;  %v2816_v5 = vpop.f32.mrf.mxu0  ;;  %v2227_v48 = vmax.f32 %v1889_v4, 0.0  ;;  %v2234_v27 = vmax.f32 %v1532_v51, 0.0  ;;  %v1538_v10 = vadd.f32 %v6777_v1, %v7242_v52  ;;  %v8450_v4 = vld [vmem:[#allocation60_spill] sm:$0xff] }
 0x359   : > { %v3131_v55 = vpop.f32.mrf.mxu1  ;;  %v2236_v0 = vmax.f32 %v1897_v19, 0.0  ;;  %v1536_v5 = vadd.f32 %v8450_v4, %v7262_v41  ;;  %v1544_v19 = vadd.f32 %v6793_v23, %v7242_v52 }
 0x35a   : > { %v2819_v18 = vpop.f32.mrf.mxu0  ;;  %3438 = vmatmul.mubr.f32.gmra.mxu0 %v2217_v22  ;;  %v1903_v22 = vadd.f32 %v6779_v7, %v7244_v45  ;;  %v8451_v55 = vld [vmem:[#allocation58_spill] sm:$0xff]  ;;  %v2242_v51 = vmax.f32 %v1538_v10, 0.0 }
 0x35b   : > { %v3134_v63 = vpop.f32.mrf.mxu1  ;;  %3753 = vmatmul.mubr.f32.gmra.mxu1 %v2219_v35  ;;  %3442 = vmatprep.mubr.f32.mxu0 %v2226_v9  ;;  %v1901_v9 = vadd.f32 %v8451_v55, %v7264_v49  ;;  %v2241_v11 = vmax.f32 %v1536_v5, 0.0 }
 0x35c   : > { %v7458_v16 = vadd.f32 %v3134_v63, %v2819_v18  ;;  %3757 = vmatprep.mubr.f32.mxu1 %v2228_v58  ;;  %v2821_v30 = vpop.f32.mrf.mxu0  ;;  %v2244_v7 = vmax.f32 %v1903_v22, 0.0  ;;  %v8452_v18 = vld [vmem:[#allocation62_spill] sm:$0xff]  ;;  %v2250_v22 = vmax.f32 %v1544_v19, 0.0 }
 0x35d   : > { %v3136_v14 = vpop.f32.mrf.mxu1  ;;  %v1909_v63 = vadd.f32 %v8452_v18, %v7244_v45  ;;  %v2243_v61 = vmax.f32 %v1901_v9, 0.0  ;;  %v8453_v30 = vld [vmem:[#allocation59_spill] sm:$0xff] }
 0x35e   : > { %v2824_v35 = vpop.f32.mrf.mxu0  ;;  %3443 = vmatmul.mubr.f32.gmra.mxu0 %v2225_v13  ;;  %v1542_v14 = vadd.f32 %v8453_v30, %v7262_v41 }
 0x35f   : > { %v3139_v56 = vpop.f32.mrf.mxu1  ;;  %3758 = vmatmul.mubr.f32.gmra.mxu1 %v2227_v48  ;;  %3447 = vmatprep.mubr.f32.mxu0 %v2234_v27  ;;  %v8454_v27 = vld [vmem:[#allocation61_spill] sm:$0xff] }
 0x360   : > { %v7468_v20 = vadd.f32 %v3139_v56, %v2824_v35  ;;  %3762 = vmatprep.mubr.f32.mxu1 %v2236_v0  ;;  %v2826_v1 = vpop.f32.mrf.mxu0  ;;  %v1907_v0 = vadd.f32 %v8454_v27, %v7264_v49  ;;  %v2252_v35 = vmax.f32 %v1909_v63, 0.0  ;;  %v1550_v56 = vadd.f32 %v6809_v53, %v7242_v52 }
 0x361   : > { %v3141_v58 = vpop.f32.mrf.mxu1  ;;  %v2249_v55 = vmax.f32 %v1542_v14, 0.0  ;;  %v8455_v1 = vld [vmem:[#allocation65_spill] sm:$0xff]  ;;  %v1556_v63 = vadd.f32 %v6825_v26, %v7242_v52 }
 0x362   : > { %v2829_v13 = vpop.f32.mrf.mxu0  ;;  %3448 = vmatmul.mubr.f32.gmra.mxu0 %v2233_v62  ;;  %v1915_v62 = vadd.f32 %v6811_v15, %v7244_v45  ;;  %v2251_v9 = vmax.f32 %v1907_v0, 0.0  ;;  %v1548_v58 = vadd.f32 %v8455_v1, %v7262_v41  ;;  %v2258_v18 = vmax.f32 %v1550_v56, 0.0  ;;  %v8458_v0 = vld [vmem:[#allocation64_spill] sm:$0xff] }
 0x363   : > { %v3144_v48 = vpop.f32.mrf.mxu1  ;;  %3763 = vmatmul.mubr.f32.gmra.mxu1 %v2235_v59  ;;  %3452 = vmatprep.mubr.f32.mxu0 %v2242_v51  ;;  %v8456_v51 = vld [vmem:[#allocation63_spill] sm:$0xff]  ;;  %v2266_v56 = vmax.f32 %v1556_v63, 0.0 }
 0x364   : > { %v7478_v6 = vadd.f32 %v3144_v48, %v2829_v13  ;;  %3767 = vmatprep.mubr.f32.mxu1 %v2244_v7  ;;  %v2831_v23 = vpop.f32.mrf.mxu0  ;;  %v1913_v7 = vadd.f32 %v8456_v51, %v7264_v49  ;;  %v2260_v15 = vmax.f32 %v1915_v62, 0.0  ;;  %v8457_v13 = vld [vmem:[#allocation66_spill] sm:$0xff]  ;;  %v2257_v14 = vmax.f32 %v1548_v58, 0.0 }
 0x365   : > { %v3146_v10 = vpop.f32.mrf.mxu1  ;;  %v1921_v48 = vadd.f32 %v8457_v13, %v7244_v45  ;;  %v1554_v23 = vadd.f32 %v8458_v0, %v7262_v41 }
 0x366   : > { %v2834_v59 = vpop.f32.mrf.mxu0  ;;  %3453 = vmatmul.mubr.f32.gmra.mxu0 %v2241_v11  ;;  %v2259_v27 = vmax.f32 %v1913_v7, 0.0  ;;  %v8459_v10 = vld [vmem:[#allocation68_spill] sm:$0xff] }
 0x367   : > { %v3149_v4 = vpop.f32.mrf.mxu1  ;;  %3768 = vmatmul.mubr.f32.gmra.mxu1 %v2243_v61  ;;  %3457 = vmatprep.mubr.f32.mxu0 %v2250_v22  ;;  %v1919_v22 = vadd.f32 %v8459_v10, %v7264_v49  ;;  %v2268_v62 = vmax.f32 %v1921_v48, 0.0  ;;  %v2265_v51 = vmax.f32 %v1554_v23, 0.0 }
 0x368   : > { %v7488_v5 = vadd.f32 %v3149_v4, %v2834_v59  ;;  %3772 = vmatprep.mubr.f32.mxu1 %v2252_v35  ;;  %v2836_v53 = vpop.f32.mrf.mxu0  ;;  %v1562_v59 = vadd.f32 %v6841_v57, %v7242_v52  ;;  %v8460_v4 = vld [vmem:[#allocation70_spill] sm:$0xff] }
 0x369   : > { %v3151_v19 = vpop.f32.mrf.mxu1  ;;  %v2267_v7 = vmax.f32 %v1919_v22, 0.0  ;;  %v8461_v53 = vld [vmem:[#allocation67_spill] sm:$0xff] }
 0x36a   : > { %v2839_v11 = vpop.f32.mrf.mxu0  ;;  %3458 = vmatmul.mubr.f32.gmra.mxu0 %v2249_v55  ;;  %v1927_v55 = vadd.f32 %v8460_v4, %v7244_v45  ;;  %v1560_v19 = vadd.f32 %v8461_v53, %v7262_v41  ;;  %v2274_v13 = vmax.f32 %v1562_v59, 0.0 }
 0x36b   : > { %v3154_v61 = vpop.f32.mrf.mxu1  ;;  %3773 = vmatmul.mubr.f32.gmra.mxu1 %v2251_v9  ;;  %3462 = vmatprep.mubr.f32.mxu0 %v2258_v18  ;;  %v8462_v18 = vld [vmem:[#allocation69_spill] sm:$0xff] }
 0x36c   : > { %v7498_v30 = vadd.f32 %v3154_v61, %v2839_v11  ;;  %3777 = vmatprep.mubr.f32.mxu1 %v2260_v15  ;;  %v2841_v26 = vpop.f32.mrf.mxu0  ;;  %v1925_v15 = vadd.f32 %v8462_v18, %v7264_v49  ;;  %v2276_v48 = vmax.f32 %v1927_v55, 0.0  ;;  %v1568_v11 = vadd.f32 %v6857_v54, %v7242_v52  ;;  %v8463_v61 = vld [vmem:[#allocation72_spill] sm:$0xff] }
 0x36d   : > { %v3156_v35 = vpop.f32.mrf.mxu1  ;;  %v2273_v10 = vmax.f32 %v1560_v19, 0.0  ;;  %v8464_v26 = vld [vmem:[#allocation73_spill] sm:$0xff] }
 0x36e   : > { %v2844_v9 = vpop.f32.mrf.mxu0  ;;  %3463 = vmatmul.mubr.f32.gmra.mxu0 %v2257_v14  ;;  %v1933_v14 = vadd.f32 %v8463_v61, %v7244_v45  ;;  %v2275_v22 = vmax.f32 %v1925_v15, 0.0  ;;  %v1566_v35 = vadd.f32 %v8464_v26, %v7262_v41  ;;  %v2282_v4 = vmax.f32 %v1568_v11, 0.0 }
 0x36f   : > { %v3159_v1 = vpop.f32.mrf.mxu1  ;;  %3778 = vmatmul.mubr.f32.gmra.mxu1 %v2259_v27  ;;  %3467 = vmatprep.mubr.f32.mxu0 %v2266_v56  ;;  %v8465_v56 = vld [vmem:[#allocation71_spill] sm:$0xff] }
 0x370   : > { %v7508_v58 = vadd.f32 %v3159_v1, %v2844_v9  ;;  %3782 = vmatprep.mubr.f32.mxu1 %v2268_v62  ;;  %v2846_v57 = vpop.f32.mrf.mxu0  ;;  %v1931_v62 = vadd.f32 %v8465_v56, %v7264_v49  ;;  %v2284_v55 = vmax.f32 %v1933_v14, 0.0  ;;  %v1574_v9 = vadd.f32 %v6873_v2, %v7242_v52  ;;  %v8466_v1 = vld [vmem:[#allocation75_spill] sm:$0xff] }
 0x371   : > { %v3161_v63 = vpop.f32.mrf.mxu1  ;;  %v2281_v18 = vmax.f32 %v1566_v35, 0.0  ;;  %v8467_v57 = vld [vmem:[#allocation76_spill] sm:$0xff] }
 0x372   : > { %v2849_v27 = vpop.f32.mrf.mxu0  ;;  %3468 = vmatmul.mubr.f32.gmra.mxu0 %v2265_v51  ;;  %v1939_v51 = vadd.f32 %v8466_v1, %v7244_v45  ;;  %v2283_v15 = vmax.f32 %v1931_v62, 0.0  ;;  %v1572_v63 = vadd.f32 %v8467_v57, %v7262_v41  ;;  %v2290_v61 = vmax.f32 %v1574_v9, 0.0 }
 0x373   : > { %v3164_v0 = vpop.f32.mrf.mxu1  ;;  %3783 = vmatmul.mubr.f32.gmra.mxu1 %v2267_v7  ;;  %3472 = vmatprep.mubr.f32.mxu0 %v2274_v13  ;;  %v8468_v13 = vld [vmem:[#allocation74_spill] sm:$0xff] }
 0x374   : > { %v7518_v23 = vadd.f32 %v3164_v0, %v2849_v27  ;;  %3787 = vmatprep.mubr.f32.mxu1 %v2276_v48  ;;  %v2851_v54 = vpop.f32.mrf.mxu0  ;;  %v1937_v48 = vadd.f32 %v8468_v13, %v7264_v49  ;;  %v2292_v14 = vmax.f32 %v1939_v51, 0.0  ;;  %v1580_v27 = vadd.f32 %v6889_v47, %v7242_v52  ;;  %v8469_v0 = vld [vmem:[#allocation78_spill] sm:$0xff] }
 0x375   : > { %v3166_v59 = vpop.f32.mrf.mxu1  ;;  %v2289_v56 = vmax.f32 %v1572_v63, 0.0  ;;  %v8470_v54 = vld [vmem:[#allocation79_spill] sm:$0xff] }
 0x376   : > { %v2854_v7 = vpop.f32.mrf.mxu0  ;;  %3473 = vmatmul.mubr.f32.gmra.mxu0 %v2273_v10  ;;  %v1945_v10 = vadd.f32 %v8469_v0, %v7244_v45  ;;  %v2291_v62 = vmax.f32 %v1937_v48, 0.0  ;;  %v1578_v59 = vadd.f32 %v8470_v54, %v7262_v41  ;;  %v2298_v1 = vmax.f32 %v1580_v27, 0.0 }
 0x377   : > { %v3169_v53 = vpop.f32.mrf.mxu1  ;;  %3788 = vmatmul.mubr.f32.gmra.mxu1 %v2275_v22  ;;  %3477 = vmatprep.mubr.f32.mxu0 %v2282_v4  ;;  %v8471_v4 = vld [vmem:[#allocation77_spill] sm:$0xff] }
 0x378   : > { %v7528_v19 = vadd.f32 %v3169_v53, %v2854_v7  ;;  %3792 = vmatprep.mubr.f32.mxu1 %v2284_v55  ;;  %v2856_v2 = vpop.f32.mrf.mxu0  ;;  %v1943_v55 = vadd.f32 %v8471_v4, %v7264_v49  ;;  %v2300_v51 = vmax.f32 %v1945_v10, 0.0  ;;  %v1586_v7 = vadd.f32 %v6905_v24, %v7242_v52  ;;  %v8472_v53 = vld [vmem:[#allocation81_spill] sm:$0xff] }
 0x379   : > { %v3171_v11 = vpop.f32.mrf.mxu1  ;;  %v2297_v13 = vmax.f32 %v1578_v59, 0.0  ;;  %v8473_v2 = vld [vmem:[#allocation82_spill] sm:$0xff] }
 0x37a   : > { %v2859_v22 = vpop.f32.mrf.mxu0  ;;  %3478 = vmatmul.mubr.f32.gmra.mxu0 %v2281_v18  ;;  %v1951_v18 = vadd.f32 %v8472_v53, %v7244_v45  ;;  %v2299_v48 = vmax.f32 %v1943_v55, 0.0  ;;  %v1584_v11 = vadd.f32 %v8473_v2, %v7262_v41  ;;  %v2306_v0 = vmax.f32 %v1586_v7, 0.0 }
 0x37b   : > { %v3174_v26 = vpop.f32.mrf.mxu1  ;;  %3793 = vmatmul.mubr.f32.gmra.mxu1 %v2283_v15  ;;  %3482 = vmatprep.mubr.f32.mxu0 %v2290_v61  ;;  %v8474_v61 = vld [vmem:[#allocation80_spill] sm:$0xff] }
 0x37c   : > { %v7538_v35 = vadd.f32 %v3174_v26, %v2859_v22  ;;  %3797 = vmatprep.mubr.f32.mxu1 %v2292_v14  ;;  %v2861_v47 = vpop.f32.mrf.mxu0  ;;  %v1949_v14 = vadd.f32 %v8474_v61, %v7264_v49  ;;  %v2308_v10 = vmax.f32 %v1951_v18, 0.0  ;;  %v1592_v22 = vadd.f32 %v6921_v50, %v7242_v52  ;;  %v8475_v26 = vld [vmem:[#allocation84_spill] sm:$0xff] }
 0x37d   : > { %v3176_v9 = vpop.f32.mrf.mxu1  ;;  %v2305_v4 = vmax.f32 %v1584_v11, 0.0  ;;  %v8476_v47 = vld [vmem:[#allocation85_spill] sm:$0xff] }
 0x37e   : > { %v2864_v15 = vpop.f32.mrf.mxu0  ;;  %3483 = vmatmul.mubr.f32.gmra.mxu0 %v2289_v56  ;;  %v1957_v56 = vadd.f32 %v8475_v26, %v7244_v45  ;;  %v2307_v55 = vmax.f32 %v1949_v14, 0.0  ;;  %v1590_v9 = vadd.f32 %v8476_v47, %v7262_v41  ;;  %v2314_v53 = vmax.f32 %v1592_v22, 0.0 }
 0x37f   : > { %v3179_v57 = vpop.f32.mrf.mxu1  ;;  %3798 = vmatmul.mubr.f32.gmra.mxu1 %v2291_v62  ;;  %3487 = vmatprep.mubr.f32.mxu0 %v2298_v1  ;;  %v8477_v1 = vld [vmem:[#allocation83_spill] sm:$0xff] }
 0x380   : > { %v7548_v63 = vadd.f32 %v3179_v57, %v2864_v15  ;;  %3802 = vmatprep.mubr.f32.mxu1 %v2300_v51  ;;  %v2866_v24 = vpop.f32.mrf.mxu0  ;;  %v1955_v51 = vadd.f32 %v8477_v1, %v7264_v49  ;;  %v2316_v18 = vmax.f32 %v1957_v56, 0.0  ;;  %v1598_v15 = vadd.f32 %v6937_v3, %v7242_v52  ;;  %v8478_v57 = vld [vmem:[#allocation87_spill] sm:$0xff] }
 0x381   : > { %v3181_v27 = vpop.f32.mrf.mxu1  ;;  %v2313_v61 = vmax.f32 %v1590_v9, 0.0  ;;  %v8479_v24 = vld [vmem:[#allocation88_spill] sm:$0xff] }
 0x382   : > { %v2869_v62 = vpop.f32.mrf.mxu0  ;;  %3488 = vmatmul.mubr.f32.gmra.mxu0 %v2297_v13  ;;  %v1963_v13 = vadd.f32 %v8478_v57, %v7244_v45  ;;  %v2315_v14 = vmax.f32 %v1955_v51, 0.0  ;;  %v1596_v27 = vadd.f32 %v8479_v24, %v7262_v41  ;;  %v2322_v26 = vmax.f32 %v1598_v15, 0.0  ;;  %v8485_v24 = vld [vmem:[#allocation97_spill] sm:$0xff] }
 0x383   : > { %v3184_v54 = vpop.f32.mrf.mxu1  ;;  %3803 = vmatmul.mubr.f32.gmra.mxu1 %v2299_v48  ;;  %3492 = vmatprep.mubr.f32.mxu0 %v2306_v0  ;;  %v8480_v0 = vld [vmem:[#allocation86_spill] sm:$0xff] }
 0x384   : > { %v7558_v59 = vadd.f32 %v3184_v54, %v2869_v62  ;;  %3807 = vmatprep.mubr.f32.mxu1 %v2308_v10  ;;  %v2871_v50 = vpop.f32.mrf.mxu0  ;;  %v1961_v10 = vadd.f32 %v8480_v0, %v7264_v49  ;;  %v2324_v56 = vmax.f32 %v1963_v13, 0.0  ;;  %v8481_v62 = vld [vmem:[#allocation90_spill] sm:$0xff]  ;;  %v2321_v51 = vmax.f32 %v1596_v27, 0.0 }
 0x385   : > { %v3186_v7 = vpop.f32.mrf.mxu1  ;;  %v1604_v54 = vadd.f32 %v8481_v62, %v7242_v52 }
 0x386   : > { %v2874_v48 = vpop.f32.mrf.mxu0  ;;  %3493 = vmatmul.mubr.f32.gmra.mxu0 %v2305_v4  ;;  %v8482_v4 = vld [vmem:[#allocation94_spill] sm:$0xff]  ;;  %v2323_v50 = vmax.f32 %v1961_v10, 0.0  ;;  %v8483_v7 = vld [vmem:[#allocation91_spill] sm:$0xff] }
 0x387   : > { %v3189_v2 = vpop.f32.mrf.mxu1  ;;  %3808 = vmatmul.mubr.f32.gmra.mxu1 %v2307_v55  ;;  %3497 = vmatprep.mubr.f32.mxu0 %v2314_v53  ;;  %v1969_v55 = vadd.f32 %v8482_v4, %v7244_v45  ;;  %v1602_v53 = vadd.f32 %v8483_v7, %v7262_v41 }
 0x388   : > { %v7568_v11 = vadd.f32 %v3189_v2, %v2874_v48  ;;  %3812 = vmatprep.mubr.f32.mxu1 %v2316_v18  ;;  %v2876_v3 = vpop.f32.mrf.mxu0  ;;  %v8484_v18 = vld [vmem:[#allocation89_spill] sm:$0xff]  ;;  %v2330_v48 = vmax.f32 %v1604_v54, 0.0 }
 0x389   : > { %v3191_v22 = vpop.f32.mrf.mxu1  ;;  %v1967_v15 = vadd.f32 %v8484_v18, %v7264_v49  ;;  %v2332_v2 = vmax.f32 %v1969_v55, 0.0  ;;  %v2329_v10 = vmax.f32 %v1602_v53, 0.0  ;;  %v8488_v54 = vld [vmem:[#allocation93_spill] sm:$0xff]  ;;  %v8489_v18 = vld [vmem:[#allocation98_spill] sm:$0xff] }
 0x38a   : > { %v2879_v47 = vpop.f32.mrf.mxu0  ;;  %3498 = vmatmul.mubr.f32.gmra.mxu0 %v2313_v61  ;;  %v1610_v61 = vadd.f32 %v8485_v24, %v7242_v52  ;;  %v1973_v4 = vadd.f32 %v8488_v54, %v7264_v49  ;;  %v8491_v24 = vld [vmem:[#allocation96_spill] sm:$0xff] }
 0x38b   : > { %v3194_v1 = vpop.f32.mrf.mxu1  ;;  %3813 = vmatmul.mubr.f32.gmra.mxu1 %v2315_v14  ;;  %3502 = vmatprep.mubr.f32.mxu0 %v2322_v26  ;;  %v8486_v14 = vld [vmem:[#allocation95_spill] sm:$0xff]  ;;  %v2331_v26 = vmax.f32 %v1967_v15, 0.0 }
 0x38c   : > { %v7578_v9 = vadd.f32 %v3194_v1, %v2879_v47  ;;  %3817 = vmatprep.mubr.f32.mxu1 %v2324_v56  ;;  %v2881_v57 = vpop.f32.mrf.mxu0  ;;  %v1975_v0 = vadd.f32 %v8486_v14, %v7244_v45  ;;  %v8487_v56 = vld [vmem:[#allocation92_spill] sm:$0xff]  ;;  %v2338_v1 = vmax.f32 %v1610_v61, 0.0  ;;  %v1614_v61 = vadd.f32 %v8491_v24, %v7262_v41 }
 0x38d   : > { %v3196_v13 = vpop.f32.mrf.mxu1  ;;  %v1608_v62 = vadd.f32 %v8487_v56, %v7262_v41  ;;  %v8492_v14 = vld [vmem:[#allocation100_spill] sm:$0xff] }
 0x38e   : > { %v2884_v3 = vpop.f32.mrf.mxu0  ;;  %3503 = vmatmul.mubr.f32.gmra.mxu0 %v2321_v51  ;;  %v2340_v7 = vmax.f32 %v1975_v0, 0.0  ;;  %v1616_v51 = vadd.f32 %v8489_v18, %v7242_v52  ;;  %v1979_v0 = vadd.f32 %v8492_v14, %v7264_v49 }
 0x38f   : > { %v3199_v22 = vpop.f32.mrf.mxu1  ;;  %3818 = vmatmul.mubr.f32.gmra.mxu1 %v2323_v50  ;;  %3507 = vmatprep.mubr.f32.mxu0 %v2330_v48  ;;  %v8490_v50 = vld [vmem:[#allocation99_spill] sm:$0xff]  ;;  %v2337_v15 = vmax.f32 %v1608_v62, 0.0 }
 0x390   : > { %v7588_v27 = vadd.f32 %v3199_v22, %v2884_v3  ;;  %3822 = vmatprep.mubr.f32.mxu1 %v2332_v2  ;;  %v2886_v55 = vpop.f32.mrf.mxu0  ;;  %v1981_v57 = vadd.f32 %v8490_v50, %v7244_v45  ;;  %v2339_v2 = vmax.f32 %v1973_v4, 0.0  ;;  %v2346_v56 = vmax.f32 %v1616_v51, 0.0  ;;  %v8495_v50 = vld [vmem:[#allocation103_spill] sm:$0xff] }
 0x391   : > { %v3201_v47 = vpop.f32.mrf.mxu1  ;;  %v8493_v55 = vld [vmem:[#allocation101_spill] sm:$0xff]  ;;  %v2345_v4 = vmax.f32 %v1614_v61, 0.0  ;;  %v2347_v18 = vmax.f32 %v1979_v0, 0.0  ;;  %v1620_v51 = vadd.f32 %v8495_v50, %v7262_v41 }
 0x392   : > { %v2889_v13 = vpop.f32.mrf.mxu0  ;;  %3508 = vmatmul.mubr.f32.gmra.mxu0 %v2329_v10  ;;  %v2348_v54 = vmax.f32 %v1981_v57, 0.0  ;;  %v1622_v10 = vadd.f32 %v8493_v55, %v7242_v52  ;;  %v8496_v57 = vld [vmem:[#allocation178_spill] sm:$0xff] }
 0x393   : > { %v3204_v48 = vpop.f32.mrf.mxu1  ;;  %3823 = vmatmul.mubr.f32.gmra.mxu1 %v2331_v26  ;;  %3512 = vmatprep.mubr.f32.mxu0 %v2338_v1  ;;  %v8494_v26 = vld [vmem:[#allocation102_spill] sm:$0xff]  ;;  %v2353_v0 = vmax.f32 %v1620_v51, 0.0 }
 0x394   : > { %v7598_v53 = vadd.f32 %v3204_v48, %v2889_v13  ;;  %3827 = vmatprep.mubr.f32.mxu1 %v2340_v7  ;;  %v2891_v3 = vpop.f32.mrf.mxu0  ;;  %v1987_v47 = vadd.f32 %v8494_v26, %v7244_v45  ;;  %v1985_v13 = vadd.f32 %v8496_v57, %v7264_v49  ;;  %v2354_v14 = vmax.f32 %v1622_v10, 0.0 }
 0x395   : > { %v3206_v22 = vpop.f32.mrf.mxu1 }
 0x396   : > { %v2894_v1 = vpop.f32.mrf.mxu0  ;;  %3513 = vmatmul.mubr.f32.gmra.mxu0 %v2337_v15  ;;  %v2356_v3 = vmax.f32 %v1987_v47, 0.0  ;;  %v8497_v22 = vld [vmem:[#allocation104_spill] sm:$0xff]  ;;  %v2355_v26 = vmax.f32 %v1985_v13, 0.0  ;;  %v8500_v47 = vld [vmem:[#allocation179_spill] sm:$0xff] }
 0x397   : > { %v3209_v7 = vpop.f32.mrf.mxu1  ;;  %3828 = vmatmul.mubr.f32.gmra.mxu1 %v2339_v2  ;;  %3517 = vmatprep.mubr.f32.mxu0 %v2346_v56  ;;  %v1628_v15 = vadd.f32 %v8497_v22, %v7242_v52  ;;  %v8498_v2 = vld [vmem:[#allocation105_spill] sm:$0xff]  ;;  %v8501_v22 = vld [vmem:[#allocation107_spill] sm:$0xff] }
 0x398   : > { %v7608_v62 = vadd.f32 %v3209_v7, %v2894_v1  ;;  %3832 = vmatprep.mubr.f32.mxu1 %v2348_v54  ;;  %v2896_v48 = vpop.f32.mrf.mxu0  ;;  %v1993_v55 = vadd.f32 %v8498_v2, %v7244_v45  ;;  %v8499_v1 = vld [vmem:[#allocation106_spill] sm:$0xff]  ;;  %v1991_v7 = vadd.f32 %v8500_v47, %v7264_v49 }
 0x399   : > { %v3211_v24 = vpop.f32.mrf.mxu1  ;;  %v1626_v10 = vadd.f32 %v8499_v1, %v7262_v41  ;;  %v2362_v48 = vmax.f32 %v1628_v15, 0.0 }
 0x39a   : > { %v2899_v56 = vpop.f32.mrf.mxu0  ;;  %3518 = vmatmul.mubr.f32.gmra.mxu0 %v2345_v4  ;;  %v2364_v24 = vmax.f32 %v1993_v55, 0.0  ;;  %v1634_v4 = vadd.f32 %v8501_v22, %v7242_v52  ;;  %v8505_v55 = vld [vmem:[#allocation110_spill] sm:$0xff] }
 0x39b   : > { %v3214_v54 = vpop.f32.mrf.mxu1  ;;  %3833 = vmatmul.mubr.f32.gmra.mxu1 %v2347_v18  ;;  %3522 = vmatprep.mubr.f32.mxu0 %v2354_v14  ;;  %v8502_v18 = vld [vmem:[#allocation108_spill] sm:$0xff]  ;;  %v2361_v13 = vmax.f32 %v1626_v10, 0.0  ;;  %v1997_v1 = vadd.f32 %v8505_v55, %v7264_v49 }
 0x39c   : > { %v7618_v61 = vadd.f32 %v3214_v54, %v2899_v56  ;;  %3837 = vmatprep.mubr.f32.mxu1 %v2356_v3  ;;  %v2901_v50 = vpop.f32.mrf.mxu0  ;;  %v1999_v2 = vadd.f32 %v8502_v18, %v7244_v45  ;;  %v2363_v56 = vmax.f32 %v1991_v7, 0.0  ;;  %v8504_v54 = vld [vmem:[#allocation109_spill] sm:$0xff]  ;;  %v8506_v18 = vld [vmem:[#allocation111_spill] sm:$0xff] }
 0x39d   : > { %v3216_v57 = vpop.f32.mrf.mxu1  ;;  %v1632_v15 = vadd.f32 %v8504_v54, %v7262_v41  ;;  %v8509_v54 = vld [vmem:[#allocation113_spill] sm:$0xff] }
 0x39e   : > { %v2904_v14 = vpop.f32.mrf.mxu0  ;;  %3523 = vmatmul.mubr.f32.gmra.mxu0 %v2353_v0  ;;  %v2370_v57 = vmax.f32 %v1634_v4, 0.0  ;;  %v2372_v22 = vmax.f32 %v1999_v2, 0.0  ;;  %v1640_v0 = vadd.f32 %v8506_v18, %v7242_v52  ;;  %v1638_v4 = vadd.f32 %v8509_v54, %v7262_v41  ;;  %v8510_v2 = vld [vmem:[#allocation114_spill] sm:$0xff]  ;;  %v8514_v54 = vld [vmem:[#allocation117_spill] sm:$0xff] }
 0x39f   : > { %v3219_v3 = vpop.f32.mrf.mxu1  ;;  %3838 = vmatmul.mubr.f32.gmra.mxu1 %v2355_v26  ;;  %3527 = vmatprep.mubr.f32.mxu0 %v2362_v48  ;;  %v8507_v26 = vld [vmem:[#allocation112_spill] sm:$0xff]  ;;  %v2369_v7 = vmax.f32 %v1632_v15, 0.0  ;;  %v2003_v55 = vadd.f32 %v8510_v2, %v7264_v49 }
 0x3a0   : > { %v7628_v51 = vadd.f32 %v3219_v3, %v2904_v14  ;;  %3842 = vmatprep.mubr.f32.mxu1 %v2364_v24  ;;  %v2906_v47 = vpop.f32.mrf.mxu0  ;;  %v2005_v14 = vadd.f32 %v8507_v26, %v7244_v45  ;;  %v2371_v3 = vmax.f32 %v1997_v1, 0.0  ;;  %v2378_v18 = vmax.f32 %v1640_v0, 0.0 }
 0x3a1   : > { %v3221_v50 = vpop.f32.mrf.mxu1  ;;  %v2377_v1 = vmax.f32 %v1638_v4, 0.0  ;;  %v1644_v0 = vadd.f32 %v8514_v54, %v7262_v41  ;;  %v8519_v54 = vld [vmem:[#allocation121_spill] sm:$0xff] }
 0x3a2   : > { %8503 = vst [vmem:[#allocation166_spill] sm:$0xff] %v7628_v51  ;;  %v2909_v48 = vpop.f32.mrf.mxu0  ;;  %3528 = vmatmul.mubr.f32.gmra.mxu0 %v2361_v13  ;;  %v2380_v26 = vmax.f32 %v2005_v14, 0.0  ;;  %v8511_v51 = vld [vmem:[#allocation115_spill] sm:$0xff]  ;;  %v8515_v14 = vld [vmem:[#allocation118_spill] sm:$0xff] }
 0x3a3   : > { %v3224_v24 = vpop.f32.mrf.mxu1  ;;  %3843 = vmatmul.mubr.f32.gmra.mxu1 %v2363_v56  ;;  %3532 = vmatprep.mubr.f32.mxu0 %v2370_v57  ;;  %v1646_v13 = vadd.f32 %v8511_v51, %v7242_v52  ;;  %v8512_v56 = vld [vmem:[#allocation116_spill] sm:$0xff]  ;;  %v2009_v2 = vadd.f32 %v8515_v14, %v7264_v49 }
 0x3a4   : > { %v7638_v10 = vadd.f32 %v3224_v24, %v2909_v48  ;;  %3847 = vmatprep.mubr.f32.mxu1 %v2372_v22  ;;  %v2911_v47 = vpop.f32.mrf.mxu0  ;;  %v2011_v48 = vadd.f32 %v8512_v56, %v7244_v45  ;;  %v2379_v24 = vmax.f32 %v2003_v55, 0.0  ;;  %v2385_v55 = vmax.f32 %v1644_v0, 0.0 }
 0x3a5   : > { %v3226_v50 = vpop.f32.mrf.mxu1 }
 0x3a6   : > { %8508 = vst [vmem:[#allocation164_spill] sm:$0xff] %v7638_v10  ;;  %v2914_v57 = vpop.f32.mrf.mxu0  ;;  %3533 = vmatmul.mubr.f32.gmra.mxu0 %v2369_v7  ;;  %v2386_v50 = vmax.f32 %v1646_v13, 0.0  ;;  %v2388_v56 = vmax.f32 %v2011_v48, 0.0  ;;  %v8516_v10 = vld [vmem:[#allocation119_spill] sm:$0xff]  ;;  %v1650_v13 = vadd.f32 %v8519_v54, %v7262_v41  ;;  %v8520_v48 = vld [vmem:[#allocation122_spill] sm:$0xff]  ;;  %v8524_v54 = vld [vmem:[#allocation125_spill] sm:$0xff] }
 0x3a7   : > { %v3229_v22 = vpop.f32.mrf.mxu1  ;;  %3848 = vmatmul.mubr.f32.gmra.mxu1 %v2371_v3  ;;  %3537 = vmatprep.mubr.f32.mxu0 %v2378_v18  ;;  %v1652_v7 = vadd.f32 %v8516_v10, %v7242_v52  ;;  %v8517_v3 = vld [vmem:[#allocation120_spill] sm:$0xff]  ;;  %v2015_v14 = vadd.f32 %v8520_v48, %v7264_v49 }
 0x3a8   : > { %v7648_v15 = vadd.f32 %v3229_v22, %v2914_v57  ;;  %3852 = vmatprep.mubr.f32.mxu1 %v2380_v26  ;;  %v2916_v51 = vpop.f32.mrf.mxu0  ;;  %v2017_v57 = vadd.f32 %v8517_v3, %v7244_v45  ;;  %v2387_v22 = vmax.f32 %v2009_v2, 0.0  ;;  %v2393_v2 = vmax.f32 %v1650_v13, 0.0 }
 0x3a9   : > { %v3231_v47 = vpop.f32.mrf.mxu1 }
 0x3aa   : > { %8513 = vst [vmem:[#allocation165_spill] sm:$0xff] %v7648_v15  ;;  %v2919_v18 = vpop.f32.mrf.mxu0  ;;  %3538 = vmatmul.mubr.f32.gmra.mxu0 %v2377_v1  ;;  %v2394_v47 = vmax.f32 %v1652_v7, 0.0  ;;  %v2396_v3 = vmax.f32 %v2017_v57, 0.0  ;;  %v8521_v15 = vld [vmem:[#allocation123_spill] sm:$0xff]  ;;  %v1656_v7 = vadd.f32 %v8524_v54, %v7262_v41  ;;  %v8525_v57 = vld [vmem:[#allocation126_spill] sm:$0xff]  ;;  %v8529_v54 = vld [vmem:[#allocation129_spill] sm:$0xff] }
 0x3ab   : > { %v3234_v26 = vpop.f32.mrf.mxu1  ;;  %3853 = vmatmul.mubr.f32.gmra.mxu1 %v2379_v24  ;;  %3542 = vmatprep.mubr.f32.mxu0 %v2386_v50  ;;  %v1658_v1 = vadd.f32 %v8521_v15, %v7242_v52  ;;  %v8522_v24 = vld [vmem:[#allocation124_spill] sm:$0xff]  ;;  %v2021_v48 = vadd.f32 %v8525_v57, %v7264_v49 }
 0x3ac   : > { %v7658_v4 = vadd.f32 %v3234_v26, %v2919_v18  ;;  %3857 = vmatprep.mubr.f32.mxu1 %v2388_v56  ;;  %v2921_v10 = vpop.f32.mrf.mxu0  ;;  %v2023_v18 = vadd.f32 %v8522_v24, %v7244_v45  ;;  %v2395_v26 = vmax.f32 %v2015_v14, 0.0  ;;  %v2401_v14 = vmax.f32 %v1656_v7, 0.0 }
 0x3ad   : > { %v3236_v51 = vpop.f32.mrf.mxu1 }
 0x3ae   : > { %8518 = vst [vmem:[#allocation169_spill] sm:$0xff] %v7658_v4  ;;  %v2924_v50 = vpop.f32.mrf.mxu0  ;;  %3543 = vmatmul.mubr.f32.gmra.mxu0 %v2385_v55  ;;  %v2402_v51 = vmax.f32 %v1658_v1, 0.0  ;;  %v2404_v24 = vmax.f32 %v2023_v18, 0.0  ;;  %v8526_v4 = vld [vmem:[#allocation127_spill] sm:$0xff]  ;;  %v1662_v1 = vadd.f32 %v8529_v54, %v7262_v41  ;;  %v8530_v18 = vld [vmem:[#allocation130_spill] sm:$0xff]  ;;  %v8534_v54 = vld [vmem:[#allocation133_spill] sm:$0xff] }
 0x3af   : > { %v3239_v56 = vpop.f32.mrf.mxu1  ;;  %3858 = vmatmul.mubr.f32.gmra.mxu1 %v2387_v22  ;;  %3547 = vmatprep.mubr.f32.mxu0 %v2394_v47  ;;  %v1664_v55 = vadd.f32 %v8526_v4, %v7242_v52  ;;  %v8527_v22 = vld [vmem:[#allocation128_spill] sm:$0xff]  ;;  %v2027_v57 = vadd.f32 %v8530_v18, %v7264_v49 }
 0x3b0   : > { %v7668_v0 = vadd.f32 %v3239_v56, %v2924_v50  ;;  %3862 = vmatprep.mubr.f32.mxu1 %v2396_v3  ;;  %v2926_v15 = vpop.f32.mrf.mxu0  ;;  %v2029_v50 = vadd.f32 %v8527_v22, %v7244_v45  ;;  %v2403_v56 = vmax.f32 %v2021_v48, 0.0  ;;  %v2409_v48 = vmax.f32 %v1662_v1, 0.0 }
 0x3b1   : > { %v3241_v10 = vpop.f32.mrf.mxu1 }
 0x3b2   : > { %8523 = vst [vmem:[#allocation170_spill] sm:$0xff] %v7668_v0  ;;  %v2929_v47 = vpop.f32.mrf.mxu0  ;;  %3548 = vmatmul.mubr.f32.gmra.mxu0 %v2393_v2  ;;  %v2410_v10 = vmax.f32 %v1664_v55, 0.0  ;;  %v2412_v22 = vmax.f32 %v2029_v50, 0.0  ;;  %v8531_v0 = vld [vmem:[#allocation131_spill] sm:$0xff]  ;;  %v1668_v55 = vadd.f32 %v8534_v54, %v7262_v41  ;;  %v8535_v50 = vld [vmem:[#allocation134_spill] sm:$0xff]  ;;  %v8539_v54 = vld [vmem:[#allocation137_spill] sm:$0xff] }
 0x3b3   : > { %v3244_v3 = vpop.f32.mrf.mxu1  ;;  %3863 = vmatmul.mubr.f32.gmra.mxu1 %v2395_v26  ;;  %3552 = vmatprep.mubr.f32.mxu0 %v2402_v51  ;;  %v1670_v2 = vadd.f32 %v8531_v0, %v7242_v52  ;;  %v8532_v26 = vld [vmem:[#allocation132_spill] sm:$0xff]  ;;  %v2033_v18 = vadd.f32 %v8535_v50, %v7264_v49 }
 0x3b4   : > { %v7678_v13 = vadd.f32 %v3244_v3, %v2929_v47  ;;  %3867 = vmatprep.mubr.f32.mxu1 %v2404_v24  ;;  %v2931_v4 = vpop.f32.mrf.mxu0  ;;  %v2035_v47 = vadd.f32 %v8532_v26, %v7244_v45  ;;  %v2411_v3 = vmax.f32 %v2027_v57, 0.0  ;;  %v2417_v57 = vmax.f32 %v1668_v55, 0.0 }
 0x3b5   : > { %v3246_v15 = vpop.f32.mrf.mxu1 }
 0x3b6   : > { %8528 = vst [vmem:[#allocation167_spill] sm:$0xff] %v7678_v13  ;;  %v2934_v51 = vpop.f32.mrf.mxu0  ;;  %3553 = vmatmul.mubr.f32.gmra.mxu0 %v2401_v14  ;;  %v2418_v15 = vmax.f32 %v1670_v2, 0.0  ;;  %v2420_v26 = vmax.f32 %v2035_v47, 0.0  ;;  %v8536_v13 = vld [vmem:[#allocation135_spill] sm:$0xff]  ;;  %v1674_v2 = vadd.f32 %v8539_v54, %v7262_v41  ;;  %v8540_v47 = vld [vmem:[#allocation138_spill] sm:$0xff]  ;;  %v8544_v54 = vld [vmem:[#allocation141_spill] sm:$0xff] }
 0x3b7   : > { %v3249_v24 = vpop.f32.mrf.mxu1  ;;  %3868 = vmatmul.mubr.f32.gmra.mxu1 %v2403_v56  ;;  %3557 = vmatprep.mubr.f32.mxu0 %v2410_v10  ;;  %v1676_v14 = vadd.f32 %v8536_v13, %v7242_v52  ;;  %v8537_v56 = vld [vmem:[#allocation136_spill] sm:$0xff]  ;;  %v2039_v50 = vadd.f32 %v8540_v47, %v7264_v49 }
 0x3b8   : > { %v7688_v7 = vadd.f32 %v3249_v24, %v2934_v51  ;;  %3872 = vmatprep.mubr.f32.mxu1 %v2412_v22  ;;  %v2936_v0 = vpop.f32.mrf.mxu0  ;;  %v2041_v51 = vadd.f32 %v8537_v56, %v7244_v45  ;;  %v2419_v24 = vmax.f32 %v2033_v18, 0.0  ;;  %v2425_v18 = vmax.f32 %v1674_v2, 0.0 }
 0x3b9   : > { %v3251_v4 = vpop.f32.mrf.mxu1 }
 0x3ba   : > { %8533 = vst [vmem:[#allocation168_spill] sm:$0xff] %v7688_v7  ;;  %v2939_v10 = vpop.f32.mrf.mxu0  ;;  %3558 = vmatmul.mubr.f32.gmra.mxu0 %v2409_v48  ;;  %v2426_v4 = vmax.f32 %v1676_v14, 0.0  ;;  %v2428_v56 = vmax.f32 %v2041_v51, 0.0  ;;  %v8541_v7 = vld [vmem:[#allocation139_spill] sm:$0xff]  ;;  %v1680_v14 = vadd.f32 %v8544_v54, %v7262_v41  ;;  %v8545_v51 = vld [vmem:[#allocation142_spill] sm:$0xff]  ;;  %v8549_v54 = vld [vmem:[#allocation145_spill] sm:$0xff] }
 0x3bb   : > { %v3254_v22 = vpop.f32.mrf.mxu1  ;;  %3873 = vmatmul.mubr.f32.gmra.mxu1 %v2411_v3  ;;  %3562 = vmatprep.mubr.f32.mxu0 %v2418_v15  ;;  %v1682_v48 = vadd.f32 %v8541_v7, %v7242_v52  ;;  %v8542_v3 = vld [vmem:[#allocation140_spill] sm:$0xff]  ;;  %v2045_v47 = vadd.f32 %v8545_v51, %v7264_v49 }
 0x3bc   : > { %v7698_v1 = vadd.f32 %v3254_v22, %v2939_v10  ;;  %3877 = vmatprep.mubr.f32.mxu1 %v2420_v26  ;;  %v2941_v13 = vpop.f32.mrf.mxu0  ;;  %v2047_v10 = vadd.f32 %v8542_v3, %v7244_v45  ;;  %v2427_v22 = vmax.f32 %v2039_v50, 0.0  ;;  %v2433_v50 = vmax.f32 %v1680_v14, 0.0 }
 0x3bd   : > { %v3256_v0 = vpop.f32.mrf.mxu1 }
 0x3be   : > { %8538 = vst [vmem:[#allocation171_spill] sm:$0xff] %v7698_v1  ;;  %v2944_v15 = vpop.f32.mrf.mxu0  ;;  %3563 = vmatmul.mubr.f32.gmra.mxu0 %v2417_v57  ;;  %v2434_v0 = vmax.f32 %v1682_v48, 0.0  ;;  %v2436_v3 = vmax.f32 %v2047_v10, 0.0  ;;  %v8546_v1 = vld [vmem:[#allocation143_spill] sm:$0xff]  ;;  %v1686_v48 = vadd.f32 %v8549_v54, %v7262_v41  ;;  %v8550_v10 = vld [vmem:[#allocation146_spill] sm:$0xff]  ;;  %v8554_v54 = vld [vmem:[#allocation149_spill] sm:$0xff] }
 0x3bf   : > { %v3259_v26 = vpop.f32.mrf.mxu1  ;;  %3878 = vmatmul.mubr.f32.gmra.mxu1 %v2419_v24  ;;  %3567 = vmatprep.mubr.f32.mxu0 %v2426_v4  ;;  %v1688_v57 = vadd.f32 %v8546_v1, %v7242_v52  ;;  %v8547_v24 = vld [vmem:[#allocation144_spill] sm:$0xff]  ;;  %v2051_v51 = vadd.f32 %v8550_v10, %v7264_v49 }
 0x3c0   : > { %v7708_v55 = vadd.f32 %v3259_v26, %v2944_v15  ;;  %3882 = vmatprep.mubr.f32.mxu1 %v2428_v56  ;;  %v2946_v7 = vpop.f32.mrf.mxu0  ;;  %v2053_v15 = vadd.f32 %v8547_v24, %v7244_v45  ;;  %v2435_v26 = vmax.f32 %v2045_v47, 0.0  ;;  %v2441_v47 = vmax.f32 %v1686_v48, 0.0 }
 0x3c1   : > { %v3261_v13 = vpop.f32.mrf.mxu1 }
 0x3c2   : > { %8543 = vst [vmem:[#allocation172_spill] sm:$0xff] %v7708_v55  ;;  %v2949_v4 = vpop.f32.mrf.mxu0  ;;  %3568 = vmatmul.mubr.f32.gmra.mxu0 %v2425_v18  ;;  %v2442_v13 = vmax.f32 %v1688_v57, 0.0  ;;  %v2444_v24 = vmax.f32 %v2053_v15, 0.0  ;;  %v8551_v55 = vld [vmem:[#allocation147_spill] sm:$0xff]  ;;  %v1692_v57 = vadd.f32 %v8554_v54, %v7262_v41  ;;  %v8555_v15 = vld [vmem:[#allocation150_spill] sm:$0xff]  ;;  %v8558_v54 = vld [vmem:[#allocation153_spill] sm:$0xff] }
 0x3c3   : > { %v3264_v56 = vpop.f32.mrf.mxu1  ;;  %3883 = vmatmul.mubr.f32.gmra.mxu1 %v2427_v22  ;;  %3572 = vmatprep.mubr.f32.mxu0 %v2434_v0  ;;  %v1694_v18 = vadd.f32 %v8551_v55, %v7242_v52  ;;  %v8552_v22 = vld [vmem:[#allocation148_spill] sm:$0xff]  ;;  %v2057_v10 = vadd.f32 %v8555_v15, %v7264_v49 }
 0x3c4   : > { %v7718_v2 = vadd.f32 %v3264_v56, %v2949_v4  ;;  %3887 = vmatprep.mubr.f32.mxu1 %v2436_v3  ;;  %v2951_v1 = vpop.f32.mrf.mxu0  ;;  %v2059_v4 = vadd.f32 %v8552_v22, %v7244_v45  ;;  %v2443_v56 = vmax.f32 %v2051_v51, 0.0  ;;  %v2449_v51 = vmax.f32 %v1692_v57, 0.0 }
 0x3c5   : > { %v3266_v7 = vpop.f32.mrf.mxu1 }
 0x3c6   : > { %8548 = vst [vmem:[#allocation175_spill] sm:$0xff] %v7718_v2  ;;  %v2954_v0 = vpop.f32.mrf.mxu0  ;;  %3573 = vmatmul.mubr.f32.gmra.mxu0 %v2433_v50  ;;  %v2450_v7 = vmax.f32 %v1694_v18, 0.0  ;;  %v2452_v22 = vmax.f32 %v2059_v4, 0.0  ;;  %v8556_v2 = vld [vmem:[#allocation151_spill] sm:$0xff]  ;;  %v1698_v18 = vadd.f32 %v8558_v54, %v7262_v41  ;;  %v8559_v4 = vld [vmem:[#allocation154_spill] sm:$0xff] }
 0x3c7   : > { %v3269_v3 = vpop.f32.mrf.mxu1  ;;  %3888 = vmatmul.mubr.f32.gmra.mxu1 %v2435_v26  ;;  %3577 = vmatprep.mubr.f32.mxu0 %v2442_v13  ;;  %v1700_v50 = vadd.f32 %v8556_v2, %v7242_v52  ;;  %v8557_v26 = vld [vmem:[#allocation152_spill] sm:$0xff]  ;;  %v2063_v15 = vadd.f32 %v8559_v4, %v7264_v49  ;;  %v8562_v54 = vld [vmem:[#allocation158_spill] sm:$0xff] }
 0x3c8   : > { %v7728_v14 = vadd.f32 %v3269_v3, %v2954_v0  ;;  %3892 = vmatprep.mubr.f32.mxu1 %v2444_v24  ;;  %v2956_v55 = vpop.f32.mrf.mxu0  ;;  %v2065_v0 = vadd.f32 %v8557_v26, %v7244_v45  ;;  %v2451_v3 = vmax.f32 %v2057_v10, 0.0  ;;  %v2457_v10 = vmax.f32 %v1698_v18, 0.0 }
 0x3c9   : > { %v3271_v1 = vpop.f32.mrf.mxu1 }
 0x3ca   : > { %8553 = vst [vmem:[#allocation173_spill] sm:$0xff] %v7728_v14  ;;  %v2959_v13 = vpop.f32.mrf.mxu0  ;;  %3578 = vmatmul.mubr.f32.gmra.mxu0 %v2441_v47  ;;  %v2458_v1 = vmax.f32 %v1700_v50, 0.0  ;;  %v2460_v26 = vmax.f32 %v2065_v0, 0.0  ;;  %v8560_v14 = vld [vmem:[#allocation157_spill] sm:$0xff]  ;;  %v1704_v50 = vadd.f32 %v8562_v54, %v7262_v41  ;;  %v8563_v0 = vld [vmem:[#allocation159_spill] sm:$0xff] }
 0x3cb   : > { %v3274_v24 = vpop.f32.mrf.mxu1  ;;  %3893 = vmatmul.mubr.f32.gmra.mxu1 %v2443_v56  ;;  %3582 = vmatprep.mubr.f32.mxu0 %v2450_v7  ;;  %v1706_v47 = vadd.f32 %v8560_v14, %v7242_v52  ;;  %v8561_v56 = vld [vmem:[#allocation155_spill] sm:$0xff]  ;;  %v2069_v4 = vadd.f32 %v8563_v0, %v7264_v49 }
 0x3cc   : > { %v7738_v48 = vadd.f32 %v3274_v24, %v2959_v13  ;;  %3897 = vmatprep.mubr.f32.mxu1 %v2452_v22  ;;  %v2961_v2 = vpop.f32.mrf.mxu0  ;;  %v2071_v13 = vadd.f32 %v8561_v56, %v7244_v45  ;;  %v2459_v24 = vmax.f32 %v2063_v15, 0.0  ;;  %v2465_v15 = vmax.f32 %v1704_v50, 0.0 }
 0x3cd   : > { %v3276_v55 = vpop.f32.mrf.mxu1 }
 0x3ce   : > { %v2964_v7 = vpop.f32.mrf.mxu0  ;;  %3583 = vmatmul.mubr.f32.gmra.mxu0 %v2449_v51  ;;  %v2466_v55 = vmax.f32 %v1706_v47, 0.0  ;;  %v2468_v56 = vmax.f32 %v2071_v13, 0.0  ;;  %v1712_v51 = vadd.f32 %v7250_v17, %v7242_v52  ;;  %v8565_v13 = vld [vmem:[#allocation162_spill] sm:$0xff] }
 0x3cf   : > { %v3279_v22 = vpop.f32.mrf.mxu1  ;;  %3898 = vmatmul.mubr.f32.gmra.mxu1 %v2451_v3  ;;  %3587 = vmatprep.mubr.f32.mxu0 %v2458_v1  ;;  %v2077_v3 = vadd.f32 %v7252_v12, %v7244_v45  ;;  %v2075_v54 = vadd.f32 %v8565_v13, %v7264_v49 }
 0x3d0   : > { %v7748_v57 = vadd.f32 %v3279_v22, %v2964_v7  ;;  %3902 = vmatprep.mubr.f32.mxu1 %v2460_v26  ;;  %v2966_v14 = vpop.f32.mrf.mxu0  ;;  %v2467_v7 = vmax.f32 %v2069_v4, 0.0  ;;  %v8564_v22 = vld [vmem:[#allocation156_spill] sm:$0xff] }
 0x3d1   : > { %v3281_v2 = vpop.f32.mrf.mxu1  ;;  %v1710_v47 = vadd.f32 %v8564_v22, %v7262_v41  ;;  %v2474_v14 = vmax.f32 %v1712_v51, 0.0  ;;  %v2476_v12 = vmax.f32 %v2077_v3, 0.0  ;;  %v8568_v3 = vld [vmem:[#allocation160_spill] sm:$0xff] }
 0x3d2   : > { %v2969_v1 = vpop.f32.mrf.mxu0  ;;  %3588 = vmatmul.mubr.f32.gmra.mxu0 %v2457_v10  ;;  %v1718_v10 = vadd.f32 %v7270_v38, %v7242_v52  ;;  %v2081_v22 = vadd.f32 %v8568_v3, %v7264_v49 }
 0x3d3   : > { %v3284_v26 = vpop.f32.mrf.mxu1  ;;  %3903 = vmatmul.mubr.f32.gmra.mxu1 %v2459_v24  ;;  %3592 = vmatprep.mubr.f32.mxu0 %v2466_v55  ;;  %v8566_v24 = vld [vmem:[#allocation161_spill] sm:$0xff]  ;;  %v2473_v4 = vmax.f32 %v1710_v47, 0.0 }
 0x3d4   : > { %v7758_v18 = vadd.f32 %v3284_v26, %v2969_v1  ;;  %3907 = vmatprep.mubr.f32.mxu1 %v2468_v56  ;;  %v2971_v17 = vpop.f32.mrf.mxu0  ;;  %v2083_v2 = vadd.f32 %v8566_v24, %v7244_v45  ;;  %v2475_v1 = vmax.f32 %v2075_v54, 0.0  ;;  %v8567_v26 = vld [vmem:[#allocation163_spill] sm:$0xff]  ;;  %v2482_v13 = vmax.f32 %v1718_v10, 0.0 }
 0x3d5   : > { %v3286_v0 = vpop.f32.mrf.mxu1  ;;  %v1716_v51 = vadd.f32 %v8567_v26, %v7262_v41  ;;  %v2483_v54 = vmax.f32 %v2081_v22, 0.0  ;;  %v2487_v22 = vld [vmem:[#allocation2 + $0x10] sm:$0xff] }
 0x3d6   : > { %v2974_v55 = vpop.f32.mrf.mxu0  ;;  %3593 = vmatmul.mubr.f32.gmra.mxu0 %v2465_v15  ;;  %v2484_v45 = vmax.f32 %v2083_v2, 0.0  ;;  %v2485_v0 = vld [vmem:[#allocation2 + $0xb0] sm:$0xff] }
 0x3d7   : > { %v3289_v56 = vpop.f32.mrf.mxu1  ;;  %3908 = vmatmul.mubr.f32.gmra.mxu1 %v2467_v7  ;;  %3597 = vmatprep.mubr.f32.mxu0 %v2474_v14  ;;  %v2481_v47 = vmax.f32 %v1716_v51, 0.0 }
 0x3d8   : > { %v7768_v50 = vadd.f32 %v3289_v56, %v2974_v55  ;;  %3912 = vmatprep.mubr.f32.mxu1 %v2476_v12  ;;  %v2976_v52 = vpop.f32.mrf.mxu0  ;;  %v2486_v55 = vld [vmem:[#allocation2 + $0xd0] sm:$0xff] }
 0x3d9   : > { %v3291_v38 = vpop.f32.mrf.mxu1 }
 0x3da   : > { %v3359_v17 = vpop.f32.mrf.mxu0  ;;  %3598 = vmatmul.mubr.f32.gmra.mxu0 %v2473_v4 }
 0x3db   : > { %v3674_v15 = vpop.f32.mrf.mxu1  ;;  %3913 = vmatmul.mubr.f32.gmra.mxu1 %v2475_v1  ;;  %v3360_v7 = vadd.f32 %v3359_v17, %v7278_v42  ;;  %3602 = vmatprep.mubr.f32.mxu0 %v2482_v13 }
 0x3dc   : > { %3917 = vmatprep.mubr.f32.mxu1 %v2484_v45  ;;  %v3361_v14 = vpop.f32.mrf.mxu0 }
 0x3dd   : > { %v3676_v41 = vpop.f32.mrf.mxu1  ;;  %v3675_v12 = vadd.f32 %v3674_v15, %v3360_v7  ;;  %v2488_v7 = vld [vmem:[#allocation2 + $0x48] sm:$0xff] }
 0x3de   : > { %v3364_v24 = vpop.f32.mrf.mxu0  ;;  %3603 = vmatmul.mubr.f32.gmra.mxu0 %v2481_v47 }
 0x3df   : > { %v3679_v49 = vpop.f32.mrf.mxu1  ;;  %3918 = vmatmul.mubr.f32.gmra.mxu1 %v2483_v54  ;;  %v3923_v10 = vadd.f32 %v3675_v12, %v2485_v0  ;;  %v3365_v2 = vadd.f32 %v3364_v24, %v7288_v43  ;;  %v2489_v24 = vld [vmem:[#allocation2 + $0x160] sm:$0xff] }
 0x3e0   : > { %v3366_v56 = vpop.f32.mrf.mxu0 }
 0x3e1   : > { %v3681_v4 = vpop.f32.mrf.mxu1  ;;  %3973 = vst [vmem:[#allocation2 + $0xb0] sm:$0xff] %v3923_v10  ;;  %v3680_v42 = vadd.f32 %v3679_v49, %v3365_v2 }
 0x3e2   : > { %v3369_v1 = vpop.f32.mrf.mxu0 }
 0x3e3   : > { %v3684_v26 = vpop.f32.mrf.mxu1  ;;  %v3924_v51 = vadd.f32 %v3680_v42, %v2486_v55  ;;  %v3370_v3 = vadd.f32 %v3369_v1, %v7298_v37  ;;  %v2490_v42 = vld [vmem:[#allocation2 + $0x128] sm:$0xff] }
 0x3e4   : > { %v3371_v52 = vpop.f32.mrf.mxu0 }
 0x3e5   : > { %v3686_v38 = vpop.f32.mrf.mxu1  ;;  %3974 = vst [vmem:[#allocation2 + $0xd0] sm:$0xff] %v3924_v51  ;;  %v3685_v13 = vadd.f32 %v3684_v26, %v3370_v3 }
 0x3e6   : > { %v3374_v45 = vpop.f32.mrf.mxu0  ;;  %v2491_v38 = vld [vmem:[#allocation2 + $0x40] sm:$0xff] }
 0x3e7   : > { %v3689_v17 = vpop.f32.mrf.mxu1  ;;  %v3925_v15 = vadd.f32 %v3685_v13, %v2487_v22  ;;  %v3375_v43 = vadd.f32 %v3374_v45, %v7308_v34 }
 0x3e8   : > { %v3376_v47 = vpop.f32.mrf.mxu0 }
 0x3e9   : > { %v3691_v54 = vpop.f32.mrf.mxu1  ;;  %3975 = vst [vmem:[#allocation2 + $0x10] sm:$0xff] %v3925_v15  ;;  %v3690_v0 = vadd.f32 %v3689_v17, %v3375_v43  ;;  %v2492_v47 = vld [vmem:[#allocation2 + $0x178] sm:$0xff] }
 0x3ea   : > { %v3379_v14 = vpop.f32.mrf.mxu0 }
 0x3eb   : > { %v3694_v41 = vpop.f32.mrf.mxu1  ;;  %v3926_v12 = vadd.f32 %v3690_v0, %v2488_v7  ;;  %v3380_v37 = vadd.f32 %v3379_v14, %v7318_v31 }
 0x3ec   : > { %v3381_v49 = vpop.f32.mrf.mxu0 }
 0x3ed   : > { %v3696_v10 = vpop.f32.mrf.mxu1  ;;  %3976 = vst [vmem:[#allocation2 + $0x48] sm:$0xff] %v3926_v12  ;;  %v3695_v2 = vadd.f32 %v3694_v41, %v3380_v37 }
 0x3ee   : > { %v3384_v55 = vpop.f32.mrf.mxu0 }
 0x3ef   : > { %v3699_v56 = vpop.f32.mrf.mxu1  ;;  %v3927_v4 = vadd.f32 %v3695_v2, %v2489_v24  ;;  %v3385_v34 = vadd.f32 %v3384_v55, %v7328_v29  ;;  %v2493_v24 = vld [vmem:[#allocation2 + $0x108] sm:$0xff] }
 0x3f0   : > { %v3386_v1 = vpop.f32.mrf.mxu0 }
 0x3f1   : > { %v3701_v26 = vpop.f32.mrf.mxu1  ;;  %3977 = vst [vmem:[#allocation2 + $0x160] sm:$0xff] %v3927_v4  ;;  %v3700_v51 = vadd.f32 %v3699_v56, %v3385_v34  ;;  %v2494_v34 = vld [vmem:[#allocation2 + $0x110] sm:$0xff] }
 0x3f2   : > { %v3389_v3 = vpop.f32.mrf.mxu0 }
 0x3f3   : > { %v3704_v22 = vpop.f32.mrf.mxu1  ;;  %v3928_v52 = vadd.f32 %v3700_v51, %v2490_v42  ;;  %v3390_v31 = vadd.f32 %v3389_v3, %v7338_v32 }
 0x3f4   : > { %v3391_v13 = vpop.f32.mrf.mxu0 }
 0x3f5   : > { %v3706_v45 = vpop.f32.mrf.mxu1  ;;  %3978 = vst [vmem:[#allocation2 + $0x128] sm:$0xff] %v3928_v52  ;;  %v3705_v17 = vadd.f32 %v3704_v22, %v3390_v31  ;;  %v2495_v52 = vld [vmem:[#allocation2 + $0x90] sm:$0xff] }
 0x3f6   : > { %v3394_v15 = vpop.f32.mrf.mxu0 }
 0x3f7   : > { %v3709_v43 = vpop.f32.mrf.mxu1  ;;  %v3929_v7 = vadd.f32 %v3705_v17, %v2491_v38  ;;  %v3395_v29 = vadd.f32 %v3394_v15, %v7348_v46 }
 0x3f8   : > { %v3396_v54 = vpop.f32.mrf.mxu0 }
 0x3f9   : > { %v3711_v0 = vpop.f32.mrf.mxu1  ;;  %3979 = vst [vmem:[#allocation2 + $0x40] sm:$0xff] %v3929_v7  ;;  %v3710_v14 = vadd.f32 %v3709_v43, %v3395_v29  ;;  %v2496_v43 = vld [vmem:[#allocation2 + $0x118] sm:$0xff] }
 0x3fa   : > { %v3399_v41 = vpop.f32.mrf.mxu0 }
 0x3fb   : > { %v3714_v12 = vpop.f32.mrf.mxu1  ;;  %v3930_v37 = vadd.f32 %v3710_v14, %v2492_v47  ;;  %v3400_v32 = vadd.f32 %v3399_v41, %v7358_v8  ;;  %v2497_v41 = vld [vmem:[#allocation2 + $0x148] sm:$0xff] }
 0x3fc   : > { %v3401_v49 = vpop.f32.mrf.mxu0 }
 0x3fd   : > { %v3716_v10 = vpop.f32.mrf.mxu1  ;;  %3980 = vst [vmem:[#allocation2 + $0x178] sm:$0xff] %v3930_v37  ;;  %v3715_v2 = vadd.f32 %v3714_v12, %v3400_v32 }
 0x3fe   : > { %v3404_v55 = vpop.f32.mrf.mxu0 }
 0x3ff   : > { %v3719_v56 = vpop.f32.mrf.mxu1  ;;  %v3931_v4 = vadd.f32 %v3715_v2, %v2493_v24  ;;  %v3405_v46 = vadd.f32 %v3404_v55, %v7368_v40  ;;  %v2498_v2 = vld [vmem:[#allocation2 + $0x100] sm:$0xff] }
 0x400   : > { %v3406_v42 = vpop.f32.mrf.mxu0 }
 0x401   : > { %v3721_v1 = vpop.f32.mrf.mxu1  ;;  %3981 = vst [vmem:[#allocation2 + $0x108] sm:$0xff] %v3931_v4  ;;  %v3720_v26 = vadd.f32 %v3719_v56, %v3405_v46 }
 0x402   : > { %v3409_v51 = vpop.f32.mrf.mxu0  ;;  %v2499_v1 = vld [vmem:[#allocation2 + $0x58] sm:$0xff] }
 0x403   : > { %v3724_v3 = vpop.f32.mrf.mxu1  ;;  %v3932_v22 = vadd.f32 %v3720_v26, %v2494_v34  ;;  %v3410_v8 = vadd.f32 %v3409_v51, %v7378_v44 }
 0x404   : > { %v3411_v31 = vpop.f32.mrf.mxu0 }
 0x405   : > { %v3726_v38 = vpop.f32.mrf.mxu1  ;;  %3982 = vst [vmem:[#allocation2 + $0x110] sm:$0xff] %v3932_v22  ;;  %v3725_v13 = vadd.f32 %v3724_v3, %v3410_v8  ;;  %v2500_v31 = vld [vmem:[#allocation2 + $0xd8] sm:$0xff] }
 0x406   : > { %v3414_v45 = vpop.f32.mrf.mxu0 }
 0x407   : > { %v3729_v17 = vpop.f32.mrf.mxu1  ;;  %v3933_v15 = vadd.f32 %v3725_v13, %v2495_v52  ;;  %v3415_v40 = vadd.f32 %v3414_v45, %v7388_v39 }
 0x408   : > { %v3416_v7 = vpop.f32.mrf.mxu0 }
 0x409   : > { %v3731_v29 = vpop.f32.mrf.mxu1  ;;  %3983 = vst [vmem:[#allocation2 + $0x90] sm:$0xff] %v3933_v15  ;;  %v3730_v47 = vadd.f32 %v3729_v17, %v3415_v40 }
 0x40a   : > { %v3419_v54 = vpop.f32.mrf.mxu0 }
 0x40b   : > { %v3734_v0 = vpop.f32.mrf.mxu1  ;;  %v3934_v14 = vadd.f32 %v3730_v47, %v2496_v43  ;;  %v3420_v44 = vadd.f32 %v3419_v54, %v7398_v60  ;;  %v2501_v43 = vld [vmem:[#allocation2 + $0x180] sm:$0xff] }
 0x40c   : > { %v3421_v12 = vpop.f32.mrf.mxu0 }
 0x40d   : > { %v3736_v37 = vpop.f32.mrf.mxu1  ;;  %3984 = vst [vmem:[#allocation2 + $0x118] sm:$0xff] %v3934_v14  ;;  %v3735_v32 = vadd.f32 %v3734_v0, %v3420_v44  ;;  %v2502_v44 = vld [vmem:[#allocation2 + $0x130] sm:$0xff] }
 0x40e   : > { %v3424_v24 = vpop.f32.mrf.mxu0 }
 0x40f   : > { %v3739_v49 = vpop.f32.mrf.mxu1  ;;  %v3935_v10 = vadd.f32 %v3735_v32, %v2497_v41  ;;  %v3425_v39 = vadd.f32 %v3424_v24, %v7408_v33 }
 0x410   : > { %v3426_v55 = vpop.f32.mrf.mxu0 }
 0x411   : > { %v3741_v56 = vpop.f32.mrf.mxu1  ;;  %3985 = vst [vmem:[#allocation2 + $0x148] sm:$0xff] %v3935_v10  ;;  %v3740_v4 = vadd.f32 %v3739_v49, %v3425_v39  ;;  %v2503_v10 = vld [vmem:[#allocation2 + $0x138] sm:$0xff] }
 0x412   : > { %v3429_v46 = vpop.f32.mrf.mxu0 }
 0x413   : > { %v3744_v34 = vpop.f32.mrf.mxu1  ;;  %v3936_v42 = vadd.f32 %v3740_v4, %v2498_v2  ;;  %v3430_v60 = vadd.f32 %v3429_v46, %v7418_v21 }
 0x414   : > { %v3431_v26 = vpop.f32.mrf.mxu0 }
 0x415   : > { %v3746_v51 = vpop.f32.mrf.mxu1  ;;  %3986 = vst [vmem:[#allocation2 + $0x100] sm:$0xff] %v3936_v42  ;;  %v3745_v3 = vadd.f32 %v3744_v34, %v3430_v60  ;;  %v2504_v34 = vld [vmem:[#allocation2 + $0x120] sm:$0xff] }
 0x416   : > { %v3434_v22 = vpop.f32.mrf.mxu0 }
 0x417   : > { %v3749_v8 = vpop.f32.mrf.mxu1  ;;  %v3937_v52 = vadd.f32 %v3745_v3, %v2499_v1  ;;  %v3435_v33 = vadd.f32 %v3434_v22, %v7428_v36  ;;  %v2505_v22 = vld [vmem:[#allocation2 + $0xe0] sm:$0xff] }
 0x418   : > { %v3436_v38 = vpop.f32.mrf.mxu0 }
 0x419   : > { %v3751_v13 = vpop.f32.mrf.mxu1  ;;  %3987 = vst [vmem:[#allocation2 + $0x58] sm:$0xff] %v3937_v52  ;;  %v3750_v45 = vadd.f32 %v3749_v8, %v3435_v33 }
 0x41a   : > { %v3439_v17 = vpop.f32.mrf.mxu0 }
 0x41b   : > { %v3754_v15 = vpop.f32.mrf.mxu1  ;;  %v3938_v40 = vadd.f32 %v3750_v45, %v2500_v31  ;;  %v3440_v21 = vadd.f32 %v3439_v17, %v7438_v28  ;;  %v2506_v45 = vld [vmem:[#allocation2 + $0xa8] sm:$0xff] }
 0x41c   : > { %v3441_v7 = vpop.f32.mrf.mxu0 }
 0x41d   : > { %v3756_v29 = vpop.f32.mrf.mxu1  ;;  %3988 = vst [vmem:[#allocation2 + $0xd8] sm:$0xff] %v3938_v40  ;;  %v3755_v47 = vadd.f32 %v3754_v15, %v3440_v21 }
 0x41e   : > { %v3444_v54 = vpop.f32.mrf.mxu0  ;;  %v2507_v29 = vld [vmem:[#allocation2 + $0xb8] sm:$0xff] }
 0x41f   : > { %v3759_v0 = vpop.f32.mrf.mxu1  ;;  %v3939_v14 = vadd.f32 %v3755_v47, %v2501_v43  ;;  %v3445_v36 = vadd.f32 %v3444_v54, %v7448_v25 }
 0x420   : > { %v3446_v41 = vpop.f32.mrf.mxu0 }
 0x421   : > { %v3761_v12 = vpop.f32.mrf.mxu1  ;;  %3989 = vst [vmem:[#allocation2 + $0x180] sm:$0xff] %v3939_v14  ;;  %v3760_v37 = vadd.f32 %v3759_v0, %v3445_v36  ;;  %v2508_v41 = vld [vmem:[#allocation2 + $0x168] sm:$0xff] }
 0x422   : > { %v3449_v32 = vpop.f32.mrf.mxu0 }
 0x423   : > { %v3764_v24 = vpop.f32.mrf.mxu1  ;;  %v3940_v49 = vadd.f32 %v3760_v37, %v2502_v44  ;;  %v3450_v28 = vadd.f32 %v3449_v32, %v7458_v16 }
 0x424   : > { %v3451_v39 = vpop.f32.mrf.mxu0 }
 0x425   : > { %v3766_v2 = vpop.f32.mrf.mxu1  ;;  %3990 = vst [vmem:[#allocation2 + $0x130] sm:$0xff] %v3940_v49  ;;  %v3765_v55 = vadd.f32 %v3764_v24, %v3450_v28 }
 0x426   : > { %v3454_v56 = vpop.f32.mrf.mxu0 }
 0x427   : > { %v3769_v4 = vpop.f32.mrf.mxu1  ;;  %v3941_v46 = vadd.f32 %v3765_v55, %v2503_v10  ;;  %v3455_v25 = vadd.f32 %v3454_v56, %v7468_v20  ;;  %v2509_v10 = vld [vmem:[#allocation2 + $0xe8] sm:$0xff] }
 0x428   : > { %v3456_v42 = vpop.f32.mrf.mxu0 }
 0x429   : > { %v3771_v60 = vpop.f32.mrf.mxu1  ;;  %3991 = vst [vmem:[#allocation2 + $0x138] sm:$0xff] %v3941_v46  ;;  %v3770_v1 = vadd.f32 %v3769_v4, %v3455_v25  ;;  %v2510_v25 = vld [vmem:[#allocation2 + $0xf8] sm:$0xff] }
 0x42a   : > { %v3459_v26 = vpop.f32.mrf.mxu0 }
 0x42b   : > { %v3774_v51 = vpop.f32.mrf.mxu1  ;;  %v3942_v3 = vadd.f32 %v3770_v1, %v2504_v34  ;;  %v3460_v16 = vadd.f32 %v3459_v26, %v7478_v6 }
 0x42c   : > { %v3461_v8 = vpop.f32.mrf.mxu0 }
 0x42d   : > { %v3776_v52 = vpop.f32.mrf.mxu1  ;;  %3992 = vst [vmem:[#allocation2 + $0x120] sm:$0xff] %v3942_v3  ;;  %v3775_v33 = vadd.f32 %v3774_v51, %v3460_v16  ;;  %v2511_v3 = vld [vmem:[#allocation2 + $0x20] sm:$0xff] }
 0x42e   : > { %v3464_v31 = vpop.f32.mrf.mxu0 }
 0x42f   : > { %v3779_v38 = vpop.f32.mrf.mxu1  ;;  %v3943_v13 = vadd.f32 %v3775_v33, %v2505_v22  ;;  %v3465_v20 = vadd.f32 %v3464_v31, %v7488_v5 }
 0x430   : > { %v3466_v17 = vpop.f32.mrf.mxu0 }
 0x431   : > { %v3781_v15 = vpop.f32.mrf.mxu1  ;;  %3993 = vst [vmem:[#allocation2 + $0xe0] sm:$0xff] %v3943_v13  ;;  %v3780_v40 = vadd.f32 %v3779_v38, %v3465_v20  ;;  %v2512_v38 = vld [vmem:[#allocation2 + $0x88] sm:$0xff] }
 0x432   : > { %v3469_v21 = vpop.f32.mrf.mxu0 }
 0x433   : > { %v3784_v43 = vpop.f32.mrf.mxu1  ;;  %v3944_v7 = vadd.f32 %v3780_v40, %v2506_v45  ;;  %v3470_v6 = vadd.f32 %v3469_v21, %v7498_v30  ;;  %v2513_v21 = vld [vmem:[#allocation2 + $0xa0] sm:$0xff] }
 0x434   : > { %v3471_v47 = vpop.f32.mrf.mxu0 }
 0x435   : > { %v3786_v54 = vpop.f32.mrf.mxu1  ;;  %3994 = vst [vmem:[#allocation2 + $0xa8] sm:$0xff] %v3944_v7  ;;  %v3785_v0 = vadd.f32 %v3784_v43, %v3470_v6 }
 0x436   : > { %v3474_v14 = vpop.f32.mrf.mxu0 }
 0x437   : > { %v3789_v36 = vpop.f32.mrf.mxu1  ;;  %v3945_v44 = vadd.f32 %v3785_v0, %v2507_v29  ;;  %v3475_v5 = vadd.f32 %v3474_v14, %v7508_v58  ;;  %v2514_v0 = vld [vmem:[#allocation2 + $0x170] sm:$0xff] }
 0x438   : > { %v3476_v12 = vpop.f32.mrf.mxu0 }
 0x439   : > { %v3791_v37 = vpop.f32.mrf.mxu1  ;;  %3995 = vst [vmem:[#allocation2 + $0xb8] sm:$0xff] %v3945_v44  ;;  %v3790_v32 = vadd.f32 %v3789_v36, %v3475_v5 }
 0x43a   : > { %v3479_v24 = vpop.f32.mrf.mxu0  ;;  %v2515_v37 = vld [vmem:[#allocation2 + $0xf0] sm:$0xff] }
 0x43b   : > { %v3794_v49 = vpop.f32.mrf.mxu1  ;;  %v3946_v28 = vadd.f32 %v3790_v32, %v2508_v41  ;;  %v3480_v30 = vadd.f32 %v3479_v24, %v7518_v23 }
 0x43c   : > { %v3481_v39 = vpop.f32.mrf.mxu0 }
 0x43d   : > { %v3796_v2 = vpop.f32.mrf.mxu1  ;;  %3996 = vst [vmem:[#allocation2 + $0x168] sm:$0xff] %v3946_v28  ;;  %v3795_v55 = vadd.f32 %v3794_v49, %v3480_v30  ;;  %v2516_v39 = vld [vmem:[#allocation2 + $0x140] sm:$0xff] }
 0x43e   : > { %v3484_v56 = vpop.f32.mrf.mxu0 }
 0x43f   : > { %v3799_v4 = vpop.f32.mrf.mxu1  ;;  %v3947_v46 = vadd.f32 %v3795_v55, %v2509_v10  ;;  %v3485_v58 = vadd.f32 %v3484_v56, %v7528_v19 }
 0x440   : > { %v3486_v34 = vpop.f32.mrf.mxu0 }
 0x441   : > { %v3801_v42 = vpop.f32.mrf.mxu1  ;;  %3997 = vst [vmem:[#allocation2 + $0xe8] sm:$0xff] %v3947_v46  ;;  %v3800_v60 = vadd.f32 %v3799_v4, %v3485_v58 }
 0x442   : > { %v3489_v1 = vpop.f32.mrf.mxu0 }
 0x443   : > { %v3804_v26 = vpop.f32.mrf.mxu1  ;;  %v3948_v51 = vadd.f32 %v3800_v60, %v2510_v25  ;;  %v3490_v23 = vadd.f32 %v3489_v1, %v7538_v35  ;;  %v2517_v25 = vld [vmem:[#allocation2 + $0x50] sm:$0xff] }
 0x444   : > { %v3491_v16 = vpop.f32.mrf.mxu0 }
 0x445   : > { %v3806_v22 = vpop.f32.mrf.mxu1  ;;  %3998 = vst [vmem:[#allocation2 + $0xf8] sm:$0xff] %v3948_v51  ;;  %v3805_v8 = vadd.f32 %v3804_v26, %v3490_v23  ;;  %v2518_v23 = vld [vmem:[#allocation2] sm:$0xff] }
 0x446   : > { %v3494_v52 = vpop.f32.mrf.mxu0 }
 0x447   : > { %v3809_v33 = vpop.f32.mrf.mxu1  ;;  %v3949_v31 = vadd.f32 %v3805_v8, %v2511_v3  ;;  %v3495_v19 = vadd.f32 %v3494_v52, %v7548_v63 }
 0x448   : > { %v3496_v13 = vpop.f32.mrf.mxu0 }
 0x449   : > { %v3811_v20 = vpop.f32.mrf.mxu1  ;;  %3999 = vst [vmem:[#allocation2 + $0x20] sm:$0xff] %v3949_v31  ;;  %v3810_v45 = vadd.f32 %v3809_v33, %v3495_v19  ;;  %v2519_v31 = vld [vmem:[#allocation2 + $0x8] sm:$0xff] }
 0x44a   : > { %v3499_v17 = vpop.f32.mrf.mxu0 }
 0x44b   : > { %v3814_v15 = vpop.f32.mrf.mxu1  ;;  %v3950_v40 = vadd.f32 %v3810_v45, %v2512_v38  ;;  %v3500_v35 = vadd.f32 %v3499_v17, %v7558_v59 }
 0x44c   : > { %v3501_v43 = vpop.f32.mrf.mxu0 }
 0x44d   : > { %v3816_v7 = vpop.f32.mrf.mxu1  ;;  %4000 = vst [vmem:[#allocation2 + $0x88] sm:$0xff] %v3950_v40  ;;  %v3815_v6 = vadd.f32 %v3814_v15, %v3500_v35  ;;  %v8569_v15 = vld [vmem:[#allocation166_spill] sm:$0xff]  ;;  %v2520_v40 = vld [vmem:[#allocation2 + $0xc0] sm:$0xff] }
 0x44e   : > { %v3504_v29 = vpop.f32.mrf.mxu0 }
 0x44f   : > { %v3819_v47 = vpop.f32.mrf.mxu1  ;;  %v3951_v54 = vadd.f32 %v3815_v6, %v2513_v21  ;;  %v3505_v63 = vadd.f32 %v3504_v29, %v7568_v11 }
 0x450   : > { %v3506_v14 = vpop.f32.mrf.mxu0 }
 0x451   : > { %v3821_v36 = vpop.f32.mrf.mxu1  ;;  %4001 = vst [vmem:[#allocation2 + $0xa0] sm:$0xff] %v3951_v54  ;;  %v3820_v44 = vadd.f32 %v3819_v47, %v3505_v63  ;;  %v8570_v47 = vld [vmem:[#allocation164_spill] sm:$0xff]  ;;  %v2521_v54 = vld [vmem:[#allocation2 + $0x98] sm:$0xff] }
 0x452   : > { %v3509_v5 = vpop.f32.mrf.mxu0 }
 0x453   : > { %v3824_v41 = vpop.f32.mrf.mxu1  ;;  %v3952_v12 = vadd.f32 %v3820_v44, %v2514_v0  ;;  %v3510_v59 = vadd.f32 %v3509_v5, %v7578_v9 }
 0x454   : > { %v3511_v32 = vpop.f32.mrf.mxu0 }
 0x455   : > { %v3826_v24 = vpop.f32.mrf.mxu1  ;;  %4002 = vst [vmem:[#allocation2 + $0x170] sm:$0xff] %v3952_v12  ;;  %v3825_v49 = vadd.f32 %v3824_v41, %v3510_v59  ;;  %v8571_v41 = vld [vmem:[#allocation165_spill] sm:$0xff]  ;;  %v2522_v59 = vld [vmem:[#allocation2 + $0x30] sm:$0xff] }
 0x456   : > { %v3514_v28 = vpop.f32.mrf.mxu0 }
 0x457   : > { %v3829_v30 = vpop.f32.mrf.mxu1  ;;  %v3953_v10 = vadd.f32 %v3825_v49, %v2515_v37  ;;  %v3515_v11 = vadd.f32 %v3514_v28, %v7588_v27 }
 0x458   : > { %v3516_v2 = vpop.f32.mrf.mxu0 }
 0x459   : > { %v3831_v55 = vpop.f32.mrf.mxu1  ;;  %4003 = vst [vmem:[#allocation2 + $0xf0] sm:$0xff] %v3953_v10  ;;  %v3830_v56 = vadd.f32 %v3829_v30, %v3515_v11  ;;  %v8572_v10 = vld [vmem:[#allocation169_spill] sm:$0xff] }
 0x45a   : > { %v3519_v4 = vpop.f32.mrf.mxu0 }
 0x45b   : > { %v3834_v46 = vpop.f32.mrf.mxu1  ;;  %v3954_v58 = vadd.f32 %v3830_v56, %v2516_v39  ;;  %v3520_v9 = vadd.f32 %v3519_v4, %v7598_v53  ;;  %v2523_v39 = vld [vmem:[#allocation2 + $0x188] sm:$0xff] }
 0x45c   : > { %v3521_v34 = vpop.f32.mrf.mxu0 }
 0x45d   : > { %v3836_v42 = vpop.f32.mrf.mxu1  ;;  %4004 = vst [vmem:[#allocation2 + $0x140] sm:$0xff] %v3954_v58  ;;  %v3835_v60 = vadd.f32 %v3834_v46, %v3520_v9  ;;  %v8573_v9 = vld [vmem:[#allocation170_spill] sm:$0xff]  ;;  %v2524_v34 = vld [vmem:[#allocation2 + $0x18] sm:$0xff] }
 0x45e   : > { %v3524_v1 = vpop.f32.mrf.mxu0 }
 0x45f   : > { %v3839_v26 = vpop.f32.mrf.mxu1  ;;  %v3955_v51 = vadd.f32 %v3835_v60, %v2517_v25  ;;  %v3525_v27 = vadd.f32 %v3524_v1, %v7608_v62 }
 0x460   : > { %v3526_v3 = vpop.f32.mrf.mxu0 }
 0x461   : > { %v3841_v16 = vpop.f32.mrf.mxu1  ;;  %4005 = vst [vmem:[#allocation2 + $0x50] sm:$0xff] %v3955_v51  ;;  %v3840_v22 = vadd.f32 %v3839_v26, %v3525_v27 }
 0x462   : > { %v3529_v8 = vpop.f32.mrf.mxu0  ;;  %v2525_v16 = vld [vmem:[#allocation2 + $0x28] sm:$0xff] }
 0x463   : > { %v3844_v52 = vpop.f32.mrf.mxu1  ;;  %v3956_v33 = vadd.f32 %v3840_v22, %v2518_v23  ;;  %v3530_v53 = vadd.f32 %v3529_v8, %v7618_v61  ;;  %v8574_v23 = vld [vmem:[#allocation167_spill] sm:$0xff] }
 0x464   : > { %v3531_v19 = vpop.f32.mrf.mxu0 }
 0x465   : > { %v3846_v38 = vpop.f32.mrf.mxu1  ;;  %4006 = vst [vmem:[#allocation2] sm:$0xff] %v3956_v33  ;;  %v3845_v13 = vadd.f32 %v3844_v52, %v3530_v53  ;;  %v8575_v19 = vld [vmem:[#allocation168_spill] sm:$0xff] }
 0x466   : > { %v3534_v20 = vpop.f32.mrf.mxu0 }
 0x467   : > { %v3849_v45 = vpop.f32.mrf.mxu1  ;;  %v3957_v17 = vadd.f32 %v3845_v13, %v2519_v31  ;;  %v3535_v62 = vadd.f32 %v3534_v20, %v8569_v15  ;;  %v2526_v13 = vld [vmem:[#allocation2 + $0x158] sm:$0xff] }
 0x468   : > { %v3536_v35 = vpop.f32.mrf.mxu0 }
 0x469   : > { %v3851_v21 = vpop.f32.mrf.mxu1  ;;  %4007 = vst [vmem:[#allocation2 + $0x8] sm:$0xff] %v3957_v17  ;;  %v3850_v43 = vadd.f32 %v3849_v45, %v3535_v62  ;;  %v8576_v35 = vld [vmem:[#allocation171_spill] sm:$0xff] }
 0x46a   : > { %v3539_v7 = vpop.f32.mrf.mxu0 }
 0x46b   : > { %v3854_v6 = vpop.f32.mrf.mxu1  ;;  %v3958_v29 = vadd.f32 %v3850_v43, %v2520_v40  ;;  %v3540_v61 = vadd.f32 %v3539_v7, %v8570_v47  ;;  %v2527_v43 = vld [vmem:[#allocation2 + $0x38] sm:$0xff] }
 0x46c   : > { %v3541_v63 = vpop.f32.mrf.mxu0 }
 0x46d   : > { %v3856_v0 = vpop.f32.mrf.mxu1  ;;  %4008 = vst [vmem:[#allocation2 + $0xc0] sm:$0xff] %v3958_v29  ;;  %v3855_v14 = vadd.f32 %v3854_v6, %v3540_v61  ;;  %v8577_v63 = vld [vmem:[#allocation172_spill] sm:$0xff] }
 0x46e   : > { %v3544_v36 = vpop.f32.mrf.mxu0 }
 0x46f   : > { %v3859_v44 = vpop.f32.mrf.mxu1  ;;  %v3959_v5 = vadd.f32 %v3855_v14, %v2521_v54  ;;  %v3545_v12 = vadd.f32 %v3544_v36, %v8571_v41  ;;  %v2528_v14 = vld [vmem:[#allocation2 + $0x70] sm:$0xff] }
 0x470   : > { %v3546_v37 = vpop.f32.mrf.mxu0 }
 0x471   : > { %v3861_v32 = vpop.f32.mrf.mxu1  ;;  %4009 = vst [vmem:[#allocation2 + $0x98] sm:$0xff] %v3959_v5  ;;  %v3860_v24 = vadd.f32 %v3859_v44, %v3545_v12  ;;  %v8578_v37 = vld [vmem:[#allocation175_spill] sm:$0xff] }
 0x472   : > { %v3549_v49 = vpop.f32.mrf.mxu0 }
 0x473   : > { %v3864_v28 = vpop.f32.mrf.mxu1  ;;  %v3960_v30 = vadd.f32 %v3860_v24, %v2522_v59  ;;  %v3550_v11 = vadd.f32 %v3549_v49, %v8572_v10  ;;  %v2529_v24 = vld [vmem:[#allocation2 + $0x68] sm:$0xff] }
 0x474   : > { %v3551_v2 = vpop.f32.mrf.mxu0 }
 0x475   : > { %v3866_v55 = vpop.f32.mrf.mxu1  ;;  %4010 = vst [vmem:[#allocation2 + $0x30] sm:$0xff] %v3960_v30  ;;  %v3865_v56 = vadd.f32 %v3864_v28, %v3550_v11  ;;  %v8579_v2 = vld [vmem:[#allocation173_spill] sm:$0xff] }
 0x476   : > { %v3554_v4 = vpop.f32.mrf.mxu0 }
 0x477   : > { %v3869_v46 = vpop.f32.mrf.mxu1  ;;  %v3961_v58 = vadd.f32 %v3865_v56, %v2523_v39  ;;  %v3555_v25 = vadd.f32 %v3554_v4, %v8573_v9  ;;  %v2530_v56 = vld [vmem:[#allocation2 + $0x80] sm:$0xff] }
 0x478   : > { %v3556_v42 = vpop.f32.mrf.mxu0 }
 0x479   : > { %v3871_v60 = vpop.f32.mrf.mxu1  ;;  %4011 = vst [vmem:[#allocation2 + $0x188] sm:$0xff] %v3961_v58  ;;  %v3870_v1 = vadd.f32 %v3869_v46, %v3555_v25 }
 0x47a   : > { %v3559_v26 = vpop.f32.mrf.mxu0  ;;  %v2531_v60 = vld [vmem:[#allocation2 + $0xc8] sm:$0xff] }
 0x47b   : > { %v3874_v51 = vpop.f32.mrf.mxu1  ;;  %v3962_v27 = vadd.f32 %v3870_v1, %v2524_v34  ;;  %v3560_v3 = vadd.f32 %v3559_v26, %v8574_v23 }
 0x47c   : > { %v3561_v22 = vpop.f32.mrf.mxu0 }
 0x47d   : > { %v3876_v8 = vpop.f32.mrf.mxu1  ;;  %4012 = vst [vmem:[#allocation2 + $0x18] sm:$0xff] %v3962_v27  ;;  %v3875_v52 = vadd.f32 %v3874_v51, %v3560_v3  ;;  %v2532_v22 = vld [vmem:[#allocation2 + $0x60] sm:$0xff] }
 0x47e   : > { %v3564_v33 = vpop.f32.mrf.mxu0 }
 0x47f   : > { %v3879_v53 = vpop.f32.mrf.mxu1  ;;  %v3963_v31 = vadd.f32 %v3875_v52, %v2525_v16  ;;  %v3565_v38 = vadd.f32 %v3564_v33, %v8575_v19 }
 0x480   : > { %v3566_v20 = vpop.f32.mrf.mxu0 }
 0x481   : > { %v3881_v45 = vpop.f32.mrf.mxu1  ;;  %4013 = vst [vmem:[#allocation2 + $0x28] sm:$0xff] %v3963_v31  ;;  %v3880_v17 = vadd.f32 %v3879_v53, %v3565_v38  ;;  %v2533_v38 = vld [vmem:[#allocation2 + $0x78] sm:$0xff] }
 0x482   : > { %v3569_v15 = vpop.f32.mrf.mxu0 }
 0x483   : > { %v3884_v62 = vpop.f32.mrf.mxu1  ;;  %v3964_v40 = vadd.f32 %v3880_v17, %v2526_v13  ;;  %v3570_v21 = vadd.f32 %v3569_v15, %v8576_v35 }
 0x484   : > { %v3571_v7 = vpop.f32.mrf.mxu0 }
 0x485   : > { %v3886_v6 = vpop.f32.mrf.mxu1  ;;  %4014 = vst [vmem:[#allocation2 + $0x158] sm:$0xff] %v3964_v40  ;;  %v3885_v29 = vadd.f32 %v3884_v62, %v3570_v21  ;;  %v2534_v40 = vld [vmem:[#allocation2 + $0x150] sm:$0xff] }
 0x486   : > { %v3574_v47 = vpop.f32.mrf.mxu0 }
 0x487   : > { %v3889_v61 = vpop.f32.mrf.mxu1  ;;  %v3965_v54 = vadd.f32 %v3885_v29, %v2527_v43  ;;  %v3575_v0 = vadd.f32 %v3574_v47, %v8577_v63 }
 0x488   : > { %v3576_v36 = vpop.f32.mrf.mxu0 }
 0x489   : > { %v3891_v44 = vpop.f32.mrf.mxu1  ;;  %4015 = vst [vmem:[#allocation2 + $0x38] sm:$0xff] %v3965_v54  ;;  %v3890_v5 = vadd.f32 %v3889_v61, %v3575_v0 }
 0x48a   : > { %v3579_v41 = vpop.f32.mrf.mxu0 }
 0x48b   : > { %v3894_v12 = vpop.f32.mrf.mxu1  ;;  %v3966_v59 = vadd.f32 %v3890_v5, %v2528_v14  ;;  %v3580_v32 = vadd.f32 %v3579_v41, %v8578_v37 }
 0x48c   : > { %v3581_v49 = vpop.f32.mrf.mxu0 }
 0x48d   : > { %v3896_v28 = vpop.f32.mrf.mxu1  ;;  %4016 = vst [vmem:[#allocation2 + $0x70] sm:$0xff] %v3966_v59  ;;  %v3895_v30 = vadd.f32 %v3894_v12, %v3580_v32 }
 0x48e   : > { %v3584_v10 = vpop.f32.mrf.mxu0 }
 0x48f   : > { %v3899_v11 = vpop.f32.mrf.mxu1  ;;  %v3967_v39 = vadd.f32 %v3895_v30, %v2529_v24  ;;  %v3585_v55 = vadd.f32 %v3584_v10, %v8579_v2 }
 0x490   : > { %v3586_v4 = vpop.f32.mrf.mxu0 }
 0x491   : > { %v3901_v46 = vpop.f32.mrf.mxu1  ;;  %4017 = vst [vmem:[#allocation2 + $0x68] sm:$0xff] %v3967_v39  ;;  %v3900_v58 = vadd.f32 %v3899_v11, %v3585_v55 }
 0x492   : > { %v3589_v9 = vpop.f32.mrf.mxu0 }
 0x493   : > { %v3904_v25 = vpop.f32.mrf.mxu1  ;;  %v3968_v34 = vadd.f32 %v3900_v58, %v2530_v56  ;;  %v3590_v42 = vadd.f32 %v3589_v9, %v7738_v48 }
 0x494   : > { %v3591_v1 = vpop.f32.mrf.mxu0 }
 0x495   : > { %v3906_v26 = vpop.f32.mrf.mxu1  ;;  %4018 = vst [vmem:[#allocation2 + $0x80] sm:$0xff] %v3968_v34  ;;  %v3905_v51 = vadd.f32 %v3904_v25, %v3590_v42 }
 0x496   : > { %v3594_v27 = vpop.f32.mrf.mxu0 }
 0x497   : > { %v3909_v23 = vpop.f32.mrf.mxu1  ;;  %v3969_v3 = vadd.f32 %v3905_v51, %v2531_v60  ;;  %v3595_v16 = vadd.f32 %v3594_v27, %v7748_v57 }
 0x498   : > { %v3596_v8 = vpop.f32.mrf.mxu0 }
 0x499   : > { %v3911_v52 = vpop.f32.mrf.mxu1  ;;  %4019 = vst [vmem:[#allocation2 + $0xc8] sm:$0xff] %v3969_v3  ;;  %v3910_v33 = vadd.f32 %v3909_v23, %v3595_v16 }
 0x49a   : > { %v3599_v53 = vpop.f32.mrf.mxu0 }
 0x49b   : > { %v3914_v31 = vpop.f32.mrf.mxu1  ;;  %v3970_v19 = vadd.f32 %v3910_v33, %v2532_v22  ;;  %v3600_v48 = vadd.f32 %v3599_v53, %v7758_v18 }
 0x49c   : > { %v3601_v13 = vpop.f32.mrf.mxu0 }
 0x49d   : > { %v3916_v20 = vpop.f32.mrf.mxu1  ;;  %4020 = vst [vmem:[#allocation2 + $0x60] sm:$0xff] %v3970_v19  ;;  %v3915_v45 = vadd.f32 %v3914_v31, %v3600_v48 }
 0x49e   : > { %v3604_v17 = vpop.f32.mrf.mxu0 }
 0x49f   : > { %v3919_v15 = vpop.f32.mrf.mxu1  ;;  %v3971_v62 = vadd.f32 %v3915_v45, %v2533_v38  ;;  %v3605_v57 = vadd.f32 %v3604_v17, %v7768_v50 }
 0x4a0   : > { %v3606_v35 = vpop.f32.mrf.mxu0 }
 0x4a1   : > { %v3921_v21 = vpop.f32.mrf.mxu1  ;;  %4021 = vst [vmem:[#allocation2 + $0x78] sm:$0xff] %v3971_v62  ;;  %v3920_v43 = vadd.f32 %v3919_v15, %v3605_v57  ;;  %4026 = sbr.rel (%p4333_p5) target bundleno = 1218 (0x4c2), region = 64 }
 0x4a3   : > { %v3972_v7 = vadd.f32 %v3920_v43, %v2534_v40 }
 0x4a5   : > { %4022 = vst [vmem:[#allocation2 + $0x150] sm:$0xff] %v3972_v7 }
 0x4a6   : > { %v4027_v18 = vld [vmem:[#allocation2 + $0xb0] sm:$0xff]  ;;  %v7828_v6 = vld [vmem:[%s7914_s4] ss:$0 sm:$0xff]  ;;  %v4030_v54 = vld [vmem:[#allocation2 + $0x48] sm:$0xff] }
 0x4a7   : > { %v4028_v29 = vld [vmem:[#allocation2 + $0xd0] sm:$0xff]  ;;  %v4084_v47 = vadd.f32 %v7828_v6, %v4027_v18  ;;  %v4031_v63 = vld [vmem:[#allocation2 + $0x160] sm:$0xff]  ;;  %v4087_v14 = vadd.f32 %v7828_v6, %v4030_v54  ;;  %v4032_v44 = vld [vmem:[#allocation2 + $0x128] sm:$0xff] }
 0x4a8   : > { %v4085_v50 = vadd.f32 %v7828_v6, %v4028_v29  ;;  %v4029_v61 = vld [vmem:[#allocation2 + $0x10] sm:$0xff]  ;;  %v4088_v36 = vadd.f32 %v7828_v6, %v4031_v63  ;;  %v4033_v5 = vld [vmem:[#allocation2 + $0x40] sm:$0xff]  ;;  %v4034_v41 = vld [vmem:[#allocation2 + $0x178] sm:$0xff]  ;;  %v4089_v12 = vadd.f32 %v7828_v6, %v4032_v44 }
 0x4a9   : > { %v4086_v0 = vadd.f32 %v7828_v6, %v4029_v61  ;;  %4134 = vst [vmem:[#allocation11] sm:$0xff] %v4084_v47  ;;  %v4090_v59 = vadd.f32 %v7828_v6, %v4033_v5  ;;  %v4091_v37 = vadd.f32 %v7828_v6, %v4034_v41  ;;  %v4035_v32 = vld [vmem:[#allocation2 + $0x108] sm:$0xff]  ;;  %v4036_v24 = vld [vmem:[#allocation2 + $0x110] sm:$0xff]  ;;  %4137 = vst [vmem:[#allocation11 + $0x18] sm:$0xff] %v4087_v14 }
 0x4aa   : > { %4135 = vst [vmem:[#allocation11 + $0x8] sm:$0xff] %v4085_v50  ;;  %v4037_v49 = vld [vmem:[#allocation2 + $0x90] sm:$0xff]  ;;  %4138 = vst [vmem:[#allocation11 + $0x20] sm:$0xff] %v4088_v36  ;;  %v4092_v28 = vadd.f32 %v7828_v6, %v4035_v32  ;;  %v4093_v30 = vadd.f32 %v7828_v6, %v4036_v24  ;;  %v4038_v11 = vld [vmem:[#allocation2 + $0x118] sm:$0xff] }
 0x4ab   : > { %4136 = vst [vmem:[#allocation11 + $0x10] sm:$0xff] %v4086_v0  ;;  %v4094_v10 = vadd.f32 %v7828_v6, %v4037_v49  ;;  %v4039_v39 = vld [vmem:[#allocation2 + $0x148] sm:$0xff]  ;;  %v4040_v2 = vld [vmem:[#allocation2 + $0x100] sm:$0xff]  ;;  %4139 = vst [vmem:[#allocation11 + $0x28] sm:$0xff] %v4089_v12  ;;  %v4095_v55 = vadd.f32 %v7828_v6, %v4038_v11 }
 0x4ac   : > { %4140 = vst [vmem:[#allocation11 + $0x30] sm:$0xff] %v4090_v59  ;;  %4141 = vst [vmem:[#allocation11 + $0x38] sm:$0xff] %v4091_v37  ;;  %v4096_v56 = vadd.f32 %v7828_v6, %v4039_v39  ;;  %v4097_v4 = vadd.f32 %v7828_v6, %v4040_v2  ;;  %v4041_v46 = vld [vmem:[#allocation2 + $0x58] sm:$0xff]  ;;  %v4043_v9 = vld [vmem:[#allocation2 + $0x180] sm:$0xff] }
 0x4ad   : > { %v4042_v58 = vld [vmem:[#allocation2 + $0xd8] sm:$0xff]  ;;  %4142 = vst [vmem:[#allocation11 + $0x40] sm:$0xff] %v4092_v28  ;;  %4143 = vst [vmem:[#allocation11 + $0x48] sm:$0xff] %v4093_v30  ;;  %v4098_v25 = vadd.f32 %v7828_v6, %v4041_v46  ;;  %v4100_v42 = vadd.f32 %v7828_v6, %v4043_v9  ;;  %v4044_v60 = vld [vmem:[#allocation2 + $0x130] sm:$0xff] }
 0x4ae   : > { %4144 = vst [vmem:[#allocation11 + $0x50] sm:$0xff] %v4094_v10  ;;  %v4099_v34 = vadd.f32 %v7828_v6, %v4042_v58  ;;  %v4045_v1 = vld [vmem:[#allocation2 + $0x138] sm:$0xff]  ;;  %v4046_v26 = vld [vmem:[#allocation2 + $0x120] sm:$0xff]  ;;  %4145 = vst [vmem:[#allocation11 + $0x58] sm:$0xff] %v4095_v55  ;;  %v4101_v51 = vadd.f32 %v7828_v6, %v4044_v60 }
 0x4af   : > { %4146 = vst [vmem:[#allocation11 + $0x60] sm:$0xff] %v4096_v56  ;;  %4147 = vst [vmem:[#allocation11 + $0x68] sm:$0xff] %v4097_v4  ;;  %v4102_v27 = vadd.f32 %v7828_v6, %v4045_v1  ;;  %v4103_v23 = vadd.f32 %v7828_v6, %v4046_v26  ;;  %v4047_v3 = vld [vmem:[#allocation2 + $0xe0] sm:$0xff]  ;;  %v4048_v16 = vld [vmem:[#allocation2 + $0xa8] sm:$0xff] }
 0x4b0   : > { %v4049_v22 = vld [vmem:[#allocation2 + $0xb8] sm:$0xff]  ;;  %4148 = vst [vmem:[#allocation11 + $0x70] sm:$0xff] %v4098_v25  ;;  %4149 = vst [vmem:[#allocation11 + $0x78] sm:$0xff] %v4099_v34  ;;  %v4104_v8 = vadd.f32 %v7828_v6, %v4047_v3  ;;  %v4105_v52 = vadd.f32 %v7828_v6, %v4048_v16  ;;  %v4050_v53 = vld [vmem:[#allocation2 + $0x168] sm:$0xff] }
 0x4b1   : > { %4150 = vst [vmem:[#allocation11 + $0x80] sm:$0xff] %v4100_v42  ;;  %v4106_v33 = vadd.f32 %v7828_v6, %v4049_v22  ;;  %v4051_v31 = vld [vmem:[#allocation2 + $0xe8] sm:$0xff]  ;;  %v4052_v19 = vld [vmem:[#allocation2 + $0xf8] sm:$0xff]  ;;  %4151 = vst [vmem:[#allocation11 + $0x88] sm:$0xff] %v4101_v51  ;;  %v4107_v48 = vadd.f32 %v7828_v6, %v4050_v53 }
 0x4b2   : > { %4152 = vst [vmem:[#allocation11 + $0x90] sm:$0xff] %v4102_v27  ;;  %4153 = vst [vmem:[#allocation11 + $0x98] sm:$0xff] %v4103_v23  ;;  %v4108_v38 = vadd.f32 %v7828_v6, %v4051_v31  ;;  %v4109_v13 = vadd.f32 %v7828_v6, %v4052_v19  ;;  %v4053_v20 = vld [vmem:[#allocation2 + $0x20] sm:$0xff]  ;;  %v4054_v45 = vld [vmem:[#allocation2 + $0x88] sm:$0xff] }
 0x4b3   : > { %v4055_v17 = vld [vmem:[#allocation2 + $0xa0] sm:$0xff]  ;;  %4154 = vst [vmem:[#allocation11 + $0xa0] sm:$0xff] %v4104_v8  ;;  %4155 = vst [vmem:[#allocation11 + $0xa8] sm:$0xff] %v4105_v52  ;;  %v4110_v15 = vadd.f32 %v7828_v6, %v4053_v20  ;;  %v4111_v62 = vadd.f32 %v7828_v6, %v4054_v45  ;;  %v4056_v40 = vld [vmem:[#allocation2 + $0x170] sm:$0xff] }
 0x4b4   : > { %4156 = vst [vmem:[#allocation11 + $0xb0] sm:$0xff] %v4106_v33  ;;  %v4112_v57 = vadd.f32 %v7828_v6, %v4055_v17  ;;  %v4057_v35 = vld [vmem:[#allocation2 + $0xf0] sm:$0xff]  ;;  %v4058_v21 = vld [vmem:[#allocation2 + $0x140] sm:$0xff]  ;;  %4157 = vst [vmem:[#allocation11 + $0xb8] sm:$0xff] %v4107_v48  ;;  %v4113_v43 = vadd.f32 %v7828_v6, %v4056_v40 }
 0x4b5   : > { %4158 = vst [vmem:[#allocation11 + $0xc0] sm:$0xff] %v4108_v38  ;;  %4159 = vst [vmem:[#allocation11 + $0xc8] sm:$0xff] %v4109_v13  ;;  %v4114_v7 = vadd.f32 %v7828_v6, %v4057_v35  ;;  %v4115_v18 = vadd.f32 %v7828_v6, %v4058_v21  ;;  %v4059_v29 = vld [vmem:[#allocation2 + $0x50] sm:$0xff]  ;;  %v4060_v47 = vld [vmem:[#allocation2] sm:$0xff] }
 0x4b6   : > { %v4061_v50 = vld [vmem:[#allocation2 + $0x8] sm:$0xff]  ;;  %4160 = vst [vmem:[#allocation11 + $0xd0] sm:$0xff] %v4110_v15  ;;  %4161 = vst [vmem:[#allocation11 + $0xd8] sm:$0xff] %v4111_v62  ;;  %v4116_v61 = vadd.f32 %v7828_v6, %v4059_v29  ;;  %v4117_v54 = vadd.f32 %v7828_v6, %v4060_v47  ;;  %v4062_v0 = vld [vmem:[#allocation2 + $0xc0] sm:$0xff] }
 0x4b7   : > { %4162 = vst [vmem:[#allocation11 + $0xe0] sm:$0xff] %v4112_v57  ;;  %v4118_v63 = vadd.f32 %v7828_v6, %v4061_v50  ;;  %v4063_v14 = vld [vmem:[#allocation2 + $0x98] sm:$0xff]  ;;  %v4064_v36 = vld [vmem:[#allocation2 + $0x30] sm:$0xff]  ;;  %4163 = vst [vmem:[#allocation11 + $0xe8] sm:$0xff] %v4113_v43  ;;  %v4119_v44 = vadd.f32 %v7828_v6, %v4062_v0 }
 0x4b8   : > { %4164 = vst [vmem:[#allocation11 + $0xf0] sm:$0xff] %v4114_v7  ;;  %4165 = vst [vmem:[#allocation11 + $0xf8] sm:$0xff] %v4115_v18  ;;  %v4120_v5 = vadd.f32 %v7828_v6, %v4063_v14  ;;  %v4121_v41 = vadd.f32 %v7828_v6, %v4064_v36  ;;  %v4065_v12 = vld [vmem:[#allocation2 + $0x188] sm:$0xff]  ;;  %v4066_v59 = vld [vmem:[#allocation2 + $0x18] sm:$0xff] }
 0x4b9   : > { %v4067_v37 = vld [vmem:[#allocation2 + $0x28] sm:$0xff]  ;;  %4166 = vst [vmem:[#allocation11 + $0x100] sm:$0xff] %v4116_v61  ;;  %4167 = vst [vmem:[#allocation11 + $0x108] sm:$0xff] %v4117_v54  ;;  %v4122_v32 = vadd.f32 %v7828_v6, %v4065_v12  ;;  %v4123_v24 = vadd.f32 %v7828_v6, %v4066_v59  ;;  %v4068_v28 = vld [vmem:[#allocation2 + $0x158] sm:$0xff] }
 0x4ba   : > { %4168 = vst [vmem:[#allocation11 + $0x110] sm:$0xff] %v4118_v63  ;;  %v4124_v49 = vadd.f32 %v7828_v6, %v4067_v37  ;;  %v4069_v30 = vld [vmem:[#allocation2 + $0x38] sm:$0xff]  ;;  %v4070_v10 = vld [vmem:[#allocation2 + $0x70] sm:$0xff]  ;;  %4169 = vst [vmem:[#allocation11 + $0x118] sm:$0xff] %v4119_v44  ;;  %v4125_v11 = vadd.f32 %v7828_v6, %v4068_v28 }
 0x4bb   : > { %4170 = vst [vmem:[#allocation11 + $0x120] sm:$0xff] %v4120_v5  ;;  %4171 = vst [vmem:[#allocation11 + $0x128] sm:$0xff] %v4121_v41  ;;  %v4126_v39 = vadd.f32 %v7828_v6, %v4069_v30  ;;  %v4127_v2 = vadd.f32 %v7828_v6, %v4070_v10  ;;  %v4071_v55 = vld [vmem:[#allocation2 + $0x68] sm:$0xff]  ;;  %v4072_v56 = vld [vmem:[#allocation2 + $0x80] sm:$0xff] }
 0x4bc   : > { %v4073_v4 = vld [vmem:[#allocation2 + $0xc8] sm:$0xff]  ;;  %4172 = vst [vmem:[#allocation11 + $0x130] sm:$0xff] %v4122_v32  ;;  %4173 = vst [vmem:[#allocation11 + $0x138] sm:$0xff] %v4123_v24  ;;  %v4128_v46 = vadd.f32 %v7828_v6, %v4071_v55  ;;  %v4129_v58 = vadd.f32 %v7828_v6, %v4072_v56  ;;  %v4074_v25 = vld [vmem:[#allocation2 + $0x60] sm:$0xff] }
 0x4bd   : > { %4174 = vst [vmem:[#allocation11 + $0x140] sm:$0xff] %v4124_v49  ;;  %v4130_v9 = vadd.f32 %v7828_v6, %v4073_v4  ;;  %v4075_v34 = vld [vmem:[#allocation2 + $0x78] sm:$0xff]  ;;  %v4076_v42 = vld [vmem:[#allocation2 + $0x150] sm:$0xff]  ;;  %4175 = vst [vmem:[#allocation11 + $0x148] sm:$0xff] %v4125_v11  ;;  %v4131_v60 = vadd.f32 %v7828_v6, %v4074_v25 }
 0x4be   : > { %4176 = vst [vmem:[#allocation11 + $0x150] sm:$0xff] %v4126_v39  ;;  %4177 = vst [vmem:[#allocation11 + $0x158] sm:$0xff] %v4127_v2  ;;  %v4132_v1 = vadd.f32 %v7828_v6, %v4075_v34  ;;  %v4133_v26 = vadd.f32 %v7828_v6, %v4076_v42 }
 0x4bf   : > { %4178 = vst [vmem:[#allocation11 + $0x160] sm:$0xff] %v4128_v46  ;;  %4179 = vst [vmem:[#allocation11 + $0x168] sm:$0xff] %v4129_v58 }
 0x4c0   : > { %4180 = vst [vmem:[#allocation11 + $0x170] sm:$0xff] %v4130_v9  ;;  %4181 = vst [vmem:[#allocation11 + $0x178] sm:$0xff] %v4131_v60 }
 0x4c1   : > { %4182 = vst [vmem:[#allocation11 + $0x180] sm:$0xff] %v4132_v1  ;;  %4183 = vst [vmem:[#allocation11 + $0x188] sm:$0xff] %v4133_v26 }
 0x4c2 PF: > { %p4901_p8 = scmp.eq.s32.totalorder %s5291_s7, 1  ;;  %s5180_s21 = smov [#allocation11]  }
 0x4c3   : > { %s4193_s14 = sshll.u32 %s5180_s21, 4  ;;  %s4194_s14 = int_to_ptr.vmem [resolvable:$true] %s4193_s14 }
 0x4c4   : > { %s5082_s26 = scalar_lea.vmem %s4194_s14, 6400  ;;  %p5089_p10 = scmp.lt.s32.totalorder %s4194_s14, %s4194_s14 }
 0x4c5   : > { %p5083_p1 = scmp.ne.s32.totalorder %s4194_s14, %s5082_s26  ;;  %p5090_p4 = scmp.lt.s32.totalorder %s5082_s26, %s5082_s26 }
 0x4c7   : > { %p5084_p3 = pnand %p5083_p1, %p4901_p8  ;;  %p5091_p9 = por %p5090_p4, %p5089_p10 }
 0x4c9   : > { %p5085_p2 = pneg %p5084_p3 }
 0x4cb   : > { %p5092_p11 = pnand %p5091_p9, %p5085_p2 }
 0x4cd   : > { %5095 = shalt.err (!%p5092_p11)
}
 0x4ce   : > { %s5181_s1 = smov 128   ;;  %s5182_s2 = smov 8  }
 0x4cf   : > { %4881 = dma.vmem_to_hbm [thread:$0]  (%p4901_p8), %s4194_s14, 6400, %s7915_s5, [#allocation5], %s5181_s1, %s5181_s1, %s5182_s2  }
 0x4d0   : > { %5143 = dma.done.wait (%p4901_p8), [#allocation5], 6400  }
 0x4d1   : > { %5145 = vsyncadd (%p4901_p8), [#allocation5], 4294960896 }
 0x4d2 PF: > { %s23_s23 = sadd.s32 1, %s5168_s23   ;;  %s8580_s18 = smov %s5152_s19 }
 0x4d3   : > { %p20_p12 = scmp.ge.s32.totalorder %s23_s23, 4   ;;  %s8581_s19 = smov %s5156_s20 }
 0x4d4   : > { %s8582_s20 = smov %s5262_s30  ;;  %s8583_s21 = smov %s5164_s22 }
 0x4d5   : > { %s8584_s22 = smov %s8586_s24  ;;  %22 = sbr.rel (!%p20_p12) target bundleno = 11 (0xb), region = 116 }
 0x4da   :  { %4209 = vsyncpa [#allocation4], 1 }
 0x4db   :  { %4211 = vsyncpa [#allocation4 + $0x1], 1 }
 0x4dc   :  { %4212 = vsyncpa [#allocation7], 1 }
 0x4dd   :  { %4214 = vsyncpa [#allocation7 + $0x1], 1 }
 0x4de   :  { %4215 = vsyncpa [#allocation10], 1 }
 0x4df   :  { %4217 = vsyncpa [#allocation10 + $0x1], 1 }
 0x4e0   :  { %4218 = vsyncpa [#allocation5], 1 }
 0x4e1   :  { %4220 = vsyncpa [#allocation5 + $0x1], 1 }

</bundles_post_ra>
